<compile_context>
chip_gen: v5e
topology: v5e:2x2
jax: 0.10.0
libtpu: 0.0.40
codegen_flags: <defaults>
</compile_context>

<pallas_src>
import numpy as np
import jax
import jax.numpy as jnp
from jax.experimental import pallas as pl
from jax.experimental.pallas import tpu as pltpu


_BBLK = 8  # images per grid step


# ----------------------------------------------------------------------------
# Handoff-buffer layout
# ----------------------------------------------------------------------------
# A stage's input activation x[h, w, c] (spatial Hi x Wi, C channels, Bblk
# images) is stored in a VMEM buffer S of shape (J, I, 2*Bblk, 2*C) with
#   J = Wi/2 + 1, I = Hi/2 + 1,
#   S[j, i, r*Bblk + b, 0:C]   = x[b, h=2i+r-1, w=2j-1, :]
#   S[j, i, r*Bblk + b, C:2C]  = x[b, h=2i+r-1, w=2j  , :]
# (zeros where h/w fall outside the image -> these are the conv's zero pad).
#
# For a 4x4 / stride-2 / pad-1 conv, the tap group (kh, kw in {2p, 2p+1}) of
# output pixel (ho, wo) then reads exactly S[wo+p, ho+q, r*Bblk:(r+1)*Bblk, :]
# with q = kh//2, r = kh%2 -- a contiguous, (8,128)-aligned slice.  The full
# conv is 8 accumulated matmuls with K = 2*C against contiguous row-blocks of
# the standard (kh, kw, cin)-ordered im2col weight matrix.


def _zero_borders(s_ref, bblk):
    """Zero only the padding border of a handoff buffer (interior is rewritten)."""
    J, I, B2, C2 = s_ref.shape
    C = C2 // 2
    dt = s_ref.dtype
    s_ref[:, 0, 0:bblk, :] = jnp.zeros((J, bblk, C2), dt)            # h = -1
    s_ref[:, I - 1, bblk:2 * bblk, :] = jnp.zeros((J, bblk, C2), dt)  # h = Hi
    s_ref[0, :, :, 0:C] = jnp.zeros((I, B2, C), dt)                   # w = -1
    s_ref[J - 1, :, :, C:2 * C] = jnp.zeros((I, B2, C), dt)           # w = Wi


def _handoff(y, s_ref, hi, wi, c, bblk):
    """Scatter a stage output y ((wi*hi*bblk, c), rows ordered (w, h, b)) into
    the next stage's handoff buffer.  Every store is an aligned (bblk, c) block."""
    for w in range(wi):
        j = (w + 1) // 2
        slot = 1 if (w % 2 == 0) else 0          # w = 2j -> slot1, w = 2j-1 -> slot0
        for h in range(hi):
            i = (h + 1) // 2
            r = (h + 1) % 2                      # h = 2i + r - 1
            row0 = (w * hi + h) * bblk
            s_ref[j, i, r * bblk:(r + 1) * bblk, slot * c:(slot + 1) * c] = (
                y[row0:row0 + bblk, :])


def _conv_stage(s_ref, w_ref, ho_n, wo_n, hi, cin, cout, bblk, shift=None):
    """4x4 stride-2 pad-1 conv (+ optional folded-BN shift) + LeakyReLU(0.2).

    s_ref: handoff buffer (see layout above); w_ref: (16*cin, cout) bf16 weight
    with rows ordered (kh, kw, cin).  Returns (wo_n*ho_n*bblk, cout) f32 with
    rows ordered (wo, ho, b)."""
    M = wo_n * ho_n * bblk
    acc = jnp.zeros((M, cout), jnp.float32)
    for kh in range(4):
        # Statically skip tap rows that fall entirely in the zero padding
        # (only happens for the 2x2 -> 1x1 stage).
        if not any(0 <= 2 * ho + kh - 1 < hi for ho in range(ho_n)):
            continue
        q, r = kh // 2, kh % 2
        for p in range(2):
            lhs = s_ref[p:p + wo_n, q:q + ho_n, r * bblk:(r + 1) * bblk, :]
            lhs = lhs.reshape(M, 2 * cin).astype(jnp.bfloat16)
            rb = (kh * 4 + 2 * p) * cin
            acc = acc + jnp.dot(lhs, w_ref[rb:rb + 2 * cin, :],
                                preferred_element_type=jnp.float32)
    if shift is not None:
        acc = acc + shift                        # folded BatchNorm shift
    return jnp.where(acc >= 0.0, acc, 0.2 * acc)  # LeakyReLU(0.2); Dropout = id (eval)


def _disc_kernel(p1_ref, w1_ref, w2_ref, w3_ref, w4_ref, wfc_ref,
                 sh2_ref, sh3_ref, bfc_ref,
                 o_ref,
                 s2_ref, s3_ref, s4_ref):
    bblk = o_ref.shape[0]

    # Conv zero padding lives in the buffer borders.  Re-zero them every step
    # (cheap, ~60 vector stores) so each TensorCore's private scratch is valid
    # under "parallel" megacore sharding; interiors are fully overwritten below.
    _zero_borders(s2_ref, bblk)
    _zero_borders(s3_ref, bblk)
    _zero_borders(s4_ref, bblk)

    # Stage 1: conv(4->64, padded 8->128).  Patches were built in the wrapper;
    # rows ordered (w1, h1, b) so the handoff below is a pure aligned scatter.
    p1 = p1_ref[0].astype(jnp.bfloat16)                       # (64*bblk, 128)
    y1 = jnp.dot(p1, w1_ref[...], preferred_element_type=jnp.float32)
    y1 = jnp.where(y1 >= 0.0, y1, 0.2 * y1)
    _handoff(y1, s2_ref, 8, 8, 128, bblk)

    # Stage 2: conv(64->128) + folded BN + LeakyReLU   (M = 16*bblk)
    y2 = _conv_stage(s2_ref, w2_ref, 4, 4, 8, 128, 128, bblk, sh2_ref[...])
    _handoff(y2, s3_ref, 4, 4, 128, bblk)

    # Stage 3: conv(128->256) + folded BN + LeakyReLU  (M = 4*bblk)
    y3 = _conv_stage(s3_ref, w3_ref, 2, 2, 4, 128, 256, bblk, sh3_ref[...])
    _handoff(y3, s4_ref, 2, 2, 256, bblk)

    # Stage 4: conv(256->512) + LeakyReLU              (M = bblk)
    y4 = _conv_stage(s4_ref, w4_ref, 1, 1, 2, 256, 512, bblk)

    # Linear(512, 1) + exact sigmoid, emitted lane-dense (128 cols, col 0 real).
    logits = jnp.dot(y4.astype(jnp.bfloat16), wfc_ref[...],
                     preferred_element_type=jnp.float32) + bfc_ref[...]
    o_ref[...] = 1.0 / (1.0 + jnp.exp(-logits))


# ----------------------------------------------------------------------------
# Wrapper: stage-1 im2col, BN folding, weight reshaping done once, outside.
# ----------------------------------------------------------------------------
def _fold_conv_weight(w, cin_pad=None, cout_pad=None, scale=None):
    """(Cout, Cin, 4, 4) torch-layout conv weight -> (16*Cin_pad, Cout_pad) bf16
    matmul operand with rows ordered (kh, kw, cin); optional BN scale folded in."""
    cout, cin, k, _ = w.shape
    if scale is not None:
        w = w * scale[:, None, None, None]
    if cin_pad is not None and cin_pad > cin:
        w = jnp.pad(w, ((0, 0), (0, cin_pad - cin), (0, 0), (0, 0)))
        cin = cin_pad
    wm = jnp.transpose(w, (2, 3, 1, 0)).reshape(k * k * cin, cout)
    if cout_pad is not None and cout_pad > cout:
        wm = jnp.pad(wm, ((0, 0), (0, cout_pad - cout)))
    return wm.astype(jnp.bfloat16)


def discriminator_forward(params, x_nchw):
    eps = 1e-5
    B, C_in, H, W = x_nchw.shape
    assert H == 16 and W == 16, "Linear(512, 1) implies a 16x16 input"
    C_pad = 8                      # pad input channels 4 -> 8 so stage-1 K = 128

    nB = (B + _BBLK - 1) // _BBLK
    B_pad = nB * _BBLK

    # ---- stage-1 im2col hoisted to the wrapper (plain XLA) -------------------
    x = jnp.transpose(x_nchw, (0, 2, 3, 1)).astype(jnp.float32)
    x = jnp.pad(x, ((0, 0), (1, 1), (1, 1), (0, C_pad - C_in)))     # (B,18,18,8)
    taps = [x[:, kh:kh + 16:2, kw:kw + 16:2, :]
            for kh in range(4) for kw in range(4)]                  # 16 x (B,8,8,8)
    p1 = jnp.stack(taps, axis=3)                                    # (B,h1,w1,16,8)
    p1 = jnp.transpose(p1, (2, 1, 0, 3, 4)).reshape(64, B, 16 * C_pad)
    p1 = jnp.pad(p1, ((0, 0), (0, B_pad - B), (0, 0)))
    p1 = p1.reshape(64, nB, _BBLK, 16 * C_pad)
    p1 = jnp.transpose(p1, (1, 0, 2, 3)).reshape(nB, 64 * _BBLK, 16 * C_pad)

    # ---- fold BatchNorm; reshape / pad weights --------------------------------
    scale2 = params["bn2_gamma"] / jnp.sqrt(params["bn2_var"] + eps)
    shift2 = (params["bn2_beta"] - params["bn2_mean"] * scale2
              ).reshape(1, 128).astype(jnp.float32)
    scale3 = params["bn3_gamma"] / jnp.sqrt(params["bn3_var"] + eps)
    shift3 = (params["bn3_beta"] - params["bn3_mean"] * scale3
              ).reshape(1, 256).astype(jnp.float32)

    # Stage-1 Cout padded 64 -> 128 (and stage-2 Cin rows to match) so every
    # activation / operand is lane dense; padded rows/cols are zero.
    w1m = _fold_conv_weight(params["w1"], cin_pad=C_pad, cout_pad=128)  # (128, 128)
    w2m = _fold_conv_weight(params["w2"], cin_pad=128, scale=scale2)    # (2048, 128)
    w3m = _fold_conv_weight(params["w3"], scale=scale3)                 # (2048, 256)
    w4m = _fold_conv_weight(params["w4"])                               # (4096, 512)

    wfc = jnp.pad(jnp.transpose(params["fc_w"]), ((0, 0), (0, 127))
                  ).astype(jnp.bfloat16)                                # (512, 128)
    bfc = jnp.pad(params["fc_b"], (0, 127)).reshape(1, 128).astype(jnp.float32)

    def resident(a):               # VMEM-resident across all grid steps
        return pl.BlockSpec(a.shape, lambda g: (0, 0))

    out = pl.pallas_call(
        _disc_kernel,
        out_shape=jax.ShapeDtypeStruct((B_pad, 128), jnp.float32),
        grid_spec=pltpu.PrefetchScalarGridSpec(
            num_scalar_prefetch=0,
            grid=(nB,),                                   # Bblk images / step
            in_specs=[
                pl.BlockSpec((1, 64 * _BBLK, 16 * C_pad), lambda g: (g, 0, 0)),
                resident(w1m), resident(w2m), resident(w3m), resident(w4m),
                resident(wfc), resident(shift2), resident(shift3), resident(bfc),
            ],
            out_specs=pl.BlockSpec((_BBLK, 128), lambda g: (g, 0)),
            scratch_shapes=[
                pltpu.VMEM((5, 5, 2 * _BBLK, 256), jnp.float32),  # stage-2 input
                pltpu.VMEM((3, 3, 2 * _BBLK, 256), jnp.float32),  # stage-3 input
                pltpu.VMEM((2, 2, 2 * _BBLK, 512), jnp.float32),  # stage-4 input
            ],
        ),
        compiler_params=pltpu.CompilerParams(
            dimension_semantics=("parallel",),            # 2-TC sharding on v7x
            vmem_limit_bytes=32 * 1024 * 1024,            # ~13 MiB actually used
        ),
    )(p1, w1m, w2m, w3m, w4m, wfc, shift2, shift3, bfc)

    return out[:B, :1]             # (B, 1); column 0 is the real sigmoid output


# ----------------------------------------------------------------------------
# Parameters (deterministic synthetic init; shapes from the module __init__)
# ----------------------------------------------------------------------------
def init_params(key, channels_in):
    ks = jax.random.split(key, 16)

    def conv_w(k, cout, cin):
        return 0.05 * jax.random.normal(k, (cout, cin, 4, 4), jnp.float32)

    return {
        "w1": conv_w(ks[0], 64, channels_in),
        "w2": conv_w(ks[1], 128, 64),
        "w3": conv_w(ks[2], 256, 128),
        "w4": conv_w(ks[3], 512, 256),
        # BatchNorm2d(128)
        "bn2_gamma": 1.0 + 0.1 * jax.random.normal(ks[4], (128,), jnp.float32),
        "bn2_beta": 0.1 * jax.random.normal(ks[5], (128,), jnp.float32),
        "bn2_mean": 0.1 * jax.random.normal(ks[6], (128,), jnp.float32),
        "bn2_var": jnp.abs(jax.random.normal(ks[7], (128,), jnp.float32)) + 0.5,
        # BatchNorm2d(256)
        "bn3_gamma": 1.0 + 0.1 * jax.random.normal(ks[8], (256,), jnp.float32),
        "bn3_beta": 0.1 * jax.random.normal(ks[9], (256,), jnp.float32),
        "bn3_mean": 0.1 * jax.random.normal(ks[10], (256,), jnp.float32),
        "bn3_var": jnp.abs(jax.random.normal(ks[11], (256,), jnp.float32)) + 0.5,
        # Linear(512, 1)
        "fc_w": 0.05 * jax.random.normal(ks[12], (1, 512), jnp.float32),
        "fc_b": 0.1 * jax.random.normal(ks[13], (1,), jnp.float32),
    }


# ----------------------------------------------------------------------------
# Pure-JAX f32 reference (for correctness verification)
# ----------------------------------------------------------------------------
def reference_forward(params, x_nchw):
    eps = 1e-5
    x = jnp.transpose(x_nchw, (0, 2, 3, 1))

    def conv(x, w):
        w_hwio = jnp.transpose(w, (2, 3, 1, 0))
        return jax.lax.conv_general_dilated(
            x, w_hwio, window_strides=(2, 2), padding=[(1, 1), (1, 1)],
            dimension_numbers=("NHWC", "HWIO", "NHWC"))

    def lrelu(x):
        return jnp.where(x >= 0, x, 0.2 * x)

    def bn(x, g, b, m, v):
        return (x - m) / jnp.sqrt(v + eps) * g + b

    x = lrelu(conv(x, params["w1"]))
    x = lrelu(bn(conv(x, params["w2"]), params["bn2_gamma"], params["bn2_beta"],
                 params["bn2_mean"], params["bn2_var"]))
    x = lrelu(bn(conv(x, params["w3"]), params["bn3_gamma"], params["bn3_beta"],
                 params["bn3_mean"], params["bn3_var"]))
    x = lrelu(conv(x, params["w4"]))
    flat = x.reshape(x.shape[0], -1)
    return jax.nn.sigmoid(flat @ jnp.transpose(params["fc_w"]) + params["fc_b"])


if __name__ == "__main__":
    key = jax.random.PRNGKey(0)
    k_param, k_x = jax.random.split(key)

    # 16x16 -> 1x1 after four stride-2 convs (matches Linear(512, 1)).
    B, C_IN, H, W = 2, 4, 16, 16
    params = init_params(k_param, C_IN)
    x = jax.random.normal(k_x, (B, C_IN, H, W), jnp.float32)

    fwd = jax.jit(discriminator_forward)
    out = jax.block_until_ready(fwd(params, x))
    ref = jax.block_until_ready(reference_forward(params, x))

    assert out.shape == (B, 1), out.shape
    # Kernel uses bf16 matmul operands with f32 accumulation, so compare against
    # the f32 reference with a relaxed but structure-revealing tolerance.
    np.testing.assert_allclose(np.asarray(out), np.asarray(ref),
                               rtol=2e-2, atol=1e-2)
    print("KERNEL_OK")
</pallas_src>

<mosaic_0001>
module attributes {stable_mosaic.version = 11 : i64} {
  func.func @_disc_kernel(%arg0: i32, %arg1: memref<1x512x128xf32, #tpu.memory_space<vmem>>, %arg2: memref<128x128xbf16, #tpu.memory_space<vmem>>, %arg3: memref<2048x128xbf16, #tpu.memory_space<vmem>>, %arg4: memref<2048x256xbf16, #tpu.memory_space<vmem>>, %arg5: memref<4096x512xbf16, #tpu.memory_space<vmem>>, %arg6: memref<512x128xbf16, #tpu.memory_space<vmem>>, %arg7: memref<1x128xf32, #tpu.memory_space<vmem>>, %arg8: memref<1x256xf32, #tpu.memory_space<vmem>>, %arg9: memref<1x128xf32, #tpu.memory_space<vmem>>, %arg10: memref<8x128xf32, #tpu.memory_space<vmem>>, %arg11: memref<5x5x16x256xf32, #tpu.memory_space<vmem>>, %arg12: memref<3x3x16x256xf32, #tpu.memory_space<vmem>>, %arg13: memref<2x2x16x512xf32, #tpu.memory_space<vmem>>) attributes {dimension_semantics = [#tpu.dimension_semantics<parallel>], iteration_bounds = array<i64: 1>, scalar_prefetch = 0 : i64, scratch_operands = 3 : i64, tpu.core_type = #tpu.core_type<tc>, window_params = [{transform_indices = @transform_0, window_bounds = array<i64: 1, 512, 128>}, {pipeline_mode = #tpu.pipeline_mode<synchronous>, transform_indices = @transform_1, window_bounds = array<i64: 128, 128>}, {pipeline_mode = #tpu.pipeline_mode<synchronous>, transform_indices = @transform_2, window_bounds = array<i64: 2048, 128>}, {pipeline_mode = #tpu.pipeline_mode<synchronous>, transform_indices = @transform_3, window_bounds = array<i64: 2048, 256>}, {pipeline_mode = #tpu.pipeline_mode<synchronous>, transform_indices = @transform_4, window_bounds = array<i64: 4096, 512>}, {pipeline_mode = #tpu.pipeline_mode<synchronous>, transform_indices = @transform_5, window_bounds = array<i64: 512, 128>}, {pipeline_mode = #tpu.pipeline_mode<synchronous>, transform_indices = @transform_6, window_bounds = array<i64: 1, 128>}, {pipeline_mode = #tpu.pipeline_mode<synchronous>, transform_indices = @transform_7, window_bounds = array<i64: 1, 256>}, {pipeline_mode = #tpu.pipeline_mode<synchronous>, transform_indices = @transform_8, window_bounds = array<i64: 1, 128>}, {transform_indices = @transform_9, window_bounds = array<i64: 8, 128>}]} {
    %cst = arith.constant 0.000000e+00 : f32
    %0 = vector.broadcast %cst : f32 to vector<5x8x256xf32>
    %c0 = arith.constant 0 : index
    %c0_0 = arith.constant 0 : index
    %c0_1 = arith.constant 0 : index
    %c0_2 = arith.constant 0 : index
    %1 = vector.load %arg11[%c0, %c0_0, %c0_1, %c0_2] : memref<5x5x16x256xf32, #tpu.memory_space<vmem>>, vector<5x1x8x256xf32>
    %2 = vector.shape_cast %1 : vector<5x1x8x256xf32> to vector<5x8x256xf32>
    %3 = vector.shape_cast %0 : vector<5x8x256xf32> to vector<5x1x8x256xf32>
    tpu.vector_store %arg11[%c0, %c0_0, %c0_1, %c0_2], %3 {strides = array<i32>} : memref<5x5x16x256xf32, #tpu.memory_space<vmem>>, vector<5x1x8x256xf32>,
    %cst_3 = arith.constant 0.000000e+00 : f32
    %4 = vector.broadcast %cst_3 : f32 to vector<5x8x256xf32>
    %c0_4 = arith.constant 0 : index
    %c4 = arith.constant 4 : index
    %c8 = arith.constant 8 : index
    %c0_5 = arith.constant 0 : index
    %5 = vector.load %arg11[%c0_4, %c4, %c8, %c0_5] : memref<5x5x16x256xf32, #tpu.memory_space<vmem>>, vector<5x1x8x256xf32>
    %6 = vector.shape_cast %5 : vector<5x1x8x256xf32> to vector<5x8x256xf32>
    %7 = vector.shape_cast %4 : vector<5x8x256xf32> to vector<5x1x8x256xf32>
    tpu.vector_store %arg11[%c0_4, %c4, %c8, %c0_5], %7 {strides = array<i32>} : memref<5x5x16x256xf32, #tpu.memory_space<vmem>>, vector<5x1x8x256xf32>,
    %cst_6 = arith.constant 0.000000e+00 : f32
    %8 = vector.broadcast %cst_6 : f32 to vector<5x16x128xf32>
    %c0_7 = arith.constant 0 : index
    %c0_8 = arith.constant 0 : index
    %c0_9 = arith.constant 0 : index
    %c0_10 = arith.constant 0 : index
    %9 = vector.load %arg11[%c0_7, %c0_8, %c0_9, %c0_10] : memref<5x5x16x256xf32, #tpu.memory_space<vmem>>, vector<1x5x16x128xf32>
    %10 = vector.shape_cast %9 : vector<1x5x16x128xf32> to vector<5x16x128xf32>
    %11 = vector.shape_cast %8 : vector<5x16x128xf32> to vector<1x5x16x128xf32>
    tpu.vector_store %arg11[%c0_7, %c0_8, %c0_9, %c0_10], %11 {strides = array<i32>} : memref<5x5x16x256xf32, #tpu.memory_space<vmem>>, vector<1x5x16x128xf32>,
    %cst_11 = arith.constant 0.000000e+00 : f32
    %12 = vector.broadcast %cst_11 : f32 to vector<5x16x128xf32>
    %c4_12 = arith.constant 4 : index
    %c0_13 = arith.constant 0 : index
    %c0_14 = arith.constant 0 : index
    %c128 = arith.constant 128 : index
    %13 = vector.load %arg11[%c4_12, %c0_13, %c0_14, %c128] : memref<5x5x16x256xf32, #tpu.memory_space<vmem>>, vector<1x5x16x128xf32>
    %14 = vector.shape_cast %13 : vector<1x5x16x128xf32> to vector<5x16x128xf32>
    %15 = vector.shape_cast %12 : vector<5x16x128xf32> to vector<1x5x16x128xf32>
    tpu.vector_store %arg11[%c4_12, %c0_13, %c0_14, %c128], %15 {strides = array<i32>} : memref<5x5x16x256xf32, #tpu.memory_space<vmem>>, vector<1x5x16x128xf32>,
    %cst_15 = arith.constant 0.000000e+00 : f32
    %16 = vector.broadcast %cst_15 : f32 to vector<3x8x256xf32>
    %c0_16 = arith.constant 0 : index
    %c0_17 = arith.constant 0 : index
    %c0_18 = arith.constant 0 : index
    %c0_19 = arith.constant 0 : index
    %17 = vector.load %arg12[%c0_16, %c0_17, %c0_18, %c0_19] : memref<3x3x16x256xf32, #tpu.memory_space<vmem>>, vector<3x1x8x256xf32>
    %18 = vector.shape_cast %17 : vector<3x1x8x256xf32> to vector<3x8x256xf32>
    %19 = vector.shape_cast %16 : vector<3x8x256xf32> to vector<3x1x8x256xf32>
    tpu.vector_store %arg12[%c0_16, %c0_17, %c0_18, %c0_19], %19 {strides = array<i32>} : memref<3x3x16x256xf32, #tpu.memory_space<vmem>>, vector<3x1x8x256xf32>,
    %cst_20 = arith.constant 0.000000e+00 : f32
    %20 = vector.broadcast %cst_20 : f32 to vector<3x8x256xf32>
    %c0_21 = arith.constant 0 : index
    %c2 = arith.constant 2 : index
    %c8_22 = arith.constant 8 : index
    %c0_23 = arith.constant 0 : index
    %21 = vector.load %arg12[%c0_21, %c2, %c8_22, %c0_23] : memref<3x3x16x256xf32, #tpu.memory_space<vmem>>, vector<3x1x8x256xf32>
    %22 = vector.shape_cast %21 : vector<3x1x8x256xf32> to vector<3x8x256xf32>
    %23 = vector.shape_cast %20 : vector<3x8x256xf32> to vector<3x1x8x256xf32>
    tpu.vector_store %arg12[%c0_21, %c2, %c8_22, %c0_23], %23 {strides = array<i32>} : memref<3x3x16x256xf32, #tpu.memory_space<vmem>>, vector<3x1x8x256xf32>,
    %cst_24 = arith.constant 0.000000e+00 : f32
    %24 = vector.broadcast %cst_24 : f32 to vector<3x16x128xf32>
    %c0_25 = arith.constant 0 : index
    %c0_26 = arith.constant 0 : index
    %c0_27 = arith.constant 0 : index
    %c0_28 = arith.constant 0 : index
    %25 = vector.load %arg12[%c0_25, %c0_26, %c0_27, %c0_28] : memref<3x3x16x256xf32, #tpu.memory_space<vmem>>, vector<1x3x16x128xf32>
    %26 = vector.shape_cast %25 : vector<1x3x16x128xf32> to vector<3x16x128xf32>
    %27 = vector.shape_cast %24 : vector<3x16x128xf32> to vector<1x3x16x128xf32>
    tpu.vector_store %arg12[%c0_25, %c0_26, %c0_27, %c0_28], %27 {strides = array<i32>} : memref<3x3x16x256xf32, #tpu.memory_space<vmem>>, vector<1x3x16x128xf32>,
    %cst_29 = arith.constant 0.000000e+00 : f32
    %28 = vector.broadcast %cst_29 : f32 to vector<3x16x128xf32>
    %c2_30 = arith.constant 2 : index
    %c0_31 = arith.constant 0 : index
    %c0_32 = arith.constant 0 : index
    %c128_33 = arith.constant 128 : index
    %29 = vector.load %arg12[%c2_30, %c0_31, %c0_32, %c128_33] : memref<3x3x16x256xf32, #tpu.memory_space<vmem>>, vector<1x3x16x128xf32>
    %30 = vector.shape_cast %29 : vector<1x3x16x128xf32> to vector<3x16x128xf32>
    %31 = vector.shape_cast %28 : vector<3x16x128xf32> to vector<1x3x16x128xf32>
    tpu.vector_store %arg12[%c2_30, %c0_31, %c0_32, %c128_33], %31 {strides = array<i32>} : memref<3x3x16x256xf32, #tpu.memory_space<vmem>>, vector<1x3x16x128xf32>,
    %cst_34 = arith.constant 0.000000e+00 : f32
    %32 = vector.broadcast %cst_34 : f32 to vector<2x8x512xf32>
    %c0_35 = arith.constant 0 : index
    %c0_36 = arith.constant 0 : index
    %c0_37 = arith.constant 0 : index
    %c0_38 = arith.constant 0 : index
    %33 = vector.load %arg13[%c0_35, %c0_36, %c0_37, %c0_38] : memref<2x2x16x512xf32, #tpu.memory_space<vmem>>, vector<2x1x8x512xf32>
    %34 = vector.shape_cast %33 : vector<2x1x8x512xf32> to vector<2x8x512xf32>
    %35 = vector.shape_cast %32 : vector<2x8x512xf32> to vector<2x1x8x512xf32>
    tpu.vector_store %arg13[%c0_35, %c0_36, %c0_37, %c0_38], %35 {strides = array<i32>} : memref<2x2x16x512xf32, #tpu.memory_space<vmem>>, vector<2x1x8x512xf32>,
    %cst_39 = arith.constant 0.000000e+00 : f32
    %36 = vector.broadcast %cst_39 : f32 to vector<2x8x512xf32>
    %c0_40 = arith.constant 0 : index
    %c1 = arith.constant 1 : index
    %c8_41 = arith.constant 8 : index
    %c0_42 = arith.constant 0 : index
    %37 = vector.load %arg13[%c0_40, %c1, %c8_41, %c0_42] : memref<2x2x16x512xf32, #tpu.memory_space<vmem>>, vector<2x1x8x512xf32>
    %38 = vector.shape_cast %37 : vector<2x1x8x512xf32> to vector<2x8x512xf32>
    %39 = vector.shape_cast %36 : vector<2x8x512xf32> to vector<2x1x8x512xf32>
    tpu.vector_store %arg13[%c0_40, %c1, %c8_41, %c0_42], %39 {strides = array<i32>} : memref<2x2x16x512xf32, #tpu.memory_space<vmem>>, vector<2x1x8x512xf32>,
    %cst_43 = arith.constant 0.000000e+00 : f32
    %40 = vector.broadcast %cst_43 : f32 to vector<2x16x256xf32>
    %c0_44 = arith.constant 0 : index
    %c0_45 = arith.constant 0 : index
    %c0_46 = arith.constant 0 : index
    %c0_47 = arith.constant 0 : index
    %41 = vector.load %arg13[%c0_44, %c0_45, %c0_46, %c0_47] : memref<2x2x16x512xf32, #tpu.memory_space<vmem>>, vector<1x2x16x256xf32>
    %42 = vector.shape_cast %41 : vector<1x2x16x256xf32> to vector<2x16x256xf32>
    %43 = vector.shape_cast %40 : vector<2x16x256xf32> to vector<1x2x16x256xf32>
    tpu.vector_store %arg13[%c0_44, %c0_45, %c0_46, %c0_47], %43 {strides = array<i32>} : memref<2x2x16x512xf32, #tpu.memory_space<vmem>>, vector<1x2x16x256xf32>,
    %cst_48 = arith.constant 0.000000e+00 : f32
    %44 = vector.broadcast %cst_48 : f32 to vector<2x16x256xf32>
    %c1_49 = arith.constant 1 : index
    %c0_50 = arith.constant 0 : index
    %c0_51 = arith.constant 0 : index
    %c256 = arith.constant 256 : index
    %45 = vector.load %arg13[%c1_49, %c0_50, %c0_51, %c256] : memref<2x2x16x512xf32, #tpu.memory_space<vmem>>, vector<1x2x16x256xf32>
    %46 = vector.shape_cast %45 : vector<1x2x16x256xf32> to vector<2x16x256xf32>
    %47 = vector.shape_cast %44 : vector<2x16x256xf32> to vector<1x2x16x256xf32>
    tpu.vector_store %arg13[%c1_49, %c0_50, %c0_51, %c256], %47 {strides = array<i32>} : memref<2x2x16x512xf32, #tpu.memory_space<vmem>>, vector<1x2x16x256xf32>,
    %c0_52 = arith.constant 0 : index
    %c0_53 = arith.constant 0 : index
    %c0_54 = arith.constant 0 : index
    %48 = vector.load %arg1[%c0_52, %c0_53, %c0_54] : memref<1x512x128xf32, #tpu.memory_space<vmem>>, vector<1x512x128xf32>
    %49 = vector.shape_cast %48 : vector<1x512x128xf32> to vector<512x128xf32>
    %50 = arith.truncf %49 : vector<512x128xf32> to vector<512x128xbf16>
    %c0_55 = arith.constant 0 : index
    %c0_56 = arith.constant 0 : index
    %51 = vector.load %arg2[%c0_55, %c0_56] : memref<128x128xbf16, #tpu.memory_space<vmem>>, vector<128x128xbf16>
    %cst_57 = arith.constant dense<0.000000e+00> : vector<512x128xf32>
    %52 = tpu.matmul %50, %51, %cst_57 {dimension_numbers = #tpu.dot_dimension_numbers<[1], [0], [0], [1], [0, 0, 1, 1], [], []>} : vector<512x128xbf16>, vector<128x128xbf16>, vector<512x128xf32> -> vector<512x128xf32>
    %cst_58 = arith.constant 0.000000e+00 : f32
    %53 = vector.broadcast %cst_58 : f32 to vector<512x128xf32>
    %54 = arith.cmpf oge, %52, %53 : vector<512x128xf32>
    %cst_59 = arith.constant 2.000000e-01 : f32
    %55 = vector.broadcast %cst_59 : f32 to vector<512x128xf32>
    %56 = arith.mulf %55, %52 : vector<512x128xf32>
    %57 = arith.select %54, %52, %56 : vector<512x128xi1>, vector<512x128xf32>
    %58 = vector.extract_strided_slice %57 {offsets = [0, 0], sizes = [8, 128], strides = [1, 1]} : vector<512x128xf32> to vector<8x128xf32>
    %c0_60 = arith.constant 0 : index
    %c0_61 = arith.constant 0 : index
    %c8_62 = arith.constant 8 : index
    %c128_63 = arith.constant 128 : index
    %59 = vector.load %arg11[%c0_60, %c0_61, %c8_62, %c128_63] : memref<5x5x16x256xf32, #tpu.memory_space<vmem>>, vector<1x1x8x128xf32>
    %60 = vector.shape_cast %59 : vector<1x1x8x128xf32> to vector<8x128xf32>
    %61 = vector.shape_cast %58 : vector<8x128xf32> to vector<1x1x8x128xf32>
    tpu.vector_store %arg11[%c0_60, %c0_61, %c8_62, %c128_63], %61 {strides = array<i32>} : memref<5x5x16x256xf32, #tpu.memory_space<vmem>>, vector<1x1x8x128xf32>,
    %62 = vector.extract_strided_slice %57 {offsets = [8, 0], sizes = [8, 128], strides = [1, 1]} : vector<512x128xf32> to vector<8x128xf32>
    %c0_64 = arith.constant 0 : index
    %c1_65 = arith.constant 1 : index
    %c0_66 = arith.constant 0 : index
    %c128_67 = arith.constant 128 : index
    %63 = vector.load %arg11[%c0_64, %c1_65, %c0_66, %c128_67] : memref<5x5x16x256xf32, #tpu.memory_space<vmem>>, vector<1x1x8x128xf32>
    %64 = vector.shape_cast %63 : vector<1x1x8x128xf32> to vector<8x128xf32>
    %65 = vector.shape_cast %62 : vector<8x128xf32> to vector<1x1x8x128xf32>
    tpu.vector_store %arg11[%c0_64, %c1_65, %c0_66, %c128_67], %65 {strides = array<i32>} : memref<5x5x16x256xf32, #tpu.memory_space<vmem>>, vector<1x1x8x128xf32>,
    %66 = vector.extract_strided_slice %57 {offsets = [16, 0], sizes = [8, 128], strides = [1, 1]} : vector<512x128xf32> to vector<8x128xf32>
    %c0_68 = arith.constant 0 : index
    %c1_69 = arith.constant 1 : index
    %c8_70 = arith.constant 8 : index
    %c128_71 = arith.constant 128 : index
    %67 = vector.load %arg11[%c0_68, %c1_69, %c8_70, %c128_71] : memref<5x5x16x256xf32, #tpu.memory_space<vmem>>, vector<1x1x8x128xf32>
    %68 = vector.shape_cast %67 : vector<1x1x8x128xf32> to vector<8x128xf32>
    %69 = vector.shape_cast %66 : vector<8x128xf32> to vector<1x1x8x128xf32>
    tpu.vector_store %arg11[%c0_68, %c1_69, %c8_70, %c128_71], %69 {strides = array<i32>} : memref<5x5x16x256xf32, #tpu.memory_space<vmem>>, vector<1x1x8x128xf32>,
    %70 = vector.extract_strided_slice %57 {offsets = [24, 0], sizes = [8, 128], strides = [1, 1]} : vector<512x128xf32> to vector<8x128xf32>
    %c0_72 = arith.constant 0 : index
    %c2_73 = arith.constant 2 : index
    %c0_74 = arith.constant 0 : index
    %c128_75 = arith.constant 128 : index
    %71 = vector.load %arg11[%c0_72, %c2_73, %c0_74, %c128_75] : memref<5x5x16x256xf32, #tpu.memory_space<vmem>>, vector<1x1x8x128xf32>
    %72 = vector.shape_cast %71 : vector<1x1x8x128xf32> to vector<8x128xf32>
    %73 = vector.shape_cast %70 : vector<8x128xf32> to vector<1x1x8x128xf32>
    tpu.vector_store %arg11[%c0_72, %c2_73, %c0_74, %c128_75], %73 {strides = array<i32>} : memref<5x5x16x256xf32, #tpu.memory_space<vmem>>, vector<1x1x8x128xf32>,
    %74 = vector.extract_strided_slice %57 {offsets = [32, 0], sizes = [8, 128], strides = [1, 1]} : vector<512x128xf32> to vector<8x128xf32>
    %c0_76 = arith.constant 0 : index
    %c2_77 = arith.constant 2 : index
    %c8_78 = arith.constant 8 : index
    %c128_79 = arith.constant 128 : index
    %75 = vector.load %arg11[%c0_76, %c2_77, %c8_78, %c128_79] : memref<5x5x16x256xf32, #tpu.memory_space<vmem>>, vector<1x1x8x128xf32>
    %76 = vector.shape_cast %75 : vector<1x1x8x128xf32> to vector<8x128xf32>
    %77 = vector.shape_cast %74 : vector<8x128xf32> to vector<1x1x8x128xf32>
    tpu.vector_store %arg11[%c0_76, %c2_77, %c8_78, %c128_79], %77 {strides = array<i32>} : memref<5x5x16x256xf32, #tpu.memory_space<vmem>>, vector<1x1x8x128xf32>,
    %78 = vector.extract_strided_slice %57 {offsets = [40, 0], sizes = [8, 128], strides = [1, 1]} : vector<512x128xf32> to vector<8x128xf32>
    %c0_80 = arith.constant 0 : index
    %c3 = arith.constant 3 : index
    %c0_81 = arith.constant 0 : index
    %c128_82 = arith.constant 128 : index
    %79 = vector.load %arg11[%c0_80, %c3, %c0_81, %c128_82] : memref<5x5x16x256xf32, #tpu.memory_space<vmem>>, vector<1x1x8x128xf32>
    %80 = vector.shape_cast %79 : vector<1x1x8x128xf32> to vector<8x128xf32>
    %81 = vector.shape_cast %78 : vector<8x128xf32> to vector<1x1x8x128xf32>
    tpu.vector_store %arg11[%c0_80, %c3, %c0_81, %c128_82], %81 {strides = array<i32>} : memref<5x5x16x256xf32, #tpu.memory_space<vmem>>, vector<1x1x8x128xf32>,
    %82 = vector.extract_strided_slice %57 {offsets = [48, 0], sizes = [8, 128], strides = [1, 1]} : vector<512x128xf32> to vector<8x128xf32>
    %c0_83 = arith.constant 0 : index
    %c3_84 = arith.constant 3 : index
    %c8_85 = arith.constant 8 : index
    %c128_86 = arith.constant 128 : index
    %83 = vector.load %arg11[%c0_83, %c3_84, %c8_85, %c128_86] : memref<5x5x16x256xf32, #tpu.memory_space<vmem>>, vector<1x1x8x128xf32>
    %84 = vector.shape_cast %83 : vector<1x1x8x128xf32> to vector<8x128xf32>
    %85 = vector.shape_cast %82 : vector<8x128xf32> to vector<1x1x8x128xf32>
    tpu.vector_store %arg11[%c0_83, %c3_84, %c8_85, %c128_86], %85 {strides = array<i32>} : memref<5x5x16x256xf32, #tpu.memory_space<vmem>>, vector<1x1x8x128xf32>,
    %86 = vector.extract_strided_slice %57 {offsets = [56, 0], sizes = [8, 128], strides = [1, 1]} : vector<512x128xf32> to vector<8x128xf32>
    %c0_87 = arith.constant 0 : index
    %c4_88 = arith.constant 4 : index
    %c0_89 = arith.constant 0 : index
    %c128_90 = arith.constant 128 : index
    %87 = vector.load %arg11[%c0_87, %c4_88, %c0_89, %c128_90] : memref<5x5x16x256xf32, #tpu.memory_space<vmem>>, vector<1x1x8x128xf32>
    %88 = vector.shape_cast %87 : vector<1x1x8x128xf32> to vector<8x128xf32>
    %89 = vector.shape_cast %86 : vector<8x128xf32> to vector<1x1x8x128xf32>
    tpu.vector_store %arg11[%c0_87, %c4_88, %c0_89, %c128_90], %89 {strides = array<i32>} : memref<5x5x16x256xf32, #tpu.memory_space<vmem>>, vector<1x1x8x128xf32>,
    %90 = vector.extract_strided_slice %57 {offsets = [64, 0], sizes = [8, 128], strides = [1, 1]} : vector<512x128xf32> to vector<8x128xf32>
    %c1_91 = arith.constant 1 : index
    %c0_92 = arith.constant 0 : index
    %c8_93 = arith.constant 8 : index
    %c0_94 = arith.constant 0 : index
    %91 = vector.load %arg11[%c1_91, %c0_92, %c8_93, %c0_94] : memref<5x5x16x256xf32, #tpu.memory_space<vmem>>, vector<1x1x8x128xf32>
    %92 = vector.shape_cast %91 : vector<1x1x8x128xf32> to vector<8x128xf32>
    %93 = vector.shape_cast %90 : vector<8x128xf32> to vector<1x1x8x128xf32>
    tpu.vector_store %arg11[%c1_91, %c0_92, %c8_93, %c0_94], %93 {strides = array<i32>} : memref<5x5x16x256xf32, #tpu.memory_space<vmem>>, vector<1x1x8x128xf32>,
    %94 = vector.extract_strided_slice %57 {offsets = [72, 0], sizes = [8, 128], strides = [1, 1]} : vector<512x128xf32> to vector<8x128xf32>
    %c1_95 = arith.constant 1 : index
    %c1_96 = arith.constant 1 : index
    %c0_97 = arith.constant 0 : index
    %c0_98 = arith.constant 0 : index
    %95 = vector.load %arg11[%c1_95, %c1_96, %c0_97, %c0_98] : memref<5x5x16x256xf32, #tpu.memory_space<vmem>>, vector<1x1x8x128xf32>
    %96 = vector.shape_cast %95 : vector<1x1x8x128xf32> to vector<8x128xf32>
    %97 = vector.shape_cast %94 : vector<8x128xf32> to vector<1x1x8x128xf32>
    tpu.vector_store %arg11[%c1_95, %c1_96, %c0_97, %c0_98], %97 {strides = array<i32>} : memref<5x5x16x256xf32, #tpu.memory_space<vmem>>, vector<1x1x8x128xf32>,
    %98 = vector.extract_strided_slice %57 {offsets = [80, 0], sizes = [8, 128], strides = [1, 1]} : vector<512x128xf32> to vector<8x128xf32>
    %c1_99 = arith.constant 1 : index
    %c1_100 = arith.constant 1 : index
    %c8_101 = arith.constant 8 : index
    %c0_102 = arith.constant 0 : index
    %99 = vector.load %arg11[%c1_99, %c1_100, %c8_101, %c0_102] : memref<5x5x16x256xf32, #tpu.memory_space<vmem>>, vector<1x1x8x128xf32>
    %100 = vector.shape_cast %99 : vector<1x1x8x128xf32> to vector<8x128xf32>
    %101 = vector.shape_cast %98 : vector<8x128xf32> to vector<1x1x8x128xf32>
    tpu.vector_store %arg11[%c1_99, %c1_100, %c8_101, %c0_102], %101 {strides = array<i32>} : memref<5x5x16x256xf32, #tpu.memory_space<vmem>>, vector<1x1x8x128xf32>,
    %102 = vector.extract_strided_slice %57 {offsets = [88, 0], sizes = [8, 128], strides = [1, 1]} : vector<512x128xf32> to vector<8x128xf32>
    %c1_103 = arith.constant 1 : index
    %c2_104 = arith.constant 2 : index
    %c0_105 = arith.constant 0 : index
    %c0_106 = arith.constant 0 : index
    %103 = vector.load %arg11[%c1_103, %c2_104, %c0_105, %c0_106] : memref<5x5x16x256xf32, #tpu.memory_space<vmem>>, vector<1x1x8x128xf32>
    %104 = vector.shape_cast %103 : vector<1x1x8x128xf32> to vector<8x128xf32>
    %105 = vector.shape_cast %102 : vector<8x128xf32> to vector<1x1x8x128xf32>
    tpu.vector_store %arg11[%c1_103, %c2_104, %c0_105, %c0_106], %105 {strides = array<i32>} : memref<5x5x16x256xf32, #tpu.memory_space<vmem>>, vector<1x1x8x128xf32>,
    %106 = vector.extract_strided_slice %57 {offsets = [96, 0], sizes = [8, 128], strides = [1, 1]} : vector<512x128xf32> to vector<8x128xf32>
    %c1_107 = arith.constant 1 : index
    %c2_108 = arith.constant 2 : index
    %c8_109 = arith.constant 8 : index
    %c0_110 = arith.constant 0 : index
    %107 = vector.load %arg11[%c1_107, %c2_108, %c8_109, %c0_110] : memref<5x5x16x256xf32, #tpu.memory_space<vmem>>, vector<1x1x8x128xf32>
    %108 = vector.shape_cast %107 : vector<1x1x8x128xf32> to vector<8x128xf32>
    %109 = vector.shape_cast %106 : vector<8x128xf32> to vector<1x1x8x128xf32>
    tpu.vector_store %arg11[%c1_107, %c2_108, %c8_109, %c0_110], %109 {strides = array<i32>} : memref<5x5x16x256xf32, #tpu.memory_space<vmem>>, vector<1x1x8x128xf32>,
    %110 = vector.extract_strided_slice %57 {offsets = [104, 0], sizes = [8, 128], strides = [1, 1]} : vector<512x128xf32> to vector<8x128xf32>
    %c1_111 = arith.constant 1 : index
    %c3_112 = arith.constant 3 : index
    %c0_113 = arith.constant 0 : index
    %c0_114 = arith.constant 0 : index
    %111 = vector.load %arg11[%c1_111, %c3_112, %c0_113, %c0_114] : memref<5x5x16x256xf32, #tpu.memory_space<vmem>>, vector<1x1x8x128xf32>
    %112 = vector.shape_cast %111 : vector<1x1x8x128xf32> to vector<8x128xf32>
    %113 = vector.shape_cast %110 : vector<8x128xf32> to vector<1x1x8x128xf32>
    tpu.vector_store %arg11[%c1_111, %c3_112, %c0_113, %c0_114], %113 {strides = array<i32>} : memref<5x5x16x256xf32, #tpu.memory_space<vmem>>, vector<1x1x8x128xf32>,
    %114 = vector.extract_strided_slice %57 {offsets = [112, 0], sizes = [8, 128], strides = [1, 1]} : vector<512x128xf32> to vector<8x128xf32>
    %c1_115 = arith.constant 1 : index
    %c3_116 = arith.constant 3 : index
    %c8_117 = arith.constant 8 : index
    %c0_118 = arith.constant 0 : index
    %115 = vector.load %arg11[%c1_115, %c3_116, %c8_117, %c0_118] : memref<5x5x16x256xf32, #tpu.memory_space<vmem>>, vector<1x1x8x128xf32>
    %116 = vector.shape_cast %115 : vector<1x1x8x128xf32> to vector<8x128xf32>
    %117 = vector.shape_cast %114 : vector<8x128xf32> to vector<1x1x8x128xf32>
    tpu.vector_store %arg11[%c1_115, %c3_116, %c8_117, %c0_118], %117 {strides = array<i32>} : memref<5x5x16x256xf32, #tpu.memory_space<vmem>>, vector<1x1x8x128xf32>,
    %118 = vector.extract_strided_slice %57 {offsets = [120, 0], sizes = [8, 128], strides = [1, 1]} : vector<512x128xf32> to vector<8x128xf32>
    %c1_119 = arith.constant 1 : index
    %c4_120 = arith.constant 4 : index
    %c0_121 = arith.constant 0 : index
    %c0_122 = arith.constant 0 : index
    %119 = vector.load %arg11[%c1_119, %c4_120, %c0_121, %c0_122] : memref<5x5x16x256xf32, #tpu.memory_space<vmem>>, vector<1x1x8x128xf32>
    %120 = vector.shape_cast %119 : vector<1x1x8x128xf32> to vector<8x128xf32>
    %121 = vector.shape_cast %118 : vector<8x128xf32> to vector<1x1x8x128xf32>
    tpu.vector_store %arg11[%c1_119, %c4_120, %c0_121, %c0_122], %121 {strides = array<i32>} : memref<5x5x16x256xf32, #tpu.memory_space<vmem>>, vector<1x1x8x128xf32>,
    %122 = vector.extract_strided_slice %57 {offsets = [128, 0], sizes = [8, 128], strides = [1, 1]} : vector<512x128xf32> to vector<8x128xf32>
    %c1_123 = arith.constant 1 : index
    %c0_124 = arith.constant 0 : index
    %c8_125 = arith.constant 8 : index
    %c128_126 = arith.constant 128 : index
    %123 = vector.load %arg11[%c1_123, %c0_124, %c8_125, %c128_126] : memref<5x5x16x256xf32, #tpu.memory_space<vmem>>, vector<1x1x8x128xf32>
    %124 = vector.shape_cast %123 : vector<1x1x8x128xf32> to vector<8x128xf32>
    %125 = vector.shape_cast %122 : vector<8x128xf32> to vector<1x1x8x128xf32>
    tpu.vector_store %arg11[%c1_123, %c0_124, %c8_125, %c128_126], %125 {strides = array<i32>} : memref<5x5x16x256xf32, #tpu.memory_space<vmem>>, vector<1x1x8x128xf32>,
    %126 = vector.extract_strided_slice %57 {offsets = [136, 0], sizes = [8, 128], strides = [1, 1]} : vector<512x128xf32> to vector<8x128xf32>
    %c1_127 = arith.constant 1 : index
    %c1_128 = arith.constant 1 : index
    %c0_129 = arith.constant 0 : index
    %c128_130 = arith.constant 128 : index
    %127 = vector.load %arg11[%c1_127, %c1_128, %c0_129, %c128_130] : memref<5x5x16x256xf32, #tpu.memory_space<vmem>>, vector<1x1x8x128xf32>
    %128 = vector.shape_cast %127 : vector<1x1x8x128xf32> to vector<8x128xf32>
    %129 = vector.shape_cast %126 : vector<8x128xf32> to vector<1x1x8x128xf32>
    tpu.vector_store %arg11[%c1_127, %c1_128, %c0_129, %c128_130], %129 {strides = array<i32>} : memref<5x5x16x256xf32, #tpu.memory_space<vmem>>, vector<1x1x8x128xf32>,
    %130 = vector.extract_strided_slice %57 {offsets = [144, 0], sizes = [8, 128], strides = [1, 1]} : vector<512x128xf32> to vector<8x128xf32>
    %c1_131 = arith.constant 1 : index
    %c1_132 = arith.constant 1 : index
    %c8_133 = arith.constant 8 : index
    %c128_134 = arith.constant 128 : index
    %131 = vector.load %arg11[%c1_131, %c1_132, %c8_133, %c128_134] : memref<5x5x16x256xf32, #tpu.memory_space<vmem>>, vector<1x1x8x128xf32>
    %132 = vector.shape_cast %131 : vector<1x1x8x128xf32> to vector<8x128xf32>
    %133 = vector.shape_cast %130 : vector<8x128xf32> to vector<1x1x8x128xf32>
    tpu.vector_store %arg11[%c1_131, %c1_132, %c8_133, %c128_134], %133 {strides = array<i32>} : memref<5x5x16x256xf32, #tpu.memory_space<vmem>>, vector<1x1x8x128xf32>,
    %134 = vector.extract_strided_slice %57 {offsets = [152, 0], sizes = [8, 128], strides = [1, 1]} : vector<512x128xf32> to vector<8x128xf32>
    %c1_135 = arith.constant 1 : index
    %c2_136 = arith.constant 2 : index
    %c0_137 = arith.constant 0 : index
    %c128_138 = arith.constant 128 : index
    %135 = vector.load %arg11[%c1_135, %c2_136, %c0_137, %c128_138] : memref<5x5x16x256xf32, #tpu.memory_space<vmem>>, vector<1x1x8x128xf32>
    %136 = vector.shape_cast %135 : vector<1x1x8x128xf32> to vector<8x128xf32>
    %137 = vector.shape_cast %134 : vector<8x128xf32> to vector<1x1x8x128xf32>
    tpu.vector_store %arg11[%c1_135, %c2_136, %c0_137, %c128_138], %137 {strides = array<i32>} : memref<5x5x16x256xf32, #tpu.memory_space<vmem>>, vector<1x1x8x128xf32>,
    %138 = vector.extract_strided_slice %57 {offsets = [160, 0], sizes = [8, 128], strides = [1, 1]} : vector<512x128xf32> to vector<8x128xf32>
    %c1_139 = arith.constant 1 : index
    %c2_140 = arith.constant 2 : index
    %c8_141 = arith.constant 8 : index
    %c128_142 = arith.constant 128 : index
    %139 = vector.load %arg11[%c1_139, %c2_140, %c8_141, %c128_142] : memref<5x5x16x256xf32, #tpu.memory_space<vmem>>, vector<1x1x8x128xf32>
    %140 = vector.shape_cast %139 : vector<1x1x8x128xf32> to vector<8x128xf32>
    %141 = vector.shape_cast %138 : vector<8x128xf32> to vector<1x1x8x128xf32>
    tpu.vector_store %arg11[%c1_139, %c2_140, %c8_141, %c128_142], %141 {strides = array<i32>} : memref<5x5x16x256xf32, #tpu.memory_space<vmem>>, vector<1x1x8x128xf32>,
    %142 = vector.extract_strided_slice %57 {offsets = [168, 0], sizes = [8, 128], strides = [1, 1]} : vector<512x128xf32> to vector<8x128xf32>
    %c1_143 = arith.constant 1 : index
    %c3_144 = arith.constant 3 : index
    %c0_145 = arith.constant 0 : index
    %c128_146 = arith.constant 128 : index
    %143 = vector.load %arg11[%c1_143, %c3_144, %c0_145, %c128_146] : memref<5x5x16x256xf32, #tpu.memory_space<vmem>>, vector<1x1x8x128xf32>
    %144 = vector.shape_cast %143 : vector<1x1x8x128xf32> to vector<8x128xf32>
    %145 = vector.shape_cast %142 : vector<8x128xf32> to vector<1x1x8x128xf32>
    tpu.vector_store %arg11[%c1_143, %c3_144, %c0_145, %c128_146], %145 {strides = array<i32>} : memref<5x5x16x256xf32, #tpu.memory_space<vmem>>, vector<1x1x8x128xf32>,
    %146 = vector.extract_strided_slice %57 {offsets = [176, 0], sizes = [8, 128], strides = [1, 1]} : vector<512x128xf32> to vector<8x128xf32>
    %c1_147 = arith.constant 1 : index
    %c3_148 = arith.constant 3 : index
    %c8_149 = arith.constant 8 : index
    %c128_150 = arith.constant 128 : index
    %147 = vector.load %arg11[%c1_147, %c3_148, %c8_149, %c128_150] : memref<5x5x16x256xf32, #tpu.memory_space<vmem>>, vector<1x1x8x128xf32>
    %148 = vector.shape_cast %147 : vector<1x1x8x128xf32> to vector<8x128xf32>
    %149 = vector.shape_cast %146 : vector<8x128xf32> to vector<1x1x8x128xf32>
    tpu.vector_store %arg11[%c1_147, %c3_148, %c8_149, %c128_150], %149 {strides = array<i32>} : memref<5x5x16x256xf32, #tpu.memory_space<vmem>>, vector<1x1x8x128xf32>,
    %150 = vector.extract_strided_slice %57 {offsets = [184, 0], sizes = [8, 128], strides = [1, 1]} : vector<512x128xf32> to vector<8x128xf32>
    %c1_151 = arith.constant 1 : index
    %c4_152 = arith.constant 4 : index
    %c0_153 = arith.constant 0 : index
    %c128_154 = arith.constant 128 : index
    %151 = vector.load %arg11[%c1_151, %c4_152, %c0_153, %c128_154] : memref<5x5x16x256xf32, #tpu.memory_space<vmem>>, vector<1x1x8x128xf32>
    %152 = vector.shape_cast %151 : vector<1x1x8x128xf32> to vector<8x128xf32>
    %153 = vector.shape_cast %150 : vector<8x128xf32> to vector<1x1x8x128xf32>
    tpu.vector_store %arg11[%c1_151, %c4_152, %c0_153, %c128_154], %153 {strides = array<i32>} : memref<5x5x16x256xf32, #tpu.memory_space<vmem>>, vector<1x1x8x128xf32>,
    %154 = vector.extract_strided_slice %57 {offsets = [192, 0], sizes = [8, 128], strides = [1, 1]} : vector<512x128xf32> to vector<8x128xf32>
    %c2_155 = arith.constant 2 : index
    %c0_156 = arith.constant 0 : index
    %c8_157 = arith.constant 8 : index
    %c0_158 = arith.constant 0 : index
    %155 = vector.load %arg11[%c2_155, %c0_156, %c8_157, %c0_158] : memref<5x5x16x256xf32, #tpu.memory_space<vmem>>, vector<1x1x8x128xf32>
    %156 = vector.shape_cast %155 : vector<1x1x8x128xf32> to vector<8x128xf32>
    %157 = vector.shape_cast %154 : vector<8x128xf32> to vector<1x1x8x128xf32>
    tpu.vector_store %arg11[%c2_155, %c0_156, %c8_157, %c0_158], %157 {strides = array<i32>} : memref<5x5x16x256xf32, #tpu.memory_space<vmem>>, vector<1x1x8x128xf32>,
    %158 = vector.extract_strided_slice %57 {offsets = [200, 0], sizes = [8, 128], strides = [1, 1]} : vector<512x128xf32> to vector<8x128xf32>
    %c2_159 = arith.constant 2 : index
    %c1_160 = arith.constant 1 : index
    %c0_161 = arith.constant 0 : index
    %c0_162 = arith.constant 0 : index
    %159 = vector.load %arg11[%c2_159, %c1_160, %c0_161, %c0_162] : memref<5x5x16x256xf32, #tpu.memory_space<vmem>>, vector<1x1x8x128xf32>
    %160 = vector.shape_cast %159 : vector<1x1x8x128xf32> to vector<8x128xf32>
    %161 = vector.shape_cast %158 : vector<8x128xf32> to vector<1x1x8x128xf32>
    tpu.vector_store %arg11[%c2_159, %c1_160, %c0_161, %c0_162], %161 {strides = array<i32>} : memref<5x5x16x256xf32, #tpu.memory_space<vmem>>, vector<1x1x8x128xf32>,
    %162 = vector.extract_strided_slice %57 {offsets = [208, 0], sizes = [8, 128], strides = [1, 1]} : vector<512x128xf32> to vector<8x128xf32>
    %c2_163 = arith.constant 2 : index
    %c1_164 = arith.constant 1 : index
    %c8_165 = arith.constant 8 : index
    %c0_166 = arith.constant 0 : index
    %163 = vector.load %arg11[%c2_163, %c1_164, %c8_165, %c0_166] : memref<5x5x16x256xf32, #tpu.memory_space<vmem>>, vector<1x1x8x128xf32>
    %164 = vector.shape_cast %163 : vector<1x1x8x128xf32> to vector<8x128xf32>
    %165 = vector.shape_cast %162 : vector<8x128xf32> to vector<1x1x8x128xf32>
    tpu.vector_store %arg11[%c2_163, %c1_164, %c8_165, %c0_166], %165 {strides = array<i32>} : memref<5x5x16x256xf32, #tpu.memory_space<vmem>>, vector<1x1x8x128xf32>,
    %166 = vector.extract_strided_slice %57 {offsets = [216, 0], sizes = [8, 128], strides = [1, 1]} : vector<512x128xf32> to vector<8x128xf32>
    %c2_167 = arith.constant 2 : index
    %c2_168 = arith.constant 2 : index
    %c0_169 = arith.constant 0 : index
    %c0_170 = arith.constant 0 : index
    %167 = vector.load %arg11[%c2_167, %c2_168, %c0_169, %c0_170] : memref<5x5x16x256xf32, #tpu.memory_space<vmem>>, vector<1x1x8x128xf32>
    %168 = vector.shape_cast %167 : vector<1x1x8x128xf32> to vector<8x128xf32>
    %169 = vector.shape_cast %166 : vector<8x128xf32> to vector<1x1x8x128xf32>
    tpu.vector_store %arg11[%c2_167, %c2_168, %c0_169, %c0_170], %169 {strides = array<i32>} : memref<5x5x16x256xf32, #tpu.memory_space<vmem>>, vector<1x1x8x128xf32>,
    %170 = vector.extract_strided_slice %57 {offsets = [224, 0], sizes = [8, 128], strides = [1, 1]} : vector<512x128xf32> to vector<8x128xf32>
    %c2_171 = arith.constant 2 : index
    %c2_172 = arith.constant 2 : index
    %c8_173 = arith.constant 8 : index
    %c0_174 = arith.constant 0 : index
    %171 = vector.load %arg11[%c2_171, %c2_172, %c8_173, %c0_174] : memref<5x5x16x256xf32, #tpu.memory_space<vmem>>, vector<1x1x8x128xf32>
    %172 = vector.shape_cast %171 : vector<1x1x8x128xf32> to vector<8x128xf32>
    %173 = vector.shape_cast %170 : vector<8x128xf32> to vector<1x1x8x128xf32>
    tpu.vector_store %arg11[%c2_171, %c2_172, %c8_173, %c0_174], %173 {strides = array<i32>} : memref<5x5x16x256xf32, #tpu.memory_space<vmem>>, vector<1x1x8x128xf32>,
    %174 = vector.extract_strided_slice %57 {offsets = [232, 0], sizes = [8, 128], strides = [1, 1]} : vector<512x128xf32> to vector<8x128xf32>
    %c2_175 = arith.constant 2 : index
    %c3_176 = arith.constant 3 : index
    %c0_177 = arith.constant 0 : index
    %c0_178 = arith.constant 0 : index
    %175 = vector.load %arg11[%c2_175, %c3_176, %c0_177, %c0_178] : memref<5x5x16x256xf32, #tpu.memory_space<vmem>>, vector<1x1x8x128xf32>
    %176 = vector.shape_cast %175 : vector<1x1x8x128xf32> to vector<8x128xf32>
    %177 = vector.shape_cast %174 : vector<8x128xf32> to vector<1x1x8x128xf32>
    tpu.vector_store %arg11[%c2_175, %c3_176, %c0_177, %c0_178], %177 {strides = array<i32>} : memref<5x5x16x256xf32, #tpu.memory_space<vmem>>, vector<1x1x8x128xf32>,
    %178 = vector.extract_strided_slice %57 {offsets = [240, 0], sizes = [8, 128], strides = [1, 1]} : vector<512x128xf32> to vector<8x128xf32>
    %c2_179 = arith.constant 2 : index
    %c3_180 = arith.constant 3 : index
    %c8_181 = arith.constant 8 : index
    %c0_182 = arith.constant 0 : index
    %179 = vector.load %arg11[%c2_179, %c3_180, %c8_181, %c0_182] : memref<5x5x16x256xf32, #tpu.memory_space<vmem>>, vector<1x1x8x128xf32>
    %180 = vector.shape_cast %179 : vector<1x1x8x128xf32> to vector<8x128xf32>
    %181 = vector.shape_cast %178 : vector<8x128xf32> to vector<1x1x8x128xf32>
    tpu.vector_store %arg11[%c2_179, %c3_180, %c8_181, %c0_182], %181 {strides = array<i32>} : memref<5x5x16x256xf32, #tpu.memory_space<vmem>>, vector<1x1x8x128xf32>,
    %182 = vector.extract_strided_slice %57 {offsets = [248, 0], sizes = [8, 128], strides = [1, 1]} : vector<512x128xf32> to vector<8x128xf32>
    %c2_183 = arith.constant 2 : index
    %c4_184 = arith.constant 4 : index
    %c0_185 = arith.constant 0 : index
    %c0_186 = arith.constant 0 : index
    %183 = vector.load %arg11[%c2_183, %c4_184, %c0_185, %c0_186] : memref<5x5x16x256xf32, #tpu.memory_space<vmem>>, vector<1x1x8x128xf32>
    %184 = vector.shape_cast %183 : vector<1x1x8x128xf32> to vector<8x128xf32>
    %185 = vector.shape_cast %182 : vector<8x128xf32> to vector<1x1x8x128xf32>
    tpu.vector_store %arg11[%c2_183, %c4_184, %c0_185, %c0_186], %185 {strides = array<i32>} : memref<5x5x16x256xf32, #tpu.memory_space<vmem>>, vector<1x1x8x128xf32>,
    %186 = vector.extract_strided_slice %57 {offsets = [256, 0], sizes = [8, 128], strides = [1, 1]} : vector<512x128xf32> to vector<8x128xf32>
    %c2_187 = arith.constant 2 : index
    %c0_188 = arith.constant 0 : index
    %c8_189 = arith.constant 8 : index
    %c128_190 = arith.constant 128 : index
    %187 = vector.load %arg11[%c2_187, %c0_188, %c8_189, %c128_190] : memref<5x5x16x256xf32, #tpu.memory_space<vmem>>, vector<1x1x8x128xf32>
    %188 = vector.shape_cast %187 : vector<1x1x8x128xf32> to vector<8x128xf32>
    %189 = vector.shape_cast %186 : vector<8x128xf32> to vector<1x1x8x128xf32>
    tpu.vector_store %arg11[%c2_187, %c0_188, %c8_189, %c128_190], %189 {strides = array<i32>} : memref<5x5x16x256xf32, #tpu.memory_space<vmem>>, vector<1x1x8x128xf32>,
    %190 = vector.extract_strided_slice %57 {offsets = [264, 0], sizes = [8, 128], strides = [1, 1]} : vector<512x128xf32> to vector<8x128xf32>
    %c2_191 = arith.constant 2 : index
    %c1_192 = arith.constant 1 : index
    %c0_193 = arith.constant 0 : index
    %c128_194 = arith.constant 128 : index
    %191 = vector.load %arg11[%c2_191, %c1_192, %c0_193, %c128_194] : memref<5x5x16x256xf32, #tpu.memory_space<vmem>>, vector<1x1x8x128xf32>
    %192 = vector.shape_cast %191 : vector<1x1x8x128xf32> to vector<8x128xf32>
    %193 = vector.shape_cast %190 : vector<8x128xf32> to vector<1x1x8x128xf32>
    tpu.vector_store %arg11[%c2_191, %c1_192, %c0_193, %c128_194], %193 {strides = array<i32>} : memref<5x5x16x256xf32, #tpu.memory_space<vmem>>, vector<1x1x8x128xf32>,
    %194 = vector.extract_strided_slice %57 {offsets = [272, 0], sizes = [8, 128], strides = [1, 1]} : vector<512x128xf32> to vector<8x128xf32>
    %c2_195 = arith.constant 2 : index
    %c1_196 = arith.constant 1 : index
    %c8_197 = arith.constant 8 : index
    %c128_198 = arith.constant 128 : index
    %195 = vector.load %arg11[%c2_195, %c1_196, %c8_197, %c128_198] : memref<5x5x16x256xf32, #tpu.memory_space<vmem>>, vector<1x1x8x128xf32>
    %196 = vector.shape_cast %195 : vector<1x1x8x128xf32> to vector<8x128xf32>
    %197 = vector.shape_cast %194 : vector<8x128xf32> to vector<1x1x8x128xf32>
    tpu.vector_store %arg11[%c2_195, %c1_196, %c8_197, %c128_198], %197 {strides = array<i32>} : memref<5x5x16x256xf32, #tpu.memory_space<vmem>>, vector<1x1x8x128xf32>,
    %198 = vector.extract_strided_slice %57 {offsets = [280, 0], sizes = [8, 128], strides = [1, 1]} : vector<512x128xf32> to vector<8x128xf32>
    %c2_199 = arith.constant 2 : index
    %c2_200 = arith.constant 2 : index
    %c0_201 = arith.constant 0 : index
    %c128_202 = arith.constant 128 : index
    %199 = vector.load %arg11[%c2_199, %c2_200, %c0_201, %c128_202] : memref<5x5x16x256xf32, #tpu.memory_space<vmem>>, vector<1x1x8x128xf32>
    %200 = vector.shape_cast %199 : vector<1x1x8x128xf32> to vector<8x128xf32>
    %201 = vector.shape_cast %198 : vector<8x128xf32> to vector<1x1x8x128xf32>
    tpu.vector_store %arg11[%c2_199, %c2_200, %c0_201, %c128_202], %201 {strides = array<i32>} : memref<5x5x16x256xf32, #tpu.memory_space<vmem>>, vector<1x1x8x128xf32>,
    %202 = vector.extract_strided_slice %57 {offsets = [288, 0], sizes = [8, 128], strides = [1, 1]} : vector<512x128xf32> to vector<8x128xf32>
    %c2_203 = arith.constant 2 : index
    %c2_204 = arith.constant 2 : index
    %c8_205 = arith.constant 8 : index
    %c128_206 = arith.constant 128 : index
    %203 = vector.load %arg11[%c2_203, %c2_204, %c8_205, %c128_206] : memref<5x5x16x256xf32, #tpu.memory_space<vmem>>, vector<1x1x8x128xf32>
    %204 = vector.shape_cast %203 : vector<1x1x8x128xf32> to vector<8x128xf32>
    %205 = vector.shape_cast %202 : vector<8x128xf32> to vector<1x1x8x128xf32>
    tpu.vector_store %arg11[%c2_203, %c2_204, %c8_205, %c128_206], %205 {strides = array<i32>} : memref<5x5x16x256xf32, #tpu.memory_space<vmem>>, vector<1x1x8x128xf32>,
    %206 = vector.extract_strided_slice %57 {offsets = [296, 0], sizes = [8, 128], strides = [1, 1]} : vector<512x128xf32> to vector<8x128xf32>
    %c2_207 = arith.constant 2 : index
    %c3_208 = arith.constant 3 : index
    %c0_209 = arith.constant 0 : index
    %c128_210 = arith.constant 128 : index
    %207 = vector.load %arg11[%c2_207, %c3_208, %c0_209, %c128_210] : memref<5x5x16x256xf32, #tpu.memory_space<vmem>>, vector<1x1x8x128xf32>
    %208 = vector.shape_cast %207 : vector<1x1x8x128xf32> to vector<8x128xf32>
    %209 = vector.shape_cast %206 : vector<8x128xf32> to vector<1x1x8x128xf32>
    tpu.vector_store %arg11[%c2_207, %c3_208, %c0_209, %c128_210], %209 {strides = array<i32>} : memref<5x5x16x256xf32, #tpu.memory_space<vmem>>, vector<1x1x8x128xf32>,
    %210 = vector.extract_strided_slice %57 {offsets = [304, 0], sizes = [8, 128], strides = [1, 1]} : vector<512x128xf32> to vector<8x128xf32>
    %c2_211 = arith.constant 2 : index
    %c3_212 = arith.constant 3 : index
    %c8_213 = arith.constant 8 : index
    %c128_214 = arith.constant 128 : index
    %211 = vector.load %arg11[%c2_211, %c3_212, %c8_213, %c128_214] : memref<5x5x16x256xf32, #tpu.memory_space<vmem>>, vector<1x1x8x128xf32>
    %212 = vector.shape_cast %211 : vector<1x1x8x128xf32> to vector<8x128xf32>
    %213 = vector.shape_cast %210 : vector<8x128xf32> to vector<1x1x8x128xf32>
    tpu.vector_store %arg11[%c2_211, %c3_212, %c8_213, %c128_214], %213 {strides = array<i32>} : memref<5x5x16x256xf32, #tpu.memory_space<vmem>>, vector<1x1x8x128xf32>,
    %214 = vector.extract_strided_slice %57 {offsets = [312, 0], sizes = [8, 128], strides = [1, 1]} : vector<512x128xf32> to vector<8x128xf32>
    %c2_215 = arith.constant 2 : index
    %c4_216 = arith.constant 4 : index
    %c0_217 = arith.constant 0 : index
    %c128_218 = arith.constant 128 : index
    %215 = vector.load %arg11[%c2_215, %c4_216, %c0_217, %c128_218] : memref<5x5x16x256xf32, #tpu.memory_space<vmem>>, vector<1x1x8x128xf32>
    %216 = vector.shape_cast %215 : vector<1x1x8x128xf32> to vector<8x128xf32>
    %217 = vector.shape_cast %214 : vector<8x128xf32> to vector<1x1x8x128xf32>
    tpu.vector_store %arg11[%c2_215, %c4_216, %c0_217, %c128_218], %217 {strides = array<i32>} : memref<5x5x16x256xf32, #tpu.memory_space<vmem>>, vector<1x1x8x128xf32>,
    %218 = vector.extract_strided_slice %57 {offsets = [320, 0], sizes = [8, 128], strides = [1, 1]} : vector<512x128xf32> to vector<8x128xf32>
    %c3_219 = arith.constant 3 : index
    %c0_220 = arith.constant 0 : index
    %c8_221 = arith.constant 8 : index
    %c0_222 = arith.constant 0 : index
    %219 = vector.load %arg11[%c3_219, %c0_220, %c8_221, %c0_222] : memref<5x5x16x256xf32, #tpu.memory_space<vmem>>, vector<1x1x8x128xf32>
    %220 = vector.shape_cast %219 : vector<1x1x8x128xf32> to vector<8x128xf32>
    %221 = vector.shape_cast %218 : vector<8x128xf32> to vector<1x1x8x128xf32>
    tpu.vector_store %arg11[%c3_219, %c0_220, %c8_221, %c0_222], %221 {strides = array<i32>} : memref<5x5x16x256xf32, #tpu.memory_space<vmem>>, vector<1x1x8x128xf32>,
    %222 = vector.extract_strided_slice %57 {offsets = [328, 0], sizes = [8, 128], strides = [1, 1]} : vector<512x128xf32> to vector<8x128xf32>
    %c3_223 = arith.constant 3 : index
    %c1_224 = arith.constant 1 : index
    %c0_225 = arith.constant 0 : index
    %c0_226 = arith.constant 0 : index
    %223 = vector.load %arg11[%c3_223, %c1_224, %c0_225, %c0_226] : memref<5x5x16x256xf32, #tpu.memory_space<vmem>>, vector<1x1x8x128xf32>
    %224 = vector.shape_cast %223 : vector<1x1x8x128xf32> to vector<8x128xf32>
    %225 = vector.shape_cast %222 : vector<8x128xf32> to vector<1x1x8x128xf32>
    tpu.vector_store %arg11[%c3_223, %c1_224, %c0_225, %c0_226], %225 {strides = array<i32>} : memref<5x5x16x256xf32, #tpu.memory_space<vmem>>, vector<1x1x8x128xf32>,
    %226 = vector.extract_strided_slice %57 {offsets = [336, 0], sizes = [8, 128], strides = [1, 1]} : vector<512x128xf32> to vector<8x128xf32>
    %c3_227 = arith.constant 3 : index
    %c1_228 = arith.constant 1 : index
    %c8_229 = arith.constant 8 : index
    %c0_230 = arith.constant 0 : index
    %227 = vector.load %arg11[%c3_227, %c1_228, %c8_229, %c0_230] : memref<5x5x16x256xf32, #tpu.memory_space<vmem>>, vector<1x1x8x128xf32>
    %228 = vector.shape_cast %227 : vector<1x1x8x128xf32> to vector<8x128xf32>
    %229 = vector.shape_cast %226 : vector<8x128xf32> to vector<1x1x8x128xf32>
    tpu.vector_store %arg11[%c3_227, %c1_228, %c8_229, %c0_230], %229 {strides = array<i32>} : memref<5x5x16x256xf32, #tpu.memory_space<vmem>>, vector<1x1x8x128xf32>,
    %230 = vector.extract_strided_slice %57 {offsets = [344, 0], sizes = [8, 128], strides = [1, 1]} : vector<512x128xf32> to vector<8x128xf32>
    %c3_231 = arith.constant 3 : index
    %c2_232 = arith.constant 2 : index
    %c0_233 = arith.constant 0 : index
    %c0_234 = arith.constant 0 : index
    %231 = vector.load %arg11[%c3_231, %c2_232, %c0_233, %c0_234] : memref<5x5x16x256xf32, #tpu.memory_space<vmem>>, vector<1x1x8x128xf32>
    %232 = vector.shape_cast %231 : vector<1x1x8x128xf32> to vector<8x128xf32>
    %233 = vector.shape_cast %230 : vector<8x128xf32> to vector<1x1x8x128xf32>
    tpu.vector_store %arg11[%c3_231, %c2_232, %c0_233, %c0_234], %233 {strides = array<i32>} : memref<5x5x16x256xf32, #tpu.memory_space<vmem>>, vector<1x1x8x128xf32>,
    %234 = vector.extract_strided_slice %57 {offsets = [352, 0], sizes = [8, 128], strides = [1, 1]} : vector<512x128xf32> to vector<8x128xf32>
    %c3_235 = arith.constant 3 : index
    %c2_236 = arith.constant 2 : index
    %c8_237 = arith.constant 8 : index
    %c0_238 = arith.constant 0 : index
    %235 = vector.load %arg11[%c3_235, %c2_236, %c8_237, %c0_238] : memref<5x5x16x256xf32, #tpu.memory_space<vmem>>, vector<1x1x8x128xf32>
    %236 = vector.shape_cast %235 : vector<1x1x8x128xf32> to vector<8x128xf32>
    %237 = vector.shape_cast %234 : vector<8x128xf32> to vector<1x1x8x128xf32>
    tpu.vector_store %arg11[%c3_235, %c2_236, %c8_237, %c0_238], %237 {strides = array<i32>} : memref<5x5x16x256xf32, #tpu.memory_space<vmem>>, vector<1x1x8x128xf32>,
    %238 = vector.extract_strided_slice %57 {offsets = [360, 0], sizes = [8, 128], strides = [1, 1]} : vector<512x128xf32> to vector<8x128xf32>
    %c3_239 = arith.constant 3 : index
    %c3_240 = arith.constant 3 : index
    %c0_241 = arith.constant 0 : index
    %c0_242 = arith.constant 0 : index
    %239 = vector.load %arg11[%c3_239, %c3_240, %c0_241, %c0_242] : memref<5x5x16x256xf32, #tpu.memory_space<vmem>>, vector<1x1x8x128xf32>
    %240 = vector.shape_cast %239 : vector<1x1x8x128xf32> to vector<8x128xf32>
    %241 = vector.shape_cast %238 : vector<8x128xf32> to vector<1x1x8x128xf32>
    tpu.vector_store %arg11[%c3_239, %c3_240, %c0_241, %c0_242], %241 {strides = array<i32>} : memref<5x5x16x256xf32, #tpu.memory_space<vmem>>, vector<1x1x8x128xf32>,
    %242 = vector.extract_strided_slice %57 {offsets = [368, 0], sizes = [8, 128], strides = [1, 1]} : vector<512x128xf32> to vector<8x128xf32>
    %c3_243 = arith.constant 3 : index
    %c3_244 = arith.constant 3 : index
    %c8_245 = arith.constant 8 : index
    %c0_246 = arith.constant 0 : index
    %243 = vector.load %arg11[%c3_243, %c3_244, %c8_245, %c0_246] : memref<5x5x16x256xf32, #tpu.memory_space<vmem>>, vector<1x1x8x128xf32>
    %244 = vector.shape_cast %243 : vector<1x1x8x128xf32> to vector<8x128xf32>
    %245 = vector.shape_cast %242 : vector<8x128xf32> to vector<1x1x8x128xf32>
    tpu.vector_store %arg11[%c3_243, %c3_244, %c8_245, %c0_246], %245 {strides = array<i32>} : memref<5x5x16x256xf32, #tpu.memory_space<vmem>>, vector<1x1x8x128xf32>,
    %246 = vector.extract_strided_slice %57 {offsets = [376, 0], sizes = [8, 128], strides = [1, 1]} : vector<512x128xf32> to vector<8x128xf32>
    %c3_247 = arith.constant 3 : index
    %c4_248 = arith.constant 4 : index
    %c0_249 = arith.constant 0 : index
    %c0_250 = arith.constant 0 : index
    %247 = vector.load %arg11[%c3_247, %c4_248, %c0_249, %c0_250] : memref<5x5x16x256xf32, #tpu.memory_space<vmem>>, vector<1x1x8x128xf32>
    %248 = vector.shape_cast %247 : vector<1x1x8x128xf32> to vector<8x128xf32>
    %249 = vector.shape_cast %246 : vector<8x128xf32> to vector<1x1x8x128xf32>
    tpu.vector_store %arg11[%c3_247, %c4_248, %c0_249, %c0_250], %249 {strides = array<i32>} : memref<5x5x16x256xf32, #tpu.memory_space<vmem>>, vector<1x1x8x128xf32>,
    %250 = vector.extract_strided_slice %57 {offsets = [384, 0], sizes = [8, 128], strides = [1, 1]} : vector<512x128xf32> to vector<8x128xf32>
    %c3_251 = arith.constant 3 : index
    %c0_252 = arith.constant 0 : index
    %c8_253 = arith.constant 8 : index
    %c128_254 = arith.constant 128 : index
    %251 = vector.load %arg11[%c3_251, %c0_252, %c8_253, %c128_254] : memref<5x5x16x256xf32, #tpu.memory_space<vmem>>, vector<1x1x8x128xf32>
    %252 = vector.shape_cast %251 : vector<1x1x8x128xf32> to vector<8x128xf32>
    %253 = vector.shape_cast %250 : vector<8x128xf32> to vector<1x1x8x128xf32>
    tpu.vector_store %arg11[%c3_251, %c0_252, %c8_253, %c128_254], %253 {strides = array<i32>} : memref<5x5x16x256xf32, #tpu.memory_space<vmem>>, vector<1x1x8x128xf32>,
    %254 = vector.extract_strided_slice %57 {offsets = [392, 0], sizes = [8, 128], strides = [1, 1]} : vector<512x128xf32> to vector<8x128xf32>
    %c3_255 = arith.constant 3 : index
    %c1_256 = arith.constant 1 : index
    %c0_257 = arith.constant 0 : index
    %c128_258 = arith.constant 128 : index
    %255 = vector.load %arg11[%c3_255, %c1_256, %c0_257, %c128_258] : memref<5x5x16x256xf32, #tpu.memory_space<vmem>>, vector<1x1x8x128xf32>
    %256 = vector.shape_cast %255 : vector<1x1x8x128xf32> to vector<8x128xf32>
    %257 = vector.shape_cast %254 : vector<8x128xf32> to vector<1x1x8x128xf32>
    tpu.vector_store %arg11[%c3_255, %c1_256, %c0_257, %c128_258], %257 {strides = array<i32>} : memref<5x5x16x256xf32, #tpu.memory_space<vmem>>, vector<1x1x8x128xf32>,
    %258 = vector.extract_strided_slice %57 {offsets = [400, 0], sizes = [8, 128], strides = [1, 1]} : vector<512x128xf32> to vector<8x128xf32>
    %c3_259 = arith.constant 3 : index
    %c1_260 = arith.constant 1 : index
    %c8_261 = arith.constant 8 : index
    %c128_262 = arith.constant 128 : index
    %259 = vector.load %arg11[%c3_259, %c1_260, %c8_261, %c128_262] : memref<5x5x16x256xf32, #tpu.memory_space<vmem>>, vector<1x1x8x128xf32>
    %260 = vector.shape_cast %259 : vector<1x1x8x128xf32> to vector<8x128xf32>
    %261 = vector.shape_cast %258 : vector<8x128xf32> to vector<1x1x8x128xf32>
    tpu.vector_store %arg11[%c3_259, %c1_260, %c8_261, %c128_262], %261 {strides = array<i32>} : memref<5x5x16x256xf32, #tpu.memory_space<vmem>>, vector<1x1x8x128xf32>,
    %262 = vector.extract_strided_slice %57 {offsets = [408, 0], sizes = [8, 128], strides = [1, 1]} : vector<512x128xf32> to vector<8x128xf32>
    %c3_263 = arith.constant 3 : index
    %c2_264 = arith.constant 2 : index
    %c0_265 = arith.constant 0 : index
    %c128_266 = arith.constant 128 : index
    %263 = vector.load %arg11[%c3_263, %c2_264, %c0_265, %c128_266] : memref<5x5x16x256xf32, #tpu.memory_space<vmem>>, vector<1x1x8x128xf32>
    %264 = vector.shape_cast %263 : vector<1x1x8x128xf32> to vector<8x128xf32>
    %265 = vector.shape_cast %262 : vector<8x128xf32> to vector<1x1x8x128xf32>
    tpu.vector_store %arg11[%c3_263, %c2_264, %c0_265, %c128_266], %265 {strides = array<i32>} : memref<5x5x16x256xf32, #tpu.memory_space<vmem>>, vector<1x1x8x128xf32>,
    %266 = vector.extract_strided_slice %57 {offsets = [416, 0], sizes = [8, 128], strides = [1, 1]} : vector<512x128xf32> to vector<8x128xf32>
    %c3_267 = arith.constant 3 : index
    %c2_268 = arith.constant 2 : index
    %c8_269 = arith.constant 8 : index
    %c128_270 = arith.constant 128 : index
    %267 = vector.load %arg11[%c3_267, %c2_268, %c8_269, %c128_270] : memref<5x5x16x256xf32, #tpu.memory_space<vmem>>, vector<1x1x8x128xf32>
    %268 = vector.shape_cast %267 : vector<1x1x8x128xf32> to vector<8x128xf32>
    %269 = vector.shape_cast %266 : vector<8x128xf32> to vector<1x1x8x128xf32>
    tpu.vector_store %arg11[%c3_267, %c2_268, %c8_269, %c128_270], %269 {strides = array<i32>} : memref<5x5x16x256xf32, #tpu.memory_space<vmem>>, vector<1x1x8x128xf32>,
    %270 = vector.extract_strided_slice %57 {offsets = [424, 0], sizes = [8, 128], strides = [1, 1]} : vector<512x128xf32> to vector<8x128xf32>
    %c3_271 = arith.constant 3 : index
    %c3_272 = arith.constant 3 : index
    %c0_273 = arith.constant 0 : index
    %c128_274 = arith.constant 128 : index
    %271 = vector.load %arg11[%c3_271, %c3_272, %c0_273, %c128_274] : memref<5x5x16x256xf32, #tpu.memory_space<vmem>>, vector<1x1x8x128xf32>
    %272 = vector.shape_cast %271 : vector<1x1x8x128xf32> to vector<8x128xf32>
    %273 = vector.shape_cast %270 : vector<8x128xf32> to vector<1x1x8x128xf32>
    tpu.vector_store %arg11[%c3_271, %c3_272, %c0_273, %c128_274], %273 {strides = array<i32>} : memref<5x5x16x256xf32, #tpu.memory_space<vmem>>, vector<1x1x8x128xf32>,
    %274 = vector.extract_strided_slice %57 {offsets = [432, 0], sizes = [8, 128], strides = [1, 1]} : vector<512x128xf32> to vector<8x128xf32>
    %c3_275 = arith.constant 3 : index
    %c3_276 = arith.constant 3 : index
    %c8_277 = arith.constant 8 : index
    %c128_278 = arith.constant 128 : index
    %275 = vector.load %arg11[%c3_275, %c3_276, %c8_277, %c128_278] : memref<5x5x16x256xf32, #tpu.memory_space<vmem>>, vector<1x1x8x128xf32>
    %276 = vector.shape_cast %275 : vector<1x1x8x128xf32> to vector<8x128xf32>
    %277 = vector.shape_cast %274 : vector<8x128xf32> to vector<1x1x8x128xf32>
    tpu.vector_store %arg11[%c3_275, %c3_276, %c8_277, %c128_278], %277 {strides = array<i32>} : memref<5x5x16x256xf32, #tpu.memory_space<vmem>>, vector<1x1x8x128xf32>,
    %278 = vector.extract_strided_slice %57 {offsets = [440, 0], sizes = [8, 128], strides = [1, 1]} : vector<512x128xf32> to vector<8x128xf32>
    %c3_279 = arith.constant 3 : index
    %c4_280 = arith.constant 4 : index
    %c0_281 = arith.constant 0 : index
    %c128_282 = arith.constant 128 : index
    %279 = vector.load %arg11[%c3_279, %c4_280, %c0_281, %c128_282] : memref<5x5x16x256xf32, #tpu.memory_space<vmem>>, vector<1x1x8x128xf32>
    %280 = vector.shape_cast %279 : vector<1x1x8x128xf32> to vector<8x128xf32>
    %281 = vector.shape_cast %278 : vector<8x128xf32> to vector<1x1x8x128xf32>
    tpu.vector_store %arg11[%c3_279, %c4_280, %c0_281, %c128_282], %281 {strides = array<i32>} : memref<5x5x16x256xf32, #tpu.memory_space<vmem>>, vector<1x1x8x128xf32>,
    %282 = vector.extract_strided_slice %57 {offsets = [448, 0], sizes = [8, 128], strides = [1, 1]} : vector<512x128xf32> to vector<8x128xf32>
    %c4_283 = arith.constant 4 : index
    %c0_284 = arith.constant 0 : index
    %c8_285 = arith.constant 8 : index
    %c0_286 = arith.constant 0 : index
    %283 = vector.load %arg11[%c4_283, %c0_284, %c8_285, %c0_286] : memref<5x5x16x256xf32, #tpu.memory_space<vmem>>, vector<1x1x8x128xf32>
    %284 = vector.shape_cast %283 : vector<1x1x8x128xf32> to vector<8x128xf32>
    %285 = vector.shape_cast %282 : vector<8x128xf32> to vector<1x1x8x128xf32>
    tpu.vector_store %arg11[%c4_283, %c0_284, %c8_285, %c0_286], %285 {strides = array<i32>} : memref<5x5x16x256xf32, #tpu.memory_space<vmem>>, vector<1x1x8x128xf32>,
    %286 = vector.extract_strided_slice %57 {offsets = [456, 0], sizes = [8, 128], strides = [1, 1]} : vector<512x128xf32> to vector<8x128xf32>
    %c4_287 = arith.constant 4 : index
    %c1_288 = arith.constant 1 : index
    %c0_289 = arith.constant 0 : index
    %c0_290 = arith.constant 0 : index
    %287 = vector.load %arg11[%c4_287, %c1_288, %c0_289, %c0_290] : memref<5x5x16x256xf32, #tpu.memory_space<vmem>>, vector<1x1x8x128xf32>
    %288 = vector.shape_cast %287 : vector<1x1x8x128xf32> to vector<8x128xf32>
    %289 = vector.shape_cast %286 : vector<8x128xf32> to vector<1x1x8x128xf32>
    tpu.vector_store %arg11[%c4_287, %c1_288, %c0_289, %c0_290], %289 {strides = array<i32>} : memref<5x5x16x256xf32, #tpu.memory_space<vmem>>, vector<1x1x8x128xf32>,
    %290 = vector.extract_strided_slice %57 {offsets = [464, 0], sizes = [8, 128], strides = [1, 1]} : vector<512x128xf32> to vector<8x128xf32>
    %c4_291 = arith.constant 4 : index
    %c1_292 = arith.constant 1 : index
    %c8_293 = arith.constant 8 : index
    %c0_294 = arith.constant 0 : index
    %291 = vector.load %arg11[%c4_291, %c1_292, %c8_293, %c0_294] : memref<5x5x16x256xf32, #tpu.memory_space<vmem>>, vector<1x1x8x128xf32>
    %292 = vector.shape_cast %291 : vector<1x1x8x128xf32> to vector<8x128xf32>
    %293 = vector.shape_cast %290 : vector<8x128xf32> to vector<1x1x8x128xf32>
    tpu.vector_store %arg11[%c4_291, %c1_292, %c8_293, %c0_294], %293 {strides = array<i32>} : memref<5x5x16x256xf32, #tpu.memory_space<vmem>>, vector<1x1x8x128xf32>,
    %294 = vector.extract_strided_slice %57 {offsets = [472, 0], sizes = [8, 128], strides = [1, 1]} : vector<512x128xf32> to vector<8x128xf32>
    %c4_295 = arith.constant 4 : index
    %c2_296 = arith.constant 2 : index
    %c0_297 = arith.constant 0 : index
    %c0_298 = arith.constant 0 : index
    %295 = vector.load %arg11[%c4_295, %c2_296, %c0_297, %c0_298] : memref<5x5x16x256xf32, #tpu.memory_space<vmem>>, vector<1x1x8x128xf32>
    %296 = vector.shape_cast %295 : vector<1x1x8x128xf32> to vector<8x128xf32>
    %297 = vector.shape_cast %294 : vector<8x128xf32> to vector<1x1x8x128xf32>
    tpu.vector_store %arg11[%c4_295, %c2_296, %c0_297, %c0_298], %297 {strides = array<i32>} : memref<5x5x16x256xf32, #tpu.memory_space<vmem>>, vector<1x1x8x128xf32>,
    %298 = vector.extract_strided_slice %57 {offsets = [480, 0], sizes = [8, 128], strides = [1, 1]} : vector<512x128xf32> to vector<8x128xf32>
    %c4_299 = arith.constant 4 : index
    %c2_300 = arith.constant 2 : index
    %c8_301 = arith.constant 8 : index
    %c0_302 = arith.constant 0 : index
    %299 = vector.load %arg11[%c4_299, %c2_300, %c8_301, %c0_302] : memref<5x5x16x256xf32, #tpu.memory_space<vmem>>, vector<1x1x8x128xf32>
    %300 = vector.shape_cast %299 : vector<1x1x8x128xf32> to vector<8x128xf32>
    %301 = vector.shape_cast %298 : vector<8x128xf32> to vector<1x1x8x128xf32>
    tpu.vector_store %arg11[%c4_299, %c2_300, %c8_301, %c0_302], %301 {strides = array<i32>} : memref<5x5x16x256xf32, #tpu.memory_space<vmem>>, vector<1x1x8x128xf32>,
    %302 = vector.extract_strided_slice %57 {offsets = [488, 0], sizes = [8, 128], strides = [1, 1]} : vector<512x128xf32> to vector<8x128xf32>
    %c4_303 = arith.constant 4 : index
    %c3_304 = arith.constant 3 : index
    %c0_305 = arith.constant 0 : index
    %c0_306 = arith.constant 0 : index
    %303 = vector.load %arg11[%c4_303, %c3_304, %c0_305, %c0_306] : memref<5x5x16x256xf32, #tpu.memory_space<vmem>>, vector<1x1x8x128xf32>
    %304 = vector.shape_cast %303 : vector<1x1x8x128xf32> to vector<8x128xf32>
    %305 = vector.shape_cast %302 : vector<8x128xf32> to vector<1x1x8x128xf32>
    tpu.vector_store %arg11[%c4_303, %c3_304, %c0_305, %c0_306], %305 {strides = array<i32>} : memref<5x5x16x256xf32, #tpu.memory_space<vmem>>, vector<1x1x8x128xf32>,
    %306 = vector.extract_strided_slice %57 {offsets = [496, 0], sizes = [8, 128], strides = [1, 1]} : vector<512x128xf32> to vector<8x128xf32>
    %c4_307 = arith.constant 4 : index
    %c3_308 = arith.constant 3 : index
    %c8_309 = arith.constant 8 : index
    %c0_310 = arith.constant 0 : index
    %307 = vector.load %arg11[%c4_307, %c3_308, %c8_309, %c0_310] : memref<5x5x16x256xf32, #tpu.memory_space<vmem>>, vector<1x1x8x128xf32>
    %308 = vector.shape_cast %307 : vector<1x1x8x128xf32> to vector<8x128xf32>
    %309 = vector.shape_cast %306 : vector<8x128xf32> to vector<1x1x8x128xf32>
    tpu.vector_store %arg11[%c4_307, %c3_308, %c8_309, %c0_310], %309 {strides = array<i32>} : memref<5x5x16x256xf32, #tpu.memory_space<vmem>>, vector<1x1x8x128xf32>,
    %310 = vector.extract_strided_slice %57 {offsets = [504, 0], sizes = [8, 128], strides = [1, 1]} : vector<512x128xf32> to vector<8x128xf32>
    %c4_311 = arith.constant 4 : index
    %c4_312 = arith.constant 4 : index
    %c0_313 = arith.constant 0 : index
    %c0_314 = arith.constant 0 : index
    %311 = vector.load %arg11[%c4_311, %c4_312, %c0_313, %c0_314] : memref<5x5x16x256xf32, #tpu.memory_space<vmem>>, vector<1x1x8x128xf32>
    %312 = vector.shape_cast %311 : vector<1x1x8x128xf32> to vector<8x128xf32>
    %313 = vector.shape_cast %310 : vector<8x128xf32> to vector<1x1x8x128xf32>
    tpu.vector_store %arg11[%c4_311, %c4_312, %c0_313, %c0_314], %313 {strides = array<i32>} : memref<5x5x16x256xf32, #tpu.memory_space<vmem>>, vector<1x1x8x128xf32>,
    %c0_315 = arith.constant 0 : index
    %c0_316 = arith.constant 0 : index
    %314 = vector.load %arg7[%c0_315, %c0_316] : memref<1x128xf32, #tpu.memory_space<vmem>>, vector<1x128xf32>
    %cst_317 = arith.constant 0.000000e+00 : f32
    %315 = vector.broadcast %cst_317 : f32 to vector<128x128xf32>
    %c0_318 = arith.constant 0 : index
    %c0_319 = arith.constant 0 : index
    %c0_320 = arith.constant 0 : index
    %c0_321 = arith.constant 0 : index
    %316 = vector.load %arg11[%c0_318, %c0_319, %c0_320, %c0_321] : memref<5x5x16x256xf32, #tpu.memory_space<vmem>>, vector<4x4x8x256xf32>
    %317 = vector.shape_cast %316 : vector<4x4x8x256xf32> to vector<128x256xf32>
    %318 = arith.truncf %317 : vector<128x256xf32> to vector<128x256xbf16>
    %c0_322 = arith.constant 0 : index
    %c0_323 = arith.constant 0 : index
    %319 = vector.load %arg3[%c0_322, %c0_323] : memref<2048x128xbf16, #tpu.memory_space<vmem>>, vector<256x128xbf16>
    %cst_324 = arith.constant dense<0.000000e+00> : vector<128x128xf32>
    %320 = tpu.matmul %318, %319, %cst_324 {dimension_numbers = #tpu.dot_dimension_numbers<[1], [0], [0], [1], [0, 0, 1, 1], [], []>} : vector<128x256xbf16>, vector<256x128xbf16>, vector<128x128xf32> -> vector<128x128xf32>
    %321 = arith.addf %315, %320 : vector<128x128xf32>
    %c1_325 = arith.constant 1 : index
    %c0_326 = arith.constant 0 : index
    %c0_327 = arith.constant 0 : index
    %c0_328 = arith.constant 0 : index
    %322 = vector.load %arg11[%c1_325, %c0_326, %c0_327, %c0_328] : memref<5x5x16x256xf32, #tpu.memory_space<vmem>>, vector<4x4x8x256xf32>
    %323 = vector.shape_cast %322 : vector<4x4x8x256xf32> to vector<128x256xf32>
    %324 = arith.truncf %323 : vector<128x256xf32> to vector<128x256xbf16>
    %c256_329 = arith.constant 256 : index
    %c0_330 = arith.constant 0 : index
    %325 = vector.load %arg3[%c256_329, %c0_330] : memref<2048x128xbf16, #tpu.memory_space<vmem>>, vector<256x128xbf16>
    %cst_331 = arith.constant dense<0.000000e+00> : vector<128x128xf32>
    %326 = tpu.matmul %324, %325, %cst_331 {dimension_numbers = #tpu.dot_dimension_numbers<[1], [0], [0], [1], [0, 0, 1, 1], [], []>} : vector<128x256xbf16>, vector<256x128xbf16>, vector<128x128xf32> -> vector<128x128xf32>
    %327 = arith.addf %321, %326 : vector<128x128xf32>
    %c0_332 = arith.constant 0 : index
    %c0_333 = arith.constant 0 : index
    %c8_334 = arith.constant 8 : index
    %c0_335 = arith.constant 0 : index
    %328 = vector.load %arg11[%c0_332, %c0_333, %c8_334, %c0_335] : memref<5x5x16x256xf32, #tpu.memory_space<vmem>>, vector<4x4x8x256xf32>
    %329 = vector.shape_cast %328 : vector<4x4x8x256xf32> to vector<128x256xf32>
    %330 = arith.truncf %329 : vector<128x256xf32> to vector<128x256xbf16>
    %c512 = arith.constant 512 : index
    %c0_336 = arith.constant 0 : index
    %331 = vector.load %arg3[%c512, %c0_336] : memref<2048x128xbf16, #tpu.memory_space<vmem>>, vector<256x128xbf16>
    %cst_337 = arith.constant dense<0.000000e+00> : vector<128x128xf32>
    %332 = tpu.matmul %330, %331, %cst_337 {dimension_numbers = #tpu.dot_dimension_numbers<[1], [0], [0], [1], [0, 0, 1, 1], [], []>} : vector<128x256xbf16>, vector<256x128xbf16>, vector<128x128xf32> -> vector<128x128xf32>
    %333 = arith.addf %327, %332 : vector<128x128xf32>
    %c1_338 = arith.constant 1 : index
    %c0_339 = arith.constant 0 : index
    %c8_340 = arith.constant 8 : index
    %c0_341 = arith.constant 0 : index
    %334 = vector.load %arg11[%c1_338, %c0_339, %c8_340, %c0_341] : memref<5x5x16x256xf32, #tpu.memory_space<vmem>>, vector<4x4x8x256xf32>
    %335 = vector.shape_cast %334 : vector<4x4x8x256xf32> to vector<128x256xf32>
    %336 = arith.truncf %335 : vector<128x256xf32> to vector<128x256xbf16>
    %c768 = arith.constant 768 : index
    %c0_342 = arith.constant 0 : index
    %337 = vector.load %arg3[%c768, %c0_342] : memref<2048x128xbf16, #tpu.memory_space<vmem>>, vector<256x128xbf16>
    %cst_343 = arith.constant dense<0.000000e+00> : vector<128x128xf32>
    %338 = tpu.matmul %336, %337, %cst_343 {dimension_numbers = #tpu.dot_dimension_numbers<[1], [0], [0], [1], [0, 0, 1, 1], [], []>} : vector<128x256xbf16>, vector<256x128xbf16>, vector<128x128xf32> -> vector<128x128xf32>
    %339 = arith.addf %333, %338 : vector<128x128xf32>
    %c0_344 = arith.constant 0 : index
    %c1_345 = arith.constant 1 : index
    %c0_346 = arith.constant 0 : index
    %c0_347 = arith.constant 0 : index
    %340 = vector.load %arg11[%c0_344, %c1_345, %c0_346, %c0_347] : memref<5x5x16x256xf32, #tpu.memory_space<vmem>>, vector<4x4x8x256xf32>
    %341 = vector.shape_cast %340 : vector<4x4x8x256xf32> to vector<128x256xf32>
    %342 = arith.truncf %341 : vector<128x256xf32> to vector<128x256xbf16>
    %c1024 = arith.constant 1024 : index
    %c0_348 = arith.constant 0 : index
    %343 = vector.load %arg3[%c1024, %c0_348] : memref<2048x128xbf16, #tpu.memory_space<vmem>>, vector<256x128xbf16>
    %cst_349 = arith.constant dense<0.000000e+00> : vector<128x128xf32>
    %344 = tpu.matmul %342, %343, %cst_349 {dimension_numbers = #tpu.dot_dimension_numbers<[1], [0], [0], [1], [0, 0, 1, 1], [], []>} : vector<128x256xbf16>, vector<256x128xbf16>, vector<128x128xf32> -> vector<128x128xf32>
    %345 = arith.addf %339, %344 : vector<128x128xf32>
    %c1_350 = arith.constant 1 : index
    %c1_351 = arith.constant 1 : index
    %c0_352 = arith.constant 0 : index
    %c0_353 = arith.constant 0 : index
    %346 = vector.load %arg11[%c1_350, %c1_351, %c0_352, %c0_353] : memref<5x5x16x256xf32, #tpu.memory_space<vmem>>, vector<4x4x8x256xf32>
    %347 = vector.shape_cast %346 : vector<4x4x8x256xf32> to vector<128x256xf32>
    %348 = arith.truncf %347 : vector<128x256xf32> to vector<128x256xbf16>
    %c1280 = arith.constant 1280 : index
    %c0_354 = arith.constant 0 : index
    %349 = vector.load %arg3[%c1280, %c0_354] : memref<2048x128xbf16, #tpu.memory_space<vmem>>, vector<256x128xbf16>
    %cst_355 = arith.constant dense<0.000000e+00> : vector<128x128xf32>
    %350 = tpu.matmul %348, %349, %cst_355 {dimension_numbers = #tpu.dot_dimension_numbers<[1], [0], [0], [1], [0, 0, 1, 1], [], []>} : vector<128x256xbf16>, vector<256x128xbf16>, vector<128x128xf32> -> vector<128x128xf32>
    %351 = arith.addf %345, %350 : vector<128x128xf32>
    %c0_356 = arith.constant 0 : index
    %c1_357 = arith.constant 1 : index
    %c8_358 = arith.constant 8 : index
    %c0_359 = arith.constant 0 : index
    %352 = vector.load %arg11[%c0_356, %c1_357, %c8_358, %c0_359] : memref<5x5x16x256xf32, #tpu.memory_space<vmem>>, vector<4x4x8x256xf32>
    %353 = vector.shape_cast %352 : vector<4x4x8x256xf32> to vector<128x256xf32>
    %354 = arith.truncf %353 : vector<128x256xf32> to vector<128x256xbf16>
    %c1536 = arith.constant 1536 : index
    %c0_360 = arith.constant 0 : index
    %355 = vector.load %arg3[%c1536, %c0_360] : memref<2048x128xbf16, #tpu.memory_space<vmem>>, vector<256x128xbf16>
    %cst_361 = arith.constant dense<0.000000e+00> : vector<128x128xf32>
    %356 = tpu.matmul %354, %355, %cst_361 {dimension_numbers = #tpu.dot_dimension_numbers<[1], [0], [0], [1], [0, 0, 1, 1], [], []>} : vector<128x256xbf16>, vector<256x128xbf16>, vector<128x128xf32> -> vector<128x128xf32>
    %357 = arith.addf %351, %356 : vector<128x128xf32>
    %c1_362 = arith.constant 1 : index
    %c1_363 = arith.constant 1 : index
    %c8_364 = arith.constant 8 : index
    %c0_365 = arith.constant 0 : index
    %358 = vector.load %arg11[%c1_362, %c1_363, %c8_364, %c0_365] : memref<5x5x16x256xf32, #tpu.memory_space<vmem>>, vector<4x4x8x256xf32>
    %359 = vector.shape_cast %358 : vector<4x4x8x256xf32> to vector<128x256xf32>
    %360 = arith.truncf %359 : vector<128x256xf32> to vector<128x256xbf16>
    %c1792 = arith.constant 1792 : index
    %c0_366 = arith.constant 0 : index
    %361 = vector.load %arg3[%c1792, %c0_366] : memref<2048x128xbf16, #tpu.memory_space<vmem>>, vector<256x128xbf16>
    %cst_367 = arith.constant dense<0.000000e+00> : vector<128x128xf32>
    %362 = tpu.matmul %360, %361, %cst_367 {dimension_numbers = #tpu.dot_dimension_numbers<[1], [0], [0], [1], [0, 0, 1, 1], [], []>} : vector<128x256xbf16>, vector<256x128xbf16>, vector<128x128xf32> -> vector<128x128xf32>
    %363 = arith.addf %357, %362 : vector<128x128xf32>
    %364 = vector.broadcast %314 : vector<1x128xf32> to vector<128x128xf32>
    %365 = arith.addf %363, %364 : vector<128x128xf32>
    %cst_368 = arith.constant 0.000000e+00 : f32
    %366 = vector.broadcast %cst_368 : f32 to vector<128x128xf32>
    %367 = arith.cmpf oge, %365, %366 : vector<128x128xf32>
    %cst_369 = arith.constant 2.000000e-01 : f32
    %368 = vector.broadcast %cst_369 : f32 to vector<128x128xf32>
    %369 = arith.mulf %368, %365 : vector<128x128xf32>
    %370 = arith.select %367, %365, %369 : vector<128x128xi1>, vector<128x128xf32>
    %371 = vector.extract_strided_slice %370 {offsets = [0, 0], sizes = [8, 128], strides = [1, 1]} : vector<128x128xf32> to vector<8x128xf32>
    %c0_370 = arith.constant 0 : index
    %c0_371 = arith.constant 0 : index
    %c8_372 = arith.constant 8 : index
    %c128_373 = arith.constant 128 : index
    %372 = vector.load %arg12[%c0_370, %c0_371, %c8_372, %c128_373] : memref<3x3x16x256xf32, #tpu.memory_space<vmem>>, vector<1x1x8x128xf32>
    %373 = vector.shape_cast %372 : vector<1x1x8x128xf32> to vector<8x128xf32>
    %374 = vector.shape_cast %371 : vector<8x128xf32> to vector<1x1x8x128xf32>
    tpu.vector_store %arg12[%c0_370, %c0_371, %c8_372, %c128_373], %374 {strides = array<i32>} : memref<3x3x16x256xf32, #tpu.memory_space<vmem>>, vector<1x1x8x128xf32>,
    %375 = vector.extract_strided_slice %370 {offsets = [8, 0], sizes = [8, 128], strides = [1, 1]} : vector<128x128xf32> to vector<8x128xf32>
    %c0_374 = arith.constant 0 : index
    %c1_375 = arith.constant 1 : index
    %c0_376 = arith.constant 0 : index
    %c128_377 = arith.constant 128 : index
    %376 = vector.load %arg12[%c0_374, %c1_375, %c0_376, %c128_377] : memref<3x3x16x256xf32, #tpu.memory_space<vmem>>, vector<1x1x8x128xf32>
    %377 = vector.shape_cast %376 : vector<1x1x8x128xf32> to vector<8x128xf32>
    %378 = vector.shape_cast %375 : vector<8x128xf32> to vector<1x1x8x128xf32>
    tpu.vector_store %arg12[%c0_374, %c1_375, %c0_376, %c128_377], %378 {strides = array<i32>} : memref<3x3x16x256xf32, #tpu.memory_space<vmem>>, vector<1x1x8x128xf32>,
    %379 = vector.extract_strided_slice %370 {offsets = [16, 0], sizes = [8, 128], strides = [1, 1]} : vector<128x128xf32> to vector<8x128xf32>
    %c0_378 = arith.constant 0 : index
    %c1_379 = arith.constant 1 : index
    %c8_380 = arith.constant 8 : index
    %c128_381 = arith.constant 128 : index
    %380 = vector.load %arg12[%c0_378, %c1_379, %c8_380, %c128_381] : memref<3x3x16x256xf32, #tpu.memory_space<vmem>>, vector<1x1x8x128xf32>
    %381 = vector.shape_cast %380 : vector<1x1x8x128xf32> to vector<8x128xf32>
    %382 = vector.shape_cast %379 : vector<8x128xf32> to vector<1x1x8x128xf32>
    tpu.vector_store %arg12[%c0_378, %c1_379, %c8_380, %c128_381], %382 {strides = array<i32>} : memref<3x3x16x256xf32, #tpu.memory_space<vmem>>, vector<1x1x8x128xf32>,
    %383 = vector.extract_strided_slice %370 {offsets = [24, 0], sizes = [8, 128], strides = [1, 1]} : vector<128x128xf32> to vector<8x128xf32>
    %c0_382 = arith.constant 0 : index
    %c2_383 = arith.constant 2 : index
    %c0_384 = arith.constant 0 : index
    %c128_385 = arith.constant 128 : index
    %384 = vector.load %arg12[%c0_382, %c2_383, %c0_384, %c128_385] : memref<3x3x16x256xf32, #tpu.memory_space<vmem>>, vector<1x1x8x128xf32>
    %385 = vector.shape_cast %384 : vector<1x1x8x128xf32> to vector<8x128xf32>
    %386 = vector.shape_cast %383 : vector<8x128xf32> to vector<1x1x8x128xf32>
    tpu.vector_store %arg12[%c0_382, %c2_383, %c0_384, %c128_385], %386 {strides = array<i32>} : memref<3x3x16x256xf32, #tpu.memory_space<vmem>>, vector<1x1x8x128xf32>,
    %387 = vector.extract_strided_slice %370 {offsets = [32, 0], sizes = [8, 128], strides = [1, 1]} : vector<128x128xf32> to vector<8x128xf32>
    %c1_386 = arith.constant 1 : index
    %c0_387 = arith.constant 0 : index
    %c8_388 = arith.constant 8 : index
    %c0_389 = arith.constant 0 : index
    %388 = vector.load %arg12[%c1_386, %c0_387, %c8_388, %c0_389] : memref<3x3x16x256xf32, #tpu.memory_space<vmem>>, vector<1x1x8x128xf32>
    %389 = vector.shape_cast %388 : vector<1x1x8x128xf32> to vector<8x128xf32>
    %390 = vector.shape_cast %387 : vector<8x128xf32> to vector<1x1x8x128xf32>
    tpu.vector_store %arg12[%c1_386, %c0_387, %c8_388, %c0_389], %390 {strides = array<i32>} : memref<3x3x16x256xf32, #tpu.memory_space<vmem>>, vector<1x1x8x128xf32>,
    %391 = vector.extract_strided_slice %370 {offsets = [40, 0], sizes = [8, 128], strides = [1, 1]} : vector<128x128xf32> to vector<8x128xf32>
    %c1_390 = arith.constant 1 : index
    %c1_391 = arith.constant 1 : index
    %c0_392 = arith.constant 0 : index
    %c0_393 = arith.constant 0 : index
    %392 = vector.load %arg12[%c1_390, %c1_391, %c0_392, %c0_393] : memref<3x3x16x256xf32, #tpu.memory_space<vmem>>, vector<1x1x8x128xf32>
    %393 = vector.shape_cast %392 : vector<1x1x8x128xf32> to vector<8x128xf32>
    %394 = vector.shape_cast %391 : vector<8x128xf32> to vector<1x1x8x128xf32>
    tpu.vector_store %arg12[%c1_390, %c1_391, %c0_392, %c0_393], %394 {strides = array<i32>} : memref<3x3x16x256xf32, #tpu.memory_space<vmem>>, vector<1x1x8x128xf32>,
    %395 = vector.extract_strided_slice %370 {offsets = [48, 0], sizes = [8, 128], strides = [1, 1]} : vector<128x128xf32> to vector<8x128xf32>
    %c1_394 = arith.constant 1 : index
    %c1_395 = arith.constant 1 : index
    %c8_396 = arith.constant 8 : index
    %c0_397 = arith.constant 0 : index
    %396 = vector.load %arg12[%c1_394, %c1_395, %c8_396, %c0_397] : memref<3x3x16x256xf32, #tpu.memory_space<vmem>>, vector<1x1x8x128xf32>
    %397 = vector.shape_cast %396 : vector<1x1x8x128xf32> to vector<8x128xf32>
    %398 = vector.shape_cast %395 : vector<8x128xf32> to vector<1x1x8x128xf32>
    tpu.vector_store %arg12[%c1_394, %c1_395, %c8_396, %c0_397], %398 {strides = array<i32>} : memref<3x3x16x256xf32, #tpu.memory_space<vmem>>, vector<1x1x8x128xf32>,
    %399 = vector.extract_strided_slice %370 {offsets = [56, 0], sizes = [8, 128], strides = [1, 1]} : vector<128x128xf32> to vector<8x128xf32>
    %c1_398 = arith.constant 1 : index
    %c2_399 = arith.constant 2 : index
    %c0_400 = arith.constant 0 : index
    %c0_401 = arith.constant 0 : index
    %400 = vector.load %arg12[%c1_398, %c2_399, %c0_400, %c0_401] : memref<3x3x16x256xf32, #tpu.memory_space<vmem>>, vector<1x1x8x128xf32>
    %401 = vector.shape_cast %400 : vector<1x1x8x128xf32> to vector<8x128xf32>
    %402 = vector.shape_cast %399 : vector<8x128xf32> to vector<1x1x8x128xf32>
    tpu.vector_store %arg12[%c1_398, %c2_399, %c0_400, %c0_401], %402 {strides = array<i32>} : memref<3x3x16x256xf32, #tpu.memory_space<vmem>>, vector<1x1x8x128xf32>,
    %403 = vector.extract_strided_slice %370 {offsets = [64, 0], sizes = [8, 128], strides = [1, 1]} : vector<128x128xf32> to vector<8x128xf32>
    %c1_402 = arith.constant 1 : index
    %c0_403 = arith.constant 0 : index
    %c8_404 = arith.constant 8 : index
    %c128_405 = arith.constant 128 : index
    %404 = vector.load %arg12[%c1_402, %c0_403, %c8_404, %c128_405] : memref<3x3x16x256xf32, #tpu.memory_space<vmem>>, vector<1x1x8x128xf32>
    %405 = vector.shape_cast %404 : vector<1x1x8x128xf32> to vector<8x128xf32>
    %406 = vector.shape_cast %403 : vector<8x128xf32> to vector<1x1x8x128xf32>
    tpu.vector_store %arg12[%c1_402, %c0_403, %c8_404, %c128_405], %406 {strides = array<i32>} : memref<3x3x16x256xf32, #tpu.memory_space<vmem>>, vector<1x1x8x128xf32>,
    %407 = vector.extract_strided_slice %370 {offsets = [72, 0], sizes = [8, 128], strides = [1, 1]} : vector<128x128xf32> to vector<8x128xf32>
    %c1_406 = arith.constant 1 : index
    %c1_407 = arith.constant 1 : index
    %c0_408 = arith.constant 0 : index
    %c128_409 = arith.constant 128 : index
    %408 = vector.load %arg12[%c1_406, %c1_407, %c0_408, %c128_409] : memref<3x3x16x256xf32, #tpu.memory_space<vmem>>, vector<1x1x8x128xf32>
    %409 = vector.shape_cast %408 : vector<1x1x8x128xf32> to vector<8x128xf32>
    %410 = vector.shape_cast %407 : vector<8x128xf32> to vector<1x1x8x128xf32>
    tpu.vector_store %arg12[%c1_406, %c1_407, %c0_408, %c128_409], %410 {strides = array<i32>} : memref<3x3x16x256xf32, #tpu.memory_space<vmem>>, vector<1x1x8x128xf32>,
    %411 = vector.extract_strided_slice %370 {offsets = [80, 0], sizes = [8, 128], strides = [1, 1]} : vector<128x128xf32> to vector<8x128xf32>
    %c1_410 = arith.constant 1 : index
    %c1_411 = arith.constant 1 : index
    %c8_412 = arith.constant 8 : index
    %c128_413 = arith.constant 128 : index
    %412 = vector.load %arg12[%c1_410, %c1_411, %c8_412, %c128_413] : memref<3x3x16x256xf32, #tpu.memory_space<vmem>>, vector<1x1x8x128xf32>
    %413 = vector.shape_cast %412 : vector<1x1x8x128xf32> to vector<8x128xf32>
    %414 = vector.shape_cast %411 : vector<8x128xf32> to vector<1x1x8x128xf32>
    tpu.vector_store %arg12[%c1_410, %c1_411, %c8_412, %c128_413], %414 {strides = array<i32>} : memref<3x3x16x256xf32, #tpu.memory_space<vmem>>, vector<1x1x8x128xf32>,
    %415 = vector.extract_strided_slice %370 {offsets = [88, 0], sizes = [8, 128], strides = [1, 1]} : vector<128x128xf32> to vector<8x128xf32>
    %c1_414 = arith.constant 1 : index
    %c2_415 = arith.constant 2 : index
    %c0_416 = arith.constant 0 : index
    %c128_417 = arith.constant 128 : index
    %416 = vector.load %arg12[%c1_414, %c2_415, %c0_416, %c128_417] : memref<3x3x16x256xf32, #tpu.memory_space<vmem>>, vector<1x1x8x128xf32>
    %417 = vector.shape_cast %416 : vector<1x1x8x128xf32> to vector<8x128xf32>
    %418 = vector.shape_cast %415 : vector<8x128xf32> to vector<1x1x8x128xf32>
    tpu.vector_store %arg12[%c1_414, %c2_415, %c0_416, %c128_417], %418 {strides = array<i32>} : memref<3x3x16x256xf32, #tpu.memory_space<vmem>>, vector<1x1x8x128xf32>,
    %419 = vector.extract_strided_slice %370 {offsets = [96, 0], sizes = [8, 128], strides = [1, 1]} : vector<128x128xf32> to vector<8x128xf32>
    %c2_418 = arith.constant 2 : index
    %c0_419 = arith.constant 0 : index
    %c8_420 = arith.constant 8 : index
    %c0_421 = arith.constant 0 : index
    %420 = vector.load %arg12[%c2_418, %c0_419, %c8_420, %c0_421] : memref<3x3x16x256xf32, #tpu.memory_space<vmem>>, vector<1x1x8x128xf32>
    %421 = vector.shape_cast %420 : vector<1x1x8x128xf32> to vector<8x128xf32>
    %422 = vector.shape_cast %419 : vector<8x128xf32> to vector<1x1x8x128xf32>
    tpu.vector_store %arg12[%c2_418, %c0_419, %c8_420, %c0_421], %422 {strides = array<i32>} : memref<3x3x16x256xf32, #tpu.memory_space<vmem>>, vector<1x1x8x128xf32>,
    %423 = vector.extract_strided_slice %370 {offsets = [104, 0], sizes = [8, 128], strides = [1, 1]} : vector<128x128xf32> to vector<8x128xf32>
    %c2_422 = arith.constant 2 : index
    %c1_423 = arith.constant 1 : index
    %c0_424 = arith.constant 0 : index
    %c0_425 = arith.constant 0 : index
    %424 = vector.load %arg12[%c2_422, %c1_423, %c0_424, %c0_425] : memref<3x3x16x256xf32, #tpu.memory_space<vmem>>, vector<1x1x8x128xf32>
    %425 = vector.shape_cast %424 : vector<1x1x8x128xf32> to vector<8x128xf32>
    %426 = vector.shape_cast %423 : vector<8x128xf32> to vector<1x1x8x128xf32>
    tpu.vector_store %arg12[%c2_422, %c1_423, %c0_424, %c0_425], %426 {strides = array<i32>} : memref<3x3x16x256xf32, #tpu.memory_space<vmem>>, vector<1x1x8x128xf32>,
    %427 = vector.extract_strided_slice %370 {offsets = [112, 0], sizes = [8, 128], strides = [1, 1]} : vector<128x128xf32> to vector<8x128xf32>
    %c2_426 = arith.constant 2 : index
    %c1_427 = arith.constant 1 : index
    %c8_428 = arith.constant 8 : index
    %c0_429 = arith.constant 0 : index
    %428 = vector.load %arg12[%c2_426, %c1_427, %c8_428, %c0_429] : memref<3x3x16x256xf32, #tpu.memory_space<vmem>>, vector<1x1x8x128xf32>
    %429 = vector.shape_cast %428 : vector<1x1x8x128xf32> to vector<8x128xf32>
    %430 = vector.shape_cast %427 : vector<8x128xf32> to vector<1x1x8x128xf32>
    tpu.vector_store %arg12[%c2_426, %c1_427, %c8_428, %c0_429], %430 {strides = array<i32>} : memref<3x3x16x256xf32, #tpu.memory_space<vmem>>, vector<1x1x8x128xf32>,
    %431 = vector.extract_strided_slice %370 {offsets = [120, 0], sizes = [8, 128], strides = [1, 1]} : vector<128x128xf32> to vector<8x128xf32>
    %c2_430 = arith.constant 2 : index
    %c2_431 = arith.constant 2 : index
    %c0_432 = arith.constant 0 : index
    %c0_433 = arith.constant 0 : index
    %432 = vector.load %arg12[%c2_430, %c2_431, %c0_432, %c0_433] : memref<3x3x16x256xf32, #tpu.memory_space<vmem>>, vector<1x1x8x128xf32>
    %433 = vector.shape_cast %432 : vector<1x1x8x128xf32> to vector<8x128xf32>
    %434 = vector.shape_cast %431 : vector<8x128xf32> to vector<1x1x8x128xf32>
    tpu.vector_store %arg12[%c2_430, %c2_431, %c0_432, %c0_433], %434 {strides = array<i32>} : memref<3x3x16x256xf32, #tpu.memory_space<vmem>>, vector<1x1x8x128xf32>,
    %c0_434 = arith.constant 0 : index
    %c0_435 = arith.constant 0 : index
    %435 = vector.load %arg8[%c0_434, %c0_435] : memref<1x256xf32, #tpu.memory_space<vmem>>, vector<1x256xf32>
    %cst_436 = arith.constant 0.000000e+00 : f32
    %436 = vector.broadcast %cst_436 : f32 to vector<32x256xf32>
    %c0_437 = arith.constant 0 : index
    %c0_438 = arith.constant 0 : index
    %c0_439 = arith.constant 0 : index
    %c0_440 = arith.constant 0 : index
    %437 = vector.load %arg12[%c0_437, %c0_438, %c0_439, %c0_440] : memref<3x3x16x256xf32, #tpu.memory_space<vmem>>, vector<2x2x8x256xf32>
    %438 = vector.shape_cast %437 : vector<2x2x8x256xf32> to vector<32x256xf32>
    %439 = arith.truncf %438 : vector<32x256xf32> to vector<32x256xbf16>
    %c0_441 = arith.constant 0 : index
    %c0_442 = arith.constant 0 : index
    %440 = vector.load %arg4[%c0_441, %c0_442] : memref<2048x256xbf16, #tpu.memory_space<vmem>>, vector<256x256xbf16>
    %cst_443 = arith.constant dense<0.000000e+00> : vector<32x256xf32>
    %441 = tpu.matmul %439, %440, %cst_443 {dimension_numbers = #tpu.dot_dimension_numbers<[1], [0], [0], [1], [0, 0, 1, 1], [], []>} : vector<32x256xbf16>, vector<256x256xbf16>, vector<32x256xf32> -> vector<32x256xf32>
    %442 = arith.addf %436, %441 : vector<32x256xf32>
    %c1_444 = arith.constant 1 : index
    %c0_445 = arith.constant 0 : index
    %c0_446 = arith.constant 0 : index
    %c0_447 = arith.constant 0 : index
    %443 = vector.load %arg12[%c1_444, %c0_445, %c0_446, %c0_447] : memref<3x3x16x256xf32, #tpu.memory_space<vmem>>, vector<2x2x8x256xf32>
    %444 = vector.shape_cast %443 : vector<2x2x8x256xf32> to vector<32x256xf32>
    %445 = arith.truncf %444 : vector<32x256xf32> to vector<32x256xbf16>
    %c256_448 = arith.constant 256 : index
    %c0_449 = arith.constant 0 : index
    %446 = vector.load %arg4[%c256_448, %c0_449] : memref<2048x256xbf16, #tpu.memory_space<vmem>>, vector<256x256xbf16>
    %cst_450 = arith.constant dense<0.000000e+00> : vector<32x256xf32>
    %447 = tpu.matmul %445, %446, %cst_450 {dimension_numbers = #tpu.dot_dimension_numbers<[1], [0], [0], [1], [0, 0, 1, 1], [], []>} : vector<32x256xbf16>, vector<256x256xbf16>, vector<32x256xf32> -> vector<32x256xf32>
    %448 = arith.addf %442, %447 : vector<32x256xf32>
    %c0_451 = arith.constant 0 : index
    %c0_452 = arith.constant 0 : index
    %c8_453 = arith.constant 8 : index
    %c0_454 = arith.constant 0 : index
    %449 = vector.load %arg12[%c0_451, %c0_452, %c8_453, %c0_454] : memref<3x3x16x256xf32, #tpu.memory_space<vmem>>, vector<2x2x8x256xf32>
    %450 = vector.shape_cast %449 : vector<2x2x8x256xf32> to vector<32x256xf32>
    %451 = arith.truncf %450 : vector<32x256xf32> to vector<32x256xbf16>
    %c512_455 = arith.constant 512 : index
    %c0_456 = arith.constant 0 : index
    %452 = vector.load %arg4[%c512_455, %c0_456] : memref<2048x256xbf16, #tpu.memory_space<vmem>>, vector<256x256xbf16>
    %cst_457 = arith.constant dense<0.000000e+00> : vector<32x256xf32>
    %453 = tpu.matmul %451, %452, %cst_457 {dimension_numbers = #tpu.dot_dimension_numbers<[1], [0], [0], [1], [0, 0, 1, 1], [], []>} : vector<32x256xbf16>, vector<256x256xbf16>, vector<32x256xf32> -> vector<32x256xf32>
    %454 = arith.addf %448, %453 : vector<32x256xf32>
    %c1_458 = arith.constant 1 : index
    %c0_459 = arith.constant 0 : index
    %c8_460 = arith.constant 8 : index
    %c0_461 = arith.constant 0 : index
    %455 = vector.load %arg12[%c1_458, %c0_459, %c8_460, %c0_461] : memref<3x3x16x256xf32, #tpu.memory_space<vmem>>, vector<2x2x8x256xf32>
    %456 = vector.shape_cast %455 : vector<2x2x8x256xf32> to vector<32x256xf32>
    %457 = arith.truncf %456 : vector<32x256xf32> to vector<32x256xbf16>
    %c768_462 = arith.constant 768 : index
    %c0_463 = arith.constant 0 : index
    %458 = vector.load %arg4[%c768_462, %c0_463] : memref<2048x256xbf16, #tpu.memory_space<vmem>>, vector<256x256xbf16>
    %cst_464 = arith.constant dense<0.000000e+00> : vector<32x256xf32>
    %459 = tpu.matmul %457, %458, %cst_464 {dimension_numbers = #tpu.dot_dimension_numbers<[1], [0], [0], [1], [0, 0, 1, 1], [], []>} : vector<32x256xbf16>, vector<256x256xbf16>, vector<32x256xf32> -> vector<32x256xf32>
    %460 = arith.addf %454, %459 : vector<32x256xf32>
    %c0_465 = arith.constant 0 : index
    %c1_466 = arith.constant 1 : index
    %c0_467 = arith.constant 0 : index
    %c0_468 = arith.constant 0 : index
    %461 = vector.load %arg12[%c0_465, %c1_466, %c0_467, %c0_468] : memref<3x3x16x256xf32, #tpu.memory_space<vmem>>, vector<2x2x8x256xf32>
    %462 = vector.shape_cast %461 : vector<2x2x8x256xf32> to vector<32x256xf32>
    %463 = arith.truncf %462 : vector<32x256xf32> to vector<32x256xbf16>
    %c1024_469 = arith.constant 1024 : index
    %c0_470 = arith.constant 0 : index
    %464 = vector.load %arg4[%c1024_469, %c0_470] : memref<2048x256xbf16, #tpu.memory_space<vmem>>, vector<256x256xbf16>
    %cst_471 = arith.constant dense<0.000000e+00> : vector<32x256xf32>
    %465 = tpu.matmul %463, %464, %cst_471 {dimension_numbers = #tpu.dot_dimension_numbers<[1], [0], [0], [1], [0, 0, 1, 1], [], []>} : vector<32x256xbf16>, vector<256x256xbf16>, vector<32x256xf32> -> vector<32x256xf32>
    %466 = arith.addf %460, %465 : vector<32x256xf32>
    %c1_472 = arith.constant 1 : index
    %c1_473 = arith.constant 1 : index
    %c0_474 = arith.constant 0 : index
    %c0_475 = arith.constant 0 : index
    %467 = vector.load %arg12[%c1_472, %c1_473, %c0_474, %c0_475] : memref<3x3x16x256xf32, #tpu.memory_space<vmem>>, vector<2x2x8x256xf32>
    %468 = vector.shape_cast %467 : vector<2x2x8x256xf32> to vector<32x256xf32>
    %469 = arith.truncf %468 : vector<32x256xf32> to vector<32x256xbf16>
    %c1280_476 = arith.constant 1280 : index
    %c0_477 = arith.constant 0 : index
    %470 = vector.load %arg4[%c1280_476, %c0_477] : memref<2048x256xbf16, #tpu.memory_space<vmem>>, vector<256x256xbf16>
    %cst_478 = arith.constant dense<0.000000e+00> : vector<32x256xf32>
    %471 = tpu.matmul %469, %470, %cst_478 {dimension_numbers = #tpu.dot_dimension_numbers<[1], [0], [0], [1], [0, 0, 1, 1], [], []>} : vector<32x256xbf16>, vector<256x256xbf16>, vector<32x256xf32> -> vector<32x256xf32>
    %472 = arith.addf %466, %471 : vector<32x256xf32>
    %c0_479 = arith.constant 0 : index
    %c1_480 = arith.constant 1 : index
    %c8_481 = arith.constant 8 : index
    %c0_482 = arith.constant 0 : index
    %473 = vector.load %arg12[%c0_479, %c1_480, %c8_481, %c0_482] : memref<3x3x16x256xf32, #tpu.memory_space<vmem>>, vector<2x2x8x256xf32>
    %474 = vector.shape_cast %473 : vector<2x2x8x256xf32> to vector<32x256xf32>
    %475 = arith.truncf %474 : vector<32x256xf32> to vector<32x256xbf16>
    %c1536_483 = arith.constant 1536 : index
    %c0_484 = arith.constant 0 : index
    %476 = vector.load %arg4[%c1536_483, %c0_484] : memref<2048x256xbf16, #tpu.memory_space<vmem>>, vector<256x256xbf16>
    %cst_485 = arith.constant dense<0.000000e+00> : vector<32x256xf32>
    %477 = tpu.matmul %475, %476, %cst_485 {dimension_numbers = #tpu.dot_dimension_numbers<[1], [0], [0], [1], [0, 0, 1, 1], [], []>} : vector<32x256xbf16>, vector<256x256xbf16>, vector<32x256xf32> -> vector<32x256xf32>
    %478 = arith.addf %472, %477 : vector<32x256xf32>
    %c1_486 = arith.constant 1 : index
    %c1_487 = arith.constant 1 : index
    %c8_488 = arith.constant 8 : index
    %c0_489 = arith.constant 0 : index
    %479 = vector.load %arg12[%c1_486, %c1_487, %c8_488, %c0_489] : memref<3x3x16x256xf32, #tpu.memory_space<vmem>>, vector<2x2x8x256xf32>
    %480 = vector.shape_cast %479 : vector<2x2x8x256xf32> to vector<32x256xf32>
    %481 = arith.truncf %480 : vector<32x256xf32> to vector<32x256xbf16>
    %c1792_490 = arith.constant 1792 : index
    %c0_491 = arith.constant 0 : index
    %482 = vector.load %arg4[%c1792_490, %c0_491] : memref<2048x256xbf16, #tpu.memory_space<vmem>>, vector<256x256xbf16>
    %cst_492 = arith.constant dense<0.000000e+00> : vector<32x256xf32>
    %483 = tpu.matmul %481, %482, %cst_492 {dimension_numbers = #tpu.dot_dimension_numbers<[1], [0], [0], [1], [0, 0, 1, 1], [], []>} : vector<32x256xbf16>, vector<256x256xbf16>, vector<32x256xf32> -> vector<32x256xf32>
    %484 = arith.addf %478, %483 : vector<32x256xf32>
    %485 = vector.broadcast %435 : vector<1x256xf32> to vector<32x256xf32>
    %486 = arith.addf %484, %485 : vector<32x256xf32>
    %cst_493 = arith.constant 0.000000e+00 : f32
    %487 = vector.broadcast %cst_493 : f32 to vector<32x256xf32>
    %488 = arith.cmpf oge, %486, %487 : vector<32x256xf32>
    %cst_494 = arith.constant 2.000000e-01 : f32
    %489 = vector.broadcast %cst_494 : f32 to vector<32x256xf32>
    %490 = arith.mulf %489, %486 : vector<32x256xf32>
    %491 = arith.select %488, %486, %490 : vector<32x256xi1>, vector<32x256xf32>
    %492 = vector.extract_strided_slice %491 {offsets = [0, 0], sizes = [8, 256], strides = [1, 1]} : vector<32x256xf32> to vector<8x256xf32>
    %c0_495 = arith.constant 0 : index
    %c0_496 = arith.constant 0 : index
    %c8_497 = arith.constant 8 : index
    %c256_498 = arith.constant 256 : index
    %493 = vector.load %arg13[%c0_495, %c0_496, %c8_497, %c256_498] : memref<2x2x16x512xf32, #tpu.memory_space<vmem>>, vector<1x1x8x256xf32>
    %494 = vector.shape_cast %493 : vector<1x1x8x256xf32> to vector<8x256xf32>
    %495 = vector.shape_cast %492 : vector<8x256xf32> to vector<1x1x8x256xf32>
    tpu.vector_store %arg13[%c0_495, %c0_496, %c8_497, %c256_498], %495 {strides = array<i32>} : memref<2x2x16x512xf32, #tpu.memory_space<vmem>>, vector<1x1x8x256xf32>,
    %496 = vector.extract_strided_slice %491 {offsets = [8, 0], sizes = [8, 256], strides = [1, 1]} : vector<32x256xf32> to vector<8x256xf32>
    %c0_499 = arith.constant 0 : index
    %c1_500 = arith.constant 1 : index
    %c0_501 = arith.constant 0 : index
    %c256_502 = arith.constant 256 : index
    %497 = vector.load %arg13[%c0_499, %c1_500, %c0_501, %c256_502] : memref<2x2x16x512xf32, #tpu.memory_space<vmem>>, vector<1x1x8x256xf32>
    %498 = vector.shape_cast %497 : vector<1x1x8x256xf32> to vector<8x256xf32>
    %499 = vector.shape_cast %496 : vector<8x256xf32> to vector<1x1x8x256xf32>
    tpu.vector_store %arg13[%c0_499, %c1_500, %c0_501, %c256_502], %499 {strides = array<i32>} : memref<2x2x16x512xf32, #tpu.memory_space<vmem>>, vector<1x1x8x256xf32>,
    %500 = vector.extract_strided_slice %491 {offsets = [16, 0], sizes = [8, 256], strides = [1, 1]} : vector<32x256xf32> to vector<8x256xf32>
    %c1_503 = arith.constant 1 : index
    %c0_504 = arith.constant 0 : index
    %c8_505 = arith.constant 8 : index
    %c0_506 = arith.constant 0 : index
    %501 = vector.load %arg13[%c1_503, %c0_504, %c8_505, %c0_506] : memref<2x2x16x512xf32, #tpu.memory_space<vmem>>, vector<1x1x8x256xf32>
    %502 = vector.shape_cast %501 : vector<1x1x8x256xf32> to vector<8x256xf32>
    %503 = vector.shape_cast %500 : vector<8x256xf32> to vector<1x1x8x256xf32>
    tpu.vector_store %arg13[%c1_503, %c0_504, %c8_505, %c0_506], %503 {strides = array<i32>} : memref<2x2x16x512xf32, #tpu.memory_space<vmem>>, vector<1x1x8x256xf32>,
    %504 = vector.extract_strided_slice %491 {offsets = [24, 0], sizes = [8, 256], strides = [1, 1]} : vector<32x256xf32> to vector<8x256xf32>
    %c1_507 = arith.constant 1 : index
    %c1_508 = arith.constant 1 : index
    %c0_509 = arith.constant 0 : index
    %c0_510 = arith.constant 0 : index
    %505 = vector.load %arg13[%c1_507, %c1_508, %c0_509, %c0_510] : memref<2x2x16x512xf32, #tpu.memory_space<vmem>>, vector<1x1x8x256xf32>
    %506 = vector.shape_cast %505 : vector<1x1x8x256xf32> to vector<8x256xf32>
    %507 = vector.shape_cast %504 : vector<8x256xf32> to vector<1x1x8x256xf32>
    tpu.vector_store %arg13[%c1_507, %c1_508, %c0_509, %c0_510], %507 {strides = array<i32>} : memref<2x2x16x512xf32, #tpu.memory_space<vmem>>, vector<1x1x8x256xf32>,
    %cst_511 = arith.constant 0.000000e+00 : f32
    %508 = vector.broadcast %cst_511 : f32 to vector<8x512xf32>
    %c0_512 = arith.constant 0 : index
    %c0_513 = arith.constant 0 : index
    %c8_514 = arith.constant 8 : index
    %c0_515 = arith.constant 0 : index
    %509 = vector.load %arg13[%c0_512, %c0_513, %c8_514, %c0_515] : memref<2x2x16x512xf32, #tpu.memory_space<vmem>>, vector<1x1x8x512xf32>
    %510 = vector.shape_cast %509 : vector<1x1x8x512xf32> to vector<8x512xf32>
    %511 = arith.truncf %510 : vector<8x512xf32> to vector<8x512xbf16>
    %c1024_516 = arith.constant 1024 : index
    %c0_517 = arith.constant 0 : index
    %512 = vector.load %arg5[%c1024_516, %c0_517] : memref<4096x512xbf16, #tpu.memory_space<vmem>>, vector<512x512xbf16>
    %cst_518 = arith.constant dense<0.000000e+00> : vector<8x512xf32>
    %513 = tpu.matmul %511, %512, %cst_518 {dimension_numbers = #tpu.dot_dimension_numbers<[1], [0], [0], [1], [0, 0, 1, 1], [], []>} : vector<8x512xbf16>, vector<512x512xbf16>, vector<8x512xf32> -> vector<8x512xf32>
    %514 = arith.addf %508, %513 : vector<8x512xf32>
    %c1_519 = arith.constant 1 : index
    %c0_520 = arith.constant 0 : index
    %c8_521 = arith.constant 8 : index
    %c0_522 = arith.constant 0 : index
    %515 = vector.load %arg13[%c1_519, %c0_520, %c8_521, %c0_522] : memref<2x2x16x512xf32, #tpu.memory_space<vmem>>, vector<1x1x8x512xf32>
    %516 = vector.shape_cast %515 : vector<1x1x8x512xf32> to vector<8x512xf32>
    %517 = arith.truncf %516 : vector<8x512xf32> to vector<8x512xbf16>
    %c1536_523 = arith.constant 1536 : index
    %c0_524 = arith.constant 0 : index
    %518 = vector.load %arg5[%c1536_523, %c0_524] : memref<4096x512xbf16, #tpu.memory_space<vmem>>, vector<512x512xbf16>
    %cst_525 = arith.constant dense<0.000000e+00> : vector<8x512xf32>
    %519 = tpu.matmul %517, %518, %cst_525 {dimension_numbers = #tpu.dot_dimension_numbers<[1], [0], [0], [1], [0, 0, 1, 1], [], []>} : vector<8x512xbf16>, vector<512x512xbf16>, vector<8x512xf32> -> vector<8x512xf32>
    %520 = arith.addf %514, %519 : vector<8x512xf32>
    %c0_526 = arith.constant 0 : index
    %c1_527 = arith.constant 1 : index
    %c0_528 = arith.constant 0 : index
    %c0_529 = arith.constant 0 : index
    %521 = vector.load %arg13[%c0_526, %c1_527, %c0_528, %c0_529] : memref<2x2x16x512xf32, #tpu.memory_space<vmem>>, vector<1x1x8x512xf32>
    %522 = vector.shape_cast %521 : vector<1x1x8x512xf32> to vector<8x512xf32>
    %523 = arith.truncf %522 : vector<8x512xf32> to vector<8x512xbf16>
    %c2048 = arith.constant 2048 : index
    %c0_530 = arith.constant 0 : index
    %524 = vector.load %arg5[%c2048, %c0_530] : memref<4096x512xbf16, #tpu.memory_space<vmem>>, vector<512x512xbf16>
    %cst_531 = arith.constant dense<0.000000e+00> : vector<8x512xf32>
    %525 = tpu.matmul %523, %524, %cst_531 {dimension_numbers = #tpu.dot_dimension_numbers<[1], [0], [0], [1], [0, 0, 1, 1], [], []>} : vector<8x512xbf16>, vector<512x512xbf16>, vector<8x512xf32> -> vector<8x512xf32>
    %526 = arith.addf %520, %525 : vector<8x512xf32>
    %c1_532 = arith.constant 1 : index
    %c1_533 = arith.constant 1 : index
    %c0_534 = arith.constant 0 : index
    %c0_535 = arith.constant 0 : index
    %527 = vector.load %arg13[%c1_532, %c1_533, %c0_534, %c0_535] : memref<2x2x16x512xf32, #tpu.memory_space<vmem>>, vector<1x1x8x512xf32>
    %528 = vector.shape_cast %527 : vector<1x1x8x512xf32> to vector<8x512xf32>
    %529 = arith.truncf %528 : vector<8x512xf32> to vector<8x512xbf16>
    %c2560 = arith.constant 2560 : index
    %c0_536 = arith.constant 0 : index
    %530 = vector.load %arg5[%c2560, %c0_536] : memref<4096x512xbf16, #tpu.memory_space<vmem>>, vector<512x512xbf16>
    %cst_537 = arith.constant dense<0.000000e+00> : vector<8x512xf32>
    %531 = tpu.matmul %529, %530, %cst_537 {dimension_numbers = #tpu.dot_dimension_numbers<[1], [0], [0], [1], [0, 0, 1, 1], [], []>} : vector<8x512xbf16>, vector<512x512xbf16>, vector<8x512xf32> -> vector<8x512xf32>
    %532 = arith.addf %526, %531 : vector<8x512xf32>
    %cst_538 = arith.constant 0.000000e+00 : f32
    %533 = vector.broadcast %cst_538 : f32 to vector<8x512xf32>
    %534 = arith.cmpf oge, %532, %533 : vector<8x512xf32>
    %cst_539 = arith.constant 2.000000e-01 : f32
    %535 = vector.broadcast %cst_539 : f32 to vector<8x512xf32>
    %536 = arith.mulf %535, %532 : vector<8x512xf32>
    %537 = arith.select %534, %532, %536 : vector<8x512xi1>, vector<8x512xf32>
    %538 = arith.truncf %537 : vector<8x512xf32> to vector<8x512xbf16>
    %c0_540 = arith.constant 0 : index
    %c0_541 = arith.constant 0 : index
    %539 = vector.load %arg6[%c0_540, %c0_541] : memref<512x128xbf16, #tpu.memory_space<vmem>>, vector<512x128xbf16>
    %cst_542 = arith.constant dense<0.000000e+00> : vector<8x128xf32>
    %540 = tpu.matmul %538, %539, %cst_542 {dimension_numbers = #tpu.dot_dimension_numbers<[1], [0], [0], [1], [0, 0, 1, 1], [], []>} : vector<8x512xbf16>, vector<512x128xbf16>, vector<8x128xf32> -> vector<8x128xf32>
    %c0_543 = arith.constant 0 : index
    %c0_544 = arith.constant 0 : index
    %541 = vector.load %arg9[%c0_543, %c0_544] : memref<1x128xf32, #tpu.memory_space<vmem>>, vector<1x128xf32>
    %542 = vector.broadcast %541 : vector<1x128xf32> to vector<8x128xf32>
    %543 = arith.addf %540, %542 : vector<8x128xf32>
    %cst_545 = arith.constant 0.000000e+00 : f32
    %544 = vector.broadcast %cst_545 : f32 to vector<8x128xf32>
    %545 = arith.subf %544, %543 : vector<8x128xf32>
    %546 = math.exp %545 : vector<8x128xf32>
    %cst_546 = arith.constant 1.000000e+00 : f32
    %547 = vector.broadcast %cst_546 : f32 to vector<8x128xf32>
    %548 = arith.addf %547, %546 : vector<8x128xf32>
    %cst_547 = arith.constant 1.000000e+00 : f32
    %549 = vector.broadcast %cst_547 : f32 to vector<8x128xf32>
    %550 = arith.divf %549, %548 : vector<8x128xf32>
    %c0_548 = arith.constant 0 : index
    %c0_549 = arith.constant 0 : index
    %551 = vector.load %arg10[%c0_548, %c0_549] : memref<8x128xf32, #tpu.memory_space<vmem>>, vector<8x128xf32>
    tpu.vector_store %arg10[%c0_548, %c0_549], %550 {strides = array<i32>} : memref<8x128xf32, #tpu.memory_space<vmem>>, vector<8x128xf32>,
    return
  }
  func.func @transform_0(%arg0: i32) -> (i32, i32, i32) {
    %c0_i32 = arith.constant 0 : i32
    %c0_i32_0 = arith.constant 0 : i32
    %c0_i32_1 = arith.constant 0 : i32
    return %arg0, %c0_i32, %c0_i32_0 : i32, i32, i32
  }
  func.func @transform_1(%arg0: i32) -> (i32, i32) {
    %c0_i32 = arith.constant 0 : i32
    %c0_i32_0 = arith.constant 0 : i32
    %c0_i32_1 = arith.constant 0 : i32
    return %c0_i32, %c0_i32_0 : i32, i32
  }
  func.func @transform_2(%arg0: i32) -> (i32, i32) {
    %c0_i32 = arith.constant 0 : i32
    %c0_i32_0 = arith.constant 0 : i32
    %c0_i32_1 = arith.constant 0 : i32
    return %c0_i32, %c0_i32_0 : i32, i32
  }
  func.func @transform_3(%arg0: i32) -> (i32, i32) {
    %c0_i32 = arith.constant 0 : i32
    %c0_i32_0 = arith.constant 0 : i32
    %c0_i32_1 = arith.constant 0 : i32
    return %c0_i32, %c0_i32_0 : i32, i32
  }
  func.func @transform_4(%arg0: i32) -> (i32, i32) {
    %c0_i32 = arith.constant 0 : i32
    %c0_i32_0 = arith.constant 0 : i32
    %c0_i32_1 = arith.constant 0 : i32
    return %c0_i32, %c0_i32_0 : i32, i32
  }
  func.func @transform_5(%arg0: i32) -> (i32, i32) {
    %c0_i32 = arith.constant 0 : i32
    %c0_i32_0 = arith.constant 0 : i32
    %c0_i32_1 = arith.constant 0 : i32
    return %c0_i32, %c0_i32_0 : i32, i32
  }
  func.func @transform_6(%arg0: i32) -> (i32, i32) {
    %c0_i32 = arith.constant 0 : i32
    %c0_i32_0 = arith.constant 0 : i32
    %c0_i32_1 = arith.constant 0 : i32
    return %c0_i32, %c0_i32_0 : i32, i32
  }
  func.func @transform_7(%arg0: i32) -> (i32, i32) {
    %c0_i32 = arith.constant 0 : i32
    %c0_i32_0 = arith.constant 0 : i32
    %c0_i32_1 = arith.constant 0 : i32
    return %c0_i32, %c0_i32_0 : i32, i32
  }
  func.func @transform_8(%arg0: i32) -> (i32, i32) {
    %c0_i32 = arith.constant 0 : i32
    %c0_i32_0 = arith.constant 0 : i32
    %c0_i32_1 = arith.constant 0 : i32
    return %c0_i32, %c0_i32_0 : i32, i32
  }
  func.func @transform_9(%arg0: i32) -> (i32, i32) {
    %c0_i32 = arith.constant 0 : i32
    %c0_i32_0 = arith.constant 0 : i32
    return %arg0, %c0_i32 : i32, i32
  }
}

</mosaic_0001>

<bundles_post_ra>
// kernel: discriminator_forward.1
= control target key start
LH: loop header
LB: loop body
LE: loop exit
PB: predicated region body
PF: predicated region fallthrough
CT: control target
= control target key end

     0   :  { %v21292_v48 = vmov 0.0|0.0   ;;  %s21282_s1 = inlined_call_operand.vmem [shape: bf16[128,128], index: 1, kind: input, shape index: {}]   ;;  %s21283_s0 = inlined_call_operand.vmem [shape: f32[1,512,128], index: 0, kind: input, shape index: {}]   ;;  %s21284_s2 = inlined_call_operand.vmem [shape: bf16[2048,128], index: 2, kind: input, shape index: {}]   ;;  %s21285_s6 = inlined_call_operand.vmem [shape: f32[1,128], index: 6, kind: input, shape index: {}]   ;;  %s21286_s3 = inlined_call_operand.vmem [shape: bf16[2048,256], index: 3, kind: input, shape index: {}]   ;;  %s21287_s4 = inlined_call_operand.vmem [shape: bf16[4096,512], index: 4, kind: input, shape index: {}]   ;;  %s21288_s7 = inlined_call_operand.vmem [shape: f32[1,256], index: 7, kind: input, shape index: {}]   ;;  %s21289_s5 = inlined_call_operand.vmem [shape: bf16[512,128], index: 5, kind: input, shape index: {}]   ;;  %s21290_s8 = inlined_call_operand.vmem [shape: f32[1,128], index: 8, kind: input, shape index: {}]   ;;  %s21291_s9 = inlined_call_operand.vmem [shape: f32[8,128], index: 9, kind: output, shape index: {}]  }
   0x1   :  { %v13501_v0 = vld [vmem:[%s21282_s1 + $0x38] sm:$0xff]  ;;  %v13500_v1 = vld [vmem:[%s21282_s1 + $0x30] sm:$0xff]  ;;  %v13499_v2 = vld [vmem:[%s21282_s1 + $0x28] sm:$0xff] }
   0x2   :  { %294 = vmatpush.bf16.msra.mxu0 %v13501_v0  ;;  %v13498_v3 = vld [vmem:[%s21282_s1 + $0x20] sm:$0xff]  ;;  %v13497_v4 = vld [vmem:[%s21282_s1 + $0x18] sm:$0xff]  ;;  %v13496_v5 = vld [vmem:[%s21282_s1 + $0x10] sm:$0xff] }
   0x3   :  { %v13495_v6 = vld [vmem:[%s21282_s1 + $0x8] sm:$0xff]  ;;  %v13494_v7 = vld [vmem:[%s21282_s1] sm:$0xff]  ;;  %v136_v11 = vld [vmem:[%s21283_s0 + $0x10] sm:$0xff] }
   0x4   :  { %v134_v8 = vld [vmem:[%s21283_s0] sm:$0xff]  ;;  %v135_v9 = vld [vmem:[%s21283_s0 + $0x8] sm:$0xff]  ;;  %v137_v12 = vld [vmem:[%s21283_s0 + $0x18] sm:$0xff] }
   0x5   :  { %v198_v10 = vpack.c.bf16 %v135_v9, %v134_v8  ;;  %v199_v13 = vpack.c.bf16 %v137_v12, %v136_v11  ;;  %v138_v14 = vld [vmem:[%s21283_s0 + $0x20] sm:$0xff]  ;;  %v139_v15 = vld [vmem:[%s21283_s0 + $0x28] sm:$0xff]  ;;  %v140_v17 = vld [vmem:[%s21283_s0 + $0x30] sm:$0xff] }
   0x6   :  { %295 = vmatpush.bf16.msra.mxu0 %v13500_v1  ;;  %v200_v16 = vpack.c.bf16 %v139_v15, %v138_v14  ;;  %v141_v18 = vld [vmem:[%s21283_s0 + $0x38] sm:$0xff]  ;;  %v142_v20 = vld [vmem:[%s21283_s0 + $0x40] sm:$0xff]  ;;  %v143_v21 = vld [vmem:[%s21283_s0 + $0x48] sm:$0xff] }
   0x7   :  { %v201_v19 = vpack.c.bf16 %v141_v18, %v140_v17  ;;  %v202_v22 = vpack.c.bf16 %v143_v21, %v142_v20  ;;  %v144_v23 = vld [vmem:[%s21283_s0 + $0x50] sm:$0xff]  ;;  %v145_v24 = vld [vmem:[%s21283_s0 + $0x58] sm:$0xff]  ;;  %v146_v26 = vld [vmem:[%s21283_s0 + $0x60] sm:$0xff] }
   0x8   :  { %v203_v25 = vpack.c.bf16 %v145_v24, %v144_v23  ;;  %v147_v27 = vld [vmem:[%s21283_s0 + $0x68] sm:$0xff]  ;;  %v13509_v29 = vld [vmem:[%s21284_s2 + $0x38] sm:$0xff]  ;;  %v148_v30 = vld [vmem:[%s21283_s0 + $0x70] sm:$0xff] }
   0x9   :  { %v204_v28 = vpack.c.bf16 %v147_v27, %v146_v26  ;;  %1192 = vmatpush.bf16.msra.mxu3 %v13509_v29  ;;  %v149_v31 = vld [vmem:[%s21283_s0 + $0x78] sm:$0xff]  ;;  %v13508_v33 = vld [vmem:[%s21284_s2 + $0x30] sm:$0xff]  ;;  %v13507_v34 = vld [vmem:[%s21284_s2 + $0x28] sm:$0xff] }
   0xa   :  { %296 = vmatpush.bf16.msra.mxu0 %v13499_v2  ;;  %v205_v32 = vpack.c.bf16 %v149_v31, %v148_v30  ;;  %v13506_v35 = vld [vmem:[%s21284_s2 + $0x20] sm:$0xff]  ;;  %v13505_v36 = vld [vmem:[%s21284_s2 + $0x18] sm:$0xff]  ;;  %v151_v38 = vld [vmem:[%s21283_s0 + $0x88] sm:$0xff] }
   0xb   :  { %v150_v37 = vld [vmem:[%s21283_s0 + $0x80] sm:$0xff]  ;;  %v13504_v41 = vld [vmem:[%s21284_s2 + $0x10] sm:$0xff]  ;;  %v13503_v42 = vld [vmem:[%s21284_s2 + $0x8] sm:$0xff] }
   0xc   :  { %v206_v39 = vpack.c.bf16 %v151_v38, %v150_v37  ;;  %v13502_v44 = vld [vmem:[%s21284_s2] sm:$0xff]  ;;  %v13525_v45 = vld [vmem:[%s21284_s2 + $0xb8] sm:$0xff]  ;;  %v152_v46 = vld [vmem:[%s21283_s0 + $0x90] sm:$0xff] }
   0xd   :  { %1193 = vmatpush.bf16.msra.mxu3 %v13508_v33  ;;  %998 = vmatpush.bf16.msra.mxu1 %v13525_v45  ;;  %v153_v47 = vld [vmem:[%s21283_s0 + $0x98] sm:$0xff]  ;;  %v13524_v53 = vld [vmem:[%s21284_s2 + $0xb0] sm:$0xff]  ;;  %v13523_v56 = vld [vmem:[%s21284_s2 + $0xa8] sm:$0xff] }
   0xe   :  { %297 = vmatpush.bf16.msra.mxu0 %v13498_v3  ;;  %v207_v50 = vpack.c.bf16 %v153_v47, %v152_v46  ;;  %v13522_v61 = vld [vmem:[%s21284_s2 + $0xa0] sm:$0xff]  ;;  %v13521_v62 = vld [vmem:[%s21284_s2 + $0x98] sm:$0xff]  ;;  %v155_v2 = vld [vmem:[%s21283_s0 + $0xa8] sm:$0xff] }
   0xf   :  { %v154_v1 = vld [vmem:[%s21283_s0 + $0xa0] sm:$0xff]  ;;  %v13519_v8 = vld [vmem:[%s21284_s2 + $0x88] sm:$0xff]  ;;  %v156_v15 = vld [vmem:[%s21283_s0 + $0xb0] sm:$0xff] }
  0x10   :  { %v158_v26 = vld [vmem:[%s21283_s0 + $0xc0] sm:$0xff]  ;;  %v159_v27 = vld [vmem:[%s21283_s0 + $0xc8] sm:$0xff]  ;;  %v161_v37 = vld [vmem:[%s21283_s0 + $0xd8] sm:$0xff] }
  0x11   :  { %1194 = vmatpush.bf16.msra.mxu3 %v13507_v34  ;;  %999 = vmatpush.bf16.msra.mxu1 %v13524_v53  ;;  %v210_v29 = vpack.c.bf16 %v159_v27, %v158_v26  ;;  %v21295_v34 = vmov 0.0   ;;  %v13533_v38 = vld [vmem:[%s21284_s2 + $0xf8] sm:$0xff]  ;;  %v13531_v45 = vld [vmem:[%s21284_s2 + $0xe8] sm:$0xff] }
  0x12   :  { %298 = vmatpush.bf16.msra.mxu0 %v13497_v4  ;;  %v208_v4 = vpack.c.bf16 %v155_v2, %v154_v1  ;;  %1047 = vmatpush.bf16.msra.mxu2 %v13533_v38  ;;  %v13529_v53 = vld [vmem:[%s21284_s2 + $0xd8] sm:$0xff]  ;;  %v13528_v1 = vld [vmem:[%s21284_s2 + $0xd0] sm:$0xff] }
  0x15   :  { %1195 = vmatpush.bf16.msra.mxu3 %v13506_v35  ;;  %1000 = vmatpush.bf16.msra.mxu1 %v13523_v56  ;;  %v162_v56 = vld [vmem:[%s21283_s0 + $0xe0] sm:$0xff] }
  0x16   :  { %299 = vmatpush.bf16.msra.mxu0 %v13496_v5 }
  0x19   :  { %1196 = vmatpush.bf16.msra.mxu3 %v13505_v36  ;;  %1001 = vmatpush.bf16.msra.mxu1 %v13522_v61  ;;  %v160_v36 = vld [vmem:[%s21283_s0 + $0xd0] sm:$0xff] }
  0x1a   :  { %300 = vmatpush.bf16.msra.mxu0 %v13495_v6 }
  0x1d   :  { %1197 = vmatpush.bf16.msra.mxu3 %v13504_v41  ;;  %1002 = vmatpush.bf16.msra.mxu1 %v13521_v62 }
  0x1e   :  { %301 = vmatpush.bf16.msra.mxu0 %v13494_v7  ;;  %v13520_v7 = vld [vmem:[%s21284_s2 + $0x90] sm:$0xff] }
  0x21   :  { %302 = vmatmul.bf16.vlgmr.msra.gmra.mxu0 %v198_v10  ;;  %1198 = vmatpush.bf16.msra.mxu3 %v13503_v42 }
  0x22   :  { %1003 = vmatpush.bf16.msra.mxu1 %v13520_v7 }
  0x25   :  { %1199 = vmatpush.bf16.msra.mxu3 %v13502_v44 }
  0x26   :  { %1004 = vmatpush.bf16.msra.mxu1 %v13519_v8  ;;  %v13526_v8 = vld [vmem:[%s21284_s2 + $0xc0] sm:$0xff] }
  0x28   :  { %1200 = vmatmul.bf16.vlgmr.msra.gmra.mxu3 %v21292_v48 }
  0x31   :  { %307 = vmatmul.bf16.gmra.mxu0 %v199_v13  ;;  %v13518_v13 = vld [vmem:[%s21284_s2 + $0x80] sm:$0xff] }
  0x32   :  { %1005 = vmatpush.bf16.msra.mxu1 %v13518_v13  ;;  %v164_v13 = vld [vmem:[%s21283_s0 + $0xf0] sm:$0xff] }
  0x38   :  { %1205 = vmatmul.bf16.gmra.mxu3 %v21292_v48 }
  0x41   :  { %312 = vmatmul.bf16.gmra.mxu0 %v200_v16  ;;  %v157_v16 = vld [vmem:[%s21283_s0 + $0xb8] sm:$0xff] }
  0x42   :  { %v209_v18 = vpack.c.bf16 %v157_v16, %v156_v15  ;;  %v165_v15 = vld [vmem:[%s21283_s0 + $0xf8] sm:$0xff] }
  0x43   :  { %v213_v16 = vpack.c.bf16 %v165_v15, %v164_v13 }
  0x51   :  { %317 = vmatmul.bf16.gmra.mxu0 %v201_v19 }
  0x61   :  { %322 = vmatmul.bf16.gmra.mxu0 %v202_v22 }
  0x71   :  { %327 = vmatmul.bf16.gmra.mxu0 %v203_v25 }
  0x81   :  { %332 = vmatmul.bf16.gmra.mxu0 %v204_v28 }
  0x91   :  { %337 = vmatmul.bf16.gmra.mxu0 %v205_v32 }
  0x9e   :  { %v303_v40 = vpop.f32.mrf.mxu0 }
  0x9f   :  { %v527_v49 = vmul.f32 0.2, %v303_v40  ;;  %vm463_vm0 = vcmp.ge.f32.partialorder %v303_v40, 0.0 }
  0xa1   :  { %342 = vmatmul.bf16.gmra.mxu0 %v206_v39  ;;  %v14606_v54 = vsel %vm463_vm0, %v303_v40, %v527_v49  ;;  %v211_v40 = vpack.c.bf16 %v161_v37, %v160_v36 }
  0xa6   :  { %v305_v43 = vpop.f32.mrf.mxu0 }
  0xa7   :  { %v528_v58 = vmul.f32 0.2, %v305_v43  ;;  %vm464_vm2 = vcmp.ge.f32.partialorder %v305_v43, 0.0 }
  0xa9   :  { %v14621_v63 = vsel %vm464_vm2, %v305_v43, %v528_v58  ;;  %v13532_v43 = vld [vmem:[%s21284_s2 + $0xf0] sm:$0xff]  ;;  %v163_v58 = vld [vmem:[%s21283_s0 + $0xe8] sm:$0xff] }
  0xaa   :  { %21345 = vst [vmem:[#allocation6_spill] sm:$0xff] %v14621_v63  ;;  %1048 = vmatpush.bf16.msra.mxu2 %v13532_v43 }
  0xae   :  { %v308_v51 = vpop.f32.mrf.mxu0  ;;  %1049 = vmatpush.bf16.msra.mxu2 %v13531_v45 }
  0xaf   :  { %vm465_vm1 = vcmp.ge.f32.partialorder %v308_v51, 0.0  ;;  %v529_v52 = vmul.f32 0.2, %v308_v51 }
  0xb1   :  { %v14608_v55 = vsel %vm465_vm1, %v308_v51, %v529_v52  ;;  %347 = vmatmul.bf16.gmra.mxu0 %v207_v50  ;;  %v13530_v51 = vld [vmem:[%s21284_s2 + $0xe0] sm:$0xff] }
  0xb2   :  { %21344 = vst [vmem:[#allocation5_spill] sm:$0xff] %v14608_v55  ;;  %v1323_v57 = vpack.c.bf16 %v14608_v55, %v14606_v54  ;;  %1050 = vmatpush.bf16.msra.mxu2 %v13530_v51  ;;  %v21368_v55 = vmov 0.0|0.0  }
  0xb6   :  { %v310_v59 = vpop.f32.mrf.mxu0  ;;  %1051 = vmatpush.bf16.msra.mxu2 %v13529_v53  ;;  %v170_v53 = vld [vmem:[%s21283_s0 + $0x120] sm:$0xff] }
  0xb7   :  { %v530_v60 = vmul.f32 0.2, %v310_v59  ;;  %vm466_vm3 = vcmp.ge.f32.partialorder %v310_v59, 0.0 }
  0xb9   :  { %v14623_v0 = vsel %vm466_vm3, %v310_v59, %v530_v60  ;;  %v212_v60 = vpack.c.bf16 %v163_v58, %v162_v56  ;;  %v171_v56 = vld [vmem:[%s21283_s0 + $0x128] sm:$0xff] }
  0xba   :  { %21346 = vst [vmem:[#allocation7_spill] sm:$0xff] %v14623_v0  ;;  %1052 = vmatpush.bf16.msra.mxu2 %v13528_v1 }
  0xbe   :  { %v313_v5 = vpop.f32.mrf.mxu0 }
  0xbf   :  { %vm467_vm4 = vcmp.ge.f32.partialorder %v313_v5, 0.0  ;;  %v531_v6 = vmul.f32 0.2, %v313_v5 }
  0xc1   :  { %352 = vmatmul.bf16.gmra.mxu0 %v208_v4  ;;  %v14640_v9 = vsel %vm467_vm4, %v313_v5, %v531_v6  ;;  %v13527_v4 = vld [vmem:[%s21284_s2 + $0xc8] sm:$0xff] }
  0xc2   :  { %21347 = vst [vmem:[#allocation8_spill] sm:$0xff] %v14640_v9  ;;  %1053 = vmatpush.bf16.msra.mxu2 %v13527_v4 }
  0xc6   :  { %v315_v11 = vpop.f32.mrf.mxu0  ;;  %1054 = vmatpush.bf16.msra.mxu2 %v13526_v8 }
  0xc7   :  { %v532_v12 = vmul.f32 0.2, %v315_v11  ;;  %vm468_vm5 = vcmp.ge.f32.partialorder %v315_v11, 0.0 }
  0xc9   :  { %v14647_v14 = vsel %vm468_vm5, %v315_v11, %v532_v12 }
  0xca   :  { %21348 = vst [vmem:[#allocation9_spill] sm:$0xff] %v14647_v14 }
  0xce   :  { %v318_v19 = vpop.f32.mrf.mxu0 }
  0xcf   :  { %vm469_vm6 = vcmp.ge.f32.partialorder %v318_v19, 0.0  ;;  %v533_v20 = vmul.f32 0.2, %v318_v19 }
  0xd1   :  { %357 = vmatmul.bf16.gmra.mxu0 %v209_v18  ;;  %v14657_v21 = vsel %vm469_vm6, %v318_v19, %v533_v20 }
  0xd2   :  { %21349 = vst [vmem:[#allocation10_spill] sm:$0xff] %v14657_v21  ;;  %v1325_v22 = vpack.c.bf16 %v14657_v21, %v14640_v9 }
  0xd6   :  { %v320_v23 = vpop.f32.mrf.mxu0 }
  0xd7   :  { %vm470_vm7 = vcmp.ge.f32.partialorder %v320_v23, 0.0  ;;  %v534_v24 = vmul.f32 0.2, %v320_v23 }
  0xd9   :  { %v14661_v25 = vsel %vm470_vm7, %v320_v23, %v534_v24 }
  0xda   :  { %21350 = vst [vmem:[#allocation11_spill] sm:$0xff] %v14661_v25  ;;  %v13541_v25 = vld [vmem:[%s21284_s2 + $0x138] sm:$0xff] }
  0xdb   :  { %1466 = vmatpush.bf16.msrb.mxu2 %v13541_v25 }
  0xde   :  { %v323_v30 = vpop.f32.mrf.mxu0 }
  0xdf   :  { %v535_v39 = vmul.f32 0.2, %v323_v30  ;;  %vm471_vm9 = vcmp.ge.f32.partialorder %v323_v30, 0.0 }
  0xe1   :  { %362 = vmatmul.bf16.gmra.mxu0 %v210_v29  ;;  %v599_v46 = vsel %vm471_vm9, %v323_v30, %v535_v39  ;;  %v166_v29 = vld [vmem:[%s21283_s0 + $0x100] sm:$0xff]  ;;  %v167_v30 = vld [vmem:[%s21283_s0 + $0x108] sm:$0xff]  ;;  %v168_v39 = vld [vmem:[%s21283_s0 + $0x110] sm:$0xff] }
  0xe6   :  { %v325_v31 = vpop.f32.mrf.mxu0 }
  0xe7   :  { %v536_v32 = vmul.f32 0.2, %v325_v31  ;;  %vm472_vm8 = vcmp.ge.f32.partialorder %v325_v31, 0.0 }
  0xe9   :  { %v600_v33 = vsel %vm472_vm8, %v325_v31, %v536_v32  ;;  %v214_v32 = vpack.c.bf16 %v167_v30, %v166_v29  ;;  %v174_v29 = vld [vmem:[%s21283_s0 + $0x140] sm:$0xff]  ;;  %v175_v30 = vld [vmem:[%s21283_s0 + $0x148] sm:$0xff] }
  0xea   :  { %v778_v35 = vpack.c.bf16 %v600_v33, %v21295_v34 }
  0xec   :  { %1006 = vmatmul.bf16.vlgmr.msra.gmra.mxu1 %v778_v35  ;;  %1210 = vmatmul.bf16.gmra.mxu3 %v778_v35 }
  0xee   :  { %v328_v41 = vpop.f32.mrf.mxu0 }
  0xef   :  { %vm473_vm10 = vcmp.ge.f32.partialorder %v328_v41, 0.0  ;;  %v537_v42 = vmul.f32 0.2, %v328_v41 }
  0xf1   :  { %v601_v44 = vsel %vm473_vm10, %v328_v41, %v537_v42  ;;  %367 = vmatmul.bf16.gmra.mxu0 %v211_v40  ;;  %v169_v40 = vld [vmem:[%s21283_s0 + $0x118] sm:$0xff] }
  0xf2   :  { %v14687_v47 = vpack.c.bf16 %v601_v44, %v599_v46  ;;  %v215_v42 = vpack.c.bf16 %v169_v40, %v168_v39 }
  0xf6   :  { %v330_v49 = vpop.f32.mrf.mxu0 }
  0xf7   :  { %v538_v50 = vmul.f32 0.2, %v330_v49  ;;  %vm474_vm11 = vcmp.ge.f32.partialorder %v330_v49, 0.0 }
  0xf9   :  { %v602_v52 = vsel %vm474_vm11, %v330_v49, %v538_v50 }
  0xfa   :  { %v14701_v59 = vpack.c.bf16 %v602_v52, %v600_v33 }
  0xfc   :  { %21351 = vst [vmem:[#allocation12_spill] sm:$0xff] %v14701_v59 }
  0xfe   :  { %v333_v61 = vpop.f32.mrf.mxu0 }
  0xff   :  { %vm475_vm12 = vcmp.ge.f32.partialorder %v333_v61, 0.0  ;;  %v539_v62 = vmul.f32 0.2, %v333_v61 }
 0x101   :  { %v603_v2 = vsel %vm475_vm12, %v333_v61, %v539_v62  ;;  %372 = vmatmul.bf16.gmra.mxu0 %v212_v60  ;;  %v216_v60 = vpack.c.bf16 %v171_v56, %v170_v53 }
 0x102   :  { %v14709_v5 = vpack.c.bf16 %v603_v2, %v601_v44 }
 0x104   :  { %21352 = vst [vmem:[#allocation13_spill] sm:$0xff] %v14709_v5 }
 0x106   :  { %v335_v6 = vpop.f32.mrf.mxu0 }
 0x107   :  { %v540_v7 = vmul.f32 0.2, %v335_v6  ;;  %vm476_vm13 = vcmp.ge.f32.partialorder %v335_v6, 0.0 }
 0x109   :  { %v604_v11 = vsel %vm476_vm13, %v335_v6, %v540_v7 }
 0x10a   :  { %v780_v12 = vpack.c.bf16 %v604_v11, %v602_v52 }
 0x10c   :  { %1011 = vmatmul.bf16.gmra.mxu1 %v780_v12  ;;  %1215 = vmatmul.bf16.gmra.mxu3 %v780_v12  ;;  %v173_v12 = vld [vmem:[%s21283_s0 + $0x138] sm:$0xff] }
 0x10e   :  { %v338_v18 = vpop.f32.mrf.mxu0 }
 0x10f   :  { %vm477_vm14 = vcmp.ge.f32.partialorder %v338_v18, 0.0  ;;  %v541_v19 = vmul.f32 0.2, %v338_v18 }
 0x111   :  { %v14720_v20 = vsel %vm477_vm14, %v338_v18, %v541_v19  ;;  %377 = vmatmul.bf16.gmra.mxu0 %v213_v16 }
 0x112   :  { %21353 = vst [vmem:[#allocation14_spill] sm:$0xff] %v14720_v20  ;;  %v14723_v23 = vpack.c.bf16 %v14720_v20, %v603_v2 }
 0x116   :  { %v340_v24 = vpop.f32.mrf.mxu0 }
 0x117   :  { %vm478_vm15 = vcmp.ge.f32.partialorder %v340_v24, 0.0  ;;  %v542_v26 = vmul.f32 0.2, %v340_v24 }
 0x119   :  { %v606_v27 = vsel %vm478_vm15, %v340_v24, %v542_v26 }
 0x11a   :  { %v14731_v31 = vpack.c.bf16 %v606_v27, %v604_v11  ;;  %v172_v11 = vld [vmem:[%s21283_s0 + $0x130] sm:$0xff] }
 0x11b   :  { %v217_v13 = vpack.c.bf16 %v173_v12, %v172_v11 }
 0x11c   :  { %21354 = vst [vmem:[#allocation15_spill] sm:$0xff] %v14731_v31 }
 0x11e   :  { %v343_v33 = vpop.f32.mrf.mxu0 }
 0x11f   :  { %v543_v41 = vmul.f32 0.2, %v343_v33  ;;  %vm479_vm1 = vcmp.ge.f32.partialorder %v343_v33, 0.0 }
 0x121   :  { %382 = vmatmul.bf16.gmra.mxu0 %v214_v32  ;;  %v607_v45 = vsel %vm479_vm1, %v343_v33, %v543_v41  ;;  %v218_v33 = vpack.c.bf16 %v175_v30, %v174_v29  ;;  %v176_v41 = vld [vmem:[%s21283_s0 + $0x150] sm:$0xff] }
 0x126   :  { %v345_v35 = vpop.f32.mrf.mxu0 }
 0x127   :  { %v544_v36 = vmul.f32 0.2, %v345_v35  ;;  %vm480_vm0 = vcmp.ge.f32.partialorder %v345_v35, 0.0 }
 0x129   :  { %v608_v37 = vsel %vm480_vm0, %v345_v35, %v544_v36 }
 0x12a   :  { %v14734_v38 = vpack.c.bf16 %v608_v37, %v21295_v34 }
 0x12c   :  { %1055 = vmatmul.bf16.vlgmr.msra.gmra.mxu2 %v14734_v38 }
 0x12e   :  { %v348_v43 = vpop.f32.mrf.mxu0 }
 0x12f   :  { %vm481_vm2 = vcmp.ge.f32.partialorder %v348_v43, 0.0  ;;  %v545_v44 = vmul.f32 0.2, %v348_v43 }
 0x131   :  { %387 = vmatmul.bf16.gmra.mxu0 %v215_v42  ;;  %v609_v46 = vsel %vm481_vm2, %v348_v43, %v545_v44  ;;  %v177_v42 = vld [vmem:[%s21283_s0 + $0x158] sm:$0xff] }
 0x132   :  { %v14743_v49 = vpack.c.bf16 %v609_v46, %v607_v45  ;;  %v219_v44 = vpack.c.bf16 %v177_v42, %v176_v41  ;;  %v182_v41 = vld [vmem:[%s21283_s0 + $0x180] sm:$0xff]  ;;  %v183_v42 = vld [vmem:[%s21283_s0 + $0x188] sm:$0xff] }
 0x136   :  { %v350_v50 = vpop.f32.mrf.mxu0 }
 0x137   :  { %v546_v51 = vmul.f32 0.2, %v350_v50  ;;  %vm482_vm3 = vcmp.ge.f32.partialorder %v350_v50, 0.0 }
 0x139   :  { %v610_v52 = vsel %vm482_vm3, %v350_v50, %v546_v51 }
 0x13a   :  { %v14751_v58 = vpack.c.bf16 %v610_v52, %v608_v37 }
 0x13e   :  { %v353_v61 = vpop.f32.mrf.mxu0 }
 0x13f   :  { %vm483_vm4 = vcmp.ge.f32.partialorder %v353_v61, 0.0  ;;  %v547_v62 = vmul.f32 0.2, %v353_v61 }
 0x141   :  { %392 = vmatmul.bf16.gmra.mxu0 %v216_v60  ;;  %v611_v1 = vsel %vm483_vm4, %v353_v61, %v547_v62  ;;  %v178_v61 = vld [vmem:[%s21283_s0 + $0x160] sm:$0xff]  ;;  %v179_v62 = vld [vmem:[%s21283_s0 + $0x168] sm:$0xff] }
 0x142   :  { %v14753_v2 = vpack.c.bf16 %v611_v1, %v609_v46 }
 0x144   :  { %21355 = vst [vmem:[#allocation16_spill] sm:$0xff] %v14753_v2  ;;  %v21310_v2 = vpack.c.bf16 0.0, %v14720_v20  ;;  %v21378_v20 = vmov 0.0  }
 0x146   :  { %v355_v4 = vpop.f32.mrf.mxu0 }
 0x147   :  { %v548_v6 = vmul.f32 0.2, %v355_v4  ;;  %vm484_vm5 = vcmp.ge.f32.partialorder %v355_v4, 0.0 }
 0x149   :  { %v612_v7 = vsel %vm484_vm5, %v355_v4, %v548_v6  ;;  %v220_v4 = vpack.c.bf16 %v179_v62, %v178_v61 }
 0x14a   :  { %v14755_v8 = vpack.c.bf16 %v612_v7, %v610_v52 }
 0x14c   :  { %1060 = vmatmul.bf16.gmra.mxu2 %v14755_v8 }
 0x14e   :  { %v358_v15 = vpop.f32.mrf.mxu0 }
 0x14f   :  { %vm485_vm6 = vcmp.ge.f32.partialorder %v358_v15, 0.0  ;;  %v549_v16 = vmul.f32 0.2, %v358_v15 }
 0x151   :  { %397 = vmatmul.bf16.gmra.mxu0 %v217_v13  ;;  %v14764_v18 = vsel %vm485_vm6, %v358_v15, %v549_v16 }
 0x152   :  { %21356 = vst [vmem:[#allocation17_spill] sm:$0xff] %v14764_v18  ;;  %v14767_v19 = vpack.c.bf16 %v14764_v18, %v611_v1 }
 0x156   :  { %v360_v24 = vpop.f32.mrf.mxu0 }
 0x157   :  { %vm486_vm7 = vcmp.ge.f32.partialorder %v360_v24, 0.0  ;;  %v550_v26 = vmul.f32 0.2, %v360_v24 }
 0x159   :  { %v614_v27 = vsel %vm486_vm7, %v360_v24, %v550_v26  ;;  %v180_v26 = vld [vmem:[%s21283_s0 + $0x170] sm:$0xff] }
 0x15a   :  { %v14775_v32 = vpack.c.bf16 %v614_v27, %v612_v7  ;;  %v181_v27 = vld [vmem:[%s21283_s0 + $0x178] sm:$0xff] }
 0x15b   :  { %v221_v29 = vpack.c.bf16 %v181_v27, %v180_v26 }
 0x15e   :  { %v363_v35 = vpop.f32.mrf.mxu0 }
 0x15f   :  { %v551_v43 = vmul.f32 0.2, %v363_v35  ;;  %vm487_vm9 = vcmp.ge.f32.partialorder %v363_v35, 0.0 }
 0x161   :  { %402 = vmatmul.bf16.gmra.mxu0 %v218_v33  ;;  %v615_v50 = vsel %vm487_vm9, %v363_v35, %v551_v43 }
 0x166   :  { %v365_v36 = vpop.f32.mrf.mxu0 }
 0x167   :  { %v552_v37 = vmul.f32 0.2, %v365_v36  ;;  %vm488_vm8 = vcmp.ge.f32.partialorder %v365_v36, 0.0 }
 0x169   :  { %v616_v39 = vsel %vm488_vm8, %v365_v36, %v552_v37 }
 0x16a   :  { %v782_v40 = vpack.c.bf16 %v616_v39, %v21295_v34 }
 0x16c   :  { %1016 = vmatmul.bf16.gmra.mxu1 %v782_v40  ;;  %1220 = vmatmul.bf16.gmra.mxu3 %v782_v40 }
 0x16e   :  { %v368_v45 = vpop.f32.mrf.mxu0 }
 0x16f   :  { %vm489_vm10 = vcmp.ge.f32.partialorder %v368_v45, 0.0  ;;  %v553_v46 = vmul.f32 0.2, %v368_v45 }
 0x171   :  { %v617_v51 = vsel %vm489_vm10, %v368_v45, %v553_v46  ;;  %407 = vmatmul.bf16.gmra.mxu0 %v219_v44  ;;  %v222_v44 = vpack.c.bf16 %v183_v42, %v182_v41 }
 0x172   :  { %v14784_v52 = vpack.c.bf16 %v617_v51, %v615_v50 }
 0x176   :  { %v370_v53 = vpop.f32.mrf.mxu0 }
 0x177   :  { %v554_v56 = vmul.f32 0.2, %v370_v53  ;;  %vm490_vm11 = vcmp.ge.f32.partialorder %v370_v53, 0.0 }
 0x179   :  { %v618_v60 = vsel %vm490_vm11, %v370_v53, %v554_v56  ;;  %v184_v56 = vld [vmem:[%s21283_s0 + $0x190] sm:$0xff] }
 0x17a   :  { %v14792_v1 = vpack.c.bf16 %v618_v60, %v616_v39 }
 0x17c   :  { %21357 = vst [vmem:[#allocation18_spill] sm:$0xff] %v14792_v1 }
 0x17e   :  { %v373_v6 = vpop.f32.mrf.mxu0 }
 0x17f   :  { %vm491_vm12 = vcmp.ge.f32.partialorder %v373_v6, 0.0  ;;  %v555_v7 = vmul.f32 0.2, %v373_v6 }
 0x181   :  { %v619_v11 = vsel %vm491_vm12, %v373_v6, %v555_v7  ;;  %412 = vmatmul.bf16.gmra.mxu0 %v220_v4  ;;  %v1007_v6 = vpop.f32.mrf.mxu1 }
 0x182   :  { %v14794_v12 = vpack.c.bf16 %v619_v11, %v617_v51 }
 0x184   :  { %21358 = vst [vmem:[#allocation19_spill] sm:$0xff] %v14794_v12 }
 0x186   :  { %v375_v13 = vpop.f32.mrf.mxu0 }
 0x187   :  { %v556_v15 = vmul.f32 0.2, %v375_v13  ;;  %vm492_vm13 = vcmp.ge.f32.partialorder %v375_v13, 0.0 }
 0x189   :  { %v620_v16 = vsel %vm492_vm13, %v375_v13, %v556_v15 }
 0x18a   :  { %v784_v24 = vpack.c.bf16 %v620_v16, %v618_v60  ;;  %v185_v60 = vld [vmem:[%s21283_s0 + $0x198] sm:$0xff] }
 0x18b   :  { %v223_v62 = vpack.c.bf16 %v185_v60, %v184_v56 }
 0x18c   :  { %1021 = vmatmul.bf16.gmra.mxu1 %v784_v24  ;;  %1225 = vmatmul.bf16.gmra.mxu3 %v784_v24 }
 0x18e   :  { %v378_v30 = vpop.f32.mrf.mxu0 }
 0x18f   :  { %vm493_vm14 = vcmp.ge.f32.partialorder %v378_v30, 0.0  ;;  %v557_v33 = vmul.f32 0.2, %v378_v30 }
 0x191   :  { %v14802_v35 = vsel %vm493_vm14, %v378_v30, %v557_v33  ;;  %417 = vmatmul.bf16.gmra.mxu0 %v221_v29  ;;  %v186_v30 = vld [vmem:[%s21283_s0 + $0x1a0] sm:$0xff]  ;;  %v187_v33 = vld [vmem:[%s21283_s0 + $0x1a8] sm:$0xff] }
 0x192   :  { %21359 = vst [vmem:[#allocation20_spill] sm:$0xff] %v14802_v35  ;;  %v14805_v36 = vpack.c.bf16 %v14802_v35, %v619_v11 }
 0x196   :  { %v380_v37 = vpop.f32.mrf.mxu0 }
 0x197   :  { %vm494_vm15 = vcmp.ge.f32.partialorder %v380_v37, 0.0  ;;  %v558_v39 = vmul.f32 0.2, %v380_v37 }
 0x199   :  { %v622_v40 = vsel %vm494_vm15, %v380_v37, %v558_v39  ;;  %v224_v39 = vpack.c.bf16 %v187_v33, %v186_v30  ;;  %v13549_v33 = vld [vmem:[%s21284_s2 + $0x178] sm:$0xff] }
 0x19a   :  { %v14813_v43 = vpack.c.bf16 %v622_v40, %v620_v16  ;;  %1515 = vmatpush.bf16.msrb.mxu3 %v13549_v33  ;;  %v192_v33 = vld [vmem:[%s21283_s0 + $0x1d0] sm:$0xff] }
 0x19c   :  { %21360 = vst [vmem:[#allocation21_spill] sm:$0xff] %v14813_v43 }
 0x19e   :  { %v383_v45 = vpop.f32.mrf.mxu0 }
 0x19f   :  { %v559_v61 = vmul.f32 0.2, %v383_v45  ;;  %vm495_vm1 = vcmp.ge.f32.partialorder %v383_v45, 0.0 }
 0x1a1   :  { %422 = vmatmul.bf16.gmra.mxu0 %v222_v44  ;;  %v623_v15 = vsel %vm495_vm1, %v383_v45, %v559_v61 }
 0x1a6   :  { %v385_v46 = vpop.f32.mrf.mxu0 }
 0x1a7   :  { %v560_v50 = vmul.f32 0.2, %v385_v46  ;;  %vm496_vm0 = vcmp.ge.f32.partialorder %v385_v46, 0.0 }
 0x1a9   :  { %v624_v51 = vsel %vm496_vm0, %v385_v46, %v560_v50  ;;  %v14839_v46 = vpop.f32.mrf.mxu1 }
 0x1aa   :  { %v14816_v53 = vpack.c.bf16 %v624_v51, %v21295_v34 }
 0x1ac   :  { %1065 = vmatmul.bf16.gmra.mxu2 %v14816_v53 }
 0x1ae   :  { %v388_v4 = vpop.f32.mrf.mxu0 }
 0x1af   :  { %vm497_vm2 = vcmp.ge.f32.partialorder %v388_v4, 0.0  ;;  %v561_v7 = vmul.f32 0.2, %v388_v4  ;;  %v1056_v11 = vpop.f32.mrf.mxu2 }
 0x1b0   :  { %v14825_v13 = vadd.f32 %v1056_v11, %v1007_v6 }
 0x1b1   :  { %v625_v16 = vsel %vm497_vm2, %v388_v4, %v561_v7  ;;  %427 = vmatmul.bf16.gmra.mxu0 %v223_v62  ;;  %v189_v62 = vld [vmem:[%s21283_s0 + $0x1b8] sm:$0xff]  ;;  %v1012_v7 = vpop.f32.mrf.mxu1 }
 0x1b2   :  { %v14827_v24 = vpack.c.bf16 %v625_v16, %v623_v15 }
 0x1b6   :  { %v390_v26 = vpop.f32.mrf.mxu0 }
 0x1b7   :  { %v562_v27 = vmul.f32 0.2, %v390_v26  ;;  %vm498_vm3 = vcmp.ge.f32.partialorder %v390_v26, 0.0  ;;  %v14841_v50 = vpop.f32.mrf.mxu2 }
 0x1b9   :  { %v626_v29 = vsel %vm498_vm3, %v390_v26, %v562_v27 }
 0x1ba   :  { %v14835_v37 = vpack.c.bf16 %v626_v29, %v624_v51  ;;  %v188_v51 = vld [vmem:[%s21283_s0 + $0x1b0] sm:$0xff] }
 0x1bb   :  { %v225_v4 = vpack.c.bf16 %v189_v62, %v188_v51  ;;  %v13548_v51 = vld [vmem:[%s21284_s2 + $0x170] sm:$0xff]  ;;  %v13605_v62 = vld [vmem:[%s21284_s2 + $0x338] sm:$0xff] }
 0x1bc   :  { %1516 = vmatpush.bf16.msrb.mxu3 %v13548_v51  ;;  %2626 = vmatpush.bf16.msrb.mxu0 %v13605_v62 }
 0x1be   :  { %v393_v40 = vpop.f32.mrf.mxu0 }
 0x1bf   :  { %vm499_vm4 = vcmp.ge.f32.partialorder %v393_v40, 0.0  ;;  %v563_v41 = vmul.f32 0.2, %v393_v40 }
 0x1c1   :  { %v627_v42 = vsel %vm499_vm4, %v393_v40, %v563_v41  ;;  %432 = vmatmul.bf16.gmra.mxu0 %v224_v39  ;;  %v190_v40 = vld [vmem:[%s21283_s0 + $0x1c0] sm:$0xff]  ;;  %v191_v41 = vld [vmem:[%s21283_s0 + $0x1c8] sm:$0xff] }
 0x1c2   :  { %v14837_v44 = vpack.c.bf16 %v627_v42, %v625_v16 }
 0x1c4   :  { %21361 = vst [vmem:[#allocation22_spill] sm:$0xff] %v14837_v44 }
 0x1c6   :  { %v395_v45 = vpop.f32.mrf.mxu0 }
 0x1c7   :  { %v564_v56 = vmul.f32 0.2, %v395_v45  ;;  %vm500_vm5 = vcmp.ge.f32.partialorder %v395_v45, 0.0 }
 0x1c9   :  { %v628_v60 = vsel %vm500_vm5, %v395_v45, %v564_v56 }
 0x1ca   :  { %v14843_v61 = vpack.c.bf16 %v628_v60, %v626_v29 }
 0x1cc   :  { %1070 = vmatmul.bf16.gmra.mxu2 %v14843_v61 }
 0x1ce   :  { %v398_v6 = vpop.f32.mrf.mxu0 }
 0x1cf   :  { %vm501_vm6 = vcmp.ge.f32.partialorder %v398_v6, 0.0  ;;  %v565_v11 = vmul.f32 0.2, %v398_v6  ;;  %v1061_v15 = vpop.f32.mrf.mxu2 }
 0x1d0   :  { %v14852_v16 = vadd.f32 %v1061_v15, %v1012_v7  ;;  %v13603_v15 = vld [vmem:[%s21284_s2 + $0x328] sm:$0xff] }
 0x1d1   :  { %v14854_v26 = vsel %vm501_vm6, %v398_v6, %v565_v11  ;;  %437 = vmatmul.bf16.gmra.mxu0 %v225_v4  ;;  %v13547_v4 = vld [vmem:[%s21284_s2 + $0x168] sm:$0xff]  ;;  %v13546_v11 = vld [vmem:[%s21284_s2 + $0x160] sm:$0xff] }
 0x1d2   :  { %21362 = vst [vmem:[#allocation23_spill] sm:$0xff] %v14854_v26  ;;  %v14857_v27 = vpack.c.bf16 %v14854_v26, %v627_v42  ;;  %v226_v42 = vpack.c.bf16 %v191_v41, %v190_v40  ;;  %1517 = vmatpush.bf16.msrb.mxu3 %v13547_v4  ;;  %v13545_v40 = vld [vmem:[%s21284_s2 + $0x158] sm:$0xff]  ;;  %v13602_v41 = vld [vmem:[%s21284_s2 + $0x320] sm:$0xff] }
 0x1d6   :  { %v400_v29 = vpop.f32.mrf.mxu0  ;;  %1518 = vmatpush.bf16.msrb.mxu3 %v13546_v11 }
 0x1d7   :  { %vm502_vm7 = vcmp.ge.f32.partialorder %v400_v29, 0.0  ;;  %v566_v30 = vmul.f32 0.2, %v400_v29 }
 0x1d9   :  { %v630_v39 = vsel %vm502_vm7, %v400_v29, %v566_v30 }
 0x1da   :  { %v14868_v45 = vpack.c.bf16 %v630_v39, %v628_v60  ;;  %v13604_v60 = vld [vmem:[%s21284_s2 + $0x330] sm:$0xff]  ;;  %v193_v39 = vld [vmem:[%s21283_s0 + $0x1d8] sm:$0xff]  ;;  %1519 = vmatpush.bf16.msrb.mxu3 %v13545_v40 }
 0x1db   :  { %2627 = vmatpush.bf16.msrb.mxu0 %v13604_v60  ;;  %v227_v51 = vpack.c.bf16 %v193_v39, %v192_v33  ;;  %v13544_v60 = vld [vmem:[%s21284_s2 + $0x150] sm:$0xff] }
 0x1dc   :  { %21363 = vst [vmem:[#allocation24_spill] sm:$0xff] %v14868_v45  ;;  %v13600_v33 = vld [vmem:[%s21284_s2 + $0x310] sm:$0xff] }
 0x1de   :  { %v403_v56 = vpop.f32.mrf.mxu0  ;;  %1520 = vmatpush.bf16.msrb.mxu3 %v13544_v60  ;;  %v13598_v60 = vld [vmem:[%s21284_s2 + $0x300] sm:$0xff] }
 0x1df   :  { %2628 = vmatpush.bf16.msrb.mxu0 %v13603_v15  ;;  %vm503_vm9 = vcmp.ge.f32.partialorder %v403_v56, 0.0  ;;  %v13543_v15 = vld [vmem:[%s21284_s2 + $0x148] sm:$0xff] }
 0x1e1   :  { %442 = vmatmul.bf16.gmra.mxu0 %v226_v42  ;;  %v567_v42 = vmul.f32 0.2, %v403_v56 }
 0x1e2   :  { %1521 = vmatpush.bf16.msrb.mxu3 %v13543_v15 }
 0x1e3   :  { %2629 = vmatpush.bf16.msrb.mxu0 %v13602_v41  ;;  %v13599_v41 = vld [vmem:[%s21284_s2 + $0x308] sm:$0xff] }
 0x1e6   :  { %v405_v6 = vpop.f32.mrf.mxu0 }
 0x1e7   :  { %v568_v7 = vmul.f32 0.2, %v405_v6  ;;  %vm504_vm8 = vcmp.ge.f32.partialorder %v405_v6, 0.0 }
 0x1e9   :  { %v632_v29 = vsel %vm504_vm8, %v405_v6, %v568_v7  ;;  %v13601_v6 = vld [vmem:[%s21284_s2 + $0x318] sm:$0xff]  ;;  %v631_v7 = vsel %vm503_vm9, %v403_v56, %v567_v42  ;;  %v13542_v56 = vld [vmem:[%s21284_s2 + $0x140] sm:$0xff] }
 0x1ea   :  { %v786_v30 = vpack.c.bf16 %v632_v29, %v21295_v34  ;;  %2630 = vmatpush.bf16.msrb.mxu0 %v13601_v6  ;;  %1522 = vmatpush.bf16.msrb.mxu3 %v13542_v56 }
 0x1ec   :  { %1026 = vmatmul.bf16.gmra.mxu1 %v786_v30  ;;  %1230 = vmatmul.bf16.gmra.mxu3 %v786_v30 }
 0x1ee   :  { %v408_v62 = vpop.f32.mrf.mxu0  ;;  %2631 = vmatpush.bf16.msrb.mxu0 %v13600_v33 }
 0x1ef   :  { %vm505_vm10 = vcmp.ge.f32.partialorder %v408_v62, 0.0  ;;  %v569_v4 = vmul.f32 0.2, %v408_v62 }
 0x1f1   :  { %v633_v11 = vsel %vm505_vm10, %v408_v62, %v569_v4  ;;  %447 = vmatmul.bf16.gmra.mxu0 %v227_v51  ;;  %v194_v51 = vld [vmem:[%s21283_s0 + $0x1e0] sm:$0xff]  ;;  %v195_v62 = vld [vmem:[%s21283_s0 + $0x1e8] sm:$0xff] }
 0x1f2   :  { %v14910_v30 = vpack.c.bf16 %v633_v11, %v631_v7  ;;  %2632 = vmatpush.bf16.msrb.mxu0 %v13599_v41  ;;  %v228_v6 = vpack.c.bf16 %v195_v62, %v194_v51  ;;  %v196_v41 = vld [vmem:[%s21283_s0 + $0x1f0] sm:$0xff]  ;;  %v197_v51 = vld [vmem:[%s21283_s0 + $0x1f8] sm:$0xff]  ;;  %v14940_v62 = vpop.f32.mrf.mxu3 }
 0x1f6   :  { %v410_v39 = vpop.f32.mrf.mxu0  ;;  %2633 = vmatpush.bf16.msrb.mxu0 %v13598_v60  ;;  %v229_v60 = vpack.c.bf16 %v197_v51, %v196_v41 }
 0x1f7   :  { %v570_v40 = vmul.f32 0.2, %v410_v39  ;;  %vm506_vm11 = vcmp.ge.f32.partialorder %v410_v39, 0.0 }
 0x1f9   :  { %v634_v42 = vsel %vm506_vm11, %v410_v39, %v570_v40 }
 0x1fa   :  { %v14927_v4 = vpack.c.bf16 %v634_v42, %v632_v29 }
 0x1fc   :  { %21364 = vst [vmem:[#allocation25_spill] sm:$0xff] %v14927_v4 }
 0x1fe   :  { %v413_v7 = vpop.f32.mrf.mxu0 }
 0x1ff   :  { %vm507_vm12 = vcmp.ge.f32.partialorder %v413_v7, 0.0  ;;  %v571_v15 = vmul.f32 0.2, %v413_v7 }
 0x201   :  { %v635_v33 = vsel %vm507_vm12, %v413_v7, %v571_v15  ;;  %452 = vmatmul.bf16.gmra.mxu0 %v228_v6  ;;  %v14947_v15 = vpop.f32.mrf.mxu3 }
 0x202   :  { %v14932_v39 = vpack.c.bf16 %v635_v33, %v633_v11 }
 0x204   :  { %21365 = vst [vmem:[#allocation26_spill] sm:$0xff] %v14932_v39 }
 0x206   :  { %v415_v40 = vpop.f32.mrf.mxu0 }
 0x207   :  { %v572_v56 = vmul.f32 0.2, %v415_v40  ;;  %vm508_vm13 = vcmp.ge.f32.partialorder %v415_v40, 0.0 }
 0x209   :  { %v636_v10 = vsel %vm508_vm13, %v415_v40, %v572_v56  ;;  %v14954_v41 = vpop.f32.mrf.mxu3 }
 0x20a   :  { %v788_v29 = vpack.c.bf16 %v636_v10, %v634_v42 }
 0x20c   :  { %1031 = vmatmul.bf16.gmra.mxu1 %v788_v29  ;;  %1235 = vmatmul.bf16.gmra.mxu3 %v788_v29 }
 0x20e   :  { %v418_v11 = vpop.f32.mrf.mxu0 }
 0x20f   :  { %vm509_vm14 = vcmp.ge.f32.partialorder %v418_v11, 0.0  ;;  %v573_v6 = vmul.f32 0.2, %v418_v11 }
 0x211   :  { %v14942_v7 = vsel %vm509_vm14, %v418_v11, %v573_v6  ;;  %457 = vmatmul.bf16.gmra.mxu0 %v229_v60  ;;  %v14959_v60 = vpop.f32.mrf.mxu2 }
 0x212   :  { %21366 = vst [vmem:[#allocation27_spill] sm:$0xff] %v14942_v7  ;;  %v14945_v42 = vpack.c.bf16 %v14942_v7, %v635_v33  ;;  %v14957_v33 = vpop.f32.mrf.mxu1 }
 0x214   :  { %21367 = vst [vmem:[#allocation28_spill] sm:$0xff] %v14945_v42 }
 0x216   :  { %v420_v40 = vpop.f32.mrf.mxu0 }
 0x217   :  { %vm510_vm15 = vcmp.ge.f32.partialorder %v420_v40, 0.0  ;;  %v574_v56 = vmul.f32 0.2, %v420_v40 }
 0x219   :  { %v638_v28 = vsel %vm510_vm15, %v420_v40, %v574_v56  ;;  %v14961_v40 = vpop.f32.mrf.mxu3 }
 0x21a   :  { %v14949_v3 = vpack.c.bf16 %v638_v28, %v636_v10  ;;  %v1017_v28 = vpop.f32.mrf.mxu1 }
 0x21c   :  { %1523 = vmatmul.bf16.vlgmr.msrb.gmra.mxu3 %v1323_v57 }
 0x21e   :  { %v423_v29 = vpop.f32.mrf.mxu0 }
 0x21f   :  { %v575_v54 = vmul.f32 0.2, %v423_v29  ;;  %vm511_vm1 = vcmp.ge.f32.partialorder %v423_v29, 0.0 }
 0x221   :  { %2634 = vmatmul.bf16.vlgmr.msrb.gmra.mxu0 %v21292_v48  ;;  %v14975_v26 = vpop.f32.mrf.mxu3 }
 0x226   :  { %v425_v51 = vpop.f32.mrf.mxu0 }
 0x227   :  { %v576_v11 = vmul.f32 0.2, %v425_v51  ;;  %vm512_vm0 = vcmp.ge.f32.partialorder %v425_v51, 0.0 }
 0x229   :  { %v640_v6 = vsel %vm512_vm0, %v425_v51, %v576_v11  ;;  %v639_v51 = vsel %vm511_vm1, %v423_v29, %v575_v54 }
 0x22a   :  { %v14964_v10 = vpack.c.bf16 %v640_v6, %v21295_v34 }
 0x22c   :  { %1075 = vmatmul.bf16.gmra.mxu2 %v14964_v10  ;;  %1528 = vmatmul.bf16.gmra.mxu3 %v1325_v22 }
 0x22e   :  { %v428_v57 = vpop.f32.mrf.mxu0 }
 0x22f   :  { %vm513_vm2 = vcmp.ge.f32.partialorder %v428_v57, 0.0  ;;  %v577_v56 = vmul.f32 0.2, %v428_v57  ;;  %v1066_v17 = vpop.f32.mrf.mxu2 }
 0x230   :  { %v14970_v48 = vadd.f32 %v1066_v17, %v1017_v28  ;;  %v14983_v17 = vpop.f32.mrf.mxu3 }
 0x231   :  { %v641_v11 = vsel %vm513_vm2, %v428_v57, %v577_v56  ;;  %2639 = vmatmul.bf16.gmra.mxu0 %v21368_v55  ;;  %v13540_v57 = vld [vmem:[%s21284_s2 + $0x130] sm:$0xff]  ;;  %v14999_v56 = vpop.f32.mrf.mxu1 }
 0x232   :  { %v14973_v34 = vpack.c.bf16 %v641_v11, %v639_v51  ;;  %1467 = vmatpush.bf16.msrb.mxu2 %v13540_v57 }
 0x236   :  { %v430_v44 = vpop.f32.mrf.mxu0 }
 0x237   :  { %v578_v21 = vmul.f32 0.2, %v430_v44  ;;  %vm514_vm3 = vcmp.ge.f32.partialorder %v430_v44, 0.0  ;;  %v15001_v51 = vpop.f32.mrf.mxu2 }
 0x239   :  { %v642_v22 = vsel %vm514_vm3, %v430_v44, %v578_v21  ;;  %v13539_v21 = vld [vmem:[%s21284_s2 + $0x128] sm:$0xff]  ;;  %v14997_v44 = vpop.f32.mrf.mxu3 }
 0x23a   :  { %v14977_v9 = vpack.c.bf16 %v642_v22, %v640_v6  ;;  %1468 = vmatpush.bf16.msrb.mxu2 %v13539_v21  ;;  %21371 = vst [vmem:[#allocation31_spill] sm:$0xff] %v14997_v44 }
 0x23c   :  { %21369 = vst [vmem:[#allocation29_spill] sm:$0xff] %v14977_v9  ;;  %1533 = vmatmul.bf16.gmra.mxu3 %v14743_v49 }
 0x23e   :  { %v433_v29 = vpop.f32.mrf.mxu0 }
 0x23f   :  { %vm515_vm4 = vcmp.ge.f32.partialorder %v433_v29, 0.0  ;;  %v579_v54 = vmul.f32 0.2, %v433_v29 }
 0x241   :  { %v14988_v28 = vsel %vm515_vm4, %v433_v29, %v579_v54  ;;  %2644 = vmatmul.bf16.gmra.mxu0 %v14709_v5  ;;  %v13538_v54 = vld [vmem:[%s21284_s2 + $0x120] sm:$0xff] }
 0x242   :  { %v14995_v25 = vpack.c.bf16 %v14988_v28, %v641_v11  ;;  %1469 = vmatpush.bf16.msrb.mxu2 %v13538_v54  ;;  %v13537_v11 = vld [vmem:[%s21284_s2 + $0x118] sm:$0xff] }
 0x244   :  { %21370 = vst [vmem:[#allocation30_spill] sm:$0xff] %v14995_v25  ;;  %v1022_v25 = vpop.f32.mrf.mxu1 }
 0x246   :  { %v435_v6 = vpop.f32.mrf.mxu0  ;;  %1470 = vmatpush.bf16.msrb.mxu2 %v13537_v11 }
 0x247   :  { %v580_v29 = vmul.f32 0.2, %v435_v6  ;;  %vm516_vm5 = vcmp.ge.f32.partialorder %v435_v6, 0.0 }
 0x249   :  { %v644_v57 = vsel %vm516_vm5, %v435_v6, %v580_v29  ;;  %v15021_v6 = vpop.f32.mrf.mxu3  ;;  %v13535_v29 = vld [vmem:[%s21284_s2 + $0x108] sm:$0xff] }
 0x24a   :  { %v15006_v5 = vpack.c.bf16 %v644_v57, %v642_v22  ;;  %v13536_v22 = vld [vmem:[%s21284_s2 + $0x110] sm:$0xff]  ;;  %21373 = vst [vmem:[#allocation33_spill] sm:$0xff] %v15021_v6 }
 0x24b   :  { %1471 = vmatpush.bf16.msrb.mxu2 %v13536_v22  ;;  %v13517_v22 = vld [vmem:[%s21284_s2 + $0x78] sm:$0xff] }
 0x24c   :  { %1080 = vmatmul.bf16.gmra.mxu2 %v15006_v5  ;;  %1538 = vmatmul.bf16.gmra.mxu3 %v14767_v19 }
 0x24d   :  { %1241 = vmatpush.bf16.msrb.mxu1 %v13517_v22 }
 0x24e   :  { %v15013_v21 = vpop.f32.mrf.mxu0 }
 0x24f   :  { %v1071_v18 = vpop.f32.mrf.mxu2  ;;  %1472 = vmatpush.bf16.msrb.mxu2 %v13535_v29  ;;  %v13573_v29 = vld [vmem:[%s21284_s2 + $0x238] sm:$0xff]  ;;  %vm517_vm12 = vcmp.ge.f32.partialorder %v15013_v21, 0.0 }
 0x250   :  { %v15016_v9 = vadd.f32 %v1071_v18, %v1022_v25  ;;  %v13534_v18 = vld [vmem:[%s21284_s2 + $0x100] sm:$0xff]  ;;  %2046 = vmatpush.bf16.msra.mxu3 %v13573_v29 }
 0x251   :  { %2649 = vmatmul.bf16.gmra.mxu0 %v21310_v2  ;;  %v15031_v25 = vpop.f32.mrf.mxu3 }
 0x252   :  { %21372 = vst [vmem:[#allocation32_spill] sm:$0xff] %v15016_v9 }
 0x253   :  { %21374 = vst [vmem:[#allocation34_spill] sm:$0xff] %v15031_v25  ;;  %1473 = vmatpush.bf16.msrb.mxu2 %v13534_v18 }
 0x256   :  { %v440_v54 = vpop.f32.mrf.mxu0 }
 0x257   :  { %vm518_vm6 = vcmp.ge.f32.partialorder %v440_v54, 0.0  ;;  %v582_v11 = vmul.f32 0.2, %v440_v54 }
 0x259   :  { %v646_v45 = vsel %vm518_vm6, %v440_v54, %v582_v11  ;;  %v13515_v54 = vld [vmem:[%s21284_s2 + $0x68] sm:$0xff]  ;;  %v15056_v18 = vpop.f32.mrf.mxu3 }
 0x25a   :  { %v15033_v6 = vpack.c.bf16 %v646_v45, %v644_v57  ;;  %v13516_v45 = vld [vmem:[%s21284_s2 + $0x70] sm:$0xff]  ;;  %v13571_v11 = vld [vmem:[%s21284_s2 + $0x228] sm:$0xff]  ;;  %21376 = vst [vmem:[#allocation36_spill] sm:$0xff] %v15056_v18 }
 0x25b   :  { %v13572_v57 = vld [vmem:[%s21284_s2 + $0x230] sm:$0xff]  ;;  %1242 = vmatpush.bf16.msrb.mxu1 %v13516_v45  ;;  %v13514_v45 = vld [vmem:[%s21284_s2 + $0x60] sm:$0xff] }
 0x25c   :  { %21375 = vst [vmem:[#allocation35_spill] sm:$0xff] %v15033_v6  ;;  %1085 = vmatmul.bf16.gmra.mxu2 %v21368_v55  ;;  %1543 = vmatmul.bf16.gmra.mxu3 %v14827_v24 }
 0x25d   :  { %2047 = vmatpush.bf16.msra.mxu3 %v13572_v57  ;;  %v13570_v57 = vld [vmem:[%s21284_s2 + $0x220] sm:$0xff] }
 0x25e   :  { %v443_v2 = vpop.f32.mrf.mxu0 }
 0x25f   :  { %1243 = vmatpush.bf16.msrb.mxu1 %v13515_v54  ;;  %v13513_v54 = vld [vmem:[%s21284_s2 + $0x58] sm:$0xff]  ;;  %vm519_vm8 = vcmp.ge.f32.partialorder %v443_v2, 0.0 }
 0x261   :  { %2654 = vmatmul.bf16.gmra.mxu0 %v14794_v12  ;;  %2048 = vmatpush.bf16.msra.mxu3 %v13571_v11  ;;  %v15068_v18 = vpop.f32.mrf.mxu3  ;;  %v13569_v11 = vld [vmem:[%s21284_s2 + $0x218] sm:$0xff] }
 0x262   :  { %21379 = vst [vmem:[#allocation38_spill] sm:$0xff] %v15068_v18  ;;  %v13568_v18 = vld [vmem:[%s21284_s2 + $0x210] sm:$0xff] }
 0x263   :  { %1244 = vmatpush.bf16.msrb.mxu1 %v13514_v45 }
 0x265   :  { %2049 = vmatpush.bf16.msra.mxu3 %v13570_v57  ;;  %v13512_v57 = vld [vmem:[%s21284_s2 + $0x50] sm:$0xff] }
 0x266   :  { %v445_v22 = vpop.f32.mrf.mxu0 }
 0x267   :  { %v584_v29 = vmul.f32 0.2, %v445_v22  ;;  %vm520_vm7 = vcmp.ge.f32.partialorder %v445_v22, 0.0  ;;  %1245 = vmatpush.bf16.msrb.mxu1 %v13513_v54  ;;  %v13511_v54 = vld [vmem:[%s21284_s2 + $0x48] sm:$0xff] }
 0x269   :  { %v15064_v12 = vsel %vm520_vm7, %v445_v22, %v584_v29  ;;  %v583_v22 = vmul.f32 0.2, %v443_v2  ;;  %2050 = vmatpush.bf16.msra.mxu3 %v13569_v11  ;;  %v13567_v11 = vld [vmem:[%s21284_s2 + $0x208] sm:$0xff] }
 0x26a   :  { %21377 = vst [vmem:[#allocation37_spill] sm:$0xff] %v15064_v12  ;;  %v866_v6 = vpack.c.bf16 %v15064_v12, %v21378_v20 }
 0x26b   :  { %v15085_v25 = vsel %vm519_vm8, %v443_v2, %v583_v22  ;;  %1246 = vmatpush.bf16.msrb.mxu1 %v13512_v57  ;;  %v15099_v2 = vpop.f32.mrf.mxu3 }
 0x26c   :  { %1036 = vmatmul.bf16.gmra.mxu1 %v866_v6  ;;  %1090 = vmatmul.bf16.gmra.mxu2 %v21368_v55  ;;  %v21314_v6 = vpack.c.bf16 0.0, %v14802_v35  ;;  %21380 = vst [vmem:[#allocation39_spill] sm:$0xff] %v15085_v25 }
 0x26d   :  { %1548 = vmatmul.bf16.gmra.mxu3 %v14857_v27  ;;  %21382 = vst [vmem:[#allocation41_spill] sm:$0xff] %v15099_v2 }
 0x26e   :  { %v448_v29 = vpop.f32.mrf.mxu0  ;;  %2051 = vmatpush.bf16.msra.mxu3 %v13568_v18  ;;  %v13510_v18 = vld [vmem:[%s21284_s2 + $0x40] sm:$0xff] }
 0x26f   :  { %vm521_vm9 = vcmp.ge.f32.partialorder %v448_v29, 0.0  ;;  %v585_v45 = vmul.f32 0.2, %v448_v29  ;;  %1247 = vmatpush.bf16.msrb.mxu1 %v13511_v54 }
 0x271   :  { %v15087_v44 = vsel %vm521_vm9, %v448_v29, %v585_v45  ;;  %2659 = vmatmul.bf16.gmra.mxu0 %v21314_v6  ;;  %v13566_v45 = vld [vmem:[%s21284_s2 + $0x200] sm:$0xff] }
 0x272   :  { %21381 = vst [vmem:[#allocation40_spill] sm:$0xff] %v15087_v44  ;;  %2052 = vmatpush.bf16.msra.mxu3 %v13567_v11  ;;  %v13554_v44 = vld [vmem:[%s21284_s2 + $0x1a0] sm:$0xff] }
 0x273   :  { %1248 = vmatpush.bf16.msrb.mxu1 %v13510_v18  ;;  %v15112_v54 = vpop.f32.mrf.mxu3 }
 0x274   :  { %21384 = vst [vmem:[#allocation43_spill] sm:$0xff] %v15112_v54 }
 0x276   :  { %v450_v22 = vpop.f32.mrf.mxu0  ;;  %2053 = vmatpush.bf16.msra.mxu3 %v13566_v45 }
 0x277   :  { %v586_v29 = vmul.f32 0.2, %v450_v22  ;;  %vm522_vm10 = vcmp.ge.f32.partialorder %v450_v22, 0.0 }
 0x279   :  { %v15107_v57 = vsel %vm522_vm10, %v450_v22, %v586_v29  ;;  %v581_v29 = vmul.f32 0.2, %v15013_v21 }
 0x27a   :  { %21383 = vst [vmem:[#allocation42_spill] sm:$0xff] %v15107_v57 }
 0x27b   :  { %v15122_v45 = vpop.f32.mrf.mxu3  ;;  %v15125_v12 = vsel %vm517_vm12, %v15013_v21, %v581_v29  ;;  %v15150_v29 = vpop.f32.mrf.mxu1 }
 0x27c   :  { %1474 = vmatmul.bf16.vlgmr.msrb.gmra.mxu2 %v21368_v55  ;;  %21386 = vst [vmem:[#allocation45_spill] sm:$0xff] %v15122_v45 }
 0x27d   :  { %1553 = vmatmul.bf16.gmra.mxu3 %v14973_v34  ;;  %21387 = vst [vmem:[#allocation46_spill] sm:$0xff] %v15125_v12 }
 0x27e   :  { %v453_v11 = vpop.f32.mrf.mxu0 }
 0x27f   :  { %vm523_vm11 = vcmp.ge.f32.partialorder %v453_v11, 0.0  ;;  %v587_v9 = vmul.f32 0.2, %v453_v11 }
 0x281   :  { %v15115_v35 = vsel %vm523_vm11, %v453_v11, %v587_v9  ;;  %2664 = vmatmul.bf16.gmra.mxu0 %v14932_v39  ;;  %v15133_v11 = vpack.c.bf16 %v15125_v12, %v14988_v28  ;;  %v21319_v39 = vpack.c.bf16 0.0, %v14942_v7 }
 0x282   :  { %21385 = vst [vmem:[#allocation44_spill] sm:$0xff] %v15115_v35 }
 0x286   :  { %v455_v18 = vpop.f32.mrf.mxu0 }
 0x287   :  { %v588_v6 = vmul.f32 0.2, %v455_v18  ;;  %vm524_vm13 = vcmp.ge.f32.partialorder %v455_v18, 0.0 }
 0x289   :  { %v15127_v25 = vsel %vm524_vm13, %v455_v18, %v588_v6  ;;  %v775_v6 = vpack.c.bf16 %v14621_v63, %v21378_v20  ;;  %v15152_v18 = vpop.f32.mrf.mxu2 }
 0x28a   :  { %21388 = vst [vmem:[#allocation47_spill] sm:$0xff] %v15127_v25  ;;  %v868_v9 = vpack.c.bf16 %v15127_v25, %v15107_v57 }
 0x28c   :  { %1041 = vmatmul.bf16.gmra.mxu1 %v868_v9  ;;  %1479 = vmatmul.bf16.gmra.mxu2 %v21368_v55 }
 0x28d   :  { %1558 = vmatmul.bf16.gmra.mxu3 %v15133_v11 }
 0x28f   :  { %v15137_v22 = vpop.f32.mrf.mxu3 }
 0x290   :  { %21389 = vst [vmem:[#allocation48_spill] sm:$0xff] %v15137_v22 }
 0x291   :  { %2669 = vmatmul.bf16.gmra.mxu0 %v21319_v39  ;;  %v21391_v39 = vpack.c.bf16 %v14647_v14, %v14623_v0 }
 0x297   :  { %v15142_v21 = vpop.f32.mrf.mxu3 }
 0x298   :  { %21390 = vst [vmem:[#allocation49_spill] sm:$0xff] %v15142_v21 }
 0x29c   :  { %1249 = vmatmul.bf16.vlgmr.msrb.gmra.mxu1 %v775_v6  ;;  %1484 = vmatmul.bf16.gmra.mxu2 %v14687_v47  ;;  %v1027_v6 = vpop.f32.mrf.mxu1 }
 0x29d   :  { %2054 = vmatmul.bf16.vlgmr.msra.gmra.mxu3 %v21368_v55 }
 0x29f   :  { %v15148_v28 = vpop.f32.mrf.mxu3 }
 0x2a7   :  { %v15154_v9 = vpop.f32.mrf.mxu3 }
 0x2ac   :  { %1254 = vmatmul.bf16.gmra.mxu1 %v21391_v39  ;;  %1489 = vmatmul.bf16.gmra.mxu2 %v14723_v23  ;;  %v13565_v39 = vld [vmem:[%s21284_s2 + $0x1f8] sm:$0xff] }
 0x2ad   :  { %2059 = vmatmul.bf16.gmra.mxu3 %v21368_v55  ;;  %1805 = vmatpush.bf16.msra.mxu2 %v13565_v39  ;;  %v13562_v39 = vld [vmem:[%s21284_s2 + $0x1e0] sm:$0xff] }
 0x2af   :  { %v1076_v20 = vpop.f32.mrf.mxu2  ;;  %v15161_v7 = vpop.f32.mrf.mxu3 }
 0x2b0   :  { %v15163_v12 = vadd.f32 %v1076_v20, %v1027_v6  ;;  %v13564_v20 = vld [vmem:[%s21284_s2 + $0x1f0] sm:$0xff]  ;;  %v15181_v6 = vpop.f32.mrf.mxu1 }
 0x2b1   :  { %1806 = vmatpush.bf16.msra.mxu2 %v13564_v20  ;;  %v13561_v20 = vld [vmem:[%s21284_s2 + $0x1d8] sm:$0xff] }
 0x2b7   :  { %v15165_v25 = vpop.f32.mrf.mxu3  ;;  %v15183_v14 = vpop.f32.mrf.mxu2 }
 0x2bc   :  { %1259 = vmatmul.bf16.gmra.mxu1 %v14734_v38  ;;  %1494 = vmatmul.bf16.gmra.mxu2 %v14784_v52  ;;  %v13563_v38 = vld [vmem:[%s21284_s2 + $0x1e8] sm:$0xff] }
 0x2bd   :  { %2064 = vmatmul.bf16.gmra.mxu3 %v14701_v59  ;;  %1807 = vmatpush.bf16.msra.mxu2 %v13563_v38  ;;  %v1032_v38 = vpop.f32.mrf.mxu1 }
 0x2bf   :  { %v15173_v57 = vpop.f32.mrf.mxu3 }
 0x2c1   :  { %1808 = vmatpush.bf16.msra.mxu2 %v13562_v39  ;;  %v13560_v39 = vld [vmem:[%s21284_s2 + $0x1d0] sm:$0xff] }
 0x2c5   :  { %1809 = vmatpush.bf16.msra.mxu2 %v13561_v20  ;;  %v13558_v20 = vld [vmem:[%s21284_s2 + $0x1c0] sm:$0xff]  ;;  %v15230_v45 = vpop.f32.mrf.mxu1 }
 0x2c7   :  { %v15185_v63 = vpop.f32.mrf.mxu3 }
 0x2c9   :  { %1810 = vmatpush.bf16.msra.mxu2 %v13560_v39 }
 0x2cc   :  { %1264 = vmatmul.bf16.gmra.mxu1 %v14755_v8  ;;  %1499 = vmatmul.bf16.gmra.mxu2 %v14805_v36  ;;  %v13559_v8 = vld [vmem:[%s21284_s2 + $0x1c8] sm:$0xff] }
 0x2cd   :  { %2069 = vmatmul.bf16.gmra.mxu3 %v14731_v31  ;;  %1811 = vmatpush.bf16.msra.mxu2 %v13559_v8 }
 0x2cf   :  { %v1081_v0 = vpop.f32.mrf.mxu2  ;;  %v15196_v21 = vpop.f32.mrf.mxu3 }
 0x2d0   :  { %v15198_v35 = vadd.f32 %v1081_v0, %v1032_v38  ;;  %v13557_v0 = vld [vmem:[%s21284_s2 + $0x1b8] sm:$0xff] }
 0x2d1   :  { %1812 = vmatpush.bf16.msra.mxu2 %v13558_v20  ;;  %v13597_v38 = vld [vmem:[%s21284_s2 + $0x2f8] sm:$0xff]  ;;  %1756 = vmatpush.bf16.msra.mxu1 %v13557_v0  ;;  %v13596_v20 = vld [vmem:[%s21284_s2 + $0x2f0] sm:$0xff]  ;;  %v13555_v0 = vld [vmem:[%s21284_s2 + $0x1a8] sm:$0xff] }
 0x2d2   :  { %2385 = vmatpush.bf16.msrb.mxu3 %v13597_v38  ;;  %v13595_v38 = vld [vmem:[%s21284_s2 + $0x2e8] sm:$0xff] }
 0x2d6   :  { %2386 = vmatpush.bf16.msrb.mxu3 %v13596_v20 }
 0x2d7   :  { %v15206_v22 = vpop.f32.mrf.mxu2  ;;  %v15208_v31 = vpop.f32.mrf.mxu3 }
 0x2da   :  { %2387 = vmatpush.bf16.msrb.mxu3 %v13595_v38  ;;  %v13593_v38 = vld [vmem:[%s21284_s2 + $0x2d8] sm:$0xff] }
 0x2dc   :  { %1269 = vmatmul.bf16.gmra.mxu1 %v14816_v53  ;;  %1504 = vmatmul.bf16.gmra.mxu2 %v14910_v30  ;;  %v13556_v53 = vld [vmem:[%s21284_s2 + $0x1b0] sm:$0xff] }
 0x2dd   :  { %2074 = vmatmul.bf16.gmra.mxu3 %v14792_v1  ;;  %1757 = vmatpush.bf16.msra.mxu1 %v13556_v53  ;;  %v13594_v53 = vld [vmem:[%s21284_s2 + $0x2e0] sm:$0xff] }
 0x2de   :  { %2388 = vmatpush.bf16.msrb.mxu3 %v13594_v53  ;;  %v13551_v53 = vld [vmem:[%s21284_s2 + $0x188] sm:$0xff] }
 0x2df   :  { %v1086_v39 = vpop.f32.mrf.mxu2  ;;  %v15222_v8 = vpop.f32.mrf.mxu3 }
 0x2e1   :  { %1758 = vmatpush.bf16.msra.mxu1 %v13555_v0  ;;  %v13553_v0 = vld [vmem:[%s21284_s2 + $0x198] sm:$0xff] }
 0x2e2   :  { %2389 = vmatpush.bf16.msrb.mxu3 %v13593_v38 }
 0x2e5   :  { %1759 = vmatpush.bf16.msra.mxu1 %v13554_v44  ;;  %v13592_v44 = vld [vmem:[%s21284_s2 + $0x2d0] sm:$0xff] }
 0x2e6   :  { %2390 = vmatpush.bf16.msrb.mxu3 %v13592_v44 }
 0x2e7   :  { %v15238_v1 = vpop.f32.mrf.mxu2  ;;  %v15240_v59 = vpop.f32.mrf.mxu3 }
 0x2e8   :  { %21392 = vst [vmem:[#allocation50_spill] sm:$0xff] %v15238_v1  ;;  %v13550_v1 = vld [vmem:[%s21284_s2 + $0x180] sm:$0xff] }
 0x2e9   :  { %v1037_v20 = vpop.f32.mrf.mxu1  ;;  %1760 = vmatpush.bf16.msra.mxu1 %v13553_v0  ;;  %v13591_v0 = vld [vmem:[%s21284_s2 + $0x2c8] sm:$0xff] }
 0x2ea   :  { %v15248_v54 = vadd.f32 %v1086_v39, %v1037_v20  ;;  %2391 = vmatpush.bf16.msrb.mxu3 %v13591_v0 }
 0x2ec   :  { %21393 = vst [vmem:[#allocation51_spill] sm:$0xff] %v15248_v54  ;;  %1274 = vmatmul.bf16.gmra.mxu1 %v14843_v61  ;;  %1509 = vmatmul.bf16.gmra.mxu2 %v14945_v42  ;;  %v13552_v61 = vld [vmem:[%s21284_s2 + $0x190] sm:$0xff] }
 0x2ed   :  { %2079 = vmatmul.bf16.gmra.mxu3 %v14813_v43  ;;  %1761 = vmatpush.bf16.msra.mxu1 %v13552_v61  ;;  %v13590_v61 = vld [vmem:[%s21284_s2 + $0x2c0] sm:$0xff] }
 0x2ee   :  { %2392 = vmatpush.bf16.msrb.mxu3 %v13590_v61 }
 0x2ef   :  { %v1091_v39 = vpop.f32.mrf.mxu2 }
 0x2f0   :  { %v15259_v20 = vpop.f32.mrf.mxu3 }
 0x2f1   :  { %1762 = vmatpush.bf16.msra.mxu1 %v13551_v53  ;;  %v15286_v0 = vpop.f32.mrf.mxu1 }
 0x2f2   :  { %21395 = vst [vmem:[#allocation53_spill] sm:$0xff] %v15286_v0  ;;  %v1202_v0 = vadd.f32 %v14940_v62, %v14825_v13 }
 0x2f5   :  { %1763 = vmatpush.bf16.msra.mxu1 %v13550_v1 }
 0x2f7   :  { %v1093_v38 = vpop.f32.mrf.mxu2 }
 0x2f8   :  { %v15273_v43 = vpop.f32.mrf.mxu3 }
 0x2f9   :  { %21394 = vst [vmem:[#allocation52_spill] sm:$0xff] %v15273_v43 }
 0x2fc   :  { %1279 = vmatmul.bf16.gmra.mxu1 %v14964_v10  ;;  %1813 = vmatmul.bf16.vlgmr.msra.gmra.mxu2 %v14743_v49 }
 0x2fd   :  { %2084 = vmatmul.bf16.gmra.mxu3 %v14927_v4 }
 0x2ff   :  { %v1475_v44 = vpop.f32.mrf.mxu2 }
 0x300   :  { %v15284_v53 = vpop.f32.mrf.mxu3 }
 0x307   :  { %v1477_v54 = vpop.f32.mrf.mxu2 }
 0x308   :  { %v15288_v43 = vpop.f32.mrf.mxu3 }
 0x309   :  { %21396 = vst [vmem:[#allocation54_spill] sm:$0xff] %v15288_v43  ;;  %v1042_v2 = vpop.f32.mrf.mxu1 }
 0x30a   :  { %v15290_v42 = vadd.f32 %v1091_v39, %v1042_v2  ;;  %v1525_v2 = vadd.f32 %v15148_v28, %v1475_v44  ;;  %v1527_v28 = vadd.f32 %v15154_v9, %v1477_v54 }
 0x30c   :  { %1284 = vmatmul.bf16.gmra.mxu1 %v15006_v5  ;;  %1818 = vmatmul.bf16.gmra.mxu2 %v14767_v19  ;;  %v1059_v5 = vadd.f32 %v14841_v50, %v14839_v46 }
 0x30d   :  { %2089 = vmatmul.bf16.gmra.mxu3 %v14949_v3 }
 0x30e   :  { %v1204_v13 = vadd.f32 %v14947_v15, %v1059_v5 }
 0x30f   :  { %v1480_v49 = vpop.f32.mrf.mxu2 }
 0x310   :  { %v15297_v61 = vpop.f32.mrf.mxu3 }
 0x311   :  { %v1044_v1 = vpop.f32.mrf.mxu1 }
 0x312   :  { %v15295_v10 = vadd.f32 %v1093_v38, %v1044_v1 }
 0x317   :  { %v1482_v4 = vpop.f32.mrf.mxu2 }
 0x318   :  { %v15308_v38 = vpop.f32.mrf.mxu3 }
 0x319   :  { %v1250_v43 = vpop.f32.mrf.mxu1 }
 0x31a   :  { %v1251_v39 = vadd.f32 %v1250_v43, %v1202_v0  ;;  %v1530_v0 = vadd.f32 %v15161_v7, %v1480_v49  ;;  %v1532_v7 = vadd.f32 %v15165_v25, %v1482_v4  ;;  %v13589_v4 = vld [vmem:[%s21284_s2 + $0x2b8] sm:$0xff] }
 0x31b   :  { %2336 = vmatpush.bf16.msrb.mxu2 %v13589_v4 }
 0x31c   :  { %v15304_v19 = vadd.f32 %v1525_v2, %v1251_v39  ;;  %1764 = vmatmul.bf16.vlgmr.msra.gmra.mxu1 %v14687_v47  ;;  %1823 = vmatmul.bf16.gmra.mxu2 %v14827_v24  ;;  %v1207_v47 = vadd.f32 %v14954_v41, %v14852_v16  ;;  %v1064_v39 = vadd.f32 %v14959_v60, %v14957_v33 }
 0x31d   :  { %2393 = vmatmul.bf16.vlgmr.msrb.gmra.mxu3 %v14751_v58  ;;  %v1212_v60 = vadd.f32 %v14975_v26, %v14970_v48 }
 0x31e   :  { %v1209_v9 = vadd.f32 %v14961_v40, %v1064_v39  ;;  %v1069_v40 = vadd.f32 %v15001_v51, %v14999_v56  ;;  %v13588_v56 = vld [vmem:[%s21284_s2 + $0x2b0] sm:$0xff]  ;;  %v1074_v39 = vadd.f32 %v15152_v18, %v15150_v29 }
 0x31f   :  { %v1485_v1 = vpop.f32.mrf.mxu2  ;;  %2337 = vmatpush.bf16.msrb.mxu2 %v13588_v56  ;;  %v13584_v29 = vld [vmem:[%s21284_s2 + $0x290] sm:$0xff] }
 0x320   :  { %v15315_v46 = vpop.f32.mrf.mxu3  ;;  %v1214_v26 = vadd.f32 %v14983_v17, %v1069_v40  ;;  %v21397_v17 = vld [vmem:[#allocation32_spill] sm:$0xff]  ;;  %v21401_v40 = vld [vmem:[#allocation34_spill] sm:$0xff] }
 0x321   :  { %v1252_v62 = vpop.f32.mrf.mxu1  ;;  %v1222_v4 = vadd.f32 %v21401_v40, %v15163_v12  ;;  %v13581_v12 = vld [vmem:[%s21284_s2 + $0x278] sm:$0xff] }
 0x322   :  { %v1253_v43 = vadd.f32 %v1252_v62, %v1204_v13  ;;  %2095 = vmatpush.bf16.msrb.mxu1 %v13581_v12  ;;  %v13577_v40 = vld [vmem:[%s21284_s2 + $0x258] sm:$0xff] }
 0x324   :  { %v15313_v44 = vadd.f32 %v1527_v28, %v1253_v43 }
 0x327   :  { %v1487_v50 = vpop.f32.mrf.mxu2 }
 0x328   :  { %v15328_v5 = vpop.f32.mrf.mxu3  ;;  %v1537_v25 = vadd.f32 %v15185_v63, %v1487_v50 }
 0x329   :  { %v1255_v24 = vpop.f32.mrf.mxu1 }
 0x32a   :  { %v1256_v2 = vadd.f32 %v1255_v24, %v1207_v47  ;;  %v21398_v47 = vld [vmem:[#allocation31_spill] sm:$0xff] }
 0x32b   :  { %v1217_v24 = vadd.f32 %v21398_v47, %v21397_v17  ;;  %v13628_v17 = vld [vmem:[%s21284_s2 + $0x3f0] sm:$0xff] }
 0x32c   :  { %v15322_v15 = vadd.f32 %v1530_v0, %v1256_v2  ;;  %1769 = vmatmul.bf16.gmra.mxu1 %v14723_v23  ;;  %1828 = vmatmul.bf16.gmra.mxu2 %v14857_v27  ;;  %v1535_v27 = vadd.f32 %v15173_v57, %v1485_v1  ;;  %v13587_v57 = vld [vmem:[%s21284_s2 + $0x2a8] sm:$0xff]  ;;  %v13586_v0 = vld [vmem:[%s21284_s2 + $0x2a0] sm:$0xff] }
 0x32d   :  { %2398 = vmatmul.bf16.gmra.mxu3 %v14775_v32  ;;  %2338 = vmatpush.bf16.msrb.mxu2 %v13587_v57  ;;  %v13629_v57 = vld [vmem:[%s21284_s2 + $0x3f8] sm:$0xff] }
 0x32e   :  { %2965 = vmatpush.bf16.msra.mxu3 %v13629_v57 }
 0x32f   :  { %v1490_v54 = vpop.f32.mrf.mxu2 }
 0x330   :  { %v15336_v62 = vpop.f32.mrf.mxu3  ;;  %v1540_v50 = vadd.f32 %v15196_v21, %v1490_v54  ;;  %v21400_v54 = vld [vmem:[#allocation33_spill] sm:$0xff] }
 0x331   :  { %v1257_v16 = vpop.f32.mrf.mxu1  ;;  %2339 = vmatpush.bf16.msrb.mxu2 %v13586_v0 }
 0x332   :  { %v1258_v41 = vadd.f32 %v1257_v16, %v1209_v9  ;;  %v13585_v16 = vld [vmem:[%s21284_s2 + $0x298] sm:$0xff]  ;;  %2966 = vmatpush.bf16.msra.mxu3 %v13628_v17 }
 0x334   :  { %v15331_v49 = vadd.f32 %v1532_v7, %v1258_v41  ;;  %v21399_v7 = vld [vmem:[#allocation24_spill] sm:$0xff] }
 0x335   :  { %2340 = vmatpush.bf16.msrb.mxu2 %v13585_v16 }
 0x337   :  { %v1492_v33 = vpop.f32.mrf.mxu2 }
 0x338   :  { %v15358_v1 = vpop.f32.mrf.mxu3 }
 0x339   :  { %v1260_v23 = vpop.f32.mrf.mxu1  ;;  %2341 = vmatpush.bf16.msrb.mxu2 %v13584_v29 }
 0x33a   :  { %v1261_v13 = vadd.f32 %v1260_v23, %v1212_v60  ;;  %v1219_v60 = vadd.f32 %v21400_v54, %v1074_v39  ;;  %v13627_v39 = vld [vmem:[%s21284_s2 + $0x3e8] sm:$0xff]  ;;  %v13578_v54 = vld [vmem:[%s21284_s2 + $0x260] sm:$0xff] }
 0x33b   :  { %2967 = vmatpush.bf16.msra.mxu3 %v13627_v39  ;;  %v13622_v39 = vld [vmem:[%s21284_s2 + $0x3c0] sm:$0xff] }
 0x33c   :  { %v15340_v28 = vadd.f32 %v1535_v27, %v1261_v13  ;;  %1774 = vmatmul.bf16.gmra.mxu1 %v14784_v52  ;;  %1833 = vmatmul.bf16.gmra.mxu2 %v14973_v34  ;;  %v13583_v27 = vld [vmem:[%s21284_s2 + $0x288] sm:$0xff] }
 0x33d   :  { %2403 = vmatmul.bf16.gmra.mxu3 %v14835_v37  ;;  %2342 = vmatpush.bf16.msrb.mxu2 %v13583_v27 }
 0x33f   :  { %v1495_v48 = vpop.f32.mrf.mxu2 }
 0x340   :  { %v15376_v41 = vpop.f32.mrf.mxu3 }
 0x341   :  { %v1262_v51 = vpop.f32.mrf.mxu1 }
 0x342   :  { %v1263_v52 = vadd.f32 %v1262_v51, %v1214_v26  ;;  %v13582_v26 = vld [vmem:[%s21284_s2 + $0x280] sm:$0xff] }
 0x343   :  { %2343 = vmatpush.bf16.msrb.mxu2 %v13582_v26 }
 0x344   :  { %v15353_v34 = vadd.f32 %v1537_v25, %v1263_v52  ;;  %v1079_v25 = vadd.f32 %v15183_v14, %v15181_v6  ;;  %v21403_v14 = vld [vmem:[#allocation36_spill] sm:$0xff] }
 0x346   :  { %v1224_v6 = vadd.f32 %v21403_v14, %v1079_v25  ;;  %v21408_v25 = vld [vmem:[#allocation52_spill] sm:$0xff] }
 0x347   :  { %v1497_v43 = vpop.f32.mrf.mxu2 }
 0x348   :  { %v15393_v56 = vpop.f32.mrf.mxu3 }
 0x349   :  { %v1265_v63 = vpop.f32.mrf.mxu1 }
 0x34a   :  { %v1266_v2 = vadd.f32 %v1265_v63, %v1217_v24  ;;  %v1547_v24 = vadd.f32 %v15240_v59, %v1497_v43  ;;  %v21404_v59 = vld [vmem:[#allocation38_spill] sm:$0xff] }
 0x34b   :  { %v1227_v43 = vadd.f32 %v21404_v59, %v15198_v35  ;;  %v21405_v35 = vld [vmem:[#allocation28_spill] sm:$0xff] }
 0x34c   :  { %v15368_v9 = vadd.f32 %v1540_v50, %v1266_v2  ;;  %1779 = vmatmul.bf16.gmra.mxu1 %v14805_v36  ;;  %1838 = vmatmul.bf16.gmra.mxu2 %v15133_v11  ;;  %v1542_v36 = vadd.f32 %v15208_v31, %v1492_v33  ;;  %v1545_v33 = vadd.f32 %v15222_v8, %v1495_v48  ;;  %v21402_v8 = vld [vmem:[#allocation29_spill] sm:$0xff]  ;;  %v13579_v2 = vld [vmem:[%s21284_s2 + $0x268] sm:$0xff] }
 0x34d   :  { %2408 = vmatmul.bf16.gmra.mxu3 %v21399_v7 }
 0x34f   :  { %v1500_v21 = vpop.f32.mrf.mxu2 }
 0x350   :  { %v15417_v63 = vpop.f32.mrf.mxu3 }
 0x351   :  { %v1267_v18 = vpop.f32.mrf.mxu1 }
 0x352   :  { %v1268_v11 = vadd.f32 %v1267_v18, %v1219_v60  ;;  %v13626_v60 = vld [vmem:[%s21284_s2 + $0x3e0] sm:$0xff]  ;;  %v1550_v18 = vadd.f32 %v15259_v20, %v1500_v21  ;;  %v13625_v20 = vld [vmem:[%s21284_s2 + $0x3d8] sm:$0xff] }
 0x353   :  { %2968 = vmatpush.bf16.msra.mxu3 %v13626_v60  ;;  %v21411_v60 = vld [vmem:[#allocation53_spill] sm:$0xff] }
 0x354   :  { %v15383_v23 = vadd.f32 %v1542_v36, %v1268_v11  ;;  %v1084_v11 = vadd.f32 %v15206_v22, %v15230_v45  ;;  %v21407_v45 = vld [vmem:[#allocation41_spill] sm:$0xff] }
 0x356   :  { %v1229_v26 = vadd.f32 %v21407_v45, %v1084_v11  ;;  %v21413_v11 = vld [vmem:[#allocation40_spill] sm:$0xff] }
 0x357   :  { %v1502_v13 = vpop.f32.mrf.mxu2  ;;  %2969 = vmatpush.bf16.msra.mxu3 %v13625_v20  ;;  %v21416_v20 = vld [vmem:[#allocation12_spill] sm:$0xff] }
 0x358   :  { %v15448_v21 = vpop.f32.mrf.mxu3  ;;  %v1552_v12 = vadd.f32 %v21408_v25, %v1502_v13  ;;  %v21410_v13 = vld [vmem:[#allocation43_spill] sm:$0xff] }
 0x359   :  { %v1270_v31 = vpop.f32.mrf.mxu1 }
 0x35a   :  { %v1271_v51 = vadd.f32 %v1270_v31, %v1222_v4  ;;  %v21406_v4 = vld [vmem:[#allocation35_spill] sm:$0xff] }
 0x35b   :  { %v13576_v31 = vld [vmem:[%s21284_s2 + $0x250] sm:$0xff] }
 0x35c   :  { %v15398_v52 = vadd.f32 %v1545_v33, %v1271_v51  ;;  %1784 = vmatmul.bf16.gmra.mxu1 %v14910_v30  ;;  %1843 = vmatmul.bf16.gmra.mxu2 %v21368_v55  ;;  %v13580_v30 = vld [vmem:[%s21284_s2 + $0x270] sm:$0xff] }
 0x35d   :  { %2413 = vmatmul.bf16.gmra.mxu3 %v21402_v8  ;;  %2096 = vmatpush.bf16.msrb.mxu1 %v13580_v30  ;;  %v13624_v33 = vld [vmem:[%s21284_s2 + $0x3d0] sm:$0xff]  ;;  %v13623_v30 = vld [vmem:[%s21284_s2 + $0x3c8] sm:$0xff] }
 0x35e   :  { %2970 = vmatpush.bf16.msra.mxu3 %v13624_v33 }
 0x35f   :  { %v1505_v48 = vpop.f32.mrf.mxu2 }
 0x360   :  { %v15467_v17 = vpop.f32.mrf.mxu3 }
 0x361   :  { %v1272_v47 = vpop.f32.mrf.mxu1  ;;  %2097 = vmatpush.bf16.msrb.mxu1 %v13579_v2  ;;  %v13574_v2 = vld [vmem:[%s21284_s2 + $0x240] sm:$0xff] }
 0x362   :  { %v1273_v0 = vadd.f32 %v1272_v47, %v1224_v6  ;;  %v13575_v6 = vld [vmem:[%s21284_s2 + $0x248] sm:$0xff]  ;;  %2971 = vmatpush.bf16.msra.mxu3 %v13623_v30 }
 0x364   :  { %v15419_v50 = vadd.f32 %v1547_v24, %v1273_v0  ;;  %v21409_v24 = vld [vmem:[#allocation51_spill] sm:$0xff] }
 0x365   :  { %2098 = vmatpush.bf16.msrb.mxu1 %v13578_v54  ;;  %v1232_v0 = vadd.f32 %v21410_v13, %v21409_v24  ;;  %v21419_v13 = vld [vmem:[#allocation48_spill] sm:$0xff] }
 0x366   :  { %2972 = vmatpush.bf16.msra.mxu3 %v13622_v39 }
 0x367   :  { %v1507_v16 = vpop.f32.mrf.mxu2 }
 0x369   :  { %v1275_v29 = vpop.f32.mrf.mxu1  ;;  %2099 = vmatpush.bf16.msrb.mxu1 %v13577_v40 }
 0x36a   :  { %v1276_v36 = vadd.f32 %v1275_v29, %v1227_v43  ;;  %v1555_v43 = vadd.f32 %v15284_v53, %v1505_v48  ;;  %v21412_v29 = vld [vmem:[#allocation50_spill] sm:$0xff]  ;;  %v15488_v48 = vpop.f32.mrf.mxu3 }
 0x36c   :  { %v15438_v27 = vadd.f32 %v1550_v18, %v1276_v36  ;;  %1789 = vmatmul.bf16.gmra.mxu1 %v21405_v35  ;;  %1848 = vmatmul.bf16.gmra.mxu2 %v21368_v55  ;;  %v1089_v18 = vadd.f32 %v21412_v29, %v21411_v60  ;;  %v21414_v35 = vld [vmem:[#allocation39_spill] sm:$0xff] }
 0x36d   :  { %2418 = vmatmul.bf16.gmra.mxu3 %v21406_v4  ;;  %2100 = vmatpush.bf16.msrb.mxu1 %v13576_v31  ;;  %v21415_v40 = vpack.c.bf16 %v21413_v11, %v21414_v35  ;;  %v21417_v31 = vld [vmem:[#allocation45_spill] sm:$0xff]  ;;  %v21421_v29 = vld [vmem:[#allocation15_spill] sm:$0xff] }
 0x36e   :  { %v1234_v53 = vadd.f32 %v21417_v31, %v1089_v18  ;;  %v21422_v35 = vld [vmem:[#allocation49_spill] sm:$0xff] }
 0x36f   :  { %v1510_v22 = vpop.f32.mrf.mxu2 }
 0x370   :  { %v1560_v39 = vadd.f32 %v15297_v61, %v1510_v22 }
 0x371   :  { %v1277_v51 = vpop.f32.mrf.mxu1  ;;  %2101 = vmatpush.bf16.msrb.mxu1 %v13575_v6 }
 0x372   :  { %v1278_v57 = vadd.f32 %v1277_v51, %v1229_v26  ;;  %v458_v26 = vpop.f32.mrf.mxu0  ;;  %v21418_v51 = vld [vmem:[#allocation54_spill] sm:$0xff]  ;;  %v15500_v60 = vpop.f32.mrf.mxu3 }
 0x373   :  { %v1557_v25 = vadd.f32 %v21418_v51, %v1507_v16  ;;  %vm525_vm14 = vcmp.ge.f32.partialorder %v458_v26, 0.0 }
 0x374   :  { %v15459_v14 = vadd.f32 %v1552_v12, %v1278_v57  ;;  %v589_v57 = vmul.f32 0.2, %v458_v26 }
 0x375   :  { %2102 = vmatpush.bf16.msrb.mxu1 %v13574_v2 }
 0x376   :  { %v15493_v30 = vsel %vm525_vm14, %v458_v26, %v589_v57 }
 0x377   :  { %v1512_v47 = vpop.f32.mrf.mxu2 }
 0x378   :  { %v1562_v61 = vadd.f32 %v15308_v38, %v1512_v47 }
 0x379   :  { %v1280_v59 = vpop.f32.mrf.mxu1 }
 0x37a   :  { %v1281_v54 = vadd.f32 %v1280_v59, %v1232_v0  ;;  %v1237_v0 = vadd.f32 %v21419_v13, %v15290_v42  ;;  %v1239_v42 = vadd.f32 %v21422_v35, %v15295_v10  ;;  %v15511_v26 = vpop.f32.mrf.mxu3  ;;  %v21426_v13 = vld [vmem:[#allocation18_spill] sm:$0xff]  ;;  %v21427_v10 = vld [vmem:[#allocation16_spill] sm:$0xff] }
 0x37c   :  { %v15480_v36 = vadd.f32 %v1555_v43, %v1281_v54  ;;  %1794 = vmatmul.bf16.gmra.mxu1 %v21415_v40  ;;  %2344 = vmatmul.bf16.vlgmr.msrb.gmra.mxu2 %v21416_v20  ;;  %v21420_v43 = vld [vmem:[#allocation44_spill] sm:$0xff] }
 0x37d   :  { %2423 = vmatmul.bf16.gmra.mxu3 %v21368_v55  ;;  %v1626_v54 = vpack.c.bf16 %v15493_v30, %v21420_v43 }
 0x37f   :  { %v1814_v45 = vpop.f32.mrf.mxu2 }
 0x381   :  { %v1282_v33 = vpop.f32.mrf.mxu1 }
 0x382   :  { %v1283_v12 = vadd.f32 %v1282_v33, %v1234_v53  ;;  %v15521_v38 = vpop.f32.mrf.mxu3 }
 0x384   :  { %v15491_v6 = vadd.f32 %v1557_v25, %v1283_v12  ;;  %v21423_v25 = vld [vmem:[#allocation7_spill] sm:$0xff]  ;;  %v21424_v12 = vld [vmem:[#allocation6_spill] sm:$0xff] }
 0x385   :  { %v21425_v57 = vpack.c.bf16 %v21423_v25, %v21424_v12 }
 0x387   :  { %v1816_v24 = vpop.f32.mrf.mxu2 }
 0x389   :  { %v1285_v2 = vpop.f32.mrf.mxu1 }
 0x38a   :  { %v1286_v59 = vadd.f32 %v1285_v2, %v1237_v0 }
 0x38c   :  { %v15502_v16 = vadd.f32 %v1560_v39, %v1286_v59  ;;  %1799 = vmatmul.bf16.gmra.mxu1 %v1626_v54  ;;  %2349 = vmatmul.bf16.gmra.mxu2 %v21421_v29  ;;  %v15526_v59 = vpop.f32.mrf.mxu3  ;;  %v21428_v29 = vld [vmem:[#allocation17_spill] sm:$0xff] }
 0x38d   :  { %2428 = vmatmul.bf16.gmra.mxu3 %v21368_v55  ;;  %v21340_v35 = vpack.c.bf16 0.0, %v21428_v29 }
 0x38f   :  { %v1819_v18 = vpop.f32.mrf.mxu2 }
 0x391   :  { %v1287_v40 = vpop.f32.mrf.mxu1 }
 0x392   :  { %v1288_v22 = vadd.f32 %v1287_v40, %v1239_v42  ;;  %v21429_v40 = vld [vmem:[#allocation11_spill] sm:$0xff] }
 0x394   :  { %v15509_v20 = vadd.f32 %v1562_v61, %v1288_v22  ;;  %v21430_v61 = vld [vmem:[#allocation9_spill] sm:$0xff]  ;;  %v15538_v25 = vpop.f32.mrf.mxu3 }
 0x395   :  { %v21431_v22 = vpack.c.bf16 %v21429_v40, %v21430_v61  ;;  %v13619_v40 = vld [vmem:[%s21284_s2 + $0x3a8] sm:$0xff] }
 0x397   :  { %v1821_v31 = vpop.f32.mrf.mxu2 }
 0x399   :  { %v1765_v53 = vpop.f32.mrf.mxu1 }
 0x39a   :  { %v1815_v33 = vadd.f32 %v1814_v45, %v1765_v53  ;;  %v21432_v53 = vld [vmem:[#allocation21_spill] sm:$0xff] }
 0x39c   :  { %v15514_v51 = vadd.f32 %v1815_v33, %v15304_v19  ;;  %2103 = vmatmul.bf16.vlgmr.msrb.gmra.mxu1 %v21425_v57  ;;  %2354 = vmatmul.bf16.gmra.mxu2 %v21426_v13 }
 0x39d   :  { %2973 = vmatmul.bf16.vlgmr.msra.gmra.mxu3 %v21427_v10 }
 0x39f   :  { %v1824_v47 = vpop.f32.mrf.mxu2 }
 0x3a1   :  { %v1767_v0 = vpop.f32.mrf.mxu1 }
 0x3a2   :  { %v1817_v2 = vadd.f32 %v1816_v24, %v1767_v0  ;;  %v21433_v0 = vld [vmem:[#allocation25_spill] sm:$0xff] }
 0x3a4   :  { %v15524_v39 = vadd.f32 %v1817_v2, %v15313_v44  ;;  %v13621_v2 = vld [vmem:[%s21284_s2 + $0x3b8] sm:$0xff] }
 0x3a5   :  { %2916 = vmatpush.bf16.msra.mxu2 %v13621_v2 }
 0x3a7   :  { %v1826_v45 = vpop.f32.mrf.mxu2 }
 0x3a9   :  { %v1770_v19 = vpop.f32.mrf.mxu1 }
 0x3aa   :  { %v1820_v54 = vadd.f32 %v1819_v18, %v1770_v19  ;;  %v21435_v19 = vld [vmem:[#allocation22_spill] sm:$0xff] }
 0x3ac   :  { %v15530_v42 = vadd.f32 %v1820_v54, %v15322_v15  ;;  %2108 = vmatmul.bf16.gmra.mxu1 %v21431_v22  ;;  %2359 = vmatmul.bf16.gmra.mxu2 %v21432_v53  ;;  %v13618_v53 = vld [vmem:[%s21284_s2 + $0x3a0] sm:$0xff] }
 0x3ad   :  { %2978 = vmatmul.bf16.gmra.mxu3 %v21340_v35 }
 0x3af   :  { %v1829_v44 = vpop.f32.mrf.mxu2 }
 0x3b1   :  { %v1772_v24 = vpop.f32.mrf.mxu1 }
 0x3b2   :  { %v1822_v33 = vadd.f32 %v1821_v31, %v1772_v24  ;;  %v15551_v31 = vpop.f32.mrf.mxu3 }
 0x3b3   :  { %21434 = vst [vmem:[#allocation32_spill] sm:$0xff] %v15551_v31 }
 0x3b4   :  { %v15541_v18 = vadd.f32 %v1822_v33, %v15331_v49 }
 0x3b7   :  { %v1831_v12 = vpop.f32.mrf.mxu2 }
 0x3b9   :  { %v1775_v15 = vpop.f32.mrf.mxu1 }
 0x3ba   :  { %v1825_v57 = vadd.f32 %v1824_v47, %v1775_v15  ;;  %v13620_v47 = vld [vmem:[%s21284_s2 + $0x3b0] sm:$0xff]  ;;  %v15563_v61 = vpop.f32.mrf.mxu3 }
 0x3bb   :  { %2917 = vmatpush.bf16.msra.mxu2 %v13620_v47 }
 0x3bc   :  { %v15544_v13 = vadd.f32 %v1825_v57, %v15340_v28  ;;  %2113 = vmatmul.bf16.gmra.mxu1 %v14751_v58  ;;  %2364 = vmatmul.bf16.gmra.mxu2 %v21433_v0  ;;  %v13617_v57 = vld [vmem:[%s21284_s2 + $0x398] sm:$0xff] }
 0x3bd   :  { %2983 = vmatmul.bf16.gmra.mxu3 %v21435_v19 }
 0x3bf   :  { %v1834_v49 = vpop.f32.mrf.mxu2  ;;  %2918 = vmatpush.bf16.msra.mxu2 %v13619_v40 }
 0x3c1   :  { %v1777_v28 = vpop.f32.mrf.mxu1 }
 0x3c2   :  { %v1827_v54 = vadd.f32 %v1826_v45, %v1777_v28  ;;  %v21436_v45 = vld [vmem:[#allocation23_spill] sm:$0xff]  ;;  %v15582_v2 = vpop.f32.mrf.mxu3 }
 0x3c3   :  { %2919 = vmatpush.bf16.msra.mxu2 %v13618_v53  ;;  %v21339_v15 = vpack.c.bf16 0.0, %v21436_v45 }
 0x3c4   :  { %v15558_v58 = vadd.f32 %v1827_v54, %v15353_v34  ;;  %v13614_v54 = vld [vmem:[%s21284_s2 + $0x380] sm:$0xff] }
 0x3c7   :  { %v1836_v22 = vpop.f32.mrf.mxu2  ;;  %2920 = vmatpush.bf16.msra.mxu2 %v13617_v57 }
 0x3c9   :  { %v1780_v24 = vpop.f32.mrf.mxu1 }
 0x3ca   :  { %v1830_v33 = vadd.f32 %v1829_v44, %v1780_v24  ;;  %v13616_v44 = vld [vmem:[%s21284_s2 + $0x390] sm:$0xff]  ;;  %v15593_v24 = vpop.f32.mrf.mxu3 }
 0x3cb   :  { %2921 = vmatpush.bf16.msra.mxu2 %v13616_v44  ;;  %v13613_v44 = vld [vmem:[%s21284_s2 + $0x378] sm:$0xff] }
 0x3cc   :  { %v15570_v34 = vadd.f32 %v1830_v33, %v15368_v9  ;;  %2118 = vmatmul.bf16.gmra.mxu1 %v14775_v32  ;;  %2369 = vmatmul.bf16.gmra.mxu2 %v14949_v3  ;;  %v13615_v32 = vld [vmem:[%s21284_s2 + $0x388] sm:$0xff]  ;;  %v21438_v33 = vld [vmem:[#allocation37_spill] sm:$0xff] }
 0x3cd   :  { %2988 = vmatmul.bf16.gmra.mxu3 %v21339_v15  ;;  %2675 = vmatpush.bf16.msra.mxu1 %v13613_v44  ;;  %v13610_v44 = vld [vmem:[%s21284_s2 + $0x360] sm:$0xff] }
 0x3cf   :  { %v1839_v0 = vpop.f32.mrf.mxu2  ;;  %2922 = vmatpush.bf16.msra.mxu2 %v13615_v32 }
 0x3d1   :  { %v1782_v9 = vpop.f32.mrf.mxu1 }
 0x3d2   :  { %v1832_v47 = vadd.f32 %v1831_v12, %v1782_v9  ;;  %v21440_v9 = vld [vmem:[#allocation30_spill] sm:$0xff] }
 0x3d3   :  { %2923 = vmatpush.bf16.msra.mxu2 %v13614_v54 }
 0x3d4   :  { %v15585_v3 = vadd.f32 %v1832_v47, %v15383_v23  ;;  %v21437_v23 = vld [vmem:[#allocation42_spill] sm:$0xff]  ;;  %v460_v47 = vpop.f32.mrf.mxu0 }
 0x3d5   :  { %v21439_v57 = vpack.c.bf16 %v21437_v23, %v21438_v33  ;;  %vm526_vm15 = vcmp.ge.f32.partialorder %v460_v47, 0.0  ;;  %v15615_v23 = vpop.f32.mrf.mxu3 }
 0x3d7   :  { %v1841_v28 = vpop.f32.mrf.mxu2 }
 0x3d9   :  { %v1785_v40 = vpop.f32.mrf.mxu1 }
 0x3da   :  { %v1835_v53 = vadd.f32 %v1834_v49, %v1785_v40 }
 0x3dc   :  { %v15596_v12 = vadd.f32 %v1835_v53, %v15398_v52  ;;  %2123 = vmatmul.bf16.gmra.mxu1 %v14835_v37  ;;  %2374 = vmatmul.bf16.gmra.mxu2 %v21439_v57  ;;  %v13612_v52 = vld [vmem:[%s21284_s2 + $0x370] sm:$0xff]  ;;  %v590_v37 = vmul.f32 0.2, %v460_v47  ;;  %v13611_v53 = vld [vmem:[%s21284_s2 + $0x368] sm:$0xff] }
 0x3dd   :  { %2993 = vmatmul.bf16.gmra.mxu3 %v21440_v9  ;;  %2676 = vmatpush.bf16.msra.mxu1 %v13612_v52 }
 0x3de   :  { %v654_v57 = vsel %vm526_vm15, %v460_v47, %v590_v37  ;;  %v13609_v47 = vld [vmem:[%s21284_s2 + $0x358] sm:$0xff] }
 0x3df   :  { %v1844_v49 = vpop.f32.mrf.mxu2 }
 0x3e1   :  { %v1787_v32 = vpop.f32.mrf.mxu1  ;;  %2677 = vmatpush.bf16.msra.mxu1 %v13611_v53  ;;  %v13608_v53 = vld [vmem:[%s21284_s2 + $0x350] sm:$0xff] }
 0x3e2   :  { %v1837_v54 = vadd.f32 %v1836_v22, %v1787_v32  ;;  %v21441_v32 = vld [vmem:[#allocation47_spill] sm:$0xff] }
 0x3e3   :  { %v2206_v15 = vpack.c.bf16 %v654_v57, %v21441_v32 }
 0x3e4   :  { %v15610_v40 = vadd.f32 %v1837_v54, %v15419_v50  ;;  %v21442_v50 = vld [vmem:[#allocation46_spill] sm:$0xff] }
 0x3e5   :  { %2678 = vmatpush.bf16.msra.mxu1 %v13610_v44  ;;  %v21341_v54 = vpack.c.bf16 0.0, %v21442_v50 }
 0x3e7   :  { %v1846_v33 = vpop.f32.mrf.mxu2 }
 0x3e9   :  { %v1790_v22 = vpop.f32.mrf.mxu1  ;;  %2679 = vmatpush.bf16.msra.mxu1 %v13609_v47 }
 0x3ea   :  { %v1840_v52 = vadd.f32 %v1839_v0, %v1790_v22  ;;  %v15631_v0 = vpop.f32.mrf.mxu3  ;;  %v13606_v22 = vld [vmem:[%s21284_s2 + $0x340] sm:$0xff] }
 0x3ec   :  { %v15623_v35 = vadd.f32 %v1840_v52, %v15438_v27  ;;  %2128 = vmatmul.bf16.gmra.mxu1 %v21399_v7  ;;  %2379 = vmatmul.bf16.gmra.mxu2 %v2206_v15  ;;  %v13607_v15 = vld [vmem:[%s21284_s2 + $0x348] sm:$0xff] }
 0x3ed   :  { %2998 = vmatmul.bf16.gmra.mxu3 %v21341_v54  ;;  %2680 = vmatpush.bf16.msra.mxu1 %v13608_v53 }
 0x3ef   :  { %v1849_v37 = vpop.f32.mrf.mxu2 }
 0x3f1   :  { %v1792_v27 = vpop.f32.mrf.mxu1  ;;  %2681 = vmatpush.bf16.msra.mxu1 %v13607_v15 }
 0x3f2   :  { %v1842_v57 = vadd.f32 %v1841_v28, %v1792_v27  ;;  %v15645_v52 = vpop.f32.mrf.mxu3 }
 0x3f4   :  { %v15637_v7 = vadd.f32 %v1842_v57, %v15459_v14  ;;  %v21443_v14 = vld [vmem:[#allocation13_spill] sm:$0xff] }
 0x3f5   :  { %2682 = vmatpush.bf16.msra.mxu1 %v13606_v22 }
 0x3f7   :  { %v1851_v44 = vpop.f32.mrf.mxu2 }
 0x3f9   :  { %v1795_v32 = vpop.f32.mrf.mxu1 }
 0x3fa   :  { %v1845_v47 = vadd.f32 %v1844_v49, %v1795_v32  ;;  %v15653_v15 = vpop.f32.mrf.mxu3 }
 0x3fc   :  { %v15648_v28 = vadd.f32 %v1845_v47, %v15480_v36  ;;  %2133 = vmatmul.bf16.gmra.mxu1 %v21402_v8  ;;  %2924 = vmatmul.bf16.vlgmr.msra.gmra.mxu2 %v21443_v14  ;;  %v21445_v8 = vld [vmem:[#allocation14_spill] sm:$0xff] }
 0x3fd   :  { %3003 = vmatmul.bf16.gmra.mxu3 %v21368_v55  ;;  %v21446_v32 = vpack.c.bf16 0.0, %v21445_v8  ;;  %v21448_v8 = vld [vmem:[#allocation8_spill] sm:$0xff] }
 0x3ff   :  { %v2345_v53 = vpop.f32.mrf.mxu2 }
 0x401   :  { %v1797_v27 = vpop.f32.mrf.mxu1 }
 0x402   :  { %v1847_v57 = vadd.f32 %v1846_v33, %v1797_v27  ;;  %v15664_v47 = vpop.f32.mrf.mxu3 }
 0x404   :  { %v15656_v54 = vadd.f32 %v1847_v57, %v15491_v6 }
 0x406   :  { %21444 = vst [vmem:[#allocation31_spill] sm:$0xff] %v15656_v54 }
 0x407   :  { %v2347_v31 = vpop.f32.mrf.mxu2 }
 0x409   :  { %v1800_v49 = vpop.f32.mrf.mxu1 }
 0x40a   :  { %v1850_v22 = vadd.f32 %v1849_v37, %v1800_v49  ;;  %v15670_v57 = vpop.f32.mrf.mxu3 }
 0x40c   :  { %v15659_v36 = vadd.f32 %v1850_v22, %v15502_v16  ;;  %2138 = vmatmul.bf16.gmra.mxu1 %v21406_v4  ;;  %2929 = vmatmul.bf16.gmra.mxu2 %v21446_v32  ;;  %v2395_v4 = vadd.f32 %v15563_v61, %v2345_v53  ;;  %v21449_v32 = vld [vmem:[#allocation5_spill] sm:$0xff] }
 0x40d   :  { %3008 = vmatmul.bf16.gmra.mxu3 %v21368_v55  ;;  %v21450_v54 = vpack.c.bf16 %v21448_v8, %v21449_v32  ;;  %v21451_v55 = vld [vmem:[#allocation19_spill] sm:$0xff]  ;;  %v21453_v32 = vld [vmem:[#allocation20_spill] sm:$0xff] }
 0x40f   :  { %v2350_v33 = vpop.f32.mrf.mxu2 }
 0x411   :  { %v1802_v14 = vpop.f32.mrf.mxu1 }
 0x412   :  { %v1852_v27 = vadd.f32 %v1851_v44, %v1802_v14  ;;  %v15681_v14 = vpop.f32.mrf.mxu3 }
 0x414   :  { %v15668_v6 = vadd.f32 %v1852_v27, %v15509_v20 }
 0x416   :  { %21447 = vst [vmem:[#allocation24_spill] sm:$0xff] %v15668_v6 }
 0x417   :  { %v2352_v37 = vpop.f32.mrf.mxu2 }
 0x419   :  { %v2104_v16 = vpop.f32.mrf.mxu1 }
 0x41a   :  { %v2105_v49 = vadd.f32 %v2104_v16, %v15315_v46  ;;  %v2397_v46 = vadd.f32 %v15582_v2, %v2347_v31 }
 0x41c   :  { %v2144_v22 = vadd.f32 %v2105_v49, %v15514_v51  ;;  %2683 = vmatmul.bf16.vlgmr.msra.gmra.mxu1 %v21450_v54  ;;  %2934 = vmatmul.bf16.gmra.mxu2 %v21451_v55  ;;  %v21452_v49 = vld [vmem:[#allocation10_spill] sm:$0xff] }
 0x41d   :  { %v2485_v54 = vpack.c.bf16 0.0, %v21452_v49 }
 0x41e   :  { %v15679_v44 = vadd.f32 %v2395_v4, %v2144_v22  ;;  %v2419_v4 = vpop.f32.mrf.mxu3  ;;  %v2400_v22 = vadd.f32 %v15593_v24, %v2350_v33 }
 0x41f   :  { %v2355_v20 = vpop.f32.mrf.mxu2 }
 0x421   :  { %v2106_v27 = vpop.f32.mrf.mxu1 }
 0x422   :  { %v2107_v6 = vadd.f32 %v2106_v27, %v15328_v5  ;;  %v21454_v5 = vpack.c.bf16 0.0, %v21453_v32  ;;  %v2402_v27 = vadd.f32 %v15615_v23, %v2352_v37 }
 0x424   :  { %v2145_v61 = vadd.f32 %v2107_v6, %v15524_v39 }
 0x426   :  { %v15686_v53 = vadd.f32 %v2397_v46, %v2145_v61 }
 0x427   :  { %v2357_v51 = vpop.f32.mrf.mxu2 }
 0x429   :  { %v2109_v16 = vpop.f32.mrf.mxu1 }
 0x42a   :  { %v2110_v55 = vadd.f32 %v2109_v16, %v15336_v62  ;;  %v15699_v62 = vpop.f32.mrf.mxu3  ;;  %v2405_v16 = vadd.f32 %v15631_v0, %v2355_v20 }
 0x42c   :  { %v2146_v8 = vadd.f32 %v2110_v55, %v15530_v42  ;;  %2688 = vmatmul.bf16.gmra.mxu1 %v2485_v54  ;;  %2939 = vmatmul.bf16.gmra.mxu2 %v21454_v5  ;;  %v21455_v54 = vld [vmem:[#allocation26_spill] sm:$0xff] }
 0x42e   :  { %v15694_v31 = vadd.f32 %v2400_v22, %v2146_v8  ;;  %v2407_v22 = vadd.f32 %v15645_v52, %v2357_v51 }
 0x42f   :  { %v2360_v39 = vpop.f32.mrf.mxu2 }
 0x430   :  { %v2410_v32 = vadd.f32 %v15653_v15, %v2360_v39 }
 0x431   :  { %v2111_v2 = vpop.f32.mrf.mxu1 }
 0x432   :  { %v2112_v6 = vadd.f32 %v2111_v2, %v15358_v1  ;;  %v2424_v23 = vpop.f32.mrf.mxu3  ;;  %v21456_v2 = vpack.c.bf16 0.0, %v21428_v29 }
 0x434   :  { %v2147_v46 = vadd.f32 %v2112_v6, %v15541_v18 }
 0x436   :  { %v15701_v61 = vadd.f32 %v2402_v27, %v2147_v46 }
 0x437   :  { %v2362_v24 = vpop.f32.mrf.mxu2 }
 0x439   :  { %v2114_v42 = vpop.f32.mrf.mxu1 }
 0x43a   :  { %v2115_v33 = vadd.f32 %v2114_v42, %v15376_v41  ;;  %v2412_v42 = vadd.f32 %v15664_v47, %v2362_v24 }
 0x43c   :  { %v2148_v49 = vadd.f32 %v2115_v33, %v15544_v13  ;;  %2693 = vmatmul.bf16.gmra.mxu1 %v21427_v10  ;;  %2944 = vmatmul.bf16.gmra.mxu2 %v21455_v54  ;;  %v15717_v13 = vpop.f32.mrf.mxu3 }
 0x43e   :  { %v15708_v1 = vadd.f32 %v2405_v16, %v2148_v49 }
 0x43f   :  { %v2365_v18 = vpop.f32.mrf.mxu2 }
 0x440   :  { %v2415_v33 = vadd.f32 %v15670_v57, %v2365_v18 }
 0x441   :  { %v2116_v37 = vpop.f32.mrf.mxu1 }
 0x442   :  { %v2117_v55 = vadd.f32 %v2116_v37, %v15393_v56  ;;  %v21457_v56 = vld [vmem:[#allocation27_spill] sm:$0xff] }
 0x443   :  { %v21458_v52 = vpack.c.bf16 0.0, %v21457_v56 }
 0x444   :  { %v2149_v8 = vadd.f32 %v2117_v55, %v15558_v58  ;;  %v2429_v46 = vpop.f32.mrf.mxu3 }
 0x446   :  { %v15713_v41 = vadd.f32 %v2407_v22, %v2149_v8 }
 0x447   :  { %v15715_v0 = vpop.f32.mrf.mxu2 }
 0x449   :  { %v2119_v10 = vpop.f32.mrf.mxu1 }
 0x44a   :  { %v2120_v20 = vadd.f32 %v2119_v10, %v15417_v63 }
 0x44c   :  { %v2150_v5 = vadd.f32 %v2120_v20, %v15570_v34  ;;  %2698 = vmatmul.bf16.gmra.mxu1 %v21456_v2  ;;  %2949 = vmatmul.bf16.gmra.mxu2 %v21458_v52  ;;  %v15742_v47 = vpop.f32.mrf.mxu3 }
 0x44e   :  { %v15726_v58 = vadd.f32 %v2410_v32, %v2150_v5 }
 0x44f   :  { %v2370_v51 = vpop.f32.mrf.mxu2 }
 0x450   :  { %v2420_v18 = vadd.f32 %v2419_v4, %v2370_v51 }
 0x451   :  { %v2121_v6 = vpop.f32.mrf.mxu1 }
 0x452   :  { %v2122_v27 = vadd.f32 %v2121_v6, %v15448_v21  ;;  %v21459_v21 = vpack.c.bf16 %v21420_v43, %v21413_v11  ;;  %v21460_v43 = vpack.c.bf16 0.0, %v21436_v45 }
 0x454   :  { %v2151_v63 = vadd.f32 %v2122_v27, %v15585_v3  ;;  %v15748_v54 = vpop.f32.mrf.mxu3 }
 0x456   :  { %v15731_v15 = vadd.f32 %v2412_v42, %v2151_v63  ;;  %v10352_v42 = vld [vmem:[%s21286_s3 + $0x170] sm:$0xf]  ;;  %v13677_v63 = vld [vmem:[%s21286_s3 + $0x174] sm:$0xf0] }
 0x457   :  { %v15733_v34 = vpop.f32.mrf.mxu2 }
 0x459   :  { %v2124_v29 = vpop.f32.mrf.mxu1 }
 0x45a   :  { %v2125_v39 = vadd.f32 %v2124_v29, %v15467_v17  ;;  %v10353_v29 = vor.u32 %v13677_v63, %v10352_v42  ;;  %v13671_v42 = vld [vmem:[%s21286_s3 + $0x144] sm:$0xf0]  ;;  %v13670_v63 = vld [vmem:[%s21286_s3 + $0x144] sm:$0xf] }
 0x45c   :  { %v2152_v16 = vadd.f32 %v2125_v39, %v15596_v12  ;;  %2703 = vmatmul.bf16.gmra.mxu1 %v21435_v19  ;;  %2954 = vmatmul.bf16.gmra.mxu2 %v21459_v21  ;;  %v2786_v19 = vpack.c.bf16 0.0, %v15493_v30  ;;  %v15759_v22 = vpop.f32.mrf.mxu3  ;;  %v10354_v39 = vld [vmem:[%s21286_s3 + $0x178] sm:$0xf0]  ;;  %v10344_v21 = vld [vmem:[%s21286_s3 + $0x160] sm:$0xf] }
 0x45d   :  { %3368 = vmatpush.bf16.msra.mxu0 %v10353_v29  ;;  %v10330_v29 = vld [vmem:[%s21286_s3 + $0x148] sm:$0xf0] }
 0x45e   :  { %v15744_v3 = vadd.f32 %v2415_v33, %v2152_v16 }
 0x45f   :  { %v2375_v24 = vpop.f32.mrf.mxu2 }
 0x461   :  { %v15746_v49 = vpop.f32.mrf.mxu1 }
 0x464   :  { %v15766_v4 = vpop.f32.mrf.mxu3 }
 0x467   :  { %v15750_v17 = vpop.f32.mrf.mxu2 }
 0x469   :  { %v2129_v57 = vpop.f32.mrf.mxu1 }
 0x46a   :  { %v2130_v12 = vadd.f32 %v2129_v57, %v15500_v60  ;;  %v2635_v60 = vpop.f32.mrf.mxu0  ;;  %v13674_v57 = vld [vmem:[%s21286_s3 + $0x164] sm:$0xf] }
 0x46c   :  { %v2154_v11 = vadd.f32 %v2130_v12, %v15623_v35  ;;  %2708 = vmatmul.bf16.gmra.mxu1 %v21460_v43  ;;  %2959 = vmatmul.bf16.gmra.mxu2 %v2786_v19  ;;  %v2425_v35 = vadd.f32 %v2424_v23, %v2375_v24  ;;  %v15776_v52 = vpop.f32.mrf.mxu3  ;;  %v13675_v24 = vld [vmem:[%s21286_s3 + $0x164] sm:$0xf0]  ;;  %v10346_v19 = vld [vmem:[%s21286_s3 + $0x168] sm:$0xf0]  ;;  %v13673_v43 = vld [vmem:[%s21286_s3 + $0x154] sm:$0xf0] }
 0x46d   :  { %v10345_v12 = vor.u32 %v13675_v24, %v10344_v21  ;;  %v10320_v24 = vld [vmem:[%s21286_s3 + $0x130] sm:$0xf] }
 0x46e   :  { %v15757_v37 = vadd.f32 %v2420_v18, %v2154_v11  ;;  %v10349_v18 = vor.u32 %v13674_v57, %v10346_v19  ;;  %v10336_v11 = vld [vmem:[%s21286_s3 + $0x150] sm:$0xf]  ;;  %v13669_v57 = vld [vmem:[%s21286_s3 + $0x134] sm:$0xf0] }
 0x46f   :  { %v2380_v55 = vpop.f32.mrf.mxu2  ;;  %3369 = vmatpush.bf16.msra.mxu0 %v10345_v12  ;;  %v13668_v12 = vld [vmem:[%s21286_s3 + $0x134] sm:$0xf] }
 0x470   :  { %v2430_v27 = vadd.f32 %v2429_v46, %v2380_v55  ;;  %v13672_v55 = vld [vmem:[%s21286_s3 + $0x154] sm:$0xf] }
 0x471   :  { %v15761_v8 = vpop.f32.mrf.mxu1 }
 0x472   :  { %v15774_v56 = vpop.f32.mrf.mxu0 }
 0x477   :  { %v15763_v10 = vpop.f32.mrf.mxu2 }
 0x479   :  { %v2134_v20 = vpop.f32.mrf.mxu1 }
 0x47a   :  { %v2135_v30 = vadd.f32 %v2134_v20, %v15521_v38 }
 0x47c   :  { %v2156_v45 = vadd.f32 %v2135_v30, %v15648_v28  ;;  %2713 = vmatmul.bf16.gmra.mxu1 %v21440_v9  ;;  %v21461_v28 = vpack.c.bf16 0.0, %v21442_v50  ;;  %v15784_v9 = vpop.f32.mrf.mxu0  ;;  %v10337_v30 = vor.u32 %v13673_v43, %v10336_v11  ;;  %v10312_v43 = vld [vmem:[%s21286_s3 + $0x120] sm:$0xf] }
 0x47e   :  { %v15770_v32 = vadd.f32 %v2425_v35, %v2156_v45  ;;  %v10338_v35 = vld [vmem:[%s21286_s3 + $0x158] sm:$0xf0]  ;;  %3370 = vmatpush.bf16.msra.mxu0 %v10337_v30  ;;  %v13667_v30 = vld [vmem:[%s21286_s3 + $0x124] sm:$0xf0] }
 0x47f   :  { %v2925_v5 = vpop.f32.mrf.mxu2 }
 0x481   :  { %v15772_v2 = vpop.f32.mrf.mxu1 }
 0x484   :  { %v15832_v45 = vpop.f32.mrf.mxu0 }
 0x487   :  { %v15778_v51 = vpop.f32.mrf.mxu2 }
 0x489   :  { %v2139_v6 = vpop.f32.mrf.mxu1 }
 0x48a   :  { %v2140_v38 = vadd.f32 %v2139_v6, %v15538_v25  ;;  %v13676_v25 = vld [vmem:[%s21286_s3 + $0x174] sm:$0xf]  ;;  %v10341_v6 = vor.u32 %v13672_v55, %v10338_v35  ;;  %v13666_v35 = vld [vmem:[%s21286_s3 + $0x124] sm:$0xf] }
 0x48b   :  { %v10357_v33 = vor.u32 %v13676_v25, %v10354_v39 }
 0x48c   :  { %v2158_v23 = vadd.f32 %v2140_v38, %v15659_v36  ;;  %2718 = vmatmul.bf16.gmra.mxu1 %v21461_v28  ;;  %v15797_v36 = vpop.f32.mrf.mxu3  ;;  %v10328_v28 = vld [vmem:[%s21286_s3 + $0x140] sm:$0xf]  ;;  %v15864_v11 = vpop.f32.mrf.mxu0 }
 0x48d   :  { %3406 = vmatpush.bf16.msrb.mxu2 %v10357_v33  ;;  %v10329_v25 = vor.u32 %v13671_v42, %v10328_v28  ;;  %v10333_v33 = vor.u32 %v13670_v63, %v10330_v29  ;;  %v10304_v28 = vld [vmem:[%s21286_s3 + $0x110] sm:$0xf]  ;;  %v13665_v42 = vld [vmem:[%s21286_s3 + $0x114] sm:$0xf0]  ;;  %v13664_v63 = vld [vmem:[%s21286_s3 + $0x114] sm:$0xf] }
 0x48e   :  { %v15795_v46 = vadd.f32 %v2430_v27, %v2158_v23 }
 0x48f   :  { %v15799_v50 = vpop.f32.mrf.mxu2  ;;  %3371 = vmatpush.bf16.msra.mxu0 %v10329_v25  ;;  %v15892_v25 = vld [vmem:[%s21285_s6] ss:$0 sm:$0xff] }
 0x491   :  { %v15804_v16 = vpop.f32.mrf.mxu1  ;;  %3407 = vmatpush.bf16.msrb.mxu2 %v10349_v18 }
 0x494   :  { %v15834_v38 = vpop.f32.mrf.mxu3 }
 0x495   :  { %3408 = vmatpush.bf16.msrb.mxu2 %v10341_v6  ;;  %v10314_v6 = vld [vmem:[%s21286_s3 + $0x128] sm:$0xf0] }
 0x497   :  { %v15827_v20 = vpop.f32.mrf.mxu2 }
 0x499   :  { %v2684_v27 = vpop.f32.mrf.mxu1  ;;  %3409 = vmatpush.bf16.msrb.mxu2 %v10333_v33  ;;  %v10306_v33 = vld [vmem:[%s21286_s3 + $0x118] sm:$0xf0] }
 0x49a   :  { %v2685_v23 = vadd.f32 %v2684_v27, %v2635_v60  ;;  %v2975_v60 = vadd.f32 %v15748_v54, %v2925_v5  ;;  %v10321_v54 = vor.u32 %v13669_v57, %v10320_v24  ;;  %v10313_v27 = vor.u32 %v13667_v30, %v10312_v43  ;;  %v15915_v43 = vpop.f32.mrf.mxu0 }
 0x49b   :  { %v10309_v24 = vor.u32 %v13664_v63, %v10306_v33  ;;  %v2980_v30 = vadd.f32 %v15766_v4, %v15799_v50  ;;  %v13693_v4 = vld [vmem:[%s21286_s3 + $0x1f4] sm:$0xf0] }
 0x49c   :  { %v2724_v39 = vadd.f32 %v2685_v23, %v15679_v44  ;;  %v10322_v44 = vld [vmem:[%s21286_s3 + $0x138] sm:$0xf0]  ;;  %3372 = vmatpush.bf16.msra.mxu0 %v10321_v54  ;;  %v15869_v55 = vpop.f32.mrf.mxu3  ;;  %v10317_v23 = vor.u32 %v13666_v35, %v10314_v6  ;;  %v10296_v54 = vld [vmem:[%s21286_s3 + $0x100] sm:$0xf] }
 0x49d   :  { %v10325_v5 = vor.u32 %v13668_v12, %v10322_v44 }
 0x49e   :  { %v3014_v21 = vadd.f32 %v2975_v60, %v2724_v39  ;;  %v10305_v39 = vor.u32 %v13665_v42, %v10304_v28  ;;  %v10416_v28 = vld [vmem:[%s21286_s3 + $0x1f0] sm:$0xf] }
 0x49f   :  { %v15859_v19 = vpop.f32.mrf.mxu2  ;;  %3410 = vmatpush.bf16.msrb.mxu2 %v10325_v5  ;;  %v13663_v5 = vld [vmem:[%s21286_s3 + $0x104] sm:$0xf0] }
 0x4a0   :  { %3373 = vmatpush.bf16.msra.mxu0 %v10313_v27  ;;  %v3033_v44 = vadd.f32 %v15892_v25, %v3014_v21  ;;  %v2977_v27 = vadd.f32 %v15759_v22, %v15778_v51  ;;  %v10417_v22 = vor.u32 %v13693_v4, %v10416_v28  ;;  %v10418_v51 = vld [vmem:[%s21286_s3 + $0x1f8] sm:$0xf0] }
 0x4a1   :  { %v2686_v18 = vpop.f32.mrf.mxu1 }
 0x4a2   :  { %v2687_v29 = vadd.f32 %v2686_v18, %v15774_v56  ;;  %v13662_v18 = vld [vmem:[%s21286_s3 + $0x104] sm:$0xf]  ;;  %v3065_v50 = vmul.f32 0.2, %v3033_v44  ;;  %vm3049_vm0 = vcmp.ge.f32.partialorder %v3033_v44, 0.0  ;;  %3387 = vmatpush.bf16.msrb.mxu1 %v10417_v22 }
 0x4a3   :  { %3411 = vmatpush.bf16.msrb.mxu2 %v10317_v23 }
 0x4a4   :  { %3374 = vmatpush.bf16.msra.mxu0 %v10305_v39  ;;  %v2725_v56 = vadd.f32 %v2687_v29, %v15686_v53  ;;  %v10297_v53 = vor.u32 %v13663_v5, %v10296_v54  ;;  %v15920_v6 = vpop.f32.mrf.mxu3  ;;  %v2982_v54 = vadd.f32 %v15776_v52, %v15827_v20 }
 0x4a6   :  { %v3015_v42 = vadd.f32 %v2977_v27, %v2725_v56  ;;  %v3081_v56 = vsel %vm3049_vm0, %v3033_v44, %v3065_v50  ;;  %v10400_v27 = vld [vmem:[%s21286_s3 + $0x1d0] sm:$0xf] }
 0x4a7   :  { %v15895_v60 = vpop.f32.mrf.mxu2  ;;  %3412 = vmatpush.bf16.msrb.mxu2 %v10309_v24 }
 0x4a8   :  { %3375 = vmatpush.bf16.msra.mxu0 %v10297_v53  ;;  %v3034_v5 = vadd.f32 %v15892_v25, %v3015_v42  ;;  %v15961_v53 = vpop.f32.mrf.mxu0  ;;  %v10402_v42 = vld [vmem:[%s21286_s3 + $0x1d8] sm:$0xf0] }
 0x4a9   :  { %v2689_v57 = vpop.f32.mrf.mxu1 }
 0x4aa   :  { %v2690_v12 = vadd.f32 %v2689_v57, %v15784_v9  ;;  %v10298_v9 = vld [vmem:[%s21286_s3 + $0x108] sm:$0xf0]  ;;  %v3066_v4 = vmul.f32 0.2, %v3034_v5  ;;  %vm3050_vm2 = vcmp.ge.f32.partialorder %v3034_v5, 0.0 }
 0x4ab   :  { %v10301_v35 = vor.u32 %v13662_v18, %v10298_v9  ;;  %v13691_v18 = vld [vmem:[%s21286_s3 + $0x1e4] sm:$0xf0]  ;;  %v13690_v9 = vld [vmem:[%s21286_s3 + $0x1e4] sm:$0xf] }
 0x4ac   :  { %v2726_v21 = vadd.f32 %v2690_v12, %v15694_v31  ;;  %v13692_v31 = vld [vmem:[%s21286_s3 + $0x1f4] sm:$0xf]  ;;  %v10408_v12 = vld [vmem:[%s21286_s3 + $0x1e0] sm:$0xf]  ;;  %v15972_v28 = vpop.f32.mrf.mxu3 }
 0x4ad   :  { %3413 = vmatpush.bf16.msrb.mxu2 %v10301_v35  ;;  %v10421_v39 = vor.u32 %v13692_v31, %v10418_v51  ;;  %v10409_v52 = vor.u32 %v13691_v18, %v10408_v12  ;;  %v15986_v12 = vsel %vm3050_vm2, %v3034_v5, %v3066_v4  ;;  %v10384_v5 = vld [vmem:[%s21286_s3 + $0x1b0] sm:$0xf] }
 0x4ae   :  { %v3016_v23 = vadd.f32 %v2980_v30, %v2726_v21 }
 0x4af   :  { %v15933_v63 = vpop.f32.mrf.mxu2  ;;  %3425 = vmatpush.bf16.msrb.mxu3 %v10421_v39  ;;  %3388 = vmatpush.bf16.msrb.mxu1 %v10409_v52  ;;  %v13685_v52 = vld [vmem:[%s21286_s3 + $0x1b4] sm:$0xf0] }
 0x4b0   :  { %v3035_v29 = vadd.f32 %v15892_v25, %v3016_v23  ;;  %v13689_v23 = vld [vmem:[%s21286_s3 + $0x1d4] sm:$0xf0] }
 0x4b1   :  { %v2691_v33 = vpop.f32.mrf.mxu1  ;;  %v10401_v50 = vor.u32 %v13689_v23, %v10400_v27  ;;  %v10386_v27 = vld [vmem:[%s21286_s3 + $0x1b8] sm:$0xf0]  ;;  %v16015_v23 = vpop.f32.mrf.mxu0 }
 0x4b2   :  { %vm3051_vm1 = vcmp.ge.f32.partialorder %v3035_v29, 0.0  ;;  %v3067_v24 = vmul.f32 0.2, %v3035_v29  ;;  %v2692_v57 = vadd.f32 %v2691_v33, %v15832_v45  ;;  %v10410_v45 = vld [vmem:[%s21286_s3 + $0x1e8] sm:$0xf0] }
 0x4b3   :  { %v10413_v20 = vor.u32 %v13690_v9, %v10410_v45  ;;  %3389 = vmatpush.bf16.msrb.mxu1 %v10401_v50 }
 0x4b4   :  { %v15955_v30 = vsel %vm3051_vm1, %v3035_v29, %v3067_v24  ;;  %v2727_v21 = vadd.f32 %v2692_v57, %v15701_v61  ;;  %v13688_v61 = vld [vmem:[%s21286_s3 + $0x1d4] sm:$0xf]  ;;  %v10392_v24 = vld [vmem:[%s21286_s3 + $0x1c0] sm:$0xf]  ;;  %v2985_v57 = vadd.f32 %v15797_v36, %v15859_v19  ;;  %v16017_v4 = vpop.f32.mrf.mxu3 }
 0x4b5   :  { %v15959_v44 = vpack.c.bf16 %v15955_v30, %v3081_v56  ;;  %3426 = vmatpush.bf16.msrb.mxu3 %v10413_v20  ;;  %v10405_v51 = vor.u32 %v13688_v61, %v10402_v42  ;;  %v13686_v56 = vld [vmem:[%s21286_s3 + $0x1c4] sm:$0xf] }
 0x4b6   :  { %v3017_v35 = vadd.f32 %v2982_v54, %v2727_v21  ;;  %v13687_v54 = vld [vmem:[%s21286_s3 + $0x1c4] sm:$0xf0] }
 0x4b7   :  { %v15974_v31 = vpop.f32.mrf.mxu2  ;;  %v10393_v45 = vor.u32 %v13687_v54, %v10392_v24 }
 0x4b8   :  { %v3036_v22 = vadd.f32 %v15892_v25, %v3017_v35  ;;  %v10385_v35 = vor.u32 %v13685_v52, %v10384_v5 }
 0x4b9   :  { %v2694_v29 = vpop.f32.mrf.mxu1  ;;  %3427 = vmatpush.bf16.msrb.mxu3 %v10405_v51  ;;  %3390 = vmatpush.bf16.msrb.mxu1 %v10393_v45  ;;  %v13683_v51 = vld [vmem:[%s21286_s3 + $0x1a4] sm:$0xf0]  ;;  %v16050_v5 = vpop.f32.mrf.mxu0 }
 0x4ba   :  { %vm3052_vm3 = vcmp.ge.f32.partialorder %v3036_v22, 0.0  ;;  %v3068_v39 = vmul.f32 0.2, %v3036_v22  ;;  %v2695_v33 = vadd.f32 %v2694_v29, %v15864_v11  ;;  %v10394_v11 = vld [vmem:[%s21286_s3 + $0x1c8] sm:$0xf0] }
 0x4bb   :  { %v10397_v21 = vor.u32 %v13686_v56, %v10394_v11  ;;  %v10368_v56 = vld [vmem:[%s21286_s3 + $0x190] sm:$0xf]  ;;  %v13681_v11 = vld [vmem:[%s21286_s3 + $0x194] sm:$0xf0] }
 0x4bc   :  { %v3084_v18 = vsel %vm3052_vm3, %v3036_v22, %v3068_v39  ;;  %v2728_v9 = vadd.f32 %v2695_v33, %v15708_v1  ;;  %v13684_v1 = vld [vmem:[%s21286_s3 + $0x1b4] sm:$0xf]  ;;  %v10376_v22 = vld [vmem:[%s21286_s3 + $0x1a0] sm:$0xf]  ;;  %v13682_v39 = vld [vmem:[%s21286_s3 + $0x1a4] sm:$0xf] }
 0x4bd   :  { %v15999_v36 = vpack.c.bf16 %v3084_v18, %v15986_v12  ;;  %3428 = vmatpush.bf16.msrb.mxu3 %v10397_v21  ;;  %v10389_v61 = vor.u32 %v13684_v1, %v10386_v27  ;;  %3391 = vmatpush.bf16.msrb.mxu1 %v10385_v35  ;;  %v10377_v29 = vor.u32 %v13683_v51, %v10376_v22  ;;  %v10378_v33 = vld [vmem:[%s21286_s3 + $0x1a8] sm:$0xf0]  ;;  %v13680_v18 = vld [vmem:[%s21286_s3 + $0x194] sm:$0xf]  ;;  %v10360_v35 = vld [vmem:[%s21286_s3 + $0x180] sm:$0xf]  ;;  %v16056_v27 = vpop.f32.mrf.mxu3 }
 0x4be   :  { %v3018_v19 = vadd.f32 %v2985_v57, %v2728_v9  ;;  %v10381_v57 = vor.u32 %v13682_v39, %v10378_v33  ;;  %v10362_v22 = vld [vmem:[%s21286_s3 + $0x188] sm:$0xf0] }
 0x4bf   :  { %v16010_v20 = vpop.f32.mrf.mxu2 }
 0x4c1   :  { %v2696_v50 = vpop.f32.mrf.mxu1  ;;  %3429 = vmatpush.bf16.msrb.mxu3 %v10389_v61  ;;  %3392 = vmatpush.bf16.msrb.mxu1 %v10377_v29  ;;  %v2990_v61 = vadd.f32 %v15869_v55, %v15933_v63  ;;  %v21462_v63 = vmov 0.0  }
 0x4c2   :  { %v2697_v42 = vadd.f32 %v2696_v50, %v15915_v43  ;;  %v2987_v43 = vadd.f32 %v15834_v38, %v15895_v60  ;;  %v10369_v38 = vor.u32 %v13681_v11, %v10368_v56  ;;  %v3037_v50 = vadd.f32 %v15892_v25, %v3018_v19  ;;  %v10546_v56 = vld [vmem:[%s21286_s3 + $0xf8] sm:$0xf0] }
 0x4c4   :  { %v2729_v24 = vadd.f32 %v2697_v42, %v15713_v41  ;;  %v10370_v41 = vld [vmem:[%s21286_s3 + $0x198] sm:$0xf0]  ;;  %v13679_v42 = vld [vmem:[%s21286_s3 + $0x184] sm:$0xf0]  ;;  %v3069_v11 = vmul.f32 0.2, %v3037_v50 }
 0x4c5   :  { %3430 = vmatpush.bf16.msrb.mxu3 %v10381_v57  ;;  %v10373_v45 = vor.u32 %v13680_v18, %v10370_v41  ;;  %3393 = vmatpush.bf16.msrb.mxu1 %v10369_v38  ;;  %v10361_v39 = vor.u32 %v13679_v42, %v10360_v35  ;;  %vm3053_vm5 = vcmp.ge.f32.partialorder %v3037_v50, 0.0  ;;  %v16109_v42 = vpop.f32.mrf.mxu0 }
 0x4c6   :  { %v3019_v54 = vadd.f32 %v2987_v43, %v2729_v24  ;;  %v10544_v43 = vld [vmem:[%s21286_s3 + $0xf0] sm:$0xf]  ;;  %v13661_v24 = vld [vmem:[%s21286_s3 + $0xf4] sm:$0xf0] }
 0x4c7   :  { %v16044_v9 = vpop.f32.mrf.mxu2 }
 0x4c8   :  { %v3038_v60 = vadd.f32 %v15892_v25, %v3019_v54  ;;  %v10545_v54 = vor.u32 %v13661_v24, %v10544_v43 }
 0x4c9   :  { %v2699_v21 = vpop.f32.mrf.mxu1  ;;  %3431 = vmatpush.bf16.msrb.mxu3 %v10373_v45  ;;  %3394 = vmatpush.bf16.msrb.mxu1 %v10361_v39 }
 0x4ca   :  { %vm3054_vm4 = vcmp.ge.f32.partialorder %v3038_v60, 0.0  ;;  %v3070_v52 = vmul.f32 0.2, %v3038_v60  ;;  %v2700_v1 = vadd.f32 %v2699_v21, %v15961_v53  ;;  %v13678_v53 = vld [vmem:[%s21286_s3 + $0x184] sm:$0xf] }
 0x4cb   :  { %v10365_v55 = vor.u32 %v13678_v53, %v10362_v22  ;;  %v10536_v21 = vld [vmem:[%s21286_s3 + $0xe0] sm:$0xf] }
 0x4cc   :  { %v16070_v51 = vsel %vm3054_vm4, %v3038_v60, %v3070_v52  ;;  %v2730_v29 = vadd.f32 %v2700_v1, %v15726_v58  ;;  %v13660_v58 = vld [vmem:[%s21286_s3 + $0xf4] sm:$0xf]  ;;  %v13659_v52 = vld [vmem:[%s21286_s3 + $0xe4] sm:$0xf0]  ;;  %v2992_v1 = vadd.f32 %v15920_v6, %v15974_v31 }
 0x4cd   :  { %v16075_v19 = vpack.c.bf16 %v16070_v51, %v21462_v63  ;;  %3432 = vmatpush.bf16.msrb.mxu3 %v10365_v55  ;;  %v10549_v38 = vor.u32 %v13660_v58, %v10546_v56  ;;  %3623 = vmatpush.bf16.msra.mxu1 %v10545_v54  ;;  %v10537_v35 = vor.u32 %v13659_v52, %v10536_v21  ;;  %v16114_v55 = vpop.f32.mrf.mxu3  ;;  %v10530_v58 = vld [vmem:[%s21286_s3 + $0xd8] sm:$0xf0]  ;;  %v10520_v52 = vld [vmem:[%s21286_s3 + $0xc0] sm:$0xf] }
 0x4ce   :  { %v3020_v33 = vadd.f32 %v2990_v61, %v2730_v29  ;;  %v13658_v61 = vld [vmem:[%s21286_s3 + $0xe4] sm:$0xf]  ;;  %v3085_v29 = vsel %vm3053_vm5, %v3037_v50, %v3069_v11  ;;  %v13656_v50 = vld [vmem:[%s21286_s3 + $0xd4] sm:$0xf] }
 0x4cf   :  { %v16086_v57 = vpop.f32.mrf.mxu2  ;;  %3376 = vmatmul.bf16.vlgmr.msra.gmra.mxu0 %v16075_v19  ;;  %3414 = vmatmul.bf16.vlgmr.msrb.gmra.mxu2 %v16075_v19  ;;  %v10533_v56 = vor.u32 %v13656_v50, %v10530_v58  ;;  %v13644_v11 = vld [vmem:[%s21286_s3 + $0x74] sm:$0xf]  ;;  %v16167_v50 = vpop.f32.mrf.mxu0 }
 0x4d0   :  { %v3039_v18 = vadd.f32 %v15892_v25, %v3020_v33  ;;  %v10528_v33 = vld [vmem:[%s21286_s3 + $0xd0] sm:$0xf] }
 0x4d1   :  { %v2701_v41 = vpop.f32.mrf.mxu1  ;;  %3661 = vmatpush.bf16.msra.mxu3 %v10549_v38  ;;  %3624 = vmatpush.bf16.msra.mxu1 %v10537_v35 }
 0x4d2   :  { %v3071_v60 = vmul.f32 0.2, %v3039_v18  ;;  %v2702_v45 = vadd.f32 %v2701_v41, %v16015_v23  ;;  %v10538_v23 = vld [vmem:[%s21286_s3 + $0xe8] sm:$0xf0]  ;;  %vm3055_vm6 = vcmp.ge.f32.partialorder %v3039_v18, 0.0 }
 0x4d3   :  { %v10541_v22 = vor.u32 %v13658_v61, %v10538_v23  ;;  %v13654_v61 = vld [vmem:[%s21286_s3 + $0xc4] sm:$0xf] }
 0x4d4   :  { %v2731_v53 = vadd.f32 %v2702_v45, %v15731_v15  ;;  %v16112_v39 = vsel %vm3055_vm6, %v3039_v18, %v3071_v60  ;;  %v13657_v15 = vld [vmem:[%s21286_s3 + $0xd4] sm:$0xf0]  ;;  %v10482_v18 = vld [vmem:[%s21286_s3 + $0x78] sm:$0xf0]  ;;  %v2127_v60 = vadd.f32 %v15746_v49, %v15488_v48  ;;  %v10522_v48 = vld [vmem:[%s21286_s3 + $0xc8] sm:$0xf0]  ;;  %v2995_v49 = vadd.f32 %v15972_v28, %v16010_v20 }
 0x4d5   :  { %v16117_v6 = vpack.c.bf16 %v16112_v39, %v3085_v29  ;;  %3662 = vmatpush.bf16.msra.mxu3 %v10541_v22  ;;  %v10529_v24 = vor.u32 %v13657_v15, %v10528_v33  ;;  %v10485_v41 = vor.u32 %v13644_v11, %v10482_v18  ;;  %v10525_v23 = vor.u32 %v13654_v61, %v10522_v48  ;;  %v10474_v22 = vld [vmem:[%s21286_s3 + $0x68] sm:$0xf0]  ;;  %v10480_v20 = vld [vmem:[%s21286_s3 + $0x70] sm:$0xf]  ;;  %v10514_v11 = vld [vmem:[%s21286_s3 + $0xb8] sm:$0xf0] }
 0x4d6   :  { %v3021_v31 = vadd.f32 %v2992_v1, %v2731_v53  ;;  %v13655_v1 = vld [vmem:[%s21286_s3 + $0xc4] sm:$0xf0]  ;;  %v13642_v53 = vld [vmem:[%s21286_s3 + $0x64] sm:$0xf]  ;;  %v2417_v18 = vadd.f32 %v15681_v14, %v15715_v0  ;;  %v10472_v14 = vld [vmem:[%s21286_s3 + $0x60] sm:$0xf] }
 0x4d7   :  { %v16128_v43 = vpop.f32.mrf.mxu2  ;;  %3625 = vmatpush.bf16.msra.mxu1 %v10529_v24  ;;  %3642 = vmatpush.bf16.msra.mxu2 %v10485_v41  ;;  %v10521_v35 = vor.u32 %v13655_v1, %v10520_v52  ;;  %v10477_v33 = vor.u32 %v13642_v53, %v10474_v22  ;;  %v13645_v24 = vld [vmem:[%s21286_s3 + $0x74] sm:$0xf0]  ;;  %v13643_v0 = vld [vmem:[%s21286_s3 + $0x64] sm:$0xf0] }
 0x4d8   :  { %v3040_v54 = vadd.f32 %v15892_v25, %v3021_v31  ;;  %v3004_v31 = vpop.f32.mrf.mxu3  ;;  %v10473_v48 = vor.u32 %v13643_v0, %v10472_v14  ;;  %v10456_v0 = vld [vmem:[%s21286_s3 + $0x40] sm:$0xf] }
 0x4d9   :  { %v2704_v38 = vpop.f32.mrf.mxu1  ;;  %3663 = vmatpush.bf16.msra.mxu3 %v10533_v56  ;;  %v13652_v56 = vld [vmem:[%s21286_s3 + $0xb4] sm:$0xf] }
 0x4da   :  { %v3072_v45 = vmul.f32 0.2, %v3040_v54  ;;  %v2705_v21 = vadd.f32 %v2704_v38, %v16050_v5  ;;  %vm3056_vm7 = vcmp.ge.f32.partialorder %v3040_v54, 0.0 }
 0x4db   :  { %3626 = vmatpush.bf16.msra.mxu1 %v10521_v35  ;;  %3643 = vmatpush.bf16.msra.mxu2 %v10477_v33  ;;  %v10458_v33 = vld [vmem:[%s21286_s3 + $0x48] sm:$0xf0] }
 0x4dc   :  { %v2732_v5 = vadd.f32 %v2705_v21, %v15744_v3  ;;  %v3088_v29 = vsel %vm3056_vm7, %v3040_v54, %v3072_v45  ;;  %v2153_v3 = vadd.f32 %v2127_v60, %v15610_v40  ;;  %v10481_v54 = vor.u32 %v13645_v24, %v10480_v20  ;;  %v13653_v40 = vld [vmem:[%s21286_s3 + $0xb4] sm:$0xf0]  ;;  %v13640_v45 = vld [vmem:[%s21286_s3 + $0x54] sm:$0xf]  ;;  %v10466_v21 = vld [vmem:[%s21286_s3 + $0x58] sm:$0xf0] }
 0x4dd   :  { %v16165_v15 = vpack.c.bf16 %v3088_v29, %v16070_v51  ;;  %3664 = vmatpush.bf16.msra.mxu3 %v10525_v23  ;;  %v10512_v51 = vld [vmem:[%s21286_s3 + $0xb0] sm:$0xf]  ;;  %v10517_v60 = vor.u32 %v13652_v56, %v10514_v11  ;;  %v10469_v1 = vor.u32 %v13640_v45, %v10466_v21  ;;  %v2997_v23 = vadd.f32 %v16017_v4, %v16044_v9  ;;  %v10506_v29 = vld [vmem:[%s21286_s3 + $0xa8] sm:$0xf0]  ;;  %v13641_v9 = vld [vmem:[%s21286_s3 + $0x54] sm:$0xf0]  ;;  %v2662_v11 = vpop.f32.mrf.mxu0 }
 0x4de   :  { %v16170_v28 = vadd.f32 %v2995_v49, %v2732_v5  ;;  %v10513_v41 = vor.u32 %v13653_v40, %v10512_v51  ;;  %3604 = vmatpush.bf16.msrb.mxu0 %v10481_v54  ;;  %v2443_v35 = vadd.f32 %v2417_v18, %v2153_v3  ;;  %v10504_v49 = vld [vmem:[%s21286_s3 + $0xa0] sm:$0xf]  ;;  %v13650_v5 = vld [vmem:[%s21286_s3 + $0xa4] sm:$0xf]  ;;  %v10464_v4 = vld [vmem:[%s21286_s3 + $0x50] sm:$0xf] }
 0x4df   :  { %v2955_v58 = vpop.f32.mrf.mxu2  ;;  %3644 = vmatpush.bf16.msra.mxu2 %v10469_v1  ;;  %v10509_v3 = vor.u32 %v13650_v5, %v10506_v29  ;;  %v10496_v51 = vld [vmem:[%s21286_s3 + $0x90] sm:$0xf]  ;;  %v13649_v54 = vld [vmem:[%s21286_s3 + $0x94] sm:$0xf0]  ;;  %v13648_v40 = vld [vmem:[%s21286_s3 + $0x94] sm:$0xf] }
 0x4e0   :  { %v16192_v38 = vadd.f32 %v3004_v31, %v2955_v58  ;;  %3627 = vmatpush.bf16.msra.mxu1 %v10513_v41  ;;  %v13638_v31 = vld [vmem:[%s21286_s3 + $0x44] sm:$0xf]  ;;  %v10465_v58 = vor.u32 %v13641_v9, %v10464_v4  ;;  %v10498_v56 = vld [vmem:[%s21286_s3 + $0x98] sm:$0xf0]  ;;  %v10497_v41 = vor.u32 %v13649_v54, %v10496_v51  ;;  %v13636_v45 = vld [vmem:[%s21286_s3 + $0x34] sm:$0xf]  ;;  %v2422_v54 = vadd.f32 %v15699_v62, %v15733_v34 }
 0x4e1   :  { %v2706_v52 = vpop.f32.mrf.mxu1  ;;  %3665 = vmatpush.bf16.msra.mxu3 %v10517_v60  ;;  %v10461_v20 = vor.u32 %v13638_v31, %v10458_v33  ;;  %v10501_v60 = vor.u32 %v13648_v40, %v10498_v56  ;;  %v10450_v21 = vld [vmem:[%s21286_s3 + $0x38] sm:$0xf0]  ;;  %v10442_v31 = vld [vmem:[%s21286_s3 + $0x28] sm:$0xf0]  ;;  %v10672_v4 = vld [vmem:[%s21286_s3 + $0x2f0] sm:$0xf] }
 0x4e2   :  { %v2707_v61 = vadd.f32 %v2706_v52, %v16109_v42  ;;  %v13651_v42 = vld [vmem:[%s21286_s3 + $0xa4] sm:$0xf0]  ;;  %3605 = vmatpush.bf16.msrb.mxu0 %v10473_v48  ;;  %v10453_v1 = vor.u32 %v13636_v45, %v10450_v21  ;;  %v3000_v48 = vadd.f32 %v16056_v27, %v16086_v57  ;;  %v13646_v57 = vld [vmem:[%s21286_s3 + $0x84] sm:$0xf]  ;;  %v13725_v9 = vld [vmem:[%s21286_s3 + $0x2f4] sm:$0xf0] }
 0x4e3   :  { %v10505_v22 = vor.u32 %v13651_v42, %v10504_v49  ;;  %3645 = vmatpush.bf16.msra.mxu2 %v10461_v20  ;;  %v13639_v49 = vld [vmem:[%s21286_s3 + $0x44] sm:$0xf0]  ;;  %v13724_v51 = vld [vmem:[%s21286_s3 + $0x2f4] sm:$0xf]  ;;  %v10673_v56 = vor.u32 %v13725_v9, %v10672_v4  ;;  %v13721_v4 = vld [vmem:[%s21286_s3 + $0x2d4] sm:$0xf0] }
 0x4e4   :  { %v2733_v53 = vadd.f32 %v2707_v61, %v2443_v35  ;;  %v2132_v35 = vadd.f32 %v15761_v8, %v15511_v26  ;;  %v10488_v26 = vld [vmem:[%s21286_s3 + $0x80] sm:$0xf]  ;;  %v13647_v8 = vld [vmem:[%s21286_s3 + $0x84] sm:$0xf0]  ;;  %v10457_v5 = vor.u32 %v13639_v49, %v10456_v0  ;;  %v13722_v49 = vld [vmem:[%s21286_s3 + $0x2e4] sm:$0xf] }
 0x4e5   :  { %3628 = vmatpush.bf16.msra.mxu1 %v10505_v22  ;;  %3666 = vmatpush.bf16.msra.mxu3 %v10509_v3  ;;  %v10489_v27 = vor.u32 %v13647_v8, %v10488_v26  ;;  %v3041_v22 = vadd.f32 %v15892_v25, %v16170_v28  ;;  %v13637_v28 = vld [vmem:[%s21286_s3 + $0x34] sm:$0xf0]  ;;  %v3002_v26 = vadd.f32 %v16114_v55, %v16128_v43  ;;  %v13708_v55 = vld [vmem:[%s21286_s3 + $0x274] sm:$0xf]  ;;  %v10610_v43 = vld [vmem:[%s21286_s3 + $0x278] sm:$0xf0] }
 0x4e6   :  { %v3023_v24 = vadd.f32 %v2997_v23, %v2733_v53  ;;  %3606 = vmatpush.bf16.msrb.mxu0 %v10465_v58  ;;  %v10490_v23 = vld [vmem:[%s21286_s3 + $0x88] sm:$0xf0]  ;;  %v13634_v53 = vld [vmem:[%s21286_s3 + $0x24] sm:$0xf]  ;;  %v2155_v33 = vadd.f32 %v2132_v35, %v15637_v7  ;;  %v10674_v58 = vld [vmem:[%s21286_s3 + $0x2f8] sm:$0xf0] }
 0x4e7   :  { %3646 = vmatpush.bf16.msra.mxu2 %v10453_v1  ;;  %v10493_v29 = vor.u32 %v13646_v57, %v10490_v23  ;;  %v10445_v20 = vor.u32 %v13634_v53, %v10442_v31  ;;  %v10677_v21 = vor.u32 %v13724_v51, %v10674_v58  ;;  %vm3057_vm9 = vcmp.ge.f32.partialorder %v3041_v22, 0.0  ;;  %v2665_v1 = vpop.f32.mrf.mxu0  ;;  %v10426_v57 = vld [vmem:[%s21286_s3 + $0x8] sm:$0xf0]  ;;  %v10658_v9 = vld [vmem:[%s21286_s3 + $0x2d8] sm:$0xf0] }
 0x4e8   :  { %v3042_v18 = vadd.f32 %v15892_v25, %v3023_v24  ;;  %v10448_v24 = vld [vmem:[%s21286_s3 + $0x30] sm:$0xf]  ;;  %v2445_v34 = vadd.f32 %v2422_v54, %v2155_v33  ;;  %v10613_v33 = vor.u32 %v13708_v55, %v10610_v43  ;;  %v13709_v43 = vld [vmem:[%s21286_s3 + $0x274] sm:$0xf0] }
 0x4e9   :  { %v2709_v52 = vpop.f32.mrf.mxu1  ;;  %3629 = vmatpush.bf16.msra.mxu1 %v10497_v41  ;;  %3667 = vmatpush.bf16.msra.mxu3 %v10501_v60  ;;  %v10449_v7 = vor.u32 %v13637_v28, %v10448_v24  ;;  %v10434_v41 = vld [vmem:[%s21286_s3 + $0x18] sm:$0xf0]  ;;  %v3073_v60 = vmul.f32 0.2, %v3041_v22  ;;  %v10656_v24 = vld [vmem:[%s21286_s3 + $0x2d0] sm:$0xf] }
 0x4ea   :  { %vm3058_vm8 = vcmp.ge.f32.partialorder %v3042_v18, 0.0  ;;  %v3074_v61 = vmul.f32 0.2, %v3042_v18  ;;  %v2710_v14 = vadd.f32 %v2709_v52, %v16167_v50  ;;  %3607 = vmatpush.bf16.msrb.mxu0 %v10457_v5  ;;  %v10666_v5 = vld [vmem:[%s21286_s3 + $0x2e8] sm:$0xf0]  ;;  %v10657_v54 = vor.u32 %v13721_v4, %v10656_v24 }
 0x4eb   :  { %3647 = vmatpush.bf16.msra.mxu2 %v10445_v20  ;;  %v10669_v23 = vor.u32 %v13722_v49, %v10666_v5  ;;  %v13633_v20 = vld [vmem:[%s21286_s3 + $0x14] sm:$0xf0]  ;;  %v10594_v5 = vld [vmem:[%s21286_s3 + $0x258] sm:$0xf0]  ;;  %v10608_v55 = vld [vmem:[%s21286_s3 + $0x270] sm:$0xf] }
 0x4ec   :  { %v16269_v50 = vsel %vm3058_vm8, %v3042_v18, %v3074_v61  ;;  %v2734_v42 = vadd.f32 %v2710_v14, %v15757_v37  ;;  %v13632_v18 = vld [vmem:[%s21286_s3 + $0x14] sm:$0xf]  ;;  %v10440_v61 = vld [vmem:[%s21286_s3 + $0x20] sm:$0xf]  ;;  %v13635_v14 = vld [vmem:[%s21286_s3 + $0x24] sm:$0xf0] }
 0x4ed   :  { %v16285_v37 = vpack.c.bf16 %v16269_v50, %v21462_v63  ;;  %3630 = vmatpush.bf16.msra.mxu1 %v10489_v27  ;;  %3668 = vmatpush.bf16.msra.mxu3 %v10493_v29  ;;  %v10437_v52 = vor.u32 %v13632_v18, %v10434_v41  ;;  %v10441_v0 = vor.u32 %v13635_v14, %v10440_v61  ;;  %v13630_v27 = vld [vmem:[%s21286_s3 + $0x4] sm:$0xf]  ;;  %v10602_v18 = vld [vmem:[%s21286_s3 + $0x268] sm:$0xf0]  ;;  %v10424_v41 = vld [vmem:[%s21286_s3] sm:$0xf] }
 0x4ee   :  { %v3024_v3 = vadd.f32 %v3000_v48, %v2734_v42  ;;  %3608 = vmatpush.bf16.msrb.mxu0 %v10449_v7  ;;  %v10664_v48 = vld [vmem:[%s21286_s3 + $0x2e0] sm:$0xf]  ;;  %v10429_v53 = vor.u32 %v13630_v27, %v10426_v57  ;;  %v3089_v29 = vsel %vm3057_vm9, %v3041_v22, %v3073_v60  ;;  %v13720_v7 = vld [vmem:[%s21286_s3 + $0x2d4] sm:$0xf]  ;;  %v2137_v60 = vadd.f32 %v15772_v2, %v15526_v59  ;;  %v13718_v14 = vld [vmem:[%s21286_s3 + $0x2c4] sm:$0xf] }
 0x4ef   :  { %3395 = vmatmul.bf16.vlgmr.msrb.gmra.mxu1 %v16285_v37  ;;  %3433 = vmatmul.bf16.vlgmr.msrb.gmra.mxu3 %v16285_v37  ;;  %v21463_v57 = vld [vmem:[#allocation31_spill] sm:$0xff]  ;;  %v13702_v4 = vld [vmem:[%s21286_s3 + $0x244] sm:$0xf] }
 0x4f0   :  { %v3043_v40 = vadd.f32 %v15892_v25, %v3024_v3  ;;  %3648 = vmatpush.bf16.msra.mxu2 %v10437_v52  ;;  %v10432_v3 = vld [vmem:[%s21286_s3 + $0x10] sm:$0xf]  ;;  %v13631_v52 = vld [vmem:[%s21286_s3 + $0x4] sm:$0xf0] }
 0x4f1   :  { %v2711_v45 = vpop.f32.mrf.mxu1  ;;  %3903 = vmatpush.bf16.msrb.mxu1 %v10673_v56  ;;  %3941 = vmatpush.bf16.msrb.mxu3 %v10677_v21  ;;  %v10433_v22 = vor.u32 %v13633_v20, %v10432_v3  ;;  %v13706_v56 = vld [vmem:[%s21286_s3 + $0x264] sm:$0xf]  ;;  %v10425_v59 = vor.u32 %v13631_v52, %v10424_v41  ;;  %v10642_v3 = vld [vmem:[%s21286_s3 + $0x2b8] sm:$0xf0]  ;;  %v2427_v20 = vadd.f32 %v15717_v13, %v15750_v17  ;;  %v13707_v13 = vld [vmem:[%s21286_s3 + $0x264] sm:$0xf0] }
 0x4f2   :  { %v3075_v62 = vmul.f32 0.2, %v3043_v40  ;;  %v2712_v35 = vadd.f32 %v2711_v45, %v2662_v11  ;;  %v13723_v11 = vld [vmem:[%s21286_s3 + $0x2e4] sm:$0xf0]  ;;  %vm3059_vm10 = vcmp.ge.f32.partialorder %v3043_v40, 0.0  ;;  %3609 = vmatpush.bf16.msrb.mxu0 %v10441_v0  ;;  %v10605_v21 = vor.u32 %v13706_v56, %v10602_v18 }
 0x4f3   :  { %v10665_v42 = vor.u32 %v13723_v11, %v10664_v48  ;;  %v10650_v0 = vld [vmem:[%s21286_s3 + $0x2c8] sm:$0xf0]  ;;  %v2667_v48 = vpop.f32.mrf.mxu0  ;;  %v3006_v11 = vpop.f32.mrf.mxu3  ;;  %v10632_v17 = vld [vmem:[%s21286_s3 + $0x2a0] sm:$0xf]  ;;  %v13700_v52 = vld [vmem:[%s21286_s3 + $0x234] sm:$0xf] }
 0x4f4   :  { %v2735_v8 = vadd.f32 %v2712_v35, %v2445_v34  ;;  %v16362_v28 = vsel %vm3059_vm10, %v3043_v40, %v3075_v62  ;;  %3649 = vmatpush.bf16.msra.mxu2 %v10429_v53  ;;  %v10661_v40 = vor.u32 %v13720_v7, %v10658_v9  ;;  %v10648_v62 = vld [vmem:[%s21286_s3 + $0x2c0] sm:$0xf]  ;;  %v13719_v34 = vld [vmem:[%s21286_s3 + $0x2c4] sm:$0xf0]  ;;  %v10586_v7 = vld [vmem:[%s21286_s3 + $0x248] sm:$0xf0] }
 0x4f5   :  { %3904 = vmatpush.bf16.msrb.mxu1 %v10665_v42  ;;  %3942 = vmatpush.bf16.msrb.mxu3 %v10669_v23  ;;  %v16374_v51 = vpack.c.bf16 %v16362_v28, %v3089_v29  ;;  %v10649_v2 = vor.u32 %v13719_v34, %v10648_v62  ;;  %v13704_v42 = vld [vmem:[%s21286_s3 + $0x254] sm:$0xf]  ;;  %v2157_v23 = vadd.f32 %v2137_v60, %v21463_v57  ;;  %v21464_v29 = vmov 0.0|0.0   ;;  %v10600_v9 = vld [vmem:[%s21286_s3 + $0x260] sm:$0xf] }
 0x4f6   :  { %v3025_v31 = vadd.f32 %v3002_v26, %v2735_v8  ;;  %3610 = vmatpush.bf16.msrb.mxu0 %v10433_v22  ;;  %v10653_v26 = vor.u32 %v13718_v14, %v10650_v0  ;;  %v2957_v8 = vpop.f32.mrf.mxu2  ;;  %v10601_v41 = vor.u32 %v13707_v13, %v10600_v9  ;;  %v10578_v62 = vld [vmem:[%s21286_s3 + $0x238] sm:$0xf0]  ;;  %v10592_v34 = vld [vmem:[%s21286_s3 + $0x250] sm:$0xf]  ;;  %v13713_v0 = vld [vmem:[%s21286_s3 + $0x294] sm:$0xf0] }
 0x4f7   :  { %v2447_v56 = vadd.f32 %v2427_v20, %v2157_v23  ;;  %v10624_v14 = vld [vmem:[%s21286_s3 + $0x290] sm:$0xf]  ;;  %v10570_v23 = vld [vmem:[%s21286_s3 + $0x228] sm:$0xf0] }
 0x4f8   :  { %v3044_v58 = vadd.f32 %v15892_v25, %v3025_v31  ;;  %3922 = vmatpush.bf16.msrb.mxu2 %v10613_v33  ;;  %v13717_v31 = vld [vmem:[%s21286_s3 + $0x2b4] sm:$0xf0]  ;;  %v13716_v33 = vld [vmem:[%s21286_s3 + $0x2b4] sm:$0xf]  ;;  %v10625_v57 = vor.u32 %v13713_v0, %v10624_v14  ;;  %v10618_v13 = vld [vmem:[%s21286_s3 + $0x288] sm:$0xf0] }
 0x4f9   :  { %v2714_v45 = vpop.f32.mrf.mxu1  ;;  %3905 = vmatpush.bf16.msrb.mxu1 %v10657_v54  ;;  %3943 = vmatpush.bf16.msrb.mxu3 %v10661_v40  ;;  %v10645_v22 = vor.u32 %v13716_v33, %v10642_v3  ;;  %v10589_v54 = vor.u32 %v13702_v4, %v10586_v7  ;;  %v13715_v40 = vld [vmem:[%s21286_s3 + $0x2a4] sm:$0xf0]  ;;  %v21465_v3 = vld [vmem:[#allocation32_spill] sm:$0xff]  ;;  %v13710_v7 = vld [vmem:[%s21286_s3 + $0x284] sm:$0xf] }
 0x4fa   :  { %v3076_v35 = vmul.f32 0.2, %v3044_v58  ;;  %v2715_v61 = vadd.f32 %v2714_v45, %v2665_v1  ;;  %vm3060_vm11 = vcmp.ge.f32.partialorder %v3044_v58, 0.0  ;;  %3611 = vmatpush.bf16.msrb.mxu0 %v10425_v59  ;;  %v10633_v60 = vor.u32 %v13715_v40, %v10632_v17  ;;  %v13714_v45 = vld [vmem:[%s21286_s3 + $0x2a4] sm:$0xf]  ;;  %v21466_v40 = vld [vmem:[#allocation24_spill] sm:$0xff] }
 0x4fb   :  { %v2142_v20 = vadd.f32 %v15804_v16, %v21465_v3  ;;  %v13757_v14 = vld [vmem:[%s21286_s3 + $0x3f4] sm:$0xf0]  ;;  %v10786_v3 = vld [vmem:[%s21286_s3 + $0x3d8] sm:$0xf0] }
 0x4fc   :  { %v2736_v49 = vadd.f32 %v2715_v61, %v15770_v32  ;;  %v3092_v1 = vsel %vm3060_vm11, %v3044_v58, %v3076_v35  ;;  %3923 = vmatpush.bf16.msrb.mxu2 %v10605_v21  ;;  %v10597_v32 = vor.u32 %v13704_v42, %v10594_v5  ;;  %v10634_v21 = vld [vmem:[%s21286_s3 + $0x2a8] sm:$0xf0]  ;;  %v13705_v35 = vld [vmem:[%s21286_s3 + $0x254] sm:$0xf0]  ;;  %v3007_v61 = vadd.f32 %v3006_v11, %v2957_v8  ;;  %v10626_v11 = vld [vmem:[%s21286_s3 + $0x298] sm:$0xf0]  ;;  %v2670_v8 = vpop.f32.mrf.mxu0  ;;  %v3009_v42 = vpop.f32.mrf.mxu3 }
 0x4fd   :  { %v16411_v27 = vpack.c.bf16 %v3092_v1, %v16269_v50  ;;  %3906 = vmatpush.bf16.msrb.mxu1 %v10649_v2  ;;  %v10640_v50 = vld [vmem:[%s21286_s3 + $0x2b0] sm:$0xf]  ;;  %3944 = vmatpush.bf16.msrb.mxu3 %v10653_v26  ;;  %v10637_v2 = vor.u32 %v13714_v45, %v10634_v21  ;;  %v13712_v26 = vld [vmem:[%s21286_s3 + $0x294] sm:$0xf]  ;;  %v13698_v1 = vld [vmem:[%s21286_s3 + $0x224] sm:$0xf] }
 0x4fe   :  { %v16415_v53 = vadd.f32 %v16192_v38, %v2736_v49  ;;  %v10609_v38 = vor.u32 %v13709_v43, %v10608_v55  ;;  %v10641_v24 = vor.u32 %v13717_v31, %v10640_v50  ;;  %v10593_v49 = vor.u32 %v13705_v35, %v10592_v34  ;;  %v13703_v55 = vld [vmem:[%s21286_s3 + $0x244] sm:$0xf0]  ;;  %v2960_v43 = vpop.f32.mrf.mxu2  ;;  %v10616_v50 = vld [vmem:[%s21286_s3 + $0x280] sm:$0xf]  ;;  %v10562_v45 = vld [vmem:[%s21286_s3 + $0x218] sm:$0xf0] }
 0x4ff   :  { %3400 = vmatmul.bf16.gmra.mxu1 %v21464_v29  ;;  %3438 = vmatmul.bf16.gmra.mxu3 %v21464_v29  ;;  %v10629_v33 = vor.u32 %v13712_v26, %v10626_v11  ;;  %v3010_v21 = vadd.f32 %v3009_v42, %v2960_v43  ;;  %v10802_v34 = vld [vmem:[%s21286_s3 + $0x3f8] sm:$0xf0]  ;;  %v10576_v35 = vld [vmem:[%s21286_s3 + $0x230] sm:$0xf]  ;;  %v13754_v11 = vld [vmem:[%s21286_s3 + $0x3e4] sm:$0xf] }
 0x500   :  { %3924 = vmatpush.bf16.msrb.mxu2 %v10597_v32  ;;  %3884 = vmatpush.bf16.msra.mxu0 %v10609_v38  ;;  %v10584_v32 = vld [vmem:[%s21286_s3 + $0x240] sm:$0xf]  ;;  %v13711_v38 = vld [vmem:[%s21286_s3 + $0x284] sm:$0xf0] }
 0x501   :  { %v2716_v58 = vpop.f32.mrf.mxu1  ;;  %3907 = vmatpush.bf16.msrb.mxu1 %v10641_v24  ;;  %3945 = vmatpush.bf16.msrb.mxu3 %v10645_v22  ;;  %v10573_v22 = vor.u32 %v13698_v1, %v10570_v23  ;;  %v10585_v4 = vor.u32 %v13703_v55, %v10584_v32  ;;  %v10794_v23 = vld [vmem:[%s21286_s3 + $0x3e8] sm:$0xf0]  ;;  %v10568_v32 = vld [vmem:[%s21286_s3 + $0x220] sm:$0xf]  ;;  %v13699_v55 = vld [vmem:[%s21286_s3 + $0x224] sm:$0xf0] }
 0x502   :  { %v2717_v18 = vadd.f32 %v2716_v58, %v2667_v48  ;;  %v10581_v48 = vor.u32 %v13700_v52, %v10578_v62  ;;  %v3129_v52 = vpack.c.bf16 %v15986_v12, %v21462_v63 }
 0x504   :  { %v2737_v59 = vadd.f32 %v2717_v18, %v2447_v56  ;;  %3925 = vmatpush.bf16.msrb.mxu2 %v10589_v54  ;;  %3885 = vmatpush.bf16.msra.mxu0 %v10601_v41  ;;  %v10617_v54 = vor.u32 %v13711_v38, %v10616_v50  ;;  %v2159_v56 = vadd.f32 %v2142_v20, %v21466_v40  ;;  %v2672_v0 = vpop.f32.mrf.mxu0  ;;  %v10792_v50 = vld [vmem:[%s21286_s3 + $0x3e0] sm:$0xf]  ;;  %v13755_v38 = vld [vmem:[%s21286_s3 + $0x3e4] sm:$0xf0] }
 0x505   :  { %3908 = vmatpush.bf16.msrb.mxu1 %v10633_v60  ;;  %3946 = vmatpush.bf16.msrb.mxu3 %v10637_v2  ;;  %v10621_v41 = vor.u32 %v13710_v7, %v10618_v13  ;;  %v13696_v60 = vld [vmem:[%s21286_s3 + $0x214] sm:$0xf]  ;;  %v10800_v2 = vld [vmem:[%s21286_s3 + $0x3f0] sm:$0xf] }
 0x506   :  { %v3027_v5 = vadd.f32 %v3007_v61, %v2737_v59  ;;  %v10565_v62 = vor.u32 %v13696_v60, %v10562_v45  ;;  %v13701_v61 = vld [vmem:[%s21286_s3 + $0x234] sm:$0xf0]  ;;  %v2432_v59 = vadd.f32 %v15742_v47, %v15763_v10  ;;  %v10801_v26 = vor.u32 %v13757_v14, %v10800_v2  ;;  %v13694_v47 = vld [vmem:[%s21286_s3 + $0x204] sm:$0xf]  ;;  %v10554_v10 = vld [vmem:[%s21286_s3 + $0x208] sm:$0xf0]  ;;  %v2962_v1 = vpop.f32.mrf.mxu2 }
 0x507   :  { %v10560_v7 = vld [vmem:[%s21286_s3 + $0x210] sm:$0xf]  ;;  %v10778_v60 = vld [vmem:[%s21286_s3 + $0x3c8] sm:$0xf0]  ;;  %v10552_v45 = vld [vmem:[%s21286_s3 + $0x200] sm:$0xf] }
 0x508   :  { %v3046_v31 = vadd.f32 %v15892_v25, %v3027_v5  ;;  %3926 = vmatpush.bf16.msrb.mxu2 %v10581_v48  ;;  %3886 = vmatpush.bf16.msra.mxu0 %v10593_v49  ;;  %v3011_v48 = vpop.f32.mrf.mxu3  ;;  %v2449_v42 = vadd.f32 %v2432_v59, %v2159_v56  ;;  %v13750_v56 = vld [vmem:[%s21286_s3 + $0x3c4] sm:$0xf] }
 0x509   :  { %v2719_v24 = vpop.f32.mrf.mxu1  ;;  %3909 = vmatpush.bf16.msrb.mxu1 %v10625_v57  ;;  %3947 = vmatpush.bf16.msrb.mxu3 %v10629_v33  ;;  %v10557_v57 = vor.u32 %v13694_v47, %v10554_v10  ;;  %v13752_v33 = vld [vmem:[%s21286_s3 + $0x3d4] sm:$0xf]  ;;  %v3012_v20 = vadd.f32 %v3011_v48, %v2962_v1  ;;  %v13738_v10 = vld [vmem:[%s21286_s3 + $0x364] sm:$0xf] }
 0x50a   :  { %v2720_v9 = vadd.f32 %v2719_v24, %v2670_v8  ;;  %vm3062_vm12 = vcmp.ge.f32.partialorder %v3046_v31, 0.0  ;;  %v3078_v58 = vmul.f32 0.2, %v3046_v31  ;;  %v3045_v8 = vadd.f32 %v15892_v25, %v16415_v53  ;;  %v14438_v24 = vld [vmem:[%s21285_s6] ss:$0 sm:$0xff] }
 0x50b   :  { %v10797_v25 = vor.u32 %v13754_v11, %v10794_v23  ;;  %v10569_v53 = vor.u32 %v13699_v55, %v10568_v32  ;;  %v10730_v11 = vld [vmem:[%s21286_s3 + $0x368] sm:$0xf0]  ;;  %v13748_v1 = vld [vmem:[%s21286_s3 + $0x3b4] sm:$0xf]  ;;  %v10722_v32 = vld [vmem:[%s21286_s3 + $0x358] sm:$0xf0] }
 0x50c   :  { %v2738_v16 = vadd.f32 %v2720_v9, %v15795_v46  ;;  %v16515_v17 = vsel %vm3062_vm12, %v3046_v31, %v3078_v58  ;;  %3927 = vmatpush.bf16.msrb.mxu2 %v10573_v22  ;;  %3887 = vmatpush.bf16.msra.mxu0 %v10585_v4  ;;  %v13756_v46 = vld [vmem:[%s21286_s3 + $0x3f4] sm:$0xf]  ;;  %v10793_v31 = vor.u32 %v13755_v38, %v10792_v50  ;;  %v13697_v9 = vld [vmem:[%s21286_s3 + $0x214] sm:$0xf0]  ;;  %v10784_v58 = vld [vmem:[%s21286_s3 + $0x3d0] sm:$0xf] }
 0x50d   :  { %v3174_v18 = vpack.c.bf16 %v16515_v17, %v21462_v63  ;;  %3910 = vmatpush.bf16.msrb.mxu1 %v10617_v54  ;;  %v10805_v12 = vor.u32 %v13756_v46, %v10802_v34  ;;  %v10577_v63 = vor.u32 %v13701_v61, %v10576_v35  ;;  %3948 = vmatpush.bf16.msrb.mxu3 %v10621_v41  ;;  %v13753_v54 = vld [vmem:[%s21286_s3 + $0x3d4] sm:$0xf0]  ;;  %v13695_v46 = vld [vmem:[%s21286_s3 + $0x204] sm:$0xf0]  ;;  %vm3061_vm13 = vcmp.ge.f32.partialorder %v3045_v8, 0.0 }
 0x50e   :  { %v3028_v49 = vadd.f32 %v3010_v21, %v2738_v16  ;;  %v10789_v16 = vor.u32 %v13752_v33, %v10786_v3  ;;  %v10561_v40 = vor.u32 %v13697_v9, %v10560_v7  ;;  %v10785_v41 = vor.u32 %v13753_v54, %v10784_v58  ;;  %v10776_v34 = vld [vmem:[%s21286_s3 + $0x3c0] sm:$0xf]  ;;  %v10762_v50 = vld [vmem:[%s21286_s3 + $0x3a8] sm:$0xf0]  ;;  %v13739_v33 = vld [vmem:[%s21286_s3 + $0x364] sm:$0xf0] }
 0x50f   :  { %3381 = vmatmul.bf16.gmra.mxu0 %v3174_v18  ;;  %3419 = vmatmul.bf16.gmra.mxu2 %v3174_v18  ;;  %v3077_v18 = vmul.f32 0.2, %v3045_v8  ;;  %v10781_v61 = vor.u32 %v13750_v56, %v10778_v60  ;;  %v10553_v59 = vor.u32 %v13695_v46, %v10552_v45  ;;  %v10733_v23 = vor.u32 %v13738_v10, %v10730_v11  ;;  %v10728_v38 = vld [vmem:[%s21286_s3 + $0x360] sm:$0xf]  ;;  %v10754_v58 = vld [vmem:[%s21286_s3 + $0x398] sm:$0xf0] }
 0x510   :  { %3631 = vmatmul.bf16.vlgmr.msra.gmra.mxu1 %v3129_v52  ;;  %3669 = vmatmul.bf16.vlgmr.msra.gmra.mxu3 %v3129_v52  ;;  %v3047_v22 = vadd.f32 %v14438_v24, %v3028_v49  ;;  %v13740_v52 = vld [vmem:[%s21286_s3 + $0x374] sm:$0xf]  ;;  %v10760_v3 = vld [vmem:[%s21286_s3 + $0x3a0] sm:$0xf]  ;;  %v10720_v54 = vld [vmem:[%s21286_s3 + $0x350] sm:$0xf] }
 0x511   :  { %v2721_v5 = vpop.f32.mrf.mxu1  ;;  %3928 = vmatpush.bf16.msrb.mxu2 %v10565_v62  ;;  %4229 = vmatpush.bf16.msra.mxu3 %v10805_v12  ;;  %v10738_v62 = vld [vmem:[%s21286_s3 + $0x378] sm:$0xf0]  ;;  %v13751_v12 = vld [vmem:[%s21286_s3 + $0x3c4] sm:$0xf0]  ;;  %v3093_v2 = vsel %vm3061_vm13, %v3045_v8, %v3077_v18  ;;  %v10752_v56 = vld [vmem:[%s21286_s3 + $0x390] sm:$0xf] }
 0x512   :  { %v2722_v43 = vadd.f32 %v2721_v5, %v2672_v0  ;;  %3888 = vmatpush.bf16.msra.mxu0 %v10577_v63  ;;  %4191 = vmatpush.bf16.msra.mxu1 %v10801_v26  ;;  %vm3063_vm14 = vcmp.ge.f32.partialorder %v3047_v22, 0.0  ;;  %v3079_v35 = vmul.f32 0.2, %v3047_v22  ;;  %v10741_v49 = vor.u32 %v13740_v52, %v10738_v62  ;;  %v13741_v5 = vld [vmem:[%s21286_s3 + $0x374] sm:$0xf0] }
 0x513   :  { %v10777_v26 = vor.u32 %v13751_v12, %v10776_v34  ;;  %v13745_v18 = vld [vmem:[%s21286_s3 + $0x394] sm:$0xf0]  ;;  %v13742_v60 = vld [vmem:[%s21286_s3 + $0x384] sm:$0xf]  ;;  %v10746_v45 = vld [vmem:[%s21286_s3 + $0x388] sm:$0xf0] }
 0x514   :  { %v2739_v4 = vadd.f32 %v2722_v43, %v2449_v42  ;;  %v16619_v14 = vsel %vm3063_vm14, %v3047_v22, %v3079_v35  ;;  %v10736_v42 = vld [vmem:[%s21286_s3 + $0x370] sm:$0xf]  ;;  %v13749_v43 = vld [vmem:[%s21286_s3 + $0x3b4] sm:$0xf0]  ;;  %v10729_v22 = vor.u32 %v13739_v33, %v10728_v38  ;;  %v13732_v52 = vld [vmem:[%s21286_s3 + $0x334] sm:$0xf]  ;;  %v10749_v34 = vor.u32 %v13742_v60, %v10746_v45 }
 0x515   :  { %3929 = vmatpush.bf16.msrb.mxu2 %v10557_v57  ;;  %4230 = vmatpush.bf16.msra.mxu3 %v10797_v25  ;;  %v16622_v0 = vpack.c.bf16 %v16619_v14, %v3093_v2  ;;  %v10768_v57 = vld [vmem:[%s21286_s3 + $0x3b0] sm:$0xf]  ;;  %v10737_v55 = vor.u32 %v13741_v5, %v10736_v42  ;;  %v10706_v62 = vld [vmem:[%s21286_s3 + $0x338] sm:$0xf0]  ;;  %v10712_v35 = vld [vmem:[%s21286_s3 + $0x340] sm:$0xf] }
 0x516   :  { %v3029_v13 = vadd.f32 %v3012_v20, %v2739_v4  ;;  %3889 = vmatpush.bf16.msra.mxu0 %v10569_v53  ;;  %4192 = vmatpush.bf16.msra.mxu1 %v10793_v31  ;;  %v10769_v25 = vor.u32 %v13749_v43, %v10768_v57  ;;  %v13746_v53 = vld [vmem:[%s21286_s3 + $0x3a4] sm:$0xf]  ;;  %v13747_v20 = vld [vmem:[%s21286_s3 + $0x3a4] sm:$0xf0]  ;;  %v13744_v4 = vld [vmem:[%s21286_s3 + $0x394] sm:$0xf]  ;;  %v10709_v12 = vor.u32 %v13732_v52, %v10706_v62 }
 0x517   :  { %v10765_v31 = vor.u32 %v13746_v53, %v10762_v50  ;;  %v10761_v9 = vor.u32 %v13747_v20, %v10760_v3  ;;  %v13788_v10 = vld [vmem:[%s21286_s3 + $0x4f4] sm:$0xf]  ;;  %v10930_v11 = vld [vmem:[%s21286_s3 + $0x4f8] sm:$0xf0]  ;;  %v13789_v57 = vld [vmem:[%s21286_s3 + $0x4f4] sm:$0xf0] }
 0x518   :  { %v3048_v21 = vadd.f32 %v14438_v24, %v3029_v13  ;;  %v13734_v24 = vld [vmem:[%s21286_s3 + $0x344] sm:$0xf]  ;;  %v13737_v13 = vld [vmem:[%s21286_s3 + $0x354] sm:$0xf0]  ;;  %v13731_v53 = vld [vmem:[%s21286_s3 + $0x324] sm:$0xf0] }
 0x519   :  { %4231 = vmatpush.bf16.msra.mxu3 %v10789_v16  ;;  %v10714_v16 = vld [vmem:[%s21286_s3 + $0x348] sm:$0xf0]  ;;  %v10920_v50 = vld [vmem:[%s21286_s3 + $0x4e0] sm:$0xf]  ;;  %v13787_v33 = vld [vmem:[%s21286_s3 + $0x4e4] sm:$0xf0] }
 0x51a   :  { %3890 = vmatpush.bf16.msra.mxu0 %v10561_v40  ;;  %vm3064_vm15 = vcmp.ge.f32.partialorder %v3048_v21, 0.0  ;;  %v3080_v63 = vmul.f32 0.2, %v3048_v21  ;;  %4193 = vmatpush.bf16.msra.mxu1 %v10785_v41  ;;  %v10757_v40 = vor.u32 %v13744_v4, %v10754_v58  ;;  %v10721_v41 = vor.u32 %v13737_v13, %v10720_v54  ;;  %v13784_v3 = vld [vmem:[%s21286_s3 + $0x4d4] sm:$0xf] }
 0x51b   :  { %v10717_v46 = vor.u32 %v13734_v24, %v10714_v16  ;;  %v10914_v20 = vld [vmem:[%s21286_s3 + $0x4d8] sm:$0xf0]  ;;  %v13726_v24 = vld [vmem:[%s21286_s3 + $0x304] sm:$0xf]  ;;  %v10921_v4 = vor.u32 %v13787_v33, %v10920_v50  ;;  %v13729_v58 = vld [vmem:[%s21286_s3 + $0x314] sm:$0xf0] }
 0x51c   :  { %v3096_v48 = vsel %vm3064_vm15, %v3048_v21, %v3080_v63  ;;  %v10753_v21 = vor.u32 %v13745_v18, %v10752_v56  ;;  %v13730_v63 = vld [vmem:[%s21286_s3 + $0x324] sm:$0xf]  ;;  %v10912_v54 = vld [vmem:[%s21286_s3 + $0x4d0] sm:$0xf]  ;;  %v13785_v13 = vld [vmem:[%s21286_s3 + $0x4d4] sm:$0xf0] }
 0x51d   :  { %v16625_v47 = vpack.c.bf16 %v3096_v48, %v16515_v17  ;;  %4232 = vmatpush.bf16.msra.mxu3 %v10781_v61  ;;  %v10770_v17 = vld [vmem:[%s21286_s3 + $0x3b8] sm:$0xf0]  ;;  %v13735_v61 = vld [vmem:[%s21286_s3 + $0x344] sm:$0xf0]  ;;  %v10913_v16 = vor.u32 %v13785_v13, %v10912_v54  ;;  %v10906_v56 = vld [vmem:[%s21286_s3 + $0x4c8] sm:$0xf0] }
 0x51e   :  { %3891 = vmatpush.bf16.msra.mxu0 %v10553_v59  ;;  %v10773_v8 = vor.u32 %v13748_v1, %v10770_v17  ;;  %4194 = vmatpush.bf16.msra.mxu1 %v10777_v26  ;;  %v10744_v59 = vld [vmem:[%s21286_s3 + $0x380] sm:$0xf]  ;;  %v10713_v2 = vor.u32 %v13735_v61, %v10712_v35  ;;  %v13743_v48 = vld [vmem:[%s21286_s3 + $0x384] sm:$0xf0]  ;;  %v10933_v1 = vor.u32 %v13788_v10, %v10930_v11  ;;  %v10704_v17 = vld [vmem:[%s21286_s3 + $0x330] sm:$0xf] }
 0x51f   :  { %3612 = vmatmul.bf16.vlgmr.msrb.gmra.mxu0 %v21464_v29  ;;  %3650 = vmatmul.bf16.vlgmr.msra.gmra.mxu2 %v21464_v29  ;;  %v10745_v26 = vor.u32 %v13743_v48, %v10744_v59  ;;  %v10866_v60 = vld [vmem:[%s21286_s3 + $0x478] sm:$0xf0]  ;;  %v13727_v52 = vld [vmem:[%s21286_s3 + $0x304] sm:$0xf0]  ;;  %v10904_v62 = vld [vmem:[%s21286_s3 + $0x4c0] sm:$0xf] }
 0x520   :  { %3636 = vmatmul.bf16.gmra.mxu1 %v16285_v37  ;;  %3674 = vmatmul.bf16.gmra.mxu3 %v16285_v37  ;;  %v13736_v37 = vld [vmem:[%s21286_s3 + $0x354] sm:$0xf]  ;;  %v10898_v61 = vld [vmem:[%s21286_s3 + $0x4b8] sm:$0xf0]  ;;  %v13773_v10 = vld [vmem:[%s21286_s3 + $0x474] sm:$0xf0] }
 0x521   :  { %4210 = vmatpush.bf16.msra.mxu2 %v10741_v49  ;;  %4233 = vmatpush.bf16.msra.mxu3 %v10773_v8  ;;  %v10725_v7 = vor.u32 %v13736_v37, %v10722_v32  ;;  %v10698_v49 = vld [vmem:[%s21286_s3 + $0x328] sm:$0xf0]  ;;  %v13733_v8 = vld [vmem:[%s21286_s3 + $0x334] sm:$0xf0]  ;;  %v13786_v32 = vld [vmem:[%s21286_s3 + $0x4e4] sm:$0xf] }
 0x522   :  { %4172 = vmatpush.bf16.msrb.mxu0 %v10737_v55  ;;  %4195 = vmatpush.bf16.msra.mxu1 %v10769_v25  ;;  %v10701_v42 = vor.u32 %v13730_v63, %v10698_v49  ;;  %v10705_v5 = vor.u32 %v13733_v8, %v10704_v17  ;;  %v10922_v55 = vld [vmem:[%s21286_s3 + $0x4e8] sm:$0xf0]  ;;  %v10696_v25 = vld [vmem:[%s21286_s3 + $0x320] sm:$0xf]  ;;  %v13780_v35 = vld [vmem:[%s21286_s3 + $0x4b4] sm:$0xf] }
 0x523   :  { %v10925_v43 = vor.u32 %v13786_v32, %v10922_v55  ;;  %v13770_v63 = vld [vmem:[%s21286_s3 + $0x464] sm:$0xf]  ;;  %v10901_v49 = vor.u32 %v13780_v35, %v10898_v61  ;;  %v10896_v11 = vld [vmem:[%s21286_s3 + $0x4b0] sm:$0xf]  ;;  %v13781_v8 = vld [vmem:[%s21286_s3 + $0x4b4] sm:$0xf0] }
 0x524   :  { %v13771_v32 = vld [vmem:[%s21286_s3 + $0x464] sm:$0xf0]  ;;  %v10888_v55 = vld [vmem:[%s21286_s3 + $0x4a0] sm:$0xf]  ;;  %v10882_v50 = vld [vmem:[%s21286_s3 + $0x498] sm:$0xf0] }
 0x525   :  { %4211 = vmatpush.bf16.msra.mxu2 %v10733_v23  ;;  %4234 = vmatpush.bf16.msra.mxu3 %v10765_v31  ;;  %v10690_v23 = vld [vmem:[%s21286_s3 + $0x318] sm:$0xf0]  ;;  %v10697_v31 = vor.u32 %v13731_v53, %v10696_v25  ;;  %v13776_v53 = vld [vmem:[%s21286_s3 + $0x494] sm:$0xf]  ;;  %v13769_v33 = vld [vmem:[%s21286_s3 + $0x454] sm:$0xf0] }
 0x526   :  { %4173 = vmatpush.bf16.msrb.mxu0 %v10729_v22  ;;  %4196 = vmatpush.bf16.msra.mxu1 %v10761_v9  ;;  %v10682_v22 = vld [vmem:[%s21286_s3 + $0x308] sm:$0xf0]  ;;  %v10688_v9 = vld [vmem:[%s21286_s3 + $0x310] sm:$0xf]  ;;  %v13775_v35 = vld [vmem:[%s21286_s3 + $0x484] sm:$0xf0] }
 0x527   :  { %v10685_v18 = vor.u32 %v13726_v24, %v10682_v22  ;;  %v10689_v45 = vor.u32 %v13729_v58, %v10688_v9  ;;  %v10885_v22 = vor.u32 %v13776_v53, %v10882_v50  ;;  %v13777_v9 = vld [vmem:[%s21286_s3 + $0x494] sm:$0xf0]  ;;  %v13774_v58 = vld [vmem:[%s21286_s3 + $0x484] sm:$0xf]  ;;  %v10874_v54 = vld [vmem:[%s21286_s3 + $0x488] sm:$0xf0] }
 0x528   :  { %v10826_v61 = vld [vmem:[%s21286_s3 + $0x428] sm:$0xf0]  ;;  %v13819_v53 = vld [vmem:[%s21286_s3 + $0x5e4] sm:$0xf0]  ;;  %v13814_v50 = vld [vmem:[%s21286_s3 + $0x5c4] sm:$0xf] }
 0x529   :  { %4212 = vmatpush.bf16.msra.mxu2 %v10725_v7  ;;  %4235 = vmatpush.bf16.msra.mxu3 %v10757_v40  ;;  %v10917_v7 = vor.u32 %v13784_v3, %v10914_v20  ;;  %v13782_v40 = vld [vmem:[%s21286_s3 + $0x4c4] sm:$0xf]  ;;  %v10842_v20 = vld [vmem:[%s21286_s3 + $0x448] sm:$0xf0] }
 0x52a   :  { %4174 = vmatpush.bf16.msrb.mxu0 %v10721_v41  ;;  %4197 = vmatpush.bf16.msra.mxu1 %v10753_v21  ;;  %v13772_v41 = vld [vmem:[%s21286_s3 + $0x474] sm:$0xf]  ;;  %v10680_v21 = vld [vmem:[%s21286_s3 + $0x300] sm:$0xf]  ;;  %v13766_v3 = vld [vmem:[%s21286_s3 + $0x444] sm:$0xf] }
 0x52b   :  { %v10869_v59 = vor.u32 %v13772_v41, %v10866_v60  ;;  %v10845_v13 = vor.u32 %v13766_v3, %v10842_v20  ;;  %v13820_v41 = vld [vmem:[%s21286_s3 + $0x5f4] sm:$0xf]  ;;  %v11058_v60 = vld [vmem:[%s21286_s3 + $0x5f8] sm:$0xf0]  ;;  %v13761_v3 = vld [vmem:[%s21286_s3 + $0x414] sm:$0xf0] }
 0x52c   :  { %v11040_v20 = vld [vmem:[%s21286_s3 + $0x5d0] sm:$0xf] }
 0x52d   :  { %4213 = vmatpush.bf16.msra.mxu2 %v10717_v46  ;;  %4236 = vmatpush.bf16.msra.mxu3 %v10749_v34  ;;  %v10909_v46 = vor.u32 %v13782_v40, %v10906_v56  ;;  %v13783_v34 = vld [vmem:[%s21286_s3 + $0x4c4] sm:$0xf0]  ;;  %v10834_v40 = vld [vmem:[%s21286_s3 + $0x438] sm:$0xf0] }
 0x52e   :  { %4175 = vmatpush.bf16.msrb.mxu0 %v10713_v2  ;;  %4198 = vmatpush.bf16.msra.mxu1 %v10745_v26  ;;  %v10858_v2 = vld [vmem:[%s21286_s3 + $0x468] sm:$0xf0]  ;;  %v10905_v48 = vor.u32 %v13783_v34, %v10904_v62  ;;  %v10864_v26 = vld [vmem:[%s21286_s3 + $0x470] sm:$0xf]  ;;  %v13762_v62 = vld [vmem:[%s21286_s3 + $0x424] sm:$0xf]  ;;  %v11061_v34 = vor.u32 %v13820_v41, %v11058_v60 }
 0x52f   :  { %3617 = vmatmul.bf16.gmra.mxu0 %v16075_v19  ;;  %3655 = vmatmul.bf16.gmra.mxu2 %v16075_v19  ;;  %v13728_v19 = vld [vmem:[%s21286_s3 + $0x314] sm:$0xf]  ;;  %v10865_v17 = vor.u32 %v13773_v10, %v10864_v26  ;;  %v11056_v26 = vld [vmem:[%s21286_s3 + $0x5f0] sm:$0xf]  ;;  %v10829_v10 = vor.u32 %v13762_v62, %v10826_v61  ;;  %v13802_v60 = vld [vmem:[%s21286_s3 + $0x564] sm:$0xf] }
 0x530   :  { %3911 = vmatmul.bf16.vlgmr.msrb.gmra.mxu1 %v15959_v44  ;;  %3949 = vmatmul.bf16.vlgmr.msrb.gmra.mxu3 %v15959_v44  ;;  %v10928_v44 = vld [vmem:[%s21286_s3 + $0x4f0] sm:$0xf]  ;;  %v10693_v38 = vor.u32 %v13728_v19, %v10690_v23  ;;  %v10890_v19 = vld [vmem:[%s21286_s3 + $0x4a8] sm:$0xf0] }
 0x531   :  { %4214 = vmatpush.bf16.msra.mxu2 %v10709_v12  ;;  %4517 = vmatpush.bf16.msrb.mxu3 %v10933_v1  ;;  %v10929_v37 = vor.u32 %v13789_v57, %v10928_v44  ;;  %v10681_v12 = vor.u32 %v13727_v52, %v10680_v21  ;;  %v10861_v1 = vor.u32 %v13770_v63, %v10858_v2  ;;  %v10850_v44 = vld [vmem:[%s21286_s3 + $0x458] sm:$0xf0]  ;;  %v10872_v21 = vld [vmem:[%s21286_s3 + $0x480] sm:$0xf]  ;;  %v13818_v63 = vld [vmem:[%s21286_s3 + $0x5e4] sm:$0xf] }
 0x532   :  { %4176 = vmatpush.bf16.msrb.mxu0 %v10705_v5  ;;  %v13768_v5 = vld [vmem:[%s21286_s3 + $0x454] sm:$0xf]  ;;  %v10897_v57 = vor.u32 %v13781_v8, %v10896_v11  ;;  %v11050_v2 = vld [vmem:[%s21286_s3 + $0x5e8] sm:$0xf0]  ;;  %v10992_v61 = vld [vmem:[%s21286_s3 + $0x570] sm:$0xf] }
 0x533   :  { %4479 = vmatpush.bf16.msrb.mxu1 %v10929_v37  ;;  %v10856_v37 = vld [vmem:[%s21286_s3 + $0x460] sm:$0xf]  ;;  %v13760_v11 = vld [vmem:[%s21286_s3 + $0x414] sm:$0xf] }
 0x534   :  { %v10857_v25 = vor.u32 %v13771_v32, %v10856_v37  ;;  %v10824_v32 = vld [vmem:[%s21286_s3 + $0x420] sm:$0xf] }
 0x535   :  { %4215 = vmatpush.bf16.msra.mxu2 %v10701_v42  ;;  %4518 = vmatpush.bf16.msrb.mxu3 %v10925_v43  ;;  %v13778_v42 = vld [vmem:[%s21286_s3 + $0x4a4] sm:$0xf]  ;;  %v13779_v43 = vld [vmem:[%s21286_s3 + $0x4a4] sm:$0xf0] }
 0x536   :  { %4177 = vmatpush.bf16.msrb.mxu0 %v10697_v31  ;;  %v10893_v23 = vor.u32 %v13778_v42, %v10890_v19  ;;  %v10848_v31 = vld [vmem:[%s21286_s3 + $0x450] sm:$0xf]  ;;  %v10889_v24 = vor.u32 %v13779_v43, %v10888_v55  ;;  %v13816_v19 = vld [vmem:[%s21286_s3 + $0x5d4] sm:$0xf]  ;;  %v13763_v55 = vld [vmem:[%s21286_s3 + $0x424] sm:$0xf0] }
 0x537   :  { %4480 = vmatpush.bf16.msrb.mxu1 %v10921_v4  ;;  %v10880_v4 = vld [vmem:[%s21286_s3 + $0x490] sm:$0xf]  ;;  %v11048_v43 = vld [vmem:[%s21286_s3 + $0x5e0] sm:$0xf] }
 0x538   :  { %v10881_v56 = vor.u32 %v13777_v9, %v10880_v4  ;;  %v13804_v4 = vld [vmem:[%s21286_s3 + $0x574] sm:$0xf]  ;;  %v10994_v9 = vld [vmem:[%s21286_s3 + $0x578] sm:$0xf0] }
 0x539   :  { %4216 = vmatpush.bf16.msra.mxu2 %v10693_v38  ;;  %4519 = vmatpush.bf16.msrb.mxu3 %v10917_v7  ;;  %v10853_v38 = vor.u32 %v13768_v5, %v10850_v44  ;;  %v10849_v7 = vor.u32 %v13769_v33, %v10848_v31  ;;  %v11042_v5 = vld [vmem:[%s21286_s3 + $0x5d8] sm:$0xf0]  ;;  %v13758_v44 = vld [vmem:[%s21286_s3 + $0x404] sm:$0xf]  ;;  %v11049_v31 = vor.u32 %v13819_v53, %v11048_v43  ;;  %v10816_v33 = vld [vmem:[%s21286_s3 + $0x410] sm:$0xf] }
 0x53a   :  { %4178 = vmatpush.bf16.msrb.mxu0 %v10689_v45  ;;  %v10840_v45 = vld [vmem:[%s21286_s3 + $0x440] sm:$0xf]  ;;  %v11045_v37 = vor.u32 %v13816_v19, %v11042_v5  ;;  %v10997_v41 = vor.u32 %v13804_v4, %v10994_v9  ;;  %v13798_v19 = vld [vmem:[%s21286_s3 + $0x544] sm:$0xf]  ;;  %v10976_v43 = vld [vmem:[%s21286_s3 + $0x550] sm:$0xf] }
 0x53b   :  { %4481 = vmatpush.bf16.msrb.mxu1 %v10913_v16  ;;  %v13764_v16 = vld [vmem:[%s21286_s3 + $0x434] sm:$0xf] }
 0x53c   :  { %v10837_v52 = vor.u32 %v13764_v16, %v10834_v40  ;;  %v11026_v16 = vld [vmem:[%s21286_s3 + $0x5b8] sm:$0xf0]  ;;  %v10808_v40 = vld [vmem:[%s21286_s3 + $0x400] sm:$0xf] }
 0x53d   :  { %4217 = vmatpush.bf16.msra.mxu2 %v10685_v18  ;;  %4520 = vmatpush.bf16.msrb.mxu3 %v10909_v46  ;;  %v10877_v18 = vor.u32 %v13774_v58, %v10874_v54  ;;  %v13767_v46 = vld [vmem:[%s21286_s3 + $0x444] sm:$0xf0]  ;;  %v10817_v58 = vor.u32 %v13761_v3, %v10816_v33  ;;  %v13796_v33 = vld [vmem:[%s21286_s3 + $0x534] sm:$0xf] }
 0x53e   :  { %4179 = vmatpush.bf16.msrb.mxu0 %v10681_v12  ;;  %v10873_v12 = vor.u32 %v13775_v35, %v10872_v21  ;;  %v10986_v21 = vld [vmem:[%s21286_s3 + $0x568] sm:$0xf0] }
 0x53f   :  { %3892 = vmatmul.bf16.vlgmr.msra.gmra.mxu0 %v21464_v29  ;;  %3930 = vmatmul.bf16.vlgmr.msrb.gmra.mxu2 %v21464_v29  ;;  %v11018_v35 = vld [vmem:[%s21286_s3 + $0x5a8] sm:$0xf0] }
 0x540   :  { %3916 = vmatmul.bf16.gmra.mxu1 %v16374_v51  ;;  %3954 = vmatmul.bf16.gmra.mxu3 %v16374_v51 }
 0x541   :  { %4498 = vmatpush.bf16.msrb.mxu2 %v10869_v59  ;;  %4482 = vmatpush.bf16.msrb.mxu1 %v10905_v48  ;;  %v10841_v59 = vor.u32 %v13767_v46, %v10840_v45  ;;  %v10832_v48 = vld [vmem:[%s21286_s3 + $0x430] sm:$0xf]  ;;  %v13815_v46 = vld [vmem:[%s21286_s3 + $0x5c4] sm:$0xf0] }
 0x542   :  { %4521 = vmatpush.bf16.msrb.mxu3 %v10901_v49  ;;  %4460 = vmatpush.bf16.msra.mxu0 %v10865_v17  ;;  %v13765_v49 = vld [vmem:[%s21286_s3 + $0x434] sm:$0xf0]  ;;  %v10818_v17 = vld [vmem:[%s21286_s3 + $0x418] sm:$0xf0] }
 0x543   :  { %v10833_v8 = vor.u32 %v13765_v49, %v10832_v48  ;;  %v13813_v49 = vld [vmem:[%s21286_s3 + $0x5b4] sm:$0xf0] }
 0x545   :  { %4499 = vmatpush.bf16.msrb.mxu2 %v10861_v1  ;;  %4483 = vmatpush.bf16.msrb.mxu1 %v10897_v57  ;;  %v13821_v1 = vld [vmem:[%s21286_s3 + $0x5f4] sm:$0xf0]  ;;  %v10810_v57 = vld [vmem:[%s21286_s3 + $0x408] sm:$0xf0] }
 0x546   :  { %4522 = vmatpush.bf16.msrb.mxu3 %v10893_v23  ;;  %4461 = vmatpush.bf16.msra.mxu0 %v10857_v25  ;;  %v11057_v42 = vor.u32 %v13821_v1, %v11056_v26  ;;  %v10821_v23 = vor.u32 %v13760_v11, %v10818_v17  ;;  %v10825_v25 = vor.u32 %v13763_v55, %v10824_v32  ;;  %v10978_v26 = vld [vmem:[%s21286_s3 + $0x558] sm:$0xf0]  ;;  %v13808_v11 = vld [vmem:[%s21286_s3 + $0x594] sm:$0xf]  ;;  %v10984_v1 = vld [vmem:[%s21286_s3 + $0x560] sm:$0xf] }
 0x547   :  { %v13803_v17 = vld [vmem:[%s21286_s3 + $0x564] sm:$0xf0]  ;;  %v13806_v32 = vld [vmem:[%s21286_s3 + $0x584] sm:$0xf]  ;;  %v11002_v55 = vld [vmem:[%s21286_s3 + $0x588] sm:$0xf0] }
 0x548   :  { %v11005_v3 = vor.u32 %v13806_v32, %v11002_v55  ;;  %v10944_v55 = vld [vmem:[%s21286_s3 + $0x510] sm:$0xf] }
 0x549   :  { %4500 = vmatpush.bf16.msrb.mxu2 %v10853_v38  ;;  %4484 = vmatpush.bf16.msrb.mxu1 %v10889_v24  ;;  %v11034_v38 = vld [vmem:[%s21286_s3 + $0x5c8] sm:$0xf0]  ;;  %v13817_v24 = vld [vmem:[%s21286_s3 + $0x5d4] sm:$0xf0] }
 0x54a   :  { %4523 = vmatpush.bf16.msrb.mxu3 %v10885_v22  ;;  %4462 = vmatpush.bf16.msra.mxu0 %v10849_v7  ;;  %v10813_v22 = vor.u32 %v13758_v44, %v10810_v57  ;;  %v11037_v7 = vor.u32 %v13814_v50, %v11034_v38  ;;  %v11041_v54 = vor.u32 %v13817_v24, %v11040_v20  ;;  %v13811_v57 = vld [vmem:[%s21286_s3 + $0x5a4] sm:$0xf0]  ;;  %v11008_v50 = vld [vmem:[%s21286_s3 + $0x590] sm:$0xf]  ;;  %v13809_v38 = vld [vmem:[%s21286_s3 + $0x594] sm:$0xf0] }
 0x54b   :  { %v10985_v44 = vor.u32 %v13803_v17, %v10984_v1  ;;  %v10962_v20 = vld [vmem:[%s21286_s3 + $0x538] sm:$0xf0]  ;;  %v13852_v24 = vld [vmem:[%s21286_s3 + $0x6f4] sm:$0xf]  ;;  %v11009_v4 = vor.u32 %v13809_v38, %v11008_v50  ;;  %v10938_v1 = vld [vmem:[%s21286_s3 + $0x508] sm:$0xf0] }
 0x54c   :  { %v13836_v38 = vld [vmem:[%s21286_s3 + $0x674] sm:$0xf] }
 0x54d   :  { %4501 = vmatpush.bf16.msrb.mxu2 %v10845_v13  ;;  %4485 = vmatpush.bf16.msrb.mxu1 %v10881_v56  ;;  %v13812_v13 = vld [vmem:[%s21286_s3 + $0x5b4] sm:$0xf]  ;;  %v13759_v56 = vld [vmem:[%s21286_s3 + $0x404] sm:$0xf0] }
 0x54e   :  { %4524 = vmatpush.bf16.msrb.mxu3 %v10877_v18  ;;  %4463 = vmatpush.bf16.msra.mxu0 %v10841_v59  ;;  %v11032_v18 = vld [vmem:[%s21286_s3 + $0x5c0] sm:$0xf]  ;;  %v11029_v45 = vor.u32 %v13812_v13, %v11026_v16  ;;  %v13805_v59 = vld [vmem:[%s21286_s3 + $0x574] sm:$0xf0]  ;;  %v10965_v16 = vor.u32 %v13796_v33, %v10962_v20  ;;  %v13844_v20 = vld [vmem:[%s21286_s3 + $0x6b4] sm:$0xf] }
 0x54f   :  { %3897 = vmatmul.bf16.gmra.mxu0 %v16117_v6  ;;  %3935 = vmatmul.bf16.gmra.mxu2 %v16117_v6  ;;  %v11033_v62 = vor.u32 %v13815_v46, %v11032_v18  ;;  %v10993_v48 = vor.u32 %v13805_v59, %v10992_v61  ;;  %v13799_v18 = vld [vmem:[%s21286_s3 + $0x544] sm:$0xf0]  ;;  %v13853_v59 = vld [vmem:[%s21286_s3 + $0x6f4] sm:$0xf0] }
 0x550   :  { %4199 = vmatmul.bf16.vlgmr.msra.gmra.mxu1 %v16374_v51  ;;  %4237 = vmatmul.bf16.vlgmr.msra.gmra.mxu3 %v16374_v51  ;;  %v11053_v51 = vor.u32 %v13818_v63, %v11050_v2  ;;  %v10989_v63 = vor.u32 %v13802_v60, %v10986_v21  ;;  %v13850_v60 = vld [vmem:[%s21286_s3 + $0x6e4] sm:$0xf]  ;;  %v13807_v21 = vld [vmem:[%s21286_s3 + $0x584] sm:$0xf0] }
 0x551   :  { %4502 = vmatpush.bf16.msrb.mxu2 %v10837_v52  ;;  %4486 = vmatpush.bf16.msrb.mxu1 %v10873_v12  ;;  %v10809_v52 = vor.u32 %v13759_v56, %v10808_v40  ;;  %v11024_v12 = vld [vmem:[%s21286_s3 + $0x5b0] sm:$0xf]  ;;  %v10968_v56 = vld [vmem:[%s21286_s3 + $0x540] sm:$0xf] }
 0x552   :  { %4805 = vmatpush.bf16.msra.mxu3 %v11061_v34  ;;  %4464 = vmatpush.bf16.msra.mxu0 %v10833_v8  ;;  %v13810_v34 = vld [vmem:[%s21286_s3 + $0x5a4] sm:$0xf]  ;;  %v11016_v8 = vld [vmem:[%s21286_s3 + $0x5a0] sm:$0xf]  ;;  %v10969_v46 = vor.u32 %v13799_v18, %v10968_v56  ;;  %v11146_v56 = vld [vmem:[%s21286_s3 + $0x6a8] sm:$0xf0] }
 0x553   :  { %v11021_v2 = vor.u32 %v13810_v34, %v11018_v35  ;;  %v10960_v34 = vld [vmem:[%s21286_s3 + $0x530] sm:$0xf]  ;;  %v10936_v18 = vld [vmem:[%s21286_s3 + $0x500] sm:$0xf] }
 0x555   :  { %4767 = vmatpush.bf16.msra.mxu1 %v11057_v42  ;;  %4503 = vmatpush.bf16.msrb.mxu2 %v10829_v10  ;;  %v11025_v10 = vor.u32 %v13813_v49, %v11024_v12  ;;  %v3415_v12 = vpop.f32.mrf.mxu2 }
 0x556   :  { %4806 = vmatpush.bf16.msra.mxu3 %v11053_v51  ;;  %4465 = vmatpush.bf16.msra.mxu0 %v10825_v25  ;;  %v11010_v51 = vld [vmem:[%s21286_s3 + $0x598] sm:$0xf0]  ;;  %v13801_v25 = vld [vmem:[%s21286_s3 + $0x554] sm:$0xf0] }
 0x557   :  { %v11013_v5 = vor.u32 %v13808_v11, %v11010_v51  ;;  %v10977_v53 = vor.u32 %v13801_v25, %v10976_v43  ;;  %v13790_v51 = vld [vmem:[%s21286_s3 + $0x504] sm:$0xf]  ;;  %v13793_v43 = vld [vmem:[%s21286_s3 + $0x514] sm:$0xf0]  ;;  %v11168_v25 = vld [vmem:[%s21286_s3 + $0x6d0] sm:$0xf] }
 0x558   :  { %v10941_v50 = vor.u32 %v13790_v51, %v10938_v1  ;;  %v13830_v1 = vld [vmem:[%s21286_s3 + $0x644] sm:$0xf] }
 0x559   :  { %4504 = vmatpush.bf16.msrb.mxu2 %v10821_v23  ;;  %4768 = vmatpush.bf16.msra.mxu1 %v11049_v31  ;;  %v10970_v23 = vld [vmem:[%s21286_s3 + $0x548] sm:$0xf0] }
 0x55a   :  { %4807 = vmatpush.bf16.msra.mxu3 %v11045_v37  ;;  %4466 = vmatpush.bf16.msra.mxu0 %v10817_v58  ;;  %v11017_v37 = vor.u32 %v13811_v57, %v11016_v8  ;;  %v10973_v31 = vor.u32 %v13798_v19, %v10970_v23  ;;  %v13794_v58 = vld [vmem:[%s21286_s3 + $0x524] sm:$0xf]  ;;  %v13795_v19 = vld [vmem:[%s21286_s3 + $0x524] sm:$0xf0]  ;;  %v11162_v57 = vld [vmem:[%s21286_s3 + $0x6c8] sm:$0xf0] }
 0x55d   :  { %4505 = vmatpush.bf16.msrb.mxu2 %v10813_v22  ;;  %4769 = vmatpush.bf16.msra.mxu1 %v11041_v54  ;;  %v11186_v22 = vld [vmem:[%s21286_s3 + $0x6f8] sm:$0xf0]  ;;  %v10954_v54 = vld [vmem:[%s21286_s3 + $0x528] sm:$0xf0] }
 0x55e   :  { %4808 = vmatpush.bf16.msra.mxu3 %v11037_v7  ;;  %4467 = vmatpush.bf16.msra.mxu0 %v10809_v52  ;;  %v3377_v7 = vpop.f32.mrf.mxu0  ;;  %v11189_v40 = vor.u32 %v13852_v24, %v11186_v22  ;;  %v10957_v35 = vor.u32 %v13794_v58, %v10954_v54  ;;  %v11154_v24 = vld [vmem:[%s21286_s3 + $0x6b8] sm:$0xf0]  ;;  %v10945_v22 = vor.u32 %v13793_v43, %v10944_v55  ;;  %v13834_v58 = vld [vmem:[%s21286_s3 + $0x664] sm:$0xf]  ;;  %v13828_v55 = vld [vmem:[%s21286_s3 + $0x634] sm:$0xf] }
 0x55f   :  { %4180 = vmatmul.bf16.vlgmr.msrb.gmra.mxu0 %v16117_v6  ;;  %4218 = vmatmul.bf16.vlgmr.msra.gmra.mxu2 %v16117_v6  ;;  %v13800_v6 = vld [vmem:[%s21286_s3 + $0x554] sm:$0xf]  ;;  %v11157_v54 = vor.u32 %v13844_v20, %v11154_v24  ;;  %v11090_v43 = vld [vmem:[%s21286_s3 + $0x638] sm:$0xf0]  ;;  %v13833_v24 = vld [vmem:[%s21286_s3 + $0x654] sm:$0xf0] }
 0x560   :  { %4204 = vmatmul.bf16.gmra.mxu1 %v21464_v29  ;;  %4242 = vmatmul.bf16.gmra.mxu3 %v21464_v29  ;;  %v10981_v42 = vor.u32 %v13800_v6, %v10978_v26  ;;  %v10946_v6 = vld [vmem:[%s21286_s3 + $0x518] sm:$0xf0] }
 0x561   :  { %4786 = vmatpush.bf16.msra.mxu2 %v10997_v41  ;;  %4770 = vmatpush.bf16.msra.mxu1 %v11033_v62  ;;  %v11000_v41 = vld [vmem:[%s21286_s3 + $0x580] sm:$0xf]  ;;  %v13792_v62 = vld [vmem:[%s21286_s3 + $0x514] sm:$0xf]  ;;  %v11314_v20 = vld [vmem:[%s21286_s3 + $0x7f8] sm:$0xf0] }
 0x562   :  { %4809 = vmatpush.bf16.msra.mxu3 %v11029_v45  ;;  %4748 = vmatpush.bf16.msrb.mxu0 %v10993_v48  ;;  %v11178_v45 = vld [vmem:[%s21286_s3 + $0x6e8] sm:$0xf0]  ;;  %v11001_v52 = vor.u32 %v13807_v21, %v11000_v41  ;;  %v11170_v48 = vld [vmem:[%s21286_s3 + $0x6d8] sm:$0xf0]  ;;  %v10949_v17 = vor.u32 %v13792_v62, %v10946_v6  ;;  %v13791_v41 = vld [vmem:[%s21286_s3 + $0x504] sm:$0xf0] }
 0x563   :  { %v11181_v61 = vor.u32 %v13850_v60, %v11178_v45  ;;  %v11160_v60 = vld [vmem:[%s21286_s3 + $0x6c0] sm:$0xf]  ;;  %v13832_v45 = vld [vmem:[%s21286_s3 + $0x654] sm:$0xf]  ;;  %v10937_v21 = vor.u32 %v13791_v41, %v10936_v18  ;;  %v13845_v6 = vld [vmem:[%s21286_s3 + $0x6b4] sm:$0xf0] }
 0x564   :  { %v11082_v41 = vld [vmem:[%s21286_s3 + $0x628] sm:$0xf0] }
 0x565   :  { %4787 = vmatpush.bf16.msra.mxu2 %v10989_v63  ;;  %4771 = vmatpush.bf16.msra.mxu1 %v11025_v10 }
 0x566   :  { %4810 = vmatpush.bf16.msra.mxu3 %v11021_v2  ;;  %4749 = vmatpush.bf16.msrb.mxu0 %v10985_v44  ;;  %v13848_v2 = vld [vmem:[%s21286_s3 + $0x6d4] sm:$0xf]  ;;  %v13846_v44 = vld [vmem:[%s21286_s3 + $0x6c4] sm:$0xf] }
 0x567   :  { %v11173_v8 = vor.u32 %v13848_v2, %v11170_v48 }
 0x569   :  { %4788 = vmatpush.bf16.msra.mxu2 %v10981_v42  ;;  %4772 = vmatpush.bf16.msra.mxu1 %v11017_v37  ;;  %v10952_v42 = vld [vmem:[%s21286_s3 + $0x520] sm:$0xf]  ;;  %v13851_v37 = vld [vmem:[%s21286_s3 + $0x6e4] sm:$0xf0] }
 0x56a   :  { %4811 = vmatpush.bf16.msra.mxu3 %v11013_v5  ;;  %4750 = vmatpush.bf16.msrb.mxu0 %v10977_v53  ;;  %v11176_v5 = vld [vmem:[%s21286_s3 + $0x6e0] sm:$0xf]  ;;  %v10953_v23 = vor.u32 %v13795_v19, %v10952_v42  ;;  %v13849_v53 = vld [vmem:[%s21286_s3 + $0x6d4] sm:$0xf0]  ;;  %v13838_v42 = vld [vmem:[%s21286_s3 + $0x684] sm:$0xf] }
 0x56b   :  { %v11177_v32 = vor.u32 %v13851_v37, %v11176_v5  ;;  %v11130_v19 = vld [vmem:[%s21286_s3 + $0x688] sm:$0xf0]  ;;  %v11112_v5 = vld [vmem:[%s21286_s3 + $0x660] sm:$0xf]  ;;  %v13843_v37 = vld [vmem:[%s21286_s3 + $0x6a4] sm:$0xf0] }
 0x56c   :  { %v3396_v9 = vpop.f32.mrf.mxu1 }
 0x56d   :  { %v17127_v13 = vadd.f32 %v3396_v9, %v3377_v7  ;;  %4789 = vmatpush.bf16.msra.mxu2 %v10973_v31  ;;  %4773 = vmatpush.bf16.msra.mxu1 %v11009_v4  ;;  %v11165_v31 = vor.u32 %v13846_v44, %v11162_v57  ;;  %v11169_v4 = vor.u32 %v13849_v53, %v11168_v25  ;;  %v13835_v44 = vld [vmem:[%s21286_s3 + $0x664] sm:$0xf0]  ;;  %v11144_v57 = vld [vmem:[%s21286_s3 + $0x6a0] sm:$0xf] }
 0x56e   :  { %4812 = vmatpush.bf16.msra.mxu3 %v11005_v3  ;;  %4751 = vmatpush.bf16.msrb.mxu0 %v10969_v46  ;;  %v11122_v3 = vld [vmem:[%s21286_s3 + $0x678] sm:$0xf0]  ;;  %v11133_v25 = vor.u32 %v13838_v42, %v11130_v19  ;;  %v11145_v53 = vor.u32 %v13843_v37, %v11144_v57  ;;  %v13822_v37 = vld [vmem:[%s21286_s3 + $0x604] sm:$0xf] }
 0x56f   :  { %4185 = vmatmul.bf16.gmra.mxu0 %v16622_v0  ;;  %4223 = vmatmul.bf16.gmra.mxu2 %v16622_v0  ;;  %v13797_v0 = vld [vmem:[%s21286_s3 + $0x534] sm:$0xf0]  ;;  %v11125_v9 = vor.u32 %v13836_v38, %v11122_v3  ;;  %v11106_v46 = vld [vmem:[%s21286_s3 + $0x658] sm:$0xf0]  ;;  %v17322_v38 = vpop.f32.mrf.mxu2  ;;  %v13884_v3 = vld [vmem:[%s21286_s3 + $0x7f4] sm:$0xf] }
 0x570   :  { %4487 = vmatmul.bf16.vlgmr.msrb.gmra.mxu1 %v15999_v36  ;;  %4525 = vmatmul.bf16.vlgmr.msrb.gmra.mxu3 %v15999_v36  ;;  %v11184_v36 = vld [vmem:[%s21286_s3 + $0x6f0] sm:$0xf]  ;;  %v10961_v49 = vor.u32 %v13797_v0, %v10960_v34  ;;  %v11138_v0 = vld [vmem:[%s21286_s3 + $0x698] sm:$0xf0]  ;;  %v11109_v51 = vor.u32 %v13832_v45, %v11106_v46  ;;  %v11317_v18 = vor.u32 %v13884_v3, %v11314_v20  ;;  %v11096_v46 = vld [vmem:[%s21286_s3 + $0x640] sm:$0xf] }
 0x571   :  { %4790 = vmatpush.bf16.msra.mxu2 %v10965_v16  ;;  %4774 = vmatpush.bf16.msra.mxu1 %v11001_v52  ;;  %v11185_v26 = vor.u32 %v13853_v59, %v11184_v36  ;;  %v11114_v16 = vld [vmem:[%s21286_s3 + $0x668] sm:$0xf0]  ;;  %v13847_v52 = vld [vmem:[%s21286_s3 + $0x6c4] sm:$0xf0]  ;;  %v11120_v36 = vld [vmem:[%s21286_s3 + $0x670] sm:$0xf] }
 0x572   :  { %5093 = vmatpush.bf16.msrb.mxu3 %v11189_v40  ;;  %v3434_v63 = vpop.f32.mrf.mxu3  ;;  %4752 = vmatpush.bf16.msrb.mxu0 %v10961_v49  ;;  %v13842_v40 = vld [vmem:[%s21286_s3 + $0x6a4] sm:$0xf]  ;;  %v11117_v62 = vor.u32 %v13834_v58, %v11114_v16  ;;  %v17285_v49 = vpop.f32.mrf.mxu0  ;;  %v13883_v3 = vld [vmem:[%s21286_s3 + $0x7e4] sm:$0xf0] }
 0x573   :  { %v17175_v10 = vadd.f32 %v3434_v63, %v3415_v12  ;;  %v11149_v34 = vor.u32 %v13842_v40, %v11146_v56  ;;  %v13837_v12 = vld [vmem:[%s21286_s3 + $0x674] sm:$0xf0]  ;;  %v11152_v63 = vld [vmem:[%s21286_s3 + $0x6b0] sm:$0xf]  ;;  %v11093_v40 = vor.u32 %v13828_v55, %v11090_v43  ;;  %v13826_v56 = vld [vmem:[%s21286_s3 + $0x624] sm:$0xf] }
 0x574   :  { %v17177_v11 = vpop.f32.mrf.mxu1  ;;  %v11121_v2 = vor.u32 %v13837_v12, %v11120_v36  ;;  %v11153_v48 = vor.u32 %v13845_v6, %v11152_v63  ;;  %v11298_v12 = vld [vmem:[%s21286_s3 + $0x7d8] sm:$0xf0]  ;;  %v11088_v63 = vld [vmem:[%s21286_s3 + $0x630] sm:$0xf]  ;;  %v11290_v55 = vld [vmem:[%s21286_s3 + $0x7c8] sm:$0xf0] }
 0x575   :  { %5055 = vmatpush.bf16.msrb.mxu1 %v11185_v26  ;;  %4791 = vmatpush.bf16.msra.mxu2 %v10957_v35  ;;  %v11161_v35 = vor.u32 %v13847_v52, %v11160_v60  ;;  %v13882_v60 = vld [vmem:[%s21286_s3 + $0x7e4] sm:$0xf]  ;;  %v11128_v52 = vld [vmem:[%s21286_s3 + $0x680] sm:$0xf] }
 0x576   :  { %5094 = vmatpush.bf16.msrb.mxu3 %v11181_v61  ;;  %4753 = vmatpush.bf16.msrb.mxu0 %v10953_v23  ;;  %v13840_v61 = vld [vmem:[%s21286_s3 + $0x694] sm:$0xf]  ;;  %v11113_v23 = vor.u32 %v13835_v44, %v11112_v5  ;;  %v11080_v43 = vld [vmem:[%s21286_s3 + $0x620] sm:$0xf] }
 0x579   :  { %4792 = vmatpush.bf16.msra.mxu2 %v10949_v17  ;;  %5056 = vmatpush.bf16.msrb.mxu1 %v11177_v32  ;;  %v11141_v17 = vor.u32 %v13840_v61, %v11138_v0  ;;  %v13839_v61 = vld [vmem:[%s21286_s3 + $0x684] sm:$0xf0]  ;;  %v11085_v0 = vor.u32 %v13826_v56, %v11082_v41  ;;  %v13876_v56 = vld [vmem:[%s21286_s3 + $0x7b4] sm:$0xf]  ;;  %v13825_v41 = vld [vmem:[%s21286_s3 + $0x614] sm:$0xf0] }
 0x57a   :  { %5095 = vmatpush.bf16.msrb.mxu3 %v11173_v8  ;;  %v17218_v33 = vpop.f32.mrf.mxu3  ;;  %4754 = vmatpush.bf16.msrb.mxu0 %v10945_v22  ;;  %v11098_v8 = vld [vmem:[%s21286_s3 + $0x648] sm:$0xf0] }
 0x57b   :  { %v11101_v32 = vor.u32 %v13830_v1, %v11098_v8  ;;  %v13885_v1 = vld [vmem:[%s21286_s3 + $0x7f4] sm:$0xf0] }
 0x57c   :  { %v17229_v7 = vpop.f32.mrf.mxu1 }
 0x57d   :  { %4793 = vmatpush.bf16.msra.mxu2 %v10941_v50  ;;  %5057 = vmatpush.bf16.msrb.mxu1 %v11169_v4  ;;  %v11104_v50 = vld [vmem:[%s21286_s3 + $0x650] sm:$0xf] }
 0x57e   :  { %5096 = vmatpush.bf16.msrb.mxu3 %v11165_v31  ;;  %4755 = vmatpush.bf16.msrb.mxu0 %v10937_v21  ;;  %v11105_v22 = vor.u32 %v13833_v24, %v11104_v50  ;;  %v11136_v4 = vld [vmem:[%s21286_s3 + $0x690] sm:$0xf]  ;;  %v13831_v21 = vld [vmem:[%s21286_s3 + $0x644] sm:$0xf0]  ;;  %v13868_v24 = vld [vmem:[%s21286_s3 + $0x774] sm:$0xf] }
 0x57f   :  { %4468 = vmatmul.bf16.vlgmr.msra.gmra.mxu0 %v21464_v29  ;;  %4506 = vmatmul.bf16.vlgmr.msrb.gmra.mxu2 %v21464_v29 }
 0x580   :  { %4492 = vmatmul.bf16.gmra.mxu1 %v16411_v27  ;;  %4530 = vmatmul.bf16.gmra.mxu3 %v16411_v27 }
 0x581   :  { %5074 = vmatpush.bf16.msrb.mxu2 %v11125_v9  ;;  %5058 = vmatpush.bf16.msrb.mxu1 %v11161_v35  ;;  %v13841_v9 = vld [vmem:[%s21286_s3 + $0x694] sm:$0xf0]  ;;  %v11097_v35 = vor.u32 %v13831_v21, %v11096_v46  ;;  %v11296_v46 = vld [vmem:[%s21286_s3 + $0x7d0] sm:$0xf] }
 0x582   :  { %5097 = vmatpush.bf16.msrb.mxu3 %v11157_v54  ;;  %v17274_v59 = vpop.f32.mrf.mxu3  ;;  %5036 = vmatpush.bf16.msra.mxu0 %v11121_v2  ;;  %v11137_v45 = vor.u32 %v13841_v9, %v11136_v4  ;;  %v11129_v2 = vor.u32 %v13839_v61, %v11128_v52  ;;  %v13881_v21 = vld [vmem:[%s21286_s3 + $0x7d4] sm:$0xf0] }
 0x584   :  { %v17287_v26 = vpop.f32.mrf.mxu1 }
 0x585   :  { %5075 = vmatpush.bf16.msrb.mxu2 %v11117_v62  ;;  %5059 = vmatpush.bf16.msrb.mxu1 %v11153_v48  ;;  %v13824_v62 = vld [vmem:[%s21286_s3 + $0x614] sm:$0xf]  ;;  %v13829_v48 = vld [vmem:[%s21286_s3 + $0x634] sm:$0xf0] }
 0x586   :  { %5098 = vmatpush.bf16.msrb.mxu3 %v11149_v34  ;;  %5037 = vmatpush.bf16.msra.mxu0 %v11113_v23  ;;  %v11074_v34 = vld [vmem:[%s21286_s3 + $0x618] sm:$0xf0]  ;;  %v11089_v42 = vor.u32 %v13829_v48, %v11088_v63  ;;  %v11064_v63 = vld [vmem:[%s21286_s3 + $0x600] sm:$0xf] }
 0x587   :  { %v11077_v23 = vor.u32 %v13824_v62, %v11074_v34 }
 0x589   :  { %5076 = vmatpush.bf16.msrb.mxu2 %v11109_v51  ;;  %5060 = vmatpush.bf16.msrb.mxu1 %v11145_v53  ;;  %v11312_v51 = vld [vmem:[%s21286_s3 + $0x7f0] sm:$0xf]  ;;  %v11304_v53 = vld [vmem:[%s21286_s3 + $0x7e0] sm:$0xf] }
 0x58a   :  { %5099 = vmatpush.bf16.msrb.mxu3 %v11141_v17  ;;  %v17324_v31 = vpop.f32.mrf.mxu3  ;;  %5038 = vmatpush.bf16.msra.mxu0 %v11105_v22  ;;  %v11313_v19 = vor.u32 %v13885_v1, %v11312_v51  ;;  %v11250_v22 = vld [vmem:[%s21286_s3 + $0x778] sm:$0xf0]  ;;  %v11305_v9 = vor.u32 %v13883_v3, %v11304_v53  ;;  %v13864_v51 = vld [vmem:[%s21286_s3 + $0x754] sm:$0xf]  ;;  %v11280_v53 = vld [vmem:[%s21286_s3 + $0x7b0] sm:$0xf] }
 0x58b   :  { %v11234_v1 = vld [vmem:[%s21286_s3 + $0x758] sm:$0xf0] }
 0x58c   :  { %v3382_v58 = vpop.f32.mrf.mxu0 }
 0x58d   :  { %v17342_v54 = vadd.f32 %v17229_v7, %v3382_v58  ;;  %v17344_v16 = vpop.f32.mrf.mxu1  ;;  %5077 = vmatpush.bf16.msrb.mxu2 %v11101_v32  ;;  %v11306_v7 = vld [vmem:[%s21286_s3 + $0x7e8] sm:$0xf0]  ;;  %5061 = vmatpush.bf16.msrb.mxu1 %v11137_v45  ;;  %v11072_v58 = vld [vmem:[%s21286_s3 + $0x610] sm:$0xf] }
 0x58e   :  { %5100 = vmatpush.bf16.msrb.mxu3 %v11133_v25  ;;  %v11309_v36 = vor.u32 %v13882_v60, %v11306_v7  ;;  %5039 = vmatpush.bf16.msra.mxu0 %v11097_v35  ;;  %v13827_v25 = vld [vmem:[%s21286_s3 + $0x624] sm:$0xf0]  ;;  %v11073_v45 = vor.u32 %v13825_v41, %v11072_v58  ;;  %v13866_v35 = vld [vmem:[%s21286_s3 + $0x764] sm:$0xf]  ;;  %v11272_v41 = vld [vmem:[%s21286_s3 + $0x7a0] sm:$0xf] }
 0x58f   :  { %4473 = vmatmul.bf16.gmra.mxu0 %v16165_v15  ;;  %4511 = vmatmul.bf16.gmra.mxu2 %v16165_v15  ;;  %v11081_v50 = vor.u32 %v13827_v25, %v11080_v43 }
 0x590   :  { %4775 = vmatmul.bf16.vlgmr.msra.gmra.mxu1 %v16411_v27  ;;  %4813 = vmatmul.bf16.vlgmr.msra.gmra.mxu3 %v16411_v27  ;;  %v13880_v27 = vld [vmem:[%s21286_s3 + $0x7d4] sm:$0xf] }
 0x591   :  { %5078 = vmatpush.bf16.msrb.mxu2 %v11093_v40  ;;  %v11301_v32 = vor.u32 %v13880_v27, %v11298_v12  ;;  %5062 = vmatpush.bf16.msrb.mxu1 %v11129_v2  ;;  %v11297_v27 = vor.u32 %v13881_v21, %v11296_v46  ;;  %v11288_v2 = vld [vmem:[%s21286_s3 + $0x7c0] sm:$0xf]  ;;  %v13875_v46 = vld [vmem:[%s21286_s3 + $0x7a4] sm:$0xf0] }
 0x592   :  { %5381 = vmatpush.bf16.msra.mxu3 %v11317_v18  ;;  %v3420_v6 = vpop.f32.mrf.mxu2  ;;  %5040 = vmatpush.bf16.msra.mxu0 %v11089_v42  ;;  %v11282_v18 = vld [vmem:[%s21286_s3 + $0x7b8] sm:$0xf0] }
 0x593   :  { %v17399_v17 = vadd.f32 %v17274_v59, %v3420_v6  ;;  %v17401_v8 = vpop.f32.mrf.mxu3  ;;  %v11066_v59 = vld [vmem:[%s21286_s3 + $0x608] sm:$0xf0]  ;;  %v11285_v61 = vor.u32 %v13876_v56, %v11282_v18  ;;  %v13823_v6 = vld [vmem:[%s21286_s3 + $0x604] sm:$0xf0]  ;;  %v11240_v56 = vld [vmem:[%s21286_s3 + $0x760] sm:$0xf] }
 0x594   :  { %v3384_v5 = vpop.f32.mrf.mxu0  ;;  %v11069_v20 = vor.u32 %v13822_v37, %v11066_v59  ;;  %v11266_v37 = vld [vmem:[%s21286_s3 + $0x798] sm:$0xf0]  ;;  %v13869_v59 = vld [vmem:[%s21286_s3 + $0x774] sm:$0xf0]  ;;  %v13867_v18 = vld [vmem:[%s21286_s3 + $0x764] sm:$0xf0] }
 0x595   :  { %v17404_v44 = vadd.f32 %v17287_v26, %v3384_v5  ;;  %v17406_v57 = vpop.f32.mrf.mxu1  ;;  %5079 = vmatpush.bf16.msrb.mxu2 %v11085_v0  ;;  %v13878_v26 = vld [vmem:[%s21286_s3 + $0x7c4] sm:$0xf]  ;;  %5343 = vmatpush.bf16.msra.mxu1 %v11313_v19  ;;  %v11242_v0 = vld [vmem:[%s21286_s3 + $0x768] sm:$0xf0]  ;;  %v11248_v19 = vld [vmem:[%s21286_s3 + $0x770] sm:$0xf] }
 0x596   :  { %5382 = vmatpush.bf16.msra.mxu3 %v11309_v36  ;;  %v11293_v4 = vor.u32 %v13878_v26, %v11290_v55  ;;  %5041 = vmatpush.bf16.msra.mxu0 %v11081_v50  ;;  %v13874_v36 = vld [vmem:[%s21286_s3 + $0x7a4] sm:$0xf]  ;;  %v11245_v48 = vor.u32 %v13866_v35, %v11242_v0  ;;  %v3399_v26 = vadd.f32 %v17177_v11, %v17285_v49  ;;  %v13877_v50 = vld [vmem:[%s21286_s3 + $0x7b4] sm:$0xf0]  ;;  %v11816_v35 = vld [vmem:[%s21287_s4 + $0xfe0] sm:$0xf] }
 0x597   :  { %v11249_v25 = vor.u32 %v13869_v59, %v11248_v19  ;;  %v11281_v58 = vor.u32 %v13877_v50, %v11280_v53  ;;  %v11232_v0 = vld [vmem:[%s21286_s3 + $0x750] sm:$0xf]  ;;  %v13858_v19 = vld [vmem:[%s21286_s3 + $0x724] sm:$0xf]  ;;  %v13863_v59 = vld [vmem:[%s21286_s3 + $0x744] sm:$0xf0] }
 0x598   :  { %v11202_v53 = vld [vmem:[%s21286_s3 + $0x718] sm:$0xf0] }
 0x599   :  { %5080 = vmatpush.bf16.msrb.mxu2 %v11077_v23  ;;  %5344 = vmatpush.bf16.msra.mxu1 %v11305_v9  ;;  %v13872_v23 = vld [vmem:[%s21286_s3 + $0x794] sm:$0xf]  ;;  %v11258_v9 = vld [vmem:[%s21286_s3 + $0x788] sm:$0xf0] }
 0x59a   :  { %5383 = vmatpush.bf16.msra.mxu3 %v11301_v32  ;;  %v3422_v40 = vpop.f32.mrf.mxu2  ;;  %5042 = vmatpush.bf16.msra.mxu0 %v11073_v45  ;;  %v11269_v49 = vor.u32 %v13872_v23, %v11266_v37  ;;  %v11241_v45 = vor.u32 %v13867_v18, %v11240_v56  ;;  %v11210_v23 = vld [vmem:[%s21286_s3 + $0x728] sm:$0xf0] }
 0x59b   :  { %v17451_v60 = vadd.f32 %v17324_v31, %v3422_v40  ;;  %v17453_v7 = vpop.f32.mrf.mxu3  ;;  %v11253_v31 = vor.u32 %v13868_v24, %v11250_v22 }
 0x59c   :  { %v3613_v52 = vpop.f32.mrf.mxu0 }
 0x59d   :  { %v3614_v62 = vadd.f32 %v3613_v52, %v17127_v13  ;;  %v17462_v34 = vpop.f32.mrf.mxu1  ;;  %5081 = vmatpush.bf16.msrb.mxu2 %v11069_v20  ;;  %v11274_v13 = vld [vmem:[%s21286_s3 + $0x7a8] sm:$0xf0]  ;;  %5345 = vmatpush.bf16.msra.mxu1 %v11297_v27  ;;  %v11237_v20 = vor.u32 %v13864_v51, %v11234_v1  ;;  %v13860_v52 = vld [vmem:[%s21286_s3 + $0x734] sm:$0xf] }
 0x59e   :  { %5384 = vmatpush.bf16.msra.mxu3 %v11293_v4  ;;  %v11277_v42 = vor.u32 %v13874_v36, %v11274_v13  ;;  %v11226_v4 = vld [vmem:[%s21286_s3 + $0x748] sm:$0xf0]  ;;  %v13865_v36 = vld [vmem:[%s21286_s3 + $0x754] sm:$0xf0] }
 0x59f   :  { %v17477_v12 = vadd.f32 %v17344_v16, %v3614_v62  ;;  %4756 = vmatmul.bf16.vlgmr.msrb.gmra.mxu0 %v16165_v15  ;;  %4794 = vmatmul.bf16.vlgmr.msra.gmra.mxu2 %v16165_v15  ;;  %v11065_v16 = vor.u32 %v13823_v6, %v11064_v63  ;;  %v13879_v15 = vld [vmem:[%s21286_s3 + $0x7c4] sm:$0xf0]  ;;  %v11218_v62 = vld [vmem:[%s21286_s3 + $0x738] sm:$0xf0]  ;;  %v11233_v63 = vor.u32 %v13865_v36, %v11232_v0  ;;  %v11264_v6 = vld [vmem:[%s21286_s3 + $0x790] sm:$0xf] }
 0x5a0   :  { %4780 = vmatmul.bf16.gmra.mxu1 %v21464_v29  ;;  %4818 = vmatmul.bf16.gmra.mxu3 %v21464_v29  ;;  %v11289_v32 = vor.u32 %v13879_v15, %v11288_v2  ;;  %v13873_v2 = vld [vmem:[%s21286_s3 + $0x794] sm:$0xf0]  ;;  %v11221_v15 = vor.u32 %v13860_v52, %v11218_v62  ;;  %v11208_v62 = vld [vmem:[%s21286_s3 + $0x720] sm:$0xf]  ;;  %v11200_v0 = vld [vmem:[%s21286_s3 + $0x710] sm:$0xf] }
 0x5a1   :  { %5362 = vmatpush.bf16.msra.mxu2 %v11253_v31  ;;  %5043 = vmatpush.bf16.msra.mxu0 %v11065_v16  ;;  %v13857_v36 = vld [vmem:[%s21286_s3 + $0x714] sm:$0xf0] }
 0x5a2   :  { %5385 = vmatpush.bf16.msra.mxu3 %v11285_v61  ;;  %v3651_v5 = vpop.f32.mrf.mxu2  ;;  %5346 = vmatpush.bf16.msra.mxu1 %v11289_v32  ;;  %v11224_v32 = vld [vmem:[%s21286_s3 + $0x740] sm:$0xf] }
 0x5a3   :  { %v3652_v55 = vadd.f32 %v3651_v5, %v17175_v10  ;;  %v17516_v43 = vpop.f32.mrf.mxu3  ;;  %v13862_v10 = vld [vmem:[%s21286_s3 + $0x744] sm:$0xf] }
 0x5a4   :  { %v3615_v3 = vpop.f32.mrf.mxu0  ;;  %v11229_v21 = vor.u32 %v13862_v10, %v11226_v4  ;;  %v14132_v10 = vld [vmem:[%s21287_s4 + $0xfac] sm:$0xf0]  ;;  %v13861_v4 = vld [vmem:[%s21286_s3 + $0x734] sm:$0xf0] }
 0x5a5   :  { %v17525_v24 = vadd.f32 %v17401_v8, %v3652_v55  ;;  %v3616_v22 = vadd.f32 %v3615_v3, %v3399_v26  ;;  %v17527_v11 = vpop.f32.mrf.mxu1  ;;  %5363 = vmatpush.bf16.msra.mxu2 %v11245_v48  ;;  %v13870_v8 = vld [vmem:[%s21286_s3 + $0x784] sm:$0xf]  ;;  %5324 = vmatpush.bf16.msrb.mxu0 %v11249_v25  ;;  %v11256_v26 = vld [vmem:[%s21286_s3 + $0x780] sm:$0xf]  ;;  %v13871_v55 = vld [vmem:[%s21286_s3 + $0x784] sm:$0xf0] }
 0x5a6   :  { %5386 = vmatpush.bf16.msra.mxu3 %v11277_v42  ;;  %v11261_v31 = vor.u32 %v13870_v8, %v11258_v9  ;;  %5347 = vmatpush.bf16.msra.mxu1 %v11281_v58  ;;  %v4841_v42 = vpack.c.bf16 0.0, %v15955_v30  ;;  %v14136_v30 = vld [vmem:[%s21287_s4 + $0xfcc] sm:$0xf0]  ;;  %v13856_v25 = vld [vmem:[%s21286_s3 + $0x714] sm:$0xf] }
 0x5a7   :  { %v17542_v40 = vadd.f32 %v17406_v57, %v3616_v22  ;;  %v3437_v57 = vadd.f32 %v17218_v33, %v17322_v38  ;;  %v14140_v33 = vld [vmem:[%s21287_s4 + $0xfec] sm:$0xf0]  ;;  %v11273_v38 = vor.u32 %v13875_v46, %v11272_v41  ;;  %v11784_v22 = vld [vmem:[%s21287_s4 + $0xfa0] sm:$0xf]  ;;  %v11205_v18 = vor.u32 %v13856_v25, %v11202_v53 }
 0x5a8   :  { %v11817_v5 = vor.u32 %v14140_v33, %v11816_v35  ;;  %v11216_v3 = vld [vmem:[%s21286_s3 + $0x730] sm:$0xf]  ;;  %v11688_v35 = vld [vmem:[%s21287_s4 + $0xee0] sm:$0xf] }
 0x5a9   :  { %5364 = vmatpush.bf16.msra.mxu2 %v11237_v20  ;;  %5325 = vmatpush.bf16.msrb.mxu0 %v11241_v45  ;;  %v11217_v58 = vor.u32 %v13861_v4, %v11216_v3  ;;  %v14100_v25 = vld [vmem:[%s21287_s4 + $0xeac] sm:$0xf0]  ;;  %v11720_v53 = vld [vmem:[%s21287_s4 + $0xf20] sm:$0xf] }
 0x5aa   :  { %5387 = vmatpush.bf16.msra.mxu3 %v11269_v49  ;;  %v3653_v61 = vpop.f32.mrf.mxu2  ;;  %5348 = vmatpush.bf16.msra.mxu1 %v11273_v38  ;;  %v11257_v49 = vor.u32 %v13871_v55, %v11256_v26 }
 0x5ab   :  { %v3654_v13 = vadd.f32 %v3653_v61, %v3437_v57  ;;  %v17576_v27 = vpop.f32.mrf.mxu3  ;;  %v13854_v57 = vld [vmem:[%s21286_s3 + $0x704] sm:$0xf] }
 0x5ac   :  { %v3618_v16 = vpop.f32.mrf.mxu0 }
 0x5ad   :  { %v17585_v48 = vadd.f32 %v17453_v7, %v3654_v13  ;;  %v3619_v51 = vadd.f32 %v3618_v16, %v17342_v54  ;;  %v17588_v1 = vpop.f32.mrf.mxu1  ;;  %5365 = vmatpush.bf16.msra.mxu2 %v11229_v21  ;;  %v11800_v54 = vld [vmem:[%s21287_s4 + $0xfc0] sm:$0xf]  ;;  %5326 = vmatpush.bf16.msrb.mxu0 %v11233_v63  ;;  %v11265_v7 = vor.u32 %v13873_v2, %v11264_v6  ;;  %v14124_v6 = vld [vmem:[%s21287_s4 + $0xf6c] sm:$0xf0] }
 0x5ae   :  { %5388 = vmatpush.bf16.msra.mxu3 %v11261_v31  ;;  %v11801_v50 = vor.u32 %v14136_v30, %v11800_v54  ;;  %v11785_v21 = vor.u32 %v14132_v10, %v11784_v22  ;;  %v13859_v31 = vld [vmem:[%s21286_s3 + $0x724] sm:$0xf0]  ;;  %v11752_v63 = vld [vmem:[%s21287_s4 + $0xf60] sm:$0xf]  ;;  %v11201_v2 = vor.u32 %v13857_v36, %v11200_v0  ;;  %v17692_v54 = vpack.c.bf16 0.0, %v16362_v28 }
 0x5af   :  { %v17604_v37 = vadd.f32 %v17462_v34, %v3619_v51  ;;  %4761 = vmatmul.bf16.gmra.mxu0 %v16625_v47  ;;  %4799 = vmatmul.bf16.gmra.mxu2 %v16625_v47  ;;  %v11225_v34 = vor.u32 %v13863_v59, %v11224_v32  ;;  %v11213_v47 = vor.u32 %v13858_v19, %v11210_v23  ;;  %v11672_v30 = vld [vmem:[%s21287_s4 + $0xec0] sm:$0xf]  ;;  %v14120_v28 = vld [vmem:[%s21287_s4 + $0xf4c] sm:$0xf0]  ;;  %v13855_v59 = vld [vmem:[%s21286_s3 + $0x704] sm:$0xf0] }
 0x5b0   :  { %5063 = vmatmul.bf16.vlgmr.msrb.gmra.mxu1 %v4841_v42  ;;  %5101 = vmatmul.bf16.vlgmr.msrb.gmra.mxu3 %v4841_v42  ;;  %v11209_v61 = vor.u32 %v13859_v31, %v11208_v62  ;;  %v11192_v32 = vld [vmem:[%s21286_s3 + $0x700] sm:$0xf]  ;;  %v4842_v0 = vpack.c.bf16 0.0, %v16112_v39 }
 0x5b1   :  { %5366 = vmatpush.bf16.msra.mxu2 %v11221_v15  ;;  %5349 = vmatpush.bf16.msra.mxu1 %v11265_v7  ;;  %v11753_v7 = vor.u32 %v14124_v6, %v11752_v63  ;;  %v11193_v26 = vor.u32 %v13855_v59, %v11192_v32  ;;  %v11608_v36 = vld [vmem:[%s21287_s4 + $0xe40] sm:$0xf]  ;;  %v14088_v63 = vld [vmem:[%s21287_s4 + $0xe4c] sm:$0xf0]  ;;  %v11802_v6 = vld [vmem:[%s21287_s4 + $0xfd0] sm:$0xf0] }
 0x5b2   :  { %6405 = vmatpush.bf16.msrb.mxu3 %v11817_v5  ;;  %v3656_v20 = vpop.f32.mrf.mxu2  ;;  %5327 = vmatpush.bf16.msrb.mxu0 %v11225_v34  ;;  %v11656_v34 = vld [vmem:[%s21287_s4 + $0xea0] sm:$0xf]  ;;  %v14080_v59 = vld [vmem:[%s21287_s4 + $0xe0c] sm:$0xf0] }
 0x5b3   :  { %v3657_v8 = vadd.f32 %v3656_v20, %v17399_v17  ;;  %v17639_v9 = vpop.f32.mrf.mxu3  ;;  %v11194_v17 = vld [vmem:[%s21286_s3 + $0x708] sm:$0xf0]  ;;  %v11657_v4 = vor.u32 %v14100_v25, %v11656_v34  ;;  %v14106_v34 = vld [vmem:[%s21287_s4 + $0xee4] sm:$0xf] }
 0x5b4   :  { %v3620_v56 = vpop.f32.mrf.mxu0  ;;  %v11197_v33 = vor.u32 %v13854_v57, %v11194_v17  ;;  %v14092_v57 = vld [vmem:[%s21287_s4 + $0xe6c] sm:$0xf0] }
 0x5b5   :  { %v17642_v41 = vadd.f32 %v17516_v43, %v3657_v8  ;;  %v3621_v45 = vadd.f32 %v3620_v56, %v17404_v44  ;;  %v17645_v46 = vpop.f32.mrf.mxu1  ;;  %5367 = vmatpush.bf16.msra.mxu2 %v11213_v47  ;;  %5350 = vmatpush.bf16.msra.mxu1 %v11257_v49  ;;  %v11768_v43 = vld [vmem:[%s21287_s4 + $0xf80] sm:$0xf]  ;;  %v14128_v44 = vld [vmem:[%s21287_s4 + $0xf8c] sm:$0xf0] }
 0x5b6   :  { %6406 = vmatpush.bf16.msrb.mxu3 %v11801_v50  ;;  %5328 = vmatpush.bf16.msrb.mxu0 %v11217_v58  ;;  %v11769_v38 = vor.u32 %v14128_v44, %v11768_v43  ;;  %v14116_v50 = vld [vmem:[%s21287_s4 + $0xf2c] sm:$0xf0]  ;;  %v11640_v8 = vld [vmem:[%s21287_s4 + $0xe80] sm:$0xf]  ;;  %v14138_v43 = vld [vmem:[%s21287_s4 + $0xfe4] sm:$0xf] }
 0x5b7   :  { %v17660_v52 = vadd.f32 %v17527_v11, %v3621_v45  ;;  %v14108_v11 = vld [vmem:[%s21287_s4 + $0xeec] sm:$0xf0]  ;;  %v11721_v58 = vor.u32 %v14116_v50, %v11720_v53  ;;  %v11704_v56 = vld [vmem:[%s21287_s4 + $0xf00] sm:$0xf]  ;;  %v11818_v44 = vld [vmem:[%s21287_s4 + $0xff0] sm:$0xf0] }
 0x5b8   :  { %v11689_v42 = vor.u32 %v14108_v11, %v11688_v35  ;;  %v11624_v45 = vld [vmem:[%s21287_s4 + $0xe60] sm:$0xf]  ;;  %v14122_v53 = vld [vmem:[%s21287_s4 + $0xf64] sm:$0xf]  ;;  %v11754_v50 = vld [vmem:[%s21287_s4 + $0xf70] sm:$0xf0] }
 0x5b9   :  { %5368 = vmatpush.bf16.msra.mxu2 %v11205_v18 }
 0x5ba   :  { %6407 = vmatpush.bf16.msrb.mxu3 %v11785_v21  ;;  %v3658_v13 = vpop.f32.mrf.mxu2  ;;  %5329 = vmatpush.bf16.msrb.mxu0 %v11209_v61  ;;  %v11625_v61 = vor.u32 %v14092_v57, %v11624_v45  ;;  %v11757_v45 = vor.u32 %v14122_v53, %v11754_v50  ;;  %v14118_v57 = vld [vmem:[%s21287_s4 + $0xf44] sm:$0xf] }
 0x5bb   :  { %v3659_v16 = vadd.f32 %v3658_v13, %v17451_v60  ;;  %v3952_v15 = vpop.f32.mrf.mxu3  ;;  %v14104_v60 = vld [vmem:[%s21287_s4 + $0xecc] sm:$0xf0]  ;;  %v11821_v13 = vor.u32 %v14138_v43, %v11818_v44  ;;  %v14098_v43 = vld [vmem:[%s21287_s4 + $0xea4] sm:$0xf]  ;;  %v11658_v44 = vld [vmem:[%s21287_s4 + $0xeb0] sm:$0xf0] }
 0x5bc   :  { %v3893_v51 = vpop.f32.mrf.mxu0  ;;  %v14082_v50 = vld [vmem:[%s21287_s4 + $0xe24] sm:$0xf] }
 0x5bd   :  { %v17688_v19 = vadd.f32 %v17576_v27, %v3659_v16  ;;  %v3913_v5 = vadd.f32 %v17588_v1, %v3893_v51  ;;  %v3917_v23 = vpop.f32.mrf.mxu1  ;;  %5369 = vmatpush.bf16.msra.mxu2 %v11197_v33  ;;  %v11736_v27 = vld [vmem:[%s21287_s4 + $0xf40] sm:$0xf] }
 0x5be   :  { %6408 = vmatpush.bf16.msrb.mxu3 %v11769_v38  ;;  %5330 = vmatpush.bf16.msrb.mxu0 %v11201_v2  ;;  %v11737_v55 = vor.u32 %v14120_v28, %v11736_v27  ;;  %v11609_v2 = vor.u32 %v14088_v63, %v11608_v36  ;;  %v11592_v16 = vld [vmem:[%s21287_s4 + $0xe20] sm:$0xf]  ;;  %v14094_v63 = vld [vmem:[%s21287_s4 + $0xe84] sm:$0xf] }
 0x5bf   :  { %v17707_v1 = vadd.f32 %v3913_v5, %v17477_v12  ;;  %5044 = vmatmul.bf16.vlgmr.msra.gmra.mxu0 %v21464_v29  ;;  %5082 = vmatmul.bf16.vlgmr.msrb.gmra.mxu2 %v21464_v29  ;;  %v11673_v12 = vor.u32 %v14104_v60, %v11672_v30  ;;  %v11786_v5 = vld [vmem:[%s21287_s4 + $0xfb0] sm:$0xf0]  ;;  %v11576_v28 = vld [vmem:[%s21287_s4 + $0xe00] sm:$0xf] }
 0x5c0   :  { %5068 = vmatmul.bf16.gmra.mxu1 %v17692_v54  ;;  %5106 = vmatmul.bf16.gmra.mxu3 %v17692_v54 }
 0x5c1   :  { %6392 = vmatpush.bf16.msrb.mxu2 %v11689_v42  ;;  %v14130_v42 = vld [vmem:[%s21287_s4 + $0xfa4] sm:$0xf] }
 0x5c2   :  { %6409 = vmatpush.bf16.msrb.mxu3 %v11753_v7  ;;  %v3931_v47 = vpop.f32.mrf.mxu2  ;;  %5331 = vmatpush.bf16.msrb.mxu0 %v11193_v26  ;;  %v11789_v32 = vor.u32 %v14130_v42, %v11786_v5  ;;  %v14126_v26 = vld [vmem:[%s21287_s4 + $0xf84] sm:$0xf]  ;;  %v11824_v5 = vld [vmem:[%s21287_s4 + $0xfe8] sm:$0xf] }
 0x5c3   :  { %v3951_v3 = vadd.f32 %v17639_v9, %v3931_v47  ;;  %v3955_v20 = vpop.f32.mrf.mxu3  ;;  %v14096_v9 = vld [vmem:[%s21287_s4 + $0xe8c] sm:$0xf0] }
 0x5c4   :  { %v17732_v22 = vpop.f32.mrf.mxu0  ;;  %v11641_v18 = vor.u32 %v14096_v9, %v11640_v8 }
 0x5c5   :  { %v17735_v10 = vadd.f32 %v3951_v3, %v17525_v24  ;;  %v17737_v49 = vpop.f32.mrf.mxu1  ;;  %6393 = vmatpush.bf16.msrb.mxu2 %v11673_v12  ;;  %v14112_v24 = vld [vmem:[%s21287_s4 + $0xf0c] sm:$0xf0]  ;;  %v11577_v12 = vor.u32 %v14080_v59, %v11576_v28 }
 0x5c6   :  { %6410 = vmatpush.bf16.msrb.mxu3 %v11737_v55  ;;  %v11705_v21 = vor.u32 %v14112_v24, %v11704_v56  ;;  %v11690_v55 = vld [vmem:[%s21287_s4 + $0xef0] sm:$0xf0]  ;;  %v14102_v24 = vld [vmem:[%s21287_s4 + $0xec4] sm:$0xf] }
 0x5c7   :  { %v11693_v8 = vor.u32 %v14106_v34, %v11690_v55  ;;  %v14086_v34 = vld [vmem:[%s21287_s4 + $0xe44] sm:$0xf]  ;;  %v11610_v55 = vld [vmem:[%s21287_s4 + $0xe50] sm:$0xf0] }
 0x5c8   :  { %v11613_v53 = vor.u32 %v14086_v34, %v11610_v55 }
 0x5c9   :  { %6394 = vmatpush.bf16.msrb.mxu2 %v11657_v4 }
 0x5ca   :  { %6411 = vmatpush.bf16.msrb.mxu3 %v11721_v58  ;;  %v3933_v17 = vpop.f32.mrf.mxu2 }
 0x5cb   :  { %v3953_v62 = vadd.f32 %v3952_v15, %v3933_v17  ;;  %v3957_v31 = vpop.f32.mrf.mxu3 }
 0x5cc   :  { %v3898_v35 = vpop.f32.mrf.mxu0 }
 0x5cd   :  { %v17764_v33 = vadd.f32 %v3953_v62, %v17585_v48  ;;  %v3918_v11 = vadd.f32 %v3917_v23, %v3898_v35  ;;  %v4200_v38 = vpop.f32.mrf.mxu1  ;;  %6395 = vmatpush.bf16.msrb.mxu2 %v11641_v18  ;;  %v14134_v48 = vld [vmem:[%s21287_s4 + $0xfc4] sm:$0xf]  ;;  %v11674_v18 = vld [vmem:[%s21287_s4 + $0xed0] sm:$0xf0] }
 0x5ce   :  { %6412 = vmatpush.bf16.msrb.mxu3 %v11705_v21  ;;  %v11805_v15 = vor.u32 %v14134_v48, %v11802_v6  ;;  %v11677_v17 = vor.u32 %v14102_v24, %v11674_v18  ;;  %v11722_v35 = vld [vmem:[%s21287_s4 + $0xf30] sm:$0xf0] }
 0x5cf   :  { %v17780_v39 = vadd.f32 %v3918_v11, %v17604_v37  ;;  %5049 = vmatmul.bf16.gmra.mxu0 %v4842_v0  ;;  %5087 = vmatmul.bf16.gmra.mxu2 %v4842_v0  ;;  %v14084_v37 = vld [vmem:[%s21287_s4 + $0xe2c] sm:$0xf0]  ;;  %v11642_v48 = vld [vmem:[%s21287_s4 + $0xe90] sm:$0xf0] }
 0x5d0   :  { %5351 = vmatmul.bf16.vlgmr.msra.gmra.mxu1 %v17692_v54  ;;  %5389 = vmatmul.bf16.vlgmr.msra.gmra.mxu3 %v17692_v54  ;;  %v11593_v27 = vor.u32 %v14084_v37, %v11592_v16  ;;  %v11645_v16 = vor.u32 %v14094_v63, %v11642_v48 }
 0x5d1   :  { %6396 = vmatpush.bf16.msrb.mxu2 %v11625_v61 }
 0x5d2   :  { %6457 = vmatpush.bf16.msra.mxu3 %v11821_v13  ;;  %v3936_v51 = vpop.f32.mrf.mxu2 }
 0x5d3   :  { %v3956_v23 = vadd.f32 %v3955_v20, %v3936_v51  ;;  %v4238_v54 = vpop.f32.mrf.mxu3  ;;  %v11626_v51 = vld [vmem:[%s21287_s4 + $0xe70] sm:$0xf0] }
 0x5d4   :  { %v17796_v30 = vpop.f32.mrf.mxu0 }
 0x5d5   :  { %v17799_v7 = vadd.f32 %v3956_v23, %v17642_v41  ;;  %v17801_v60 = vpop.f32.mrf.mxu1  ;;  %6397 = vmatpush.bf16.msrb.mxu2 %v11609_v2  ;;  %v11770_v41 = vld [vmem:[%s21287_s4 + $0xf90] sm:$0xf0]  ;;  %v14110_v2 = vld [vmem:[%s21287_s4 + $0xf04] sm:$0xf]  ;;  %v14141_v23 = vld [vmem:[%s21287_s4 + $0xff4] sm:$0xf0] }
 0x5d6   :  { %6458 = vmatpush.bf16.msra.mxu3 %v11805_v15  ;;  %v11773_v47 = vor.u32 %v14126_v26, %v11770_v41  ;;  %v14090_v15 = vld [vmem:[%s21287_s4 + $0xe64] sm:$0xf] }
 0x5d9   :  { %6398 = vmatpush.bf16.msrb.mxu2 %v11593_v27 }
 0x5da   :  { %6459 = vmatpush.bf16.msra.mxu3 %v11789_v32  ;;  %v3938_v25 = vpop.f32.mrf.mxu2  ;;  %v11629_v32 = vor.u32 %v14090_v15, %v11626_v51  ;;  %v11680_v51 = vld [vmem:[%s21287_s4 + $0xec8] sm:$0xf] }
 0x5db   :  { %v3958_v3 = vadd.f32 %v3957_v31, %v3938_v25  ;;  %v4240_v20 = vpop.f32.mrf.mxu3  ;;  %v14114_v31 = vld [vmem:[%s21287_s4 + $0xf24] sm:$0xf]  ;;  %v11808_v25 = vld [vmem:[%s21287_s4 + $0xfc8] sm:$0xf] }
 0x5dc   :  { %v4181_v4 = vpop.f32.mrf.mxu0  ;;  %v11725_v6 = vor.u32 %v14114_v31, %v11722_v35  ;;  %v14109_v31 = vld [vmem:[%s21287_s4 + $0xef4] sm:$0xf0] }
 0x5dd   :  { %v17828_v58 = vadd.f32 %v3958_v3, %v17688_v19  ;;  %v4201_v9 = vadd.f32 %v4200_v38, %v4181_v4  ;;  %v4205_v56 = vpop.f32.mrf.mxu1  ;;  %6399 = vmatpush.bf16.msrb.mxu2 %v11577_v12  ;;  %v11738_v19 = vld [vmem:[%s21287_s4 + $0xf50] sm:$0xf0]  ;;  %v5130_v12 = vpack.c.bf16 0.0, %v16619_v14 }
 0x5de   :  { %6460 = vmatpush.bf16.msra.mxu3 %v11773_v47  ;;  %v11741_v62 = vor.u32 %v14118_v57, %v11738_v19  ;;  %v11825_v47 = vor.u32 %v14141_v23, %v11824_v5  ;;  %v11594_v3 = vld [vmem:[%s21287_s4 + $0xe30] sm:$0xf0]  ;;  %v14078_v19 = vld [vmem:[%s21287_s4 + $0xe04] sm:$0xf]  ;;  %v11744_v5 = vld [vmem:[%s21287_s4 + $0xf48] sm:$0xf] }
 0x5df   :  { %v17843_v21 = vadd.f32 %v4201_v9, %v17707_v1  ;;  %5332 = vmatmul.bf16.vlgmr.msrb.gmra.mxu0 %v4842_v0  ;;  %5370 = vmatmul.bf16.vlgmr.msra.gmra.mxu2 %v4842_v0  ;;  %v11661_v0 = vor.u32 %v14098_v43, %v11658_v44  ;;  %v11597_v18 = vor.u32 %v14082_v50, %v11594_v3  ;;  %v11776_v44 = vld [vmem:[%s21287_s4 + $0xf88] sm:$0xf]  ;;  %v14097_v50 = vld [vmem:[%s21287_s4 + $0xe94] sm:$0xf0] }
 0x5e0   :  { %5394 = vmatmul.bf16.gmra.mxu3 %v21464_v29  ;;  %5356 = vmatmul.bf16.gmra.mxu1 %v21464_v29 }
 0x5e1   :  { %6444 = vmatpush.bf16.msra.mxu2 %v11693_v8  ;;  %v14133_v8 = vld [vmem:[%s21287_s4 + $0xfb4] sm:$0xf0] }
 0x5e2   :  { %6461 = vmatpush.bf16.msra.mxu3 %v11757_v45  ;;  %v4219_v1 = vpop.f32.mrf.mxu2 }
 0x5e3   :  { %v4239_v61 = vadd.f32 %v4238_v54, %v4219_v1  ;;  %v4243_v11 = vpop.f32.mrf.mxu3  ;;  %v11696_v1 = vld [vmem:[%s21287_s4 + $0xee8] sm:$0xf] }
 0x5e4   :  { %v17859_v38 = vpop.f32.mrf.mxu0 }
 0x5e5   :  { %6445 = vmatpush.bf16.msra.mxu2 %v11677_v17  ;;  %v17862_v36 = vadd.f32 %v4239_v61, %v17735_v10  ;;  %v17864_v13 = vpop.f32.mrf.mxu1  ;;  %v11706_v10 = vld [vmem:[%s21287_s4 + $0xf10] sm:$0xf0] }
 0x5e6   :  { %6462 = vmatpush.bf16.msra.mxu3 %v11741_v62  ;;  %v11709_v37 = vor.u32 %v14110_v2, %v11706_v10  ;;  %v11578_v17 = vld [vmem:[%s21287_s4 + $0xe10] sm:$0xf0]  ;;  %v11697_v2 = vor.u32 %v14109_v31, %v11696_v1 }
 0x5e7   :  { %v11581_v62 = vor.u32 %v14078_v19, %v11578_v17 }
 0x5e9   :  { %6446 = vmatpush.bf16.msra.mxu2 %v11661_v0  ;;  %v14125_v0 = vld [vmem:[%s21287_s4 + $0xf74] sm:$0xf0] }
 0x5ea   :  { %6463 = vmatpush.bf16.msra.mxu3 %v11725_v6  ;;  %v4221_v42 = vpop.f32.mrf.mxu2 }
 0x5eb   :  { %v4241_v54 = vadd.f32 %v4240_v20, %v4221_v42  ;;  %v4245_v27 = vpop.f32.mrf.mxu3 }
 0x5ec   :  { %v4186_v28 = vpop.f32.mrf.mxu0 }
 0x5ed   :  { %6447 = vmatpush.bf16.msra.mxu2 %v11645_v16  ;;  %v17891_v59 = vadd.f32 %v4241_v54, %v17764_v33  ;;  %v4206_v26 = vadd.f32 %v4205_v56, %v4186_v28  ;;  %v4488_v41 = vpop.f32.mrf.mxu1  ;;  %v14137_v33 = vld [vmem:[%s21287_s4 + $0xfd4] sm:$0xf0] }
 0x5ee   :  { %6464 = vmatpush.bf16.msra.mxu3 %v11709_v37  ;;  %v11809_v20 = vor.u32 %v14137_v33, %v11808_v25  ;;  %v14105_v37 = vld [vmem:[%s21287_s4 + $0xed4] sm:$0xf0] }
 0x5ef   :  { %v17907_v14 = vadd.f32 %v4206_v26, %v17780_v39  ;;  %5337 = vmatmul.bf16.gmra.mxu0 %v5130_v12  ;;  %5375 = vmatmul.bf16.gmra.mxu2 %v5130_v12  ;;  %v11792_v39 = vld [vmem:[%s21287_s4 + $0xfa8] sm:$0xf]  ;;  %v11681_v54 = vor.u32 %v14105_v37, %v11680_v51  ;;  %v14101_v28 = vld [vmem:[%s21287_s4 + $0xeb4] sm:$0xf0] }
 0x5f0   :  { %6413 = vmatmul.bf16.vlgmr.msrb.gmra.mxu3 %v21464_v29  ;;  %v11793_v43 = vor.u32 %v14133_v8, %v11792_v39  ;;  %v11826_v39 = vld [vmem:[%s21287_s4 + $0xff8] sm:$0xf0] }
 0x5f1   :  { %6448 = vmatpush.bf16.msra.mxu2 %v11629_v32 }
 0x5f2   :  { %6509 = vmatpush.bf16.msrb.mxu3 %v11825_v47  ;;  %v4224_v4 = vpop.f32.mrf.mxu2 }
 0x5f3   :  { %v4244_v9 = vadd.f32 %v4243_v11, %v4224_v4  ;;  %v4526_v56 = vpop.f32.mrf.mxu3  ;;  %v11760_v11 = vld [vmem:[%s21287_s4 + $0xf68] sm:$0xf]  ;;  %v14139_v4 = vld [vmem:[%s21287_s4 + $0xfec] sm:$0xf] }
 0x5f4   :  { %v17922_v24 = vpop.f32.mrf.mxu0  ;;  %v11761_v42 = vor.u32 %v14125_v0, %v11760_v11  ;;  %v11829_v17 = vor.u32 %v14139_v4, %v11826_v39  ;;  %v14089_v11 = vld [vmem:[%s21287_s4 + $0xe54] sm:$0xf0]  ;;  %v11682_v4 = vld [vmem:[%s21287_s4 + $0xed8] sm:$0xf0] }
 0x5f5   :  { %6449 = vmatpush.bf16.msra.mxu2 %v11613_v53  ;;  %v17925_v45 = vadd.f32 %v4244_v9, %v17799_v7  ;;  %v17927_v57 = vpop.f32.mrf.mxu1  ;;  %v14129_v7 = vld [vmem:[%s21287_s4 + $0xf94] sm:$0xf0]  ;;  %v11648_v53 = vld [vmem:[%s21287_s4 + $0xe88] sm:$0xf] }
 0x5f6   :  { %6510 = vmatpush.bf16.msrb.mxu3 %v11809_v20  ;;  %v11777_v35 = vor.u32 %v14129_v7, %v11776_v44  ;;  %v11712_v20 = vld [vmem:[%s21287_s4 + $0xf08] sm:$0xf]  ;;  %v11649_v8 = vor.u32 %v14097_v50, %v11648_v53  ;;  %v14135_v44 = vld [vmem:[%s21287_s4 + $0xfcc] sm:$0xf]  ;;  %v11810_v7 = vld [vmem:[%s21287_s4 + $0xfd8] sm:$0xf0] }
 0x5f7   :  { %v11632_v9 = vld [vmem:[%s21287_s4 + $0xe68] sm:$0xf]  ;;  %v11813_v0 = vor.u32 %v14135_v44, %v11810_v7  ;;  %v11762_v53 = vld [vmem:[%s21287_s4 + $0xf78] sm:$0xf0]  ;;  %v14099_v7 = vld [vmem:[%s21287_s4 + $0xeac] sm:$0xf] }
 0x5f9   :  { %6450 = vmatpush.bf16.msra.mxu2 %v11597_v18 }
 0x5fa   :  { %6511 = vmatpush.bf16.msrb.mxu3 %v11793_v43  ;;  %v4226_v61 = vpop.f32.mrf.mxu2 }
 0x5fb   :  { %v4246_v63 = vadd.f32 %v4245_v27, %v4226_v61  ;;  %v17953_v48 = vpop.f32.mrf.mxu3  ;;  %v11664_v27 = vld [vmem:[%s21287_s4 + $0xea8] sm:$0xf] }
 0x5fc   :  { %v4469_v6 = vpop.f32.mrf.mxu0  ;;  %v11665_v47 = vor.u32 %v14101_v28, %v11664_v27  ;;  %v11616_v61 = vld [vmem:[%s21287_s4 + $0xe48] sm:$0xf] }
 0x5fd   :  { %6451 = vmatpush.bf16.msra.mxu2 %v11581_v62  ;;  %v17956_v10 = vadd.f32 %v4246_v63, %v17828_v58  ;;  %v4489_v16 = vadd.f32 %v4488_v41, %v4469_v6  ;;  %v4493_v15 = vpop.f32.mrf.mxu1  ;;  %v14121_v58 = vld [vmem:[%s21287_s4 + $0xf54] sm:$0xf0]  ;;  %v14131_v6 = vld [vmem:[%s21287_s4 + $0xfac] sm:$0xf] }
 0x5fe   :  { %6512 = vmatpush.bf16.msrb.mxu3 %v11777_v35  ;;  %v11745_v32 = vor.u32 %v14121_v58, %v11744_v5  ;;  %v14117_v41 = vld [vmem:[%s21287_s4 + $0xf34] sm:$0xf0]  ;;  %v14127_v58 = vld [vmem:[%s21287_s4 + $0xf8c] sm:$0xf] }
 0x5ff   :  { %21467 = vst [vmem:[#allocation33_spill] sm:$0xff] %v17956_v10  ;;  %v17971_v23 = vadd.f32 %v4489_v16, %v17843_v21  ;;  %6400 = vmatmul.bf16.vlgmr.msrb.gmra.mxu2 %v21464_v29  ;;  %v11728_v21 = vld [vmem:[%s21287_s4 + $0xf28] sm:$0xf]  ;;  %v11617_v16 = vor.u32 %v14089_v11, %v11616_v61  ;;  %v11730_v61 = vld [vmem:[%s21287_s4 + $0xf38] sm:$0xf0] }
 0x600   :  { %6465 = vmatmul.bf16.vlgmr.msra.gmra.mxu3 %v21464_v29  ;;  %v11729_v3 = vor.u32 %v14117_v41, %v11728_v21  ;;  %v11584_v21 = vld [vmem:[%s21287_s4 + $0xe08] sm:$0xf]  ;;  %v14081_v41 = vld [vmem:[%s21287_s4 + $0xe14] sm:$0xf0]  ;;  %v11432_v11 = vld [vmem:[%s21287_s4 + $0xce0] sm:$0xf] }
 0x601   :  { %6496 = vmatpush.bf16.msrb.mxu2 %v11697_v2  ;;  %v11794_v2 = vld [vmem:[%s21287_s4 + $0xfb8] sm:$0xf0]  ;;  %v11585_v50 = vor.u32 %v14081_v41, %v11584_v21  ;;  %v14012_v21 = vld [vmem:[%s21287_s4 + $0xbec] sm:$0xf0] }
 0x602   :  { %6513 = vmatpush.bf16.msrb.mxu3 %v11761_v42  ;;  %v4507_v26 = vpop.f32.mrf.mxu2  ;;  %v11797_v37 = vor.u32 %v14131_v6, %v11794_v2 }
 0x603   :  { %v4527_v12 = vadd.f32 %v4526_v56, %v4507_v26  ;;  %v4531_v34 = vpop.f32.mrf.mxu3  ;;  %v14093_v56 = vld [vmem:[%s21287_s4 + $0xe74] sm:$0xf0] }
 0x604   :  { %v17987_v55 = vpop.f32.mrf.mxu0  ;;  %v11633_v1 = vor.u32 %v14093_v56, %v11632_v9  ;;  %v14119_v9 = vld [vmem:[%s21287_s4 + $0xf4c] sm:$0xf]  ;;  %v11746_v56 = vld [vmem:[%s21287_s4 + $0xf58] sm:$0xf0] }
 0x605   :  { %6497 = vmatpush.bf16.msrb.mxu2 %v11681_v54  ;;  %v17990_v25 = vadd.f32 %v4527_v12, %v17862_v36  ;;  %v17992_v33 = vpop.f32.mrf.mxu1  ;;  %v14113_v36 = vld [vmem:[%s21287_s4 + $0xf14] sm:$0xf0]  ;;  %v11778_v54 = vld [vmem:[%s21287_s4 + $0xf98] sm:$0xf0]  ;;  %v14107_v12 = vld [vmem:[%s21287_s4 + $0xeec] sm:$0xf] }
 0x606   :  { %6514 = vmatpush.bf16.msrb.mxu3 %v11745_v32  ;;  %v11713_v18 = vor.u32 %v14113_v36, %v11712_v20  ;;  %v14103_v36 = vld [vmem:[%s21287_s4 + $0xecc] sm:$0xf] }
 0x607   :  { %v11685_v44 = vor.u32 %v14103_v36, %v11682_v4  ;;  %v11560_v4 = vld [vmem:[%s21287_s4 + $0xde0] sm:$0xf] }
 0x609   :  { %6498 = vmatpush.bf16.msrb.mxu2 %v11665_v47  ;;  %v14123_v47 = vld [vmem:[%s21287_s4 + $0xf6c] sm:$0xf] }
 0x60a   :  { %6515 = vmatpush.bf16.msrb.mxu3 %v11729_v3  ;;  %v18018_v19 = vpop.f32.mrf.mxu2  ;;  %v11765_v39 = vor.u32 %v14123_v47, %v11762_v53  ;;  %v14091_v47 = vld [vmem:[%s21287_s4 + $0xe6c] sm:$0xf]  ;;  %v11634_v53 = vld [vmem:[%s21287_s4 + $0xe78] sm:$0xf0] }
 0x60b   :  { %v18020_v43 = vpop.f32.mrf.mxu3 }
 0x60c   :  { %21468 = vst [vmem:[#allocation34_spill] sm:$0xff] %v18020_v43  ;;  %v4474_v62 = vpop.f32.mrf.mxu0  ;;  %v14062_v43 = vld [vmem:[%s21287_s4 + $0xd84] sm:$0xf] }
 0x60d   :  { %6499 = vmatpush.bf16.msrb.mxu2 %v11649_v8  ;;  %v4494_v31 = vadd.f32 %v4493_v15, %v4474_v62  ;;  %v18028_v35 = vpop.f32.mrf.mxu1  ;;  %v11600_v15 = vld [vmem:[%s21287_s4 + $0xe28] sm:$0xf]  ;;  %v11666_v62 = vld [vmem:[%s21287_s4 + $0xeb8] sm:$0xf0] }
 0x60e   :  { %6516 = vmatpush.bf16.msrb.mxu3 %v11713_v18  ;;  %v11669_v6 = vor.u32 %v14099_v7, %v11666_v62  ;;  %v11637_v7 = vor.u32 %v14091_v47, %v11634_v53  ;;  %v11400_v62 = vld [vmem:[%s21287_s4 + $0xca0] sm:$0xf]  ;;  %v11602_v47 = vld [vmem:[%s21287_s4 + $0xe38] sm:$0xf0] }
 0x60f   :  { %v18037_v63 = vadd.f32 %v4494_v31, %v17907_v14  ;;  %6452 = vmatmul.bf16.vlgmr.msra.gmra.mxu2 %v21464_v29  ;;  %v14085_v14 = vld [vmem:[%s21287_s4 + $0xe34] sm:$0xf0]  ;;  %v14115_v31 = vld [vmem:[%s21287_s4 + $0xf2c] sm:$0xf] }
 0x610   :  { %v11601_v28 = vor.u32 %v14085_v14, %v11600_v15  ;;  %v14095_v15 = vld [vmem:[%s21287_s4 + $0xe8c] sm:$0xf]  ;;  %v11650_v14 = vld [vmem:[%s21287_s4 + $0xe98] sm:$0xf0] }
 0x611   :  { %6500 = vmatpush.bf16.msrb.mxu2 %v11633_v1  ;;  %6517 = vmatmul.bf16.vlgmr.msrb.gmra.mxu3 %v21464_v29  ;;  %v11749_v1 = vor.u32 %v14119_v9, %v11746_v56  ;;  %v11653_v41 = vor.u32 %v14095_v15, %v11650_v14  ;;  %v12312_v9 = vld [vmem:[%s21287_s4 + $0xbc0] sm:$0xf]  ;;  %v14008_v56 = vld [vmem:[%s21287_s4 + $0xbcc] sm:$0xf0] }
 0x612   :  { %6561 = vmatpush.bf16.msra.mxu3 %v11829_v17  ;;  %v4512_v51 = vpop.f32.mrf.mxu2  ;;  %v12313_v15 = vor.u32 %v14008_v56, %v12312_v9  ;;  %v14000_v9 = vld [vmem:[%s21287_s4 + $0xb8c] sm:$0xf0] }
 0x613   :  { %v4532_v42 = vadd.f32 %v4531_v34, %v4512_v51  ;;  %v18053_v5 = vpop.f32.mrf.mxu3  ;;  %v11698_v34 = vld [vmem:[%s21287_s4 + $0xef8] sm:$0xf0]  ;;  %v11733_v51 = vor.u32 %v14115_v31, %v11730_v61  ;;  %v11544_v31 = vld [vmem:[%s21287_s4 + $0xdc0] sm:$0xf] }
 0x614   :  { %v18061_v27 = vpop.f32.mrf.mxu0  ;;  %v11701_v3 = vor.u32 %v14107_v12, %v11698_v34  ;;  %v11416_v12 = vld [vmem:[%s21287_s4 + $0xcc0] sm:$0xf]  ;;  %v14040_v34 = vld [vmem:[%s21287_s4 + $0xccc] sm:$0xf0] }
 0x615   :  { %6501 = vmatpush.bf16.msrb.mxu2 %v11617_v16  ;;  %v18064_v32 = vadd.f32 %v4532_v42, %v17925_v45  ;;  %v18066_v26 = vpop.f32.mrf.mxu1  ;;  %v11781_v45 = vor.u32 %v14127_v58, %v11778_v54  ;;  %v14111_v42 = vld [vmem:[%s21287_s4 + $0xf0c] sm:$0xf]  ;;  %v11714_v58 = vld [vmem:[%s21287_s4 + $0xf18] sm:$0xf0] }
 0x616   :  { %6562 = vmatpush.bf16.msra.mxu3 %v11813_v0  ;;  %v14044_v0 = vld [vmem:[%s21287_s4 + $0xcec] sm:$0xf0] }
 0x617   :  { %21469 = vst [vmem:[#allocation29_spill] sm:$0xff] %v18064_v32  ;;  %v11433_v2 = vor.u32 %v14044_v0, %v11432_v11  ;;  %v14087_v11 = vld [vmem:[%s21287_s4 + $0xe4c] sm:$0xf]  ;;  %v11618_v0 = vld [vmem:[%s21287_s4 + $0xe58] sm:$0xf0] }
 0x619   :  { %6502 = vmatpush.bf16.msrb.mxu2 %v11601_v28  ;;  %6366 = vmatpush.bf16.msra.mxu0 %v11433_v2  ;;  %v12328_v28 = vld [vmem:[%s21287_s4 + $0xbe0] sm:$0xf]  ;;  %v14072_v2 = vld [vmem:[%s21287_s4 + $0xdcc] sm:$0xf0] }
 0x61a   :  { %6563 = vmatpush.bf16.msra.mxu3 %v11797_v37  ;;  %v18086_v20 = vpop.f32.mrf.mxu2  ;;  %v12329_v36 = vor.u32 %v14012_v21, %v12328_v28  ;;  %v11545_v14 = vor.u32 %v14072_v2, %v11544_v31  ;;  %v14004_v28 = vld [vmem:[%s21287_s4 + $0xbac] sm:$0xf0]  ;;  %v11621_v21 = vor.u32 %v14087_v11, %v11618_v0  ;;  %v14079_v11 = vld [vmem:[%s21287_s4 + $0xe0c] sm:$0xf]  ;;  %v11586_v0 = vld [vmem:[%s21287_s4 + $0xe18] sm:$0xf0] }
 0x61b   :  { %21470 = vst [vmem:[#allocation36_spill] sm:$0xff] %v18086_v20  ;;  %v18094_v8 = vpop.f32.mrf.mxu3  ;;  %v14064_v2 = vld [vmem:[%s21287_s4 + $0xd8c] sm:$0xf0]  ;;  %v11514_v20 = vld [vmem:[%s21287_s4 + $0xd90] sm:$0xf0] }
 0x61c   :  { %v18102_v18 = vpop.f32.mrf.mxu0 }
 0x61d   :  { %6503 = vmatpush.bf16.msrb.mxu2 %v11585_v50  ;;  %v18104_v17 = vpop.f32.mrf.mxu1  ;;  %v11717_v50 = vor.u32 %v14111_v42, %v11714_v58  ;;  %v12296_v58 = vld [vmem:[%s21287_s4 + $0xba0] sm:$0xf] }
 0x61e   :  { %6564 = vmatpush.bf16.msra.mxu3 %v11781_v45 }
 0x620   :  { %6504 = vmatmul.bf16.vlgmr.msrb.gmra.mxu2 %v21464_v29 }
 0x621   :  { %6548 = vmatpush.bf16.msra.mxu2 %v11701_v3  ;;  %v11417_v3 = vor.u32 %v14040_v34, %v11416_v12  ;;  %v14032_v12 = vld [vmem:[%s21287_s4 + $0xc8c] sm:$0xf0]  ;;  %v14083_v34 = vld [vmem:[%s21287_s4 + $0xe2c] sm:$0xf] }
 0x622   :  { %6565 = vmatpush.bf16.msra.mxu3 %v11765_v39  ;;  %v18125_v16 = vpop.f32.mrf.mxu2  ;;  %v14076_v39 = vld [vmem:[%s21287_s4 + $0xdec] sm:$0xf0] }
 0x623   :  { %v18133_v37 = vpop.f32.mrf.mxu3  ;;  %6367 = vmatpush.bf16.msra.mxu0 %v11417_v3  ;;  %v11528_v3 = vld [vmem:[%s21287_s4 + $0xda0] sm:$0xf] }
 0x624   :  { %v18141_v54 = vpop.f32.mrf.mxu0 }
 0x625   :  { %6549 = vmatpush.bf16.msra.mxu2 %v11685_v44  ;;  %v18155_v45 = vpop.f32.mrf.mxu1  ;;  %v11561_v44 = vor.u32 %v14076_v39, %v11560_v4  ;;  %v12280_v39 = vld [vmem:[%s21287_s4 + $0xb80] sm:$0xf] }
 0x626   :  { %6566 = vmatpush.bf16.msra.mxu3 %v11749_v1  ;;  %v14036_v1 = vld [vmem:[%s21287_s4 + $0xcac] sm:$0xf0] }
 0x627   :  { %6379 = vmatpush.bf16.msrb.mxu1 %v11561_v44  ;;  %v11605_v44 = vor.u32 %v14083_v34, %v11602_v47  ;;  %v11589_v34 = vor.u32 %v14079_v11, %v11586_v0  ;;  %v11352_v47 = vld [vmem:[%s21287_s4 + $0xc40] sm:$0xf] }
 0x628   :  { %v11336_v0 = vld [vmem:[%s21287_s4 + $0xc20] sm:$0xf] }
 0x629   :  { %6550 = vmatpush.bf16.msra.mxu2 %v11669_v6  ;;  %v11401_v6 = vor.u32 %v14036_v1, %v11400_v62  ;;  %v14028_v62 = vld [vmem:[%s21287_s4 + $0xc6c] sm:$0xf0]  ;;  %v11512_v1 = vld [vmem:[%s21287_s4 + $0xd80] sm:$0xf] }
 0x62a   :  { %6567 = vmatpush.bf16.msra.mxu3 %v11733_v51  ;;  %v18184_v61 = vpop.f32.mrf.mxu2 }
 0x62b   :  { %v18195_v51 = vpop.f32.mrf.mxu3  ;;  %6368 = vmatpush.bf16.msra.mxu0 %v11401_v6  ;;  %6380 = vmatpush.bf16.msrb.mxu1 %v11545_v14  ;;  %v13980_v14 = vld [vmem:[%s21287_s4 + $0xaec] sm:$0xf0] }
 0x62c   :  { %21471 = vst [vmem:[#allocation38_spill] sm:$0xff] %v18195_v51  ;;  %v18197_v42 = vpop.f32.mrf.mxu0  ;;  %v11530_v51 = vld [vmem:[%s21287_s4 + $0xdb0] sm:$0xf0] }
 0x62d   :  { %6551 = vmatpush.bf16.msra.mxu2 %v11653_v41  ;;  %v11384_v41 = vld [vmem:[%s21287_s4 + $0xc80] sm:$0xf]  ;;  %v18224_v4 = vpop.f32.mrf.mxu1 }
 0x62e   :  { %6568 = vmatpush.bf16.msra.mxu3 %v11717_v50  ;;  %v11385_v53 = vor.u32 %v14032_v12, %v11384_v41  ;;  %v12297_v50 = vor.u32 %v14004_v28, %v12296_v58  ;;  %v12281_v58 = vor.u32 %v14000_v9, %v12280_v39  ;;  %v11513_v28 = vor.u32 %v14064_v2, %v11512_v1  ;;  %v12264_v41 = vld [vmem:[%s21287_s4 + $0xb60] sm:$0xf]  ;;  %v13996_v12 = vld [vmem:[%s21287_s4 + $0xb6c] sm:$0xf0] }
 0x62f   :  { %v13976_v9 = vld [vmem:[%s21287_s4 + $0xacc] sm:$0xf0] }
 0x630   :  { %6369 = vmatpush.bf16.msra.mxu0 %v11385_v53  ;;  %v14024_v53 = vld [vmem:[%s21287_s4 + $0xc4c] sm:$0xf0] }
 0x631   :  { %6552 = vmatpush.bf16.msra.mxu2 %v11637_v7  ;;  %6569 = vmatmul.bf16.vlgmr.msra.gmra.mxu3 %v21464_v29  ;;  %v11368_v7 = vld [vmem:[%s21287_s4 + $0xc60] sm:$0xf]  ;;  %v11353_v39 = vor.u32 %v14024_v53, %v11352_v47  ;;  %v13992_v1 = vld [vmem:[%s21287_s4 + $0xb4c] sm:$0xf0] }
 0x632   :  { %7253 = vmatpush.bf16.msrb.mxu3 %v12329_v36  ;;  %v14068_v36 = vld [vmem:[%s21287_s4 + $0xdac] sm:$0xf0]  ;;  %v18241_v31 = vpop.f32.mrf.mxu2  ;;  %v11369_v6 = vor.u32 %v14028_v62, %v11368_v7  ;;  %v12248_v62 = vld [vmem:[%s21287_s4 + $0xb40] sm:$0xf] }
 0x633   :  { %v11529_v56 = vor.u32 %v14068_v36, %v11528_v3  ;;  %v12184_v36 = vld [vmem:[%s21287_s4 + $0xac0] sm:$0xf]  ;;  %v14060_v7 = vld [vmem:[%s21287_s4 + $0xd6c] sm:$0xf0]  ;;  %v12249_v47 = vor.u32 %v13992_v1, %v12248_v62  ;;  %v14042_v62 = vld [vmem:[%s21287_s4 + $0xce4] sm:$0xf] }
 0x634   :  { %6370 = vmatpush.bf16.msra.mxu0 %v11369_v6  ;;  %v14020_v6 = vld [vmem:[%s21287_s4 + $0xc2c] sm:$0xf0]  ;;  %v11434_v1 = vld [vmem:[%s21287_s4 + $0xcf0] sm:$0xf0] }
 0x635   :  { %6553 = vmatpush.bf16.msra.mxu2 %v11621_v21  ;;  %6381 = vmatpush.bf16.msrb.mxu1 %v11529_v56  ;;  %v18258_v21 = vpop.f32.mrf.mxu0  ;;  %v12265_v56 = vor.u32 %v13996_v12, %v12264_v41  ;;  %v18298_v2 = vpop.f32.mrf.mxu1  ;;  %v14056_v41 = vld [vmem:[%s21287_s4 + $0xd4c] sm:$0xf0]  ;;  %v12168_v12 = vld [vmem:[%s21287_s4 + $0xaa0] sm:$0xf] }
 0x636   :  { %7254 = vmatpush.bf16.msrb.mxu3 %v12313_v15  ;;  %v12200_v15 = vld [vmem:[%s21287_s4 + $0xae0] sm:$0xf] }
 0x637   :  { %v12201_v3 = vor.u32 %v13980_v14, %v12200_v15  ;;  %v12185_v14 = vor.u32 %v13976_v9, %v12184_v36  ;;  %v12232_v36 = vld [vmem:[%s21287_s4 + $0xb20] sm:$0xf] }
 0x638   :  { %6371 = vmatpush.bf16.msra.mxu0 %v11353_v39  ;;  %v13988_v39 = vld [vmem:[%s21287_s4 + $0xb2c] sm:$0xf0]  ;;  %v11320_v9 = vld [vmem:[%s21287_s4 + $0xc00] sm:$0xf] }
 0x639   :  { %6554 = vmatpush.bf16.msra.mxu2 %v11605_v44  ;;  %6382 = vmatpush.bf16.msrb.mxu1 %v11513_v28  ;;  %v11496_v44 = vld [vmem:[%s21287_s4 + $0xd60] sm:$0xf] }
 0x63a   :  { %7255 = vmatpush.bf16.msrb.mxu3 %v12297_v50  ;;  %v18272_v50 = vpop.f32.mrf.mxu3  ;;  %v11497_v11 = vor.u32 %v14060_v7, %v11496_v44  ;;  %v18300_v15 = vpop.f32.mrf.mxu2  ;;  %v11480_v28 = vld [vmem:[%s21287_s4 + $0xd40] sm:$0xf] }
 0x63b   :  { %21472 = vst [vmem:[#allocation28_spill] sm:$0xff] %v18300_v15  ;;  %v11481_v53 = vor.u32 %v14056_v41, %v11480_v28  ;;  %v13984_v41 = vld [vmem:[%s21287_s4 + $0xb0c] sm:$0xf0]  ;;  %v11370_v15 = vld [vmem:[%s21287_s4 + $0xc70] sm:$0xf0] }
 0x63d   :  { %6555 = vmatpush.bf16.msra.mxu2 %v11589_v34  ;;  %6383 = vmatpush.bf16.msrb.mxu1 %v11497_v11  ;;  %v13972_v34 = vld [vmem:[%s21287_s4 + $0xaac] sm:$0xf0]  ;;  %v12152_v11 = vld [vmem:[%s21287_s4 + $0xa80] sm:$0xf] }
 0x63e   :  { %7256 = vmatpush.bf16.msrb.mxu3 %v12281_v58  ;;  %v11337_v58 = vor.u32 %v14020_v6, %v11336_v0  ;;  %v12169_v44 = vor.u32 %v13972_v34, %v12168_v12  ;;  %v13968_v0 = vld [vmem:[%s21287_s4 + $0xa8c] sm:$0xf0]  ;;  %v12233_v6 = vor.u32 %v13988_v39, %v12232_v36  ;;  %v11464_v12 = vld [vmem:[%s21287_s4 + $0xd20] sm:$0xf] }
 0x63f   :  { %v14052_v34 = vld [vmem:[%s21287_s4 + $0xd2c] sm:$0xf0] }
 0x640   :  { %6372 = vmatpush.bf16.msra.mxu0 %v11337_v58  ;;  %6556 = vmatmul.bf16.vlgmr.msra.gmra.mxu2 %v21464_v29  ;;  %v11437_v58 = vor.u32 %v14042_v62, %v11434_v1  ;;  %v11465_v36 = vor.u32 %v14052_v34, %v11464_v12  ;;  %v14038_v1 = vld [vmem:[%s21287_s4 + $0xcc4] sm:$0xf]  ;;  %v12314_v34 = vld [vmem:[%s21287_s4 + $0xbd0] sm:$0xf0] }
 0x641   :  { %7240 = vmatpush.bf16.msrb.mxu2 %v12201_v3  ;;  %v18314_v3 = vpop.f32.mrf.mxu0  ;;  %6384 = vmatpush.bf16.msrb.mxu1 %v11481_v53  ;;  %v12330_v53 = vld [vmem:[%s21287_s4 + $0xbf0] sm:$0xf0]  ;;  %v14006_v12 = vld [vmem:[%s21287_s4 + $0xbc4] sm:$0xf] }
 0x642   :  { %7257 = vmatpush.bf16.msrb.mxu3 %v12265_v56  ;;  %v14016_v56 = vld [vmem:[%s21287_s4 + $0xc0c] sm:$0xf0]  ;;  %v18344_v28 = vpop.f32.mrf.mxu3  ;;  %v18361_v39 = vpop.f32.mrf.mxu2 }
 0x643   :  { %v11321_v7 = vor.u32 %v14016_v56, %v11320_v9  ;;  %v12153_v9 = vor.u32 %v13968_v0, %v12152_v11  ;;  %v12136_v56 = vld [vmem:[%s21287_s4 + $0xa60] sm:$0xf]  ;;  %v18375_v11 = vpop.f32.mrf.mxu1 }
 0x645   :  { %7241 = vmatpush.bf16.msrb.mxu2 %v12185_v14  ;;  %v12216_v14 = vld [vmem:[%s21287_s4 + $0xb00] sm:$0xf]  ;;  %6373 = vmatpush.bf16.msra.mxu0 %v11321_v7  ;;  %v13964_v7 = vld [vmem:[%s21287_s4 + $0xa6c] sm:$0xf0] }
 0x646   :  { %7258 = vmatpush.bf16.msrb.mxu3 %v12249_v47  ;;  %v14010_v47 = vld [vmem:[%s21287_s4 + $0xbe4] sm:$0xf]  ;;  %v12217_v62 = vor.u32 %v13984_v41, %v12216_v14  ;;  %6385 = vmatpush.bf16.msrb.mxu1 %v11465_v36  ;;  %v11448_v14 = vld [vmem:[%s21287_s4 + $0xd00] sm:$0xf]  ;;  %v14048_v41 = vld [vmem:[%s21287_s4 + $0xd0c] sm:$0xf0] }
 0x647   :  { %v11449_v36 = vor.u32 %v14048_v41, %v11448_v14  ;;  %v13960_v14 = vld [vmem:[%s21287_s4 + $0xa4c] sm:$0xf0]  ;;  %v14034_v41 = vld [vmem:[%s21287_s4 + $0xca4] sm:$0xf] }
 0x649   :  { %6418 = vmatpush.bf16.msrb.mxu0 %v11437_v58  ;;  %7242 = vmatpush.bf16.msrb.mxu2 %v12169_v44  ;;  %v11418_v44 = vld [vmem:[%s21287_s4 + $0xcd0] sm:$0xf0]  ;;  %v18377_v0 = vpop.f32.mrf.mxu0  ;;  %v12333_v58 = vor.u32 %v14010_v47, %v12330_v53  ;;  %v14074_v47 = vld [vmem:[%s21287_s4 + $0xde4] sm:$0xf] }
 0x64a   :  { %7259 = vmatpush.bf16.msrb.mxu3 %v12233_v6  ;;  %v11421_v6 = vor.u32 %v14038_v1, %v11418_v44  ;;  %v11562_v53 = vld [vmem:[%s21287_s4 + $0xdf0] sm:$0xf0]  ;;  %v12137_v1 = vor.u32 %v13964_v7, %v12136_v56  ;;  %v12120_v44 = vld [vmem:[%s21287_s4 + $0xa40] sm:$0xf]  ;;  %6386 = vmatpush.bf16.msrb.mxu1 %v11449_v36  ;;  %v12317_v56 = vor.u32 %v14006_v12, %v12314_v34  ;;  %v14002_v7 = vld [vmem:[%s21287_s4 + $0xba4] sm:$0xf]  ;;  %v18423_v12 = vpop.f32.mrf.mxu2 }
 0x64b   :  { %v11565_v29 = vor.u32 %v14074_v47, %v11562_v53  ;;  %v14070_v36 = vld [vmem:[%s21287_s4 + $0xdc4] sm:$0xf]  ;;  %v11546_v47 = vld [vmem:[%s21287_s4 + $0xdd0] sm:$0xf0]  ;;  %v12121_v34 = vor.u32 %v13960_v14, %v12120_v44 }
 0x64c   :  { %v11549_v53 = vor.u32 %v14070_v36, %v11546_v47  ;;  %v13998_v14 = vld [vmem:[%s21287_s4 + $0xb84] sm:$0xf]  ;;  %v12282_v36 = vld [vmem:[%s21287_s4 + $0xb90] sm:$0xf0] }
 0x64d   :  { %7243 = vmatpush.bf16.msrb.mxu2 %v12153_v9  ;;  %6419 = vmatpush.bf16.msrb.mxu0 %v11421_v6  ;;  %v11402_v9 = vld [vmem:[%s21287_s4 + $0xcb0] sm:$0xf0]  ;;  %v14066_v47 = vld [vmem:[%s21287_s4 + $0xda4] sm:$0xf] }
 0x64e   :  { %7260 = vmatpush.bf16.msrb.mxu3 %v12217_v62  ;;  %6431 = vmatpush.bf16.msra.mxu1 %v11565_v29  ;;  %v11405_v6 = vor.u32 %v14034_v41, %v11402_v9  ;;  %v12298_v62 = vld [vmem:[%s21287_s4 + $0xbb0] sm:$0xf0]  ;;  %v12104_v29 = vld [vmem:[%s21287_s4 + $0xa20] sm:$0xf]  ;;  %v13956_v41 = vld [vmem:[%s21287_s4 + $0xa2c] sm:$0xf0] }
 0x64f   :  { %v14030_v9 = vld [vmem:[%s21287_s4 + $0xc84] sm:$0xf]  ;;  %v12301_v44 = vor.u32 %v14002_v7, %v12298_v62  ;;  %v12105_v7 = vor.u32 %v13956_v41, %v12104_v29  ;;  %v12088_v62 = vld [vmem:[%s21287_s4 + $0xa00] sm:$0xf]  ;;  %v12285_v29 = vor.u32 %v13998_v14, %v12282_v36  ;;  %v11517_v36 = vor.u32 %v14062_v43, %v11514_v20  ;;  %v11354_v20 = vld [vmem:[%s21287_s4 + $0xc50] sm:$0xf0] }
 0x650   :  { %v13994_v41 = vld [vmem:[%s21287_s4 + $0xb64] sm:$0xf] }
 0x651   :  { %7244 = vmatpush.bf16.msrb.mxu2 %v12137_v1  ;;  %6420 = vmatpush.bf16.msrb.mxu0 %v11405_v6  ;;  %v11386_v1 = vld [vmem:[%s21287_s4 + $0xc90] sm:$0xf0]  ;;  %v18437_v10 = vpop.f32.mrf.mxu0  ;;  %v13990_v43 = vld [vmem:[%s21287_s4 + $0xb44] sm:$0xf] }
 0x652   :  { %7305 = vmatpush.bf16.msra.mxu3 %v12333_v58  ;;  %v18421_v58 = vpop.f32.mrf.mxu3  ;;  %6432 = vmatpush.bf16.msra.mxu1 %v11549_v53  ;;  %v11389_v6 = vor.u32 %v14030_v9, %v11386_v1  ;;  %v11533_v53 = vor.u32 %v14066_v47, %v11530_v51  ;;  %v13952_v9 = vld [vmem:[%s21287_s4 + $0xa0c] sm:$0xf0]  ;;  %v14026_v1 = vld [vmem:[%s21287_s4 + $0xc64] sm:$0xf]  ;;  %v12202_v51 = vld [vmem:[%s21287_s4 + $0xaf0] sm:$0xf0] }
 0x653   :  { %v12266_v47 = vld [vmem:[%s21287_s4 + $0xb70] sm:$0xf0]  ;;  %v12089_v14 = vor.u32 %v13952_v9, %v12088_v62 }
 0x654   :  { %v12269_v62 = vor.u32 %v13994_v41, %v12266_v47  ;;  %v12250_v9 = vld [vmem:[%s21287_s4 + $0xb50] sm:$0xf0]  ;;  %v3915_v41 = vadd.f32 %v17645_v46, %v17732_v22  ;;  %v4777_v47 = vadd.f32 %v18028_v35, %v18102_v18  ;;  %v13970_v35 = vld [vmem:[%s21287_s4 + $0xaa4] sm:$0xf] }
 0x655   :  { %7245 = vmatpush.bf16.msrb.mxu2 %v12121_v34  ;;  %6421 = vmatpush.bf16.msrb.mxu0 %v11389_v6  ;;  %v13978_v34 = vld [vmem:[%s21287_s4 + $0xae4] sm:$0xf]  ;;  %v11373_v6 = vor.u32 %v14026_v1, %v11370_v15  ;;  %v11338_v46 = vld [vmem:[%s21287_s4 + $0xc30] sm:$0xf0] }
 0x656   :  { %7306 = vmatpush.bf16.msra.mxu3 %v12317_v56  ;;  %v18451_v56 = vpop.f32.mrf.mxu1  ;;  %6433 = vmatpush.bf16.msra.mxu1 %v11533_v53  ;;  %v12205_v53 = vor.u32 %v13978_v34, %v12202_v51  ;;  %v13974_v15 = vld [vmem:[%s21287_s4 + $0xac4] sm:$0xf]  ;;  %v12170_v18 = vld [vmem:[%s21287_s4 + $0xab0] sm:$0xf0] }
 0x657   :  { %21473 = vst [vmem:[#allocation35_spill] sm:$0xff] %v18451_v56  ;;  %v14022_v1 = vld [vmem:[%s21287_s4 + $0xc44] sm:$0xf] }
 0x658   :  { %v11357_v34 = vor.u32 %v14022_v1, %v11354_v20  ;;  %v14058_v51 = vld [vmem:[%s21287_s4 + $0xd64] sm:$0xf]  ;;  %v18520_v1 = vld [vmem:[%s21288_s7] sm:$0x3] }
 0x659   :  { %7246 = vmatpush.bf16.msrb.mxu2 %v12105_v7  ;;  %6422 = vmatpush.bf16.msrb.mxu0 %v11373_v6  ;;  %v18493_v32 = vpop.f32.mrf.mxu0  ;;  %v12186_v7 = vld [vmem:[%s21287_s4 + $0xad0] sm:$0xf0]  ;;  %v14018_v20 = vld [vmem:[%s21287_s4 + $0xc24] sm:$0xf] }
 0x65a   :  { %7307 = vmatpush.bf16.msra.mxu3 %v12301_v44  ;;  %v18483_v44 = vpop.f32.mrf.mxu2  ;;  %v18491_v56 = vpop.f32.mrf.mxu3  ;;  %6434 = vmatpush.bf16.msra.mxu1 %v11517_v36  ;;  %v12189_v36 = vor.u32 %v13974_v15, %v12186_v7  ;;  %v11341_v15 = vor.u32 %v14018_v20, %v11338_v46  ;;  %v5065_v7 = vadd.f32 %v18224_v4, %v18314_v3  ;;  %v18557_v20 = vperm.slane %v18520_v1, 0 }
 0x65b   :  { %v4491_v3 = vadd.f32 %v17927_v57, %v17987_v55  ;;  %v12173_v46 = vor.u32 %v13970_v35, %v12170_v18  ;;  %v12154_v55 = vld [vmem:[%s21287_s4 + $0xa90] sm:$0xf0] }
 0x65d   :  { %7247 = vmatpush.bf16.msrb.mxu2 %v12089_v14  ;;  %6423 = vmatpush.bf16.msrb.mxu0 %v11357_v34  ;;  %v12253_v14 = vor.u32 %v13990_v43, %v12250_v9  ;;  %v12234_v34 = vld [vmem:[%s21287_s4 + $0xb30] sm:$0xf0]  ;;  %v3962_v43 = vadd.f32 %v3915_v41, %v17542_v40  ;;  %v4203_v9 = vadd.f32 %v17801_v60, %v17859_v38  ;;  %v14014_v40 = vld [vmem:[%s21287_s4 + $0xc04] sm:$0xf] }
 0x65e   :  { %7308 = vmatpush.bf16.msra.mxu3 %v12285_v29  ;;  %v11498_v29 = vld [vmem:[%s21287_s4 + $0xd70] sm:$0xf0]  ;;  %v5352_v22 = vpop.f32.mrf.mxu1  ;;  %v4815_v38 = vadd.f32 %v18053_v5, %v18125_v16  ;;  %v14050_v16 = vld [vmem:[%s21287_s4 + $0xd24] sm:$0xf] }
 0x65f   :  { %v11501_v6 = vor.u32 %v14058_v51, %v11498_v29  ;;  %v14054_v51 = vld [vmem:[%s21287_s4 + $0xd44] sm:$0xf]  ;;  %v11322_v60 = vld [vmem:[%s21287_s4 + $0xc10] sm:$0xf0] }
 0x660   :  { %v12218_v5 = vld [vmem:[%s21287_s4 + $0xb10] sm:$0xf0] }
 0x661   :  { %7292 = vmatpush.bf16.msra.mxu2 %v12205_v53  ;;  %v13986_v53 = vld [vmem:[%s21287_s4 + $0xb24] sm:$0xf]  ;;  %6435 = vmatpush.bf16.msra.mxu1 %v11501_v6  ;;  %v4824_v6 = vadd.f32 %v4777_v47, %v17971_v23  ;;  %v5333_v57 = vpop.f32.mrf.mxu0 }
 0x662   :  { %7309 = vmatpush.bf16.msra.mxu3 %v12269_v62  ;;  %v11482_v62 = vld [vmem:[%s21287_s4 + $0xd50] sm:$0xf0]  ;;  %v18551_v29 = vpop.f32.mrf.mxu2  ;;  %6424 = vmatpush.bf16.msrb.mxu0 %v11341_v15  ;;  %v13966_v23 = vld [vmem:[%s21287_s4 + $0xa84] sm:$0xf]  ;;  %v12237_v41 = vor.u32 %v13986_v53, %v12234_v34  ;;  %v5353_v18 = vadd.f32 %v5352_v22, %v5333_v57  ;;  %v4250_v53 = vadd.f32 %v4203_v9, %v3962_v43  ;;  %v5390_v22 = vpop.f32.mrf.mxu3  ;;  %v18608_v57 = vperm.slane %v18520_v1, 1 }
 0x663   :  { %v11485_v4 = vor.u32 %v14054_v51, %v11482_v62  ;;  %v13982_v47 = vld [vmem:[%s21287_s4 + $0xb04] sm:$0xf]  ;;  %v5112_v35 = vadd.f32 %v5065_v7, %v4824_v6  ;;  %v4779_v15 = vadd.f32 %v18066_v26, %v18141_v54  ;;  %v5103_v7 = vadd.f32 %v18272_v50, %v18361_v39  ;;  %v12138_v26 = vld [vmem:[%s21287_s4 + $0xa70] sm:$0xf0] }
 0x664   :  { %v12157_v62 = vor.u32 %v13966_v23, %v12154_v55  ;;  %v4825_v6 = vadd.f32 %v4815_v38, %v17990_v25  ;;  %v12221_v54 = vor.u32 %v13982_v47, %v12218_v5  ;;  %v4529_v50 = vadd.f32 %v17953_v48, %v18018_v19  ;;  %v14046_v25 = vld [vmem:[%s21287_s4 + $0xd04] sm:$0xf]  ;;  %v11450_v9 = vld [vmem:[%s21287_s4 + $0xd10] sm:$0xf0] }
 0x665   :  { %7293 = vmatpush.bf16.msra.mxu2 %v12189_v36  ;;  %6436 = vmatpush.bf16.msra.mxu1 %v11485_v4  ;;  %v11325_v36 = vor.u32 %v14014_v40, %v11322_v60  ;;  %v5400_v51 = vadd.f32 %v5353_v18, %v5112_v35  ;;  %v4538_v4 = vadd.f32 %v4491_v3, %v4250_v53  ;;  %v13962_v40 = vld [vmem:[%s21287_s4 + $0xa64] sm:$0xf]  ;;  %v12122_v47 = vld [vmem:[%s21287_s4 + $0xa50] sm:$0xf0] }
 0x666   :  { %7310 = vmatpush.bf16.msra.mxu3 %v12253_v14  ;;  %v11466_v14 = vld [vmem:[%s21287_s4 + $0xd30] sm:$0xf0]  ;;  %v5067_v39 = vadd.f32 %v18298_v2, %v18377_v0  ;;  %v5354_v60 = vpop.f32.mrf.mxu1  ;;  %v11453_v48 = vor.u32 %v14046_v25, %v11450_v9  ;;  %v12141_v0 = vor.u32 %v13962_v40, %v12138_v26  ;;  %v4817_v23 = vadd.f32 %v18094_v8, %v18184_v61  ;;  %v12320_v9 = vld [vmem:[%s21287_s4 + $0xbc8] sm:$0xf] }
 0x667   :  { %v11469_v34 = vor.u32 %v14050_v16, %v11466_v14  ;;  %6425 = vmatpush.bf16.msrb.mxu0 %v11325_v36  ;;  %v5413_v43 = vadd.f32 %v18557_v20, %v5400_v51  ;;  %v4826_v3 = vadd.f32 %v4779_v15, %v4538_v4  ;;  %v4539_v5 = vadd.f32 %v4529_v50, %v17891_v59 }
 0x668   :  { %v4782_v8 = vadd.f32 %v18104_v17, %v18197_v42  ;;  %v5105_v61 = vadd.f32 %v18344_v28, %v18423_v12  ;;  %v3920_v59 = vadd.f32 %v17737_v49, %v17796_v30  ;;  %v12106_v17 = vld [vmem:[%s21287_s4 + $0xa30] sm:$0xf0]  ;;  %v12336_v42 = vld [vmem:[%s21287_s4 + $0xbe8] sm:$0xf]  ;;  %v14013_v28 = vld [vmem:[%s21287_s4 + $0xbf4] sm:$0xf0]  ;;  %v5070_v12 = vadd.f32 %v18375_v11, %v18437_v10 }
 0x669   :  { %7294 = vmatpush.bf16.msra.mxu2 %v12173_v46  ;;  %6437 = vmatpush.bf16.msra.mxu1 %v11469_v34  ;;  %v5113_v46 = vadd.f32 %v5103_v7, %v4825_v6  ;;  %vm5421_vm0 = vcmp.ge.f32.partialorder %v5413_v43, 0.0  ;;  %v5429_v19 = vmul.f32 0.2, %v5413_v43  ;;  %v5335_v55 = vpop.f32.mrf.mxu0  ;;  %v5114_v1 = vadd.f32 %v5067_v39, %v4826_v3  ;;  %v13954_v7 = vld [vmem:[%s21287_s4 + $0xa24] sm:$0xf] }
 0x66a   :  { %7311 = vmatpush.bf16.msra.mxu3 %v12237_v41  ;;  %v5371_v38 = vpop.f32.mrf.mxu2  ;;  %v13958_v41 = vld [vmem:[%s21287_s4 + $0xa44] sm:$0xf]  ;;  %v5355_v18 = vadd.f32 %v5354_v60, %v5335_v55  ;;  %v5392_v34 = vpop.f32.mrf.mxu3  ;;  %v4208_v51 = vadd.f32 %v17864_v13, %v17922_v24  ;;  %v12109_v50 = vor.u32 %v13954_v7, %v12106_v17  ;;  %v12337_v39 = vor.u32 %v14013_v28, %v12336_v42  ;;  %v12090_v11 = vld [vmem:[%s21287_s4 + $0xa10] sm:$0xf0]  ;;  %v14009_v3 = vld [vmem:[%s21287_s4 + $0xbd4] sm:$0xf0] }
 0x66b   :  { %v5391_v2 = vadd.f32 %v5390_v22, %v5371_v38  ;;  %v5437_v36 = vsel %vm5421_vm0, %v5413_v43, %v5429_v19  ;;  %v12125_v15 = vor.u32 %v13958_v41, %v12122_v47  ;;  %v4827_v22 = vadd.f32 %v4817_v23, %v4539_v5  ;;  %v13950_v10 = vld [vmem:[%s21287_s4 + $0xa04] sm:$0xf]  ;;  %v21475_v47 = vld [vmem:[#allocation35_spill] sm:$0xff]  ;;  %v21477_v5 = vld [vmem:[#allocation34_spill] sm:$0xff] }
 0x66c   :  { %v18623_v16 = vpack.c.bf16 %v5437_v36, %v5437_v36  ;;  %v5402_v53 = vadd.f32 %v5355_v18, %v5114_v1  ;;  %v3966_v13 = vadd.f32 %v3920_v59, %v17660_v52  ;;  %v4496_v24 = vadd.f32 %v17992_v33, %v18061_v27  ;;  %v12208_v33 = vld [vmem:[%s21287_s4 + $0xae8] sm:$0xf]  ;;  %v13981_v27 = vld [vmem:[%s21287_s4 + $0xaf4] sm:$0xf0]  ;;  %v21474_v55 = vld [vmem:[#allocation29_spill] sm:$0xff] }
 0x66d   :  { %7295 = vmatpush.bf16.msra.mxu2 %v12157_v62  ;;  %6438 = vmatpush.bf16.msra.mxu1 %v11453_v48  ;;  %v5401_v35 = vadd.f32 %v5391_v2, %v5113_v46  ;;  %v4828_v62 = vadd.f32 %v4782_v8, %v18037_v63  ;;  %v5115_v4 = vadd.f32 %v5105_v61, %v4827_v22  ;;  %v21476_v18 = vld [vmem:[#allocation36_spill] sm:$0xff]  ;;  %v21479_v42 = vld [vmem:[#allocation38_spill] sm:$0xff] }
 0x66e   :  { %7312 = vmatpush.bf16.msra.mxu3 %v12221_v54  ;;  %7248 = vmatmul.bf16.vlgmr.msrb.gmra.mxu2 %v18623_v16  ;;  %v18644_v30 = vadd.f32 %v18557_v20, %v5402_v53  ;;  %v5357_v6 = vpop.f32.mrf.mxu1  ;;  %v4820_v63 = vadd.f32 %v18133_v37, %v18241_v31  ;;  %v4254_v37 = vadd.f32 %v4208_v51, %v3966_v13  ;;  %v14045_v7 = vld [vmem:[%s21287_s4 + $0xcf4] sm:$0xf0] }
 0x66f   :  { %v5414_v14 = vadd.f32 %v18608_v57, %v5401_v35  ;;  %v5116_v46 = vadd.f32 %v5070_v12, %v4828_v62  ;;  %v4784_v31 = vadd.f32 %v18155_v45, %v18258_v21  ;;  %v5108_v38 = vadd.f32 %v18421_v58, %v18483_v44  ;;  %v12304_v58 = vld [vmem:[%s21287_s4 + $0xba8] sm:$0xf]  ;;  %v14005_v44 = vld [vmem:[%s21287_s4 + $0xbb4] sm:$0xf0] }
 0x670   :  { %v12093_v48 = vor.u32 %v13950_v10, %v12090_v11  ;;  %v4542_v23 = vadd.f32 %v4496_v24, %v4254_v37  ;;  %v4829_v41 = vadd.f32 %v4820_v63, %v21474_v55  ;;  %v5072_v1 = vadd.f32 %v21475_v47, %v18493_v32  ;;  %v12192_v35 = vld [vmem:[%s21287_s4 + $0xac8] sm:$0xf]  ;;  %v13977_v32 = vld [vmem:[%s21287_s4 + $0xad4] sm:$0xf0]  ;;  %v21480_v11 = vld [vmem:[#allocation33_spill] sm:$0xff] }
 0x671   :  { %7296 = vmatpush.bf16.msra.mxu2 %v12141_v0  ;;  %vm5422_vm1 = vcmp.ge.f32.partialorder %v5414_v14, 0.0  ;;  %v5430_v49 = vmul.f32 0.2, %v5414_v14  ;;  %v5338_v25 = vpop.f32.mrf.mxu0  ;;  %v12321_v0 = vor.u32 %v14009_v3, %v12320_v9  ;;  %v12209_v21 = vor.u32 %v13981_v27, %v12208_v33  ;;  %v21478_v17 = vld [vmem:[#allocation28_spill] sm:$0xff]  ;;  %v12272_v27 = vld [vmem:[%s21287_s4 + $0xb68] sm:$0xf] }
 0x672   :  { %v5373_v40 = vpop.f32.mrf.mxu2  ;;  %v5358_v52 = vadd.f32 %v5357_v6, %v5338_v25  ;;  %v5395_v45 = vpop.f32.mrf.mxu3  ;;  %v4534_v8 = vadd.f32 %v21477_v5, %v21476_v18  ;;  %v4830_v61 = vadd.f32 %v4784_v31, %v4542_v23  ;;  %v4822_v28 = vadd.f32 %v21479_v42, %v21478_v17  ;;  %v14001_v6 = vld [vmem:[%s21287_s4 + $0xb94] sm:$0xf0]  ;;  %v11424_v25 = vld [vmem:[%s21287_s4 + $0xcc8] sm:$0xf] }
 0x673   :  { %v5438_v26 = vsel %vm5422_vm1, %v5414_v14, %v5430_v49  ;;  %v5393_v54 = vadd.f32 %v5392_v34, %v5373_v40  ;;  %v5117_v14 = vadd.f32 %v5108_v38, %v4829_v41  ;;  %v12305_v34 = vor.u32 %v14005_v44, %v12304_v58  ;;  %v13973_v10 = vld [vmem:[%s21287_s4 + $0xab4] sm:$0xf0]  ;;  %v12160_v31 = vld [vmem:[%s21287_s4 + $0xa88] sm:$0xf] }
 0x674   :  { %v18660_v43 = vpack.c.bf16 %v5438_v26, %v5438_v26  ;;  %v5404_v2 = vadd.f32 %v5358_v52, %v5116_v46  ;;  %v5118_v12 = vadd.f32 %v5072_v1, %v4830_v61  ;;  %v12193_v62 = vor.u32 %v13977_v32, %v12192_v35  ;;  %v14041_v9 = vld [vmem:[%s21287_s4 + $0xcd4] sm:$0xf0]  ;;  %v11568_v52 = vld [vmem:[%s21287_s4 + $0xde8] sm:$0xf] }
 0x675   :  { %7297 = vmatpush.bf16.msra.mxu2 %v12125_v15  ;;  %v5403_v60 = vadd.f32 %v5393_v54, %v5115_v4  ;;  %v11440_v15 = vld [vmem:[%s21287_s4 + $0xce8] sm:$0xf]  ;;  %v4543_v13 = vadd.f32 %v4534_v8, %v21480_v11  ;;  %v5110_v24 = vadd.f32 %v18491_v56, %v18551_v29  ;;  %v14077_v56 = vld [vmem:[%s21287_s4 + $0xdf4] sm:$0xf0]  ;;  %vm5423_vm5 = vcmp.ge.f32.partialorder %v18644_v30, 0.0 }
 0x676   :  { %7261 = vmatmul.bf16.vlgmr.msrb.gmra.mxu3 %v18660_v43  ;;  %v5417_v36 = vadd.f32 %v18557_v20, %v5404_v2  ;;  %v5359_v49 = vpop.f32.mrf.mxu1  ;;  %v12288_v4 = vld [vmem:[%s21287_s4 + $0xb88] sm:$0xf]  ;;  %v13997_v37 = vld [vmem:[%s21287_s4 + $0xb74] sm:$0xf0]  ;;  %v11425_v2 = vor.u32 %v14041_v9, %v11424_v25  ;;  %v14011_v9 = vld [vmem:[%s21287_s4 + $0xbec] sm:$0xf] }
 0x677   :  { %v18680_v19 = vadd.f32 %v18608_v57, %v5403_v60  ;;  %7357 = vmatpush.bf16.msrb.mxu3 %v12337_v39  ;;  %v12176_v39 = vld [vmem:[%s21287_s4 + $0xaa8] sm:$0xf]  ;;  %v12289_v60 = vor.u32 %v14001_v6, %v12288_v4  ;;  %v4831_v29 = vadd.f32 %v4822_v28, %v4543_v13  ;;  %v12273_v58 = vor.u32 %v13997_v37, %v12272_v27  ;;  %v14073_v32 = vld [vmem:[%s21287_s4 + $0xdd4] sm:$0xf0] }
 0x678   :  { %vm5425_vm2 = vcmp.ge.f32.partialorder %v5417_v36, 0.0  ;;  %v5433_v59 = vmul.f32 0.2, %v5417_v36  ;;  %v12177_v33 = vor.u32 %v13973_v10, %v12176_v39  ;;  %v11408_v47 = vld [vmem:[%s21287_s4 + $0xca8] sm:$0xf] }
 0x679   :  { %7298 = vmatpush.bf16.msra.mxu2 %v12109_v50  ;;  %v5340_v51 = vpop.f32.mrf.mxu0  ;;  %v11441_v50 = vor.u32 %v14045_v7, %v11440_v15  ;;  %v5119_v23 = vadd.f32 %v5110_v24, %v4831_v29  ;;  %v11552_v44 = vld [vmem:[%s21287_s4 + $0xdc8] sm:$0xf]  ;;  %v13993_v5 = vld [vmem:[%s21287_s4 + $0xb54] sm:$0xf0]  ;;  %vm5424_vm4 = vcmp.ge.f32.partialorder %v18680_v19, 0.0 }
 0x67a   :  { %v5376_v53 = vpop.f32.mrf.mxu2  ;;  %v5441_v40 = vsel %vm5425_vm2, %v5417_v36, %v5433_v59  ;;  %v5360_v54 = vadd.f32 %v5359_v49, %v5340_v51  ;;  %v5397_v55 = vpop.f32.mrf.mxu3  ;;  %v12256_v18 = vld [vmem:[%s21287_s4 + $0xb48] sm:$0xf]  ;;  %v14033_v7 = vld [vmem:[%s21287_s4 + $0xc94] sm:$0xf0] }
 0x67b   :  { %v5396_v22 = vadd.f32 %v5395_v45, %v5376_v53  ;;  %7358 = vmatpush.bf16.msrb.mxu3 %v12321_v0  ;;  %v18723_v63 = vpack.c.bf16 %v5441_v40, %v5441_v40  ;;  %v13969_v0 = vld [vmem:[%s21287_s4 + $0xa94] sm:$0xf0]  ;;  %v11392_v15 = vld [vmem:[%s21287_s4 + $0xc88] sm:$0xf] }
 0x67c   :  { %v5406_v46 = vadd.f32 %v5360_v54, %v5118_v12  ;;  %v12161_v35 = vor.u32 %v13969_v0, %v12160_v31  ;;  %v13965_v53 = vld [vmem:[%s21287_s4 + $0xa74] sm:$0xf0]  ;;  %v11536_v17 = vld [vmem:[%s21287_s4 + $0xda8] sm:$0xf]  ;;  %v11393_v49 = vor.u32 %v14033_v7, %v11392_v15  ;;  %v14007_v0 = vld [vmem:[%s21287_s4 + $0xbcc] sm:$0xf] }
 0x67d   :  { %7299 = vmatpush.bf16.msra.mxu2 %v12093_v48  ;;  %v5405_v26 = vadd.f32 %v5396_v22, %v5117_v14  ;;  %6374 = vmatmul.bf16.vlgmr.msra.gmra.mxu0 %v18723_v63  ;;  %v12144_v14 = vld [vmem:[%s21287_s4 + $0xa68] sm:$0xf]  ;;  %v11553_v22 = vor.u32 %v14073_v32, %v11552_v44  ;;  %v14069_v28 = vld [vmem:[%s21287_s4 + $0xdb4] sm:$0xf0]  ;;  %v12194_v15 = vld [vmem:[%s21287_s4 + $0xad8] sm:$0xf0] }
 0x67e   :  { %v18749_v48 = vadd.f32 %v18557_v20, %v5406_v46  ;;  %6470 = vmatpush.bf16.msra.mxu0 %v11441_v50  ;;  %v14037_v20 = vld [vmem:[%s21287_s4 + $0xcb4] sm:$0xf0]  ;;  %v12145_v42 = vor.u32 %v13965_v53, %v12144_v14  ;;  %v12240_v12 = vld [vmem:[%s21287_s4 + $0xb28] sm:$0xf]  ;;  %v11537_v40 = vor.u32 %v14069_v28, %v11536_v17  ;;  %v13975_v53 = vld [vmem:[%s21287_s4 + $0xacc] sm:$0xf] }
 0x67f   :  { %v5418_v3 = vadd.f32 %v18608_v57, %v5405_v26  ;;  %7359 = vmatpush.bf16.msrb.mxu3 %v12305_v34  ;;  %v11409_v61 = vor.u32 %v14037_v20, %v11408_v47  ;;  %v12257_v34 = vor.u32 %v13993_v5, %v12256_v18  ;;  %v12128_v51 = vld [vmem:[%s21287_s4 + $0xa48] sm:$0xf]  ;;  %v14029_v6 = vld [vmem:[%s21287_s4 + $0xc74] sm:$0xf0]  ;;  %v13979_v47 = vld [vmem:[%s21287_s4 + $0xaec] sm:$0xf] }
 0x680   :  { %7300 = vmatmul.bf16.vlgmr.msra.gmra.mxu2 %v18623_v16  ;;  %v11376_v4 = vld [vmem:[%s21287_s4 + $0xc68] sm:$0xf]  ;;  %v14065_v50 = vld [vmem:[%s21287_s4 + $0xd94] sm:$0xf0]  ;;  %v12210_v20 = vld [vmem:[%s21287_s4 + $0xaf8] sm:$0xf0] }
 0x681   :  { %7344 = vmatpush.bf16.msrb.mxu2 %v12209_v21  ;;  %vm5426_vm3 = vcmp.ge.f32.partialorder %v5418_v3, 0.0  ;;  %v5434_v38 = vmul.f32 0.2, %v5418_v3  ;;  %v11569_v21 = vor.u32 %v14077_v56, %v11568_v52  ;;  %v11520_v54 = vld [vmem:[%s21287_s4 + $0xd88] sm:$0xf]  ;;  %v11377_v24 = vor.u32 %v14029_v6, %v11376_v4 }
 0x682   :  { %v5378_v41 = vpop.f32.mrf.mxu2  ;;  %6471 = vmatpush.bf16.msra.mxu0 %v11425_v2  ;;  %v12224_v10 = vld [vmem:[%s21287_s4 + $0xb08] sm:$0xf]  ;;  %v13985_v11 = vld [vmem:[%s21287_s4 + $0xb14] sm:$0xf0]  ;;  %v11521_v52 = vor.u32 %v14065_v50, %v11520_v54  ;;  %v12213_v18 = vor.u32 %v13979_v47, %v12210_v20  ;;  %v14003_v5 = vld [vmem:[%s21287_s4 + $0xbac] sm:$0xf] }
 0x683   :  { %v5442_v1 = vsel %vm5426_vm3, %v5418_v3, %v5434_v38  ;;  %v5398_v45 = vadd.f32 %v5397_v55, %v5378_v41  ;;  %7360 = vmatpush.bf16.msrb.mxu3 %v12289_v60  ;;  %v12112_v13 = vld [vmem:[%s21287_s4 + $0xa28] sm:$0xf]  ;;  %v13957_v25 = vld [vmem:[%s21287_s4 + $0xa34] sm:$0xf0]  ;;  %v12338_v3 = vld [vmem:[%s21287_s4 + $0xbf8] sm:$0xf0]  ;;  %v12225_v56 = vor.u32 %v13985_v11, %v12224_v10 }
 0x684   :  { %v18764_v36 = vpack.c.bf16 %v5442_v1, %v5442_v1  ;;  %v11360_v46 = vld [vmem:[%s21287_s4 + $0xc48] sm:$0xf]  ;;  %v14025_v60 = vld [vmem:[%s21287_s4 + $0xc54] sm:$0xf0]  ;;  %v12341_v27 = vor.u32 %v14011_v9, %v12338_v3  ;;  %v13971_v6 = vld [vmem:[%s21287_s4 + $0xaac] sm:$0xf] }
 0x685   :  { %7345 = vmatpush.bf16.msrb.mxu2 %v12193_v62  ;;  %v5407_v8 = vadd.f32 %v5398_v45, %v5119_v23  ;;  %v13961_v62 = vld [vmem:[%s21287_s4 + $0xa54] sm:$0xf0]  ;;  %v11504_v29 = vld [vmem:[%s21287_s4 + $0xd68] sm:$0xf]  ;;  %v11361_v2 = vor.u32 %v14025_v60, %v11360_v46  ;;  %v12322_v23 = vld [vmem:[%s21287_s4 + $0xbd8] sm:$0xf0] }
 0x686   :  { %6387 = vmatmul.bf16.vlgmr.msrb.gmra.mxu1 %v18764_v36  ;;  %7313 = vmatmul.bf16.vlgmr.msra.gmra.mxu3 %v18660_v43  ;;  %v12129_v39 = vor.u32 %v13961_v62, %v12128_v51  ;;  %v14061_v37 = vld [vmem:[%s21287_s4 + $0xd74] sm:$0xf0]  ;;  %v12096_v31 = vld [vmem:[%s21287_s4 + $0xa08] sm:$0xf]  ;;  %v12290_v51 = vld [vmem:[%s21287_s4 + $0xb98] sm:$0xf0]  ;;  %v18923_v62 = vpop.f32.mrf.mxu3 }
 0x687   :  { %v18790_v59 = vadd.f32 %v18608_v57, %v5407_v8  ;;  %6483 = vmatpush.bf16.msrb.mxu1 %v11569_v21  ;;  %7361 = vmatpush.bf16.msrb.mxu3 %v12273_v58  ;;  %v13989_v57 = vld [vmem:[%s21287_s4 + $0xb34] sm:$0xf0]  ;;  %v11344_v55 = vld [vmem:[%s21287_s4 + $0xc28] sm:$0xf]  ;;  %v11505_v1 = vor.u32 %v14061_v37, %v11504_v29  ;;  %v12325_v58 = vor.u32 %v14007_v0, %v12322_v23  ;;  %v12306_v8 = vld [vmem:[%s21287_s4 + $0xbb8] sm:$0xf0] }
 0x688   :  { %6472 = vmatpush.bf16.msra.mxu0 %v11409_v61  ;;  %v12241_v26 = vor.u32 %v13989_v57, %v12240_v12  ;;  %v13953_v38 = vld [vmem:[%s21287_s4 + $0xa14] sm:$0xf0]  ;;  %v11488_v44 = vld [vmem:[%s21287_s4 + $0xd48] sm:$0xf]  ;;  %v12309_v17 = vor.u32 %v14003_v5, %v12306_v8  ;;  %v12197_v57 = vor.u32 %v13975_v53, %v12194_v15  ;;  %v14039_v54 = vld [vmem:[%s21287_s4 + $0xccc] sm:$0xf] }
 0x689   :  { %7346 = vmatpush.bf16.msrb.mxu2 %v12177_v33  ;;  %v12113_v33 = vor.u32 %v13957_v25, %v12112_v13  ;;  %v14021_v41 = vld [vmem:[%s21287_s4 + $0xc34] sm:$0xf0]  ;;  %v12097_v21 = vor.u32 %v13953_v38, %v12096_v31  ;;  %v11328_v61 = vld [vmem:[%s21287_s4 + $0xc08] sm:$0xf]  ;;  %v11426_v50 = vld [vmem:[%s21287_s4 + $0xcd8] sm:$0xf0] }
 0x68a   :  { %v18877_v45 = vpop.f32.mrf.mxu2  ;;  %v11345_v32 = vor.u32 %v14021_v41, %v11344_v55  ;;  %v14017_v14 = vld [vmem:[%s21287_s4 + $0xc14] sm:$0xf0]  ;;  %v11456_v11 = vld [vmem:[%s21287_s4 + $0xd08] sm:$0xf]  ;;  %v11570_v9 = vld [vmem:[%s21287_s4 + $0xdf8] sm:$0xf0]  ;;  %v11429_v60 = vor.u32 %v14039_v54, %v11426_v50 }
 0x68b   :  { %6484 = vmatpush.bf16.msrb.mxu1 %v11553_v22  ;;  %7362 = vmatpush.bf16.msrb.mxu3 %v12257_v34  ;;  %v14043_v22 = vld [vmem:[%s21287_s4 + $0xcec] sm:$0xf]  ;;  %v11442_v34 = vld [vmem:[%s21287_s4 + $0xcf8] sm:$0xf0]  ;;  %v14053_v28 = vld [vmem:[%s21287_s4 + $0xd34] sm:$0xf0]  ;;  %v11329_v12 = vor.u32 %v14017_v14, %v11328_v61 }
 0x68c   :  { %6473 = vmatpush.bf16.msra.mxu0 %v11393_v49  ;;  %v13999_v49 = vld [vmem:[%s21287_s4 + $0xb8c] sm:$0xf]  ;;  %v11445_v4 = vor.u32 %v14043_v22, %v11442_v34  ;;  %v14049_v13 = vld [vmem:[%s21287_s4 + $0xd14] sm:$0xf0]  ;;  %v12274_v46 = vld [vmem:[%s21287_s4 + $0xb78] sm:$0xf0] }
 0x68d   :  { %7347 = vmatpush.bf16.msrb.mxu2 %v12161_v35  ;;  %6426 = vmatmul.bf16.vlgmr.msrb.gmra.mxu0 %v18723_v63  ;;  %v14057_v35 = vld [vmem:[%s21287_s4 + $0xd54] sm:$0xf0]  ;;  %v12293_v10 = vor.u32 %v13999_v49, %v12290_v51  ;;  %v13995_v3 = vld [vmem:[%s21287_s4 + $0xb6c] sm:$0xf]  ;;  %v11457_v29 = vor.u32 %v14049_v13, %v11456_v11  ;;  %v11554_v0 = vld [vmem:[%s21287_s4 + $0xdd8] sm:$0xf0] }
 0x68e   :  { %v11489_v7 = vor.u32 %v14057_v35, %v11488_v44  ;;  %v12277_v31 = vor.u32 %v13995_v3, %v12274_v46  ;;  %v14071_v38 = vld [vmem:[%s21287_s4 + $0xdcc] sm:$0xf]  ;;  %v12258_v55 = vld [vmem:[%s21287_s4 + $0xb58] sm:$0xf0]  ;;  %v6416_v41 = vpop.f32.mrf.mxu3  ;;  %v12840_v54 = vld [vmem:[%s21287_s4 + $0x13e0] sm:$0xf] }
 0x68f   :  { %6485 = vmatpush.bf16.msrb.mxu1 %v11537_v40  ;;  %7363 = vmatpush.bf16.msrb.mxu3 %v12241_v26  ;;  %v12178_v40 = vld [vmem:[%s21287_s4 + $0xab8] sm:$0xf0]  ;;  %v13991_v23 = vld [vmem:[%s21287_s4 + $0xb4c] sm:$0xf]  ;;  %v11557_v35 = vor.u32 %v14071_v38, %v11554_v0  ;;  %v14268_v50 = vld [vmem:[%s21287_s4 + $0x13ec] sm:$0xf0] }
 0x690   :  { %6474 = vmatpush.bf16.msra.mxu0 %v11377_v24  ;;  %v14075_v24 = vld [vmem:[%s21287_s4 + $0xdec] sm:$0xf]  ;;  %v12181_v25 = vor.u32 %v13971_v6, %v12178_v40  ;;  %v11538_v8 = vld [vmem:[%s21287_s4 + $0xdb8] sm:$0xf0]  ;;  %v12841_v3 = vor.u32 %v14268_v50, %v12840_v54  ;;  %v14236_v38 = vld [vmem:[%s21287_s4 + $0x12ec] sm:$0xf0] }
 0x691   :  { %7348 = vmatpush.bf16.msrb.mxu2 %v12145_v42  ;;  %v11472_v42 = vld [vmem:[%s21287_s4 + $0xd28] sm:$0xf]  ;;  %v11573_v37 = vor.u32 %v14075_v24, %v11570_v9  ;;  %v13963_v20 = vld [vmem:[%s21287_s4 + $0xa6c] sm:$0xf]  ;;  %v12242_v14 = vld [vmem:[%s21287_s4 + $0xb38] sm:$0xf0] }
 0x692   :  { %v11473_v26 = vor.u32 %v14053_v28, %v11472_v42  ;;  %v13987_v61 = vld [vmem:[%s21287_s4 + $0xb2c] sm:$0xf]  ;;  %v11378_v34 = vld [vmem:[%s21287_s4 + $0xc78] sm:$0xf0]  ;;  %vm5427_vm6 = vcmp.ge.f32.partialorder %v18749_v48, 0.0  ;;  %vm5428_vm7 = vcmp.ge.f32.partialorder %v18790_v59, 0.0 }
 0x693   :  { %6486 = vmatpush.bf16.msrb.mxu1 %v11521_v52  ;;  %7364 = vmatpush.bf16.msrb.mxu3 %v12225_v56  ;;  %v13967_v52 = vld [vmem:[%s21287_s4 + $0xa8c] sm:$0xf]  ;;  %v12162_v56 = vld [vmem:[%s21287_s4 + $0xa98] sm:$0xf0]  ;;  %v12245_v42 = vor.u32 %v13987_v61, %v12242_v14  ;;  %v13916_v14 = vld [vmem:[%s21287_s4 + $0x8ec] sm:$0xf0] }
 0x694   :  { %6475 = vmatpush.bf16.msra.mxu0 %v11361_v2  ;;  %v12165_v2 = vor.u32 %v13967_v52, %v12162_v56  ;;  %v13959_v15 = vld [vmem:[%s21287_s4 + $0xa4c] sm:$0xf]  ;;  %v12226_v51 = vld [vmem:[%s21287_s4 + $0xb18] sm:$0xf0] }
 0x695   :  { %7349 = vmatpush.bf16.msrb.mxu2 %v12129_v39  ;;  %v6403_v39 = vpop.f32.mrf.mxu2  ;;  %v14027_v22 = vld [vmem:[%s21287_s4 + $0xc6c] sm:$0xf]  ;;  %v11506_v46 = vld [vmem:[%s21287_s4 + $0xd78] sm:$0xf0] }
 0x696   :  { %6439 = vmatmul.bf16.vlgmr.msra.gmra.mxu1 %v18764_v36  ;;  %7365 = vmatmul.bf16.vlgmr.msrb.gmra.mxu3 %v18660_v43  ;;  %v14063_v28 = vld [vmem:[%s21287_s4 + $0xd8c] sm:$0xf]  ;;  %v19035_v6 = vpop.f32.mrf.mxu3  ;;  %v11381_v40 = vor.u32 %v14027_v22, %v11378_v34  ;;  %v12098_v52 = vld [vmem:[%s21287_s4 + $0xa18] sm:$0xf0] }
 0x697   :  { %7409 = vmatpush.bf16.msra.mxu3 %v12341_v27  ;;  %6487 = vmatpush.bf16.msrb.mxu1 %v11505_v1  ;;  %v11410_v27 = vld [vmem:[%s21287_s4 + $0xcb8] sm:$0xf0]  ;;  %v13983_v49 = vld [vmem:[%s21287_s4 + $0xb0c] sm:$0xf] }
 0x698   :  { %6476 = vmatpush.bf16.msra.mxu0 %v11345_v32  ;;  %v12146_v1 = vld [vmem:[%s21287_s4 + $0xa78] sm:$0xf0]  ;;  %v12261_v32 = vor.u32 %v13991_v23, %v12258_v55  ;;  %v14023_v39 = vld [vmem:[%s21287_s4 + $0xc4c] sm:$0xf]  ;;  %v12229_v24 = vor.u32 %v13983_v49, %v12226_v51  ;;  %v11928_v51 = vld [vmem:[%s21287_s4 + $0x8c0] sm:$0xf] }
 0x699   :  { %7350 = vmatpush.bf16.msrb.mxu2 %v12113_v33  ;;  %v14035_v33 = vld [vmem:[%s21287_s4 + $0xcac] sm:$0xf]  ;;  %v12149_v5 = vor.u32 %v13963_v20, %v12146_v1  ;;  %v11490_v41 = vld [vmem:[%s21287_s4 + $0xd58] sm:$0xf0] }
 0x69a   :  { %v11413_v47 = vor.u32 %v14035_v33, %v11410_v27  ;;  %v14264_v33 = vld [vmem:[%s21287_s4 + $0x13cc] sm:$0xf0]  ;;  %v14019_v27 = vld [vmem:[%s21287_s4 + $0xc2c] sm:$0xf]  ;;  %v11458_v54 = vld [vmem:[%s21287_s4 + $0xd18] sm:$0xf0] }
 0x69b   :  { %7410 = vmatpush.bf16.msra.mxu3 %v12325_v58  ;;  %6488 = vmatpush.bf16.msrb.mxu1 %v11489_v7  ;;  %v11394_v58 = vld [vmem:[%s21287_s4 + $0xc98] sm:$0xf0]  ;;  %v14055_v55 = vld [vmem:[%s21287_s4 + $0xd4c] sm:$0xf] }
 0x69c   :  { %6477 = vmatpush.bf16.msra.mxu0 %v11329_v12  ;;  %v12130_v7 = vld [vmem:[%s21287_s4 + $0xa58] sm:$0xf0]  ;;  %v11493_v61 = vor.u32 %v14055_v55, %v11490_v41  ;;  %v13904_v55 = vld [vmem:[%s21287_s4 + $0x88c] sm:$0xf0] }
 0x69d   :  { %7351 = vmatpush.bf16.msrb.mxu2 %v12097_v21  ;;  %v14031_v21 = vld [vmem:[%s21287_s4 + $0xc8c] sm:$0xf]  ;;  %v18993_v44 = vpop.f32.mrf.mxu2  ;;  %v11522_v12 = vld [vmem:[%s21287_s4 + $0xd98] sm:$0xf0] }
 0x69e   :  { %v11397_v53 = vor.u32 %v14031_v21, %v11394_v58  ;;  %v11525_v13 = vor.u32 %v14063_v28, %v11522_v12  ;;  %v12808_v21 = vld [vmem:[%s21287_s4 + $0x13a0] sm:$0xf]  ;;  %v14260_v58 = vld [vmem:[%s21287_s4 + $0x13ac] sm:$0xf0] }
 0x69f   :  { %7411 = vmatpush.bf16.msra.mxu3 %v12309_v17  ;;  %6489 = vmatpush.bf16.msrb.mxu1 %v11473_v26  ;;  %v12114_v26 = vld [vmem:[%s21287_s4 + $0xa38] sm:$0xf0]  ;;  %v12680_v12 = vld [vmem:[%s21287_s4 + $0x12a0] sm:$0xf] }
 0x6a0   :  { %7352 = vmatmul.bf16.vlgmr.msrb.gmra.mxu2 %v18623_v16  ;;  %6522 = vmatpush.bf16.msrb.mxu0 %v11445_v4  ;;  %v13955_v4 = vld [vmem:[%s21287_s4 + $0xa2c] sm:$0xf] }
 0x6a1   :  { %7396 = vmatpush.bf16.msra.mxu2 %v12213_v18  ;;  %6478 = vmatmul.bf16.vlgmr.msra.gmra.mxu0 %v18723_v63  ;;  %v14067_v18 = vld [vmem:[%s21287_s4 + $0xdac] sm:$0xf]  ;;  %v12117_v9 = vor.u32 %v13955_v4, %v12114_v26  ;;  %v13912_v4 = vld [vmem:[%s21287_s4 + $0x8cc] sm:$0xf0] }
 0x6a2   :  { %v11541_v17 = vor.u32 %v14067_v18, %v11538_v8  ;;  %v12696_v18 = vld [vmem:[%s21287_s4 + $0x12c0] sm:$0xf]  ;;  %v14047_v26 = vld [vmem:[%s21287_s4 + $0xd0c] sm:$0xf] }
 0x6a3   :  { %7412 = vmatpush.bf16.msra.mxu3 %v12293_v10  ;;  %6490 = vmatpush.bf16.msrb.mxu1 %v11457_v29  ;;  %v11362_v10 = vld [vmem:[%s21287_s4 + $0xc58] sm:$0xf0]  ;;  %v12824_v29 = vld [vmem:[%s21287_s4 + $0x13c0] sm:$0xf] }
 0x6a4   :  { %6523 = vmatpush.bf16.msrb.mxu0 %v11429_v60  ;;  %v13951_v60 = vld [vmem:[%s21287_s4 + $0xa0c] sm:$0xf]  ;;  %v11365_v56 = vor.u32 %v14023_v39, %v11362_v10  ;;  %v12825_v23 = vor.u32 %v14264_v33, %v12824_v29  ;;  %v13948_v10 = vld [vmem:[%s21287_s4 + $0x9ec] sm:$0xf0]  ;;  %v12056_v33 = vld [vmem:[%s21287_s4 + $0x9c0] sm:$0xf] }
 0x6a5   :  { %7397 = vmatpush.bf16.msra.mxu2 %v12197_v57  ;;  %v12133_v57 = vor.u32 %v13959_v15, %v12130_v7  ;;  %v6455_v11 = vpop.f32.mrf.mxu2  ;;  %v12101_v0 = vor.u32 %v13951_v60, %v12098_v52  ;;  %v14051_v15 = vld [vmem:[%s21287_s4 + $0xd2c] sm:$0xf]  ;;  %v11474_v7 = vld [vmem:[%s21287_s4 + $0xd38] sm:$0xf0]  ;;  %v11912_v60 = vld [vmem:[%s21287_s4 + $0x8a0] sm:$0xf] }
 0x6a6   :  { %6491 = vmatmul.bf16.vlgmr.msrb.gmra.mxu1 %v18764_v36  ;;  %v11477_v49 = vor.u32 %v14051_v15, %v11474_v7  ;;  %v12776_v11 = vld [vmem:[%s21287_s4 + $0x1360] sm:$0xf]  ;;  %v13908_v52 = vld [vmem:[%s21287_s4 + $0x8ac] sm:$0xf0] }
 0x6a7   :  { %6535 = vmatpush.bf16.msra.mxu1 %v11573_v37  ;;  %7413 = vmatpush.bf16.msra.mxu3 %v12277_v31  ;;  %v11346_v37 = vld [vmem:[%s21287_s4 + $0xc38] sm:$0xf0]  ;;  %v12712_v31 = vld [vmem:[%s21287_s4 + $0x12e0] sm:$0xf] }
 0x6a8   :  { %6524 = vmatpush.bf16.msrb.mxu0 %v11413_v47  ;;  %v6468_v47 = vpop.f32.mrf.mxu3  ;;  %v11349_v20 = vor.u32 %v14019_v27, %v11346_v37  ;;  %v12713_v1 = vor.u32 %v14236_v38, %v12712_v31  ;;  %v13944_v37 = vld [vmem:[%s21287_s4 + $0x9cc] sm:$0xf0]  ;;  %v12760_v31 = vld [vmem:[%s21287_s4 + $0x1340] sm:$0xf]  ;;  %v11913_v38 = vor.u32 %v13908_v52, %v11912_v60  ;;  %v14262_v52 = vld [vmem:[%s21287_s4 + $0x13c4] sm:$0xf] }
 0x6a9   :  { %7398 = vmatpush.bf16.msra.mxu2 %v12181_v25  ;;  %v14059_v25 = vld [vmem:[%s21287_s4 + $0xd6c] sm:$0xf]  ;;  %v12057_v41 = vor.u32 %v13944_v37, %v12056_v33  ;;  %v12024_v7 = vld [vmem:[%s21287_s4 + $0x980] sm:$0xf]  ;;  %v13892_v33 = vld [vmem:[%s21287_s4 + $0x82c] sm:$0xf0] }
 0x6ab   :  { %6536 = vmatpush.bf16.msra.mxu1 %v11557_v35  ;;  %7414 = vmatpush.bf16.msra.mxu3 %v12261_v32  ;;  %v14015_v35 = vld [vmem:[%s21287_s4 + $0xc0c] sm:$0xf]  ;;  %v11330_v32 = vld [vmem:[%s21287_s4 + $0xc18] sm:$0xf0] }
 0x6ac   :  { %6525 = vmatpush.bf16.msrb.mxu0 %v11397_v53  ;;  %v12809_v53 = vor.u32 %v14260_v58, %v12808_v21  ;;  %v11333_v22 = vor.u32 %v14015_v35, %v11330_v32  ;;  %v13940_v58 = vld [vmem:[%s21287_s4 + $0x9ac] sm:$0xf0]  ;;  %v12744_v35 = vld [vmem:[%s21287_s4 + $0x1320] sm:$0xf] }
 0x6ad   :  { %7399 = vmatpush.bf16.msra.mxu2 %v12165_v2  ;;  %v11509_v2 = vor.u32 %v14059_v25, %v11506_v46  ;;  %v19107_v8 = vpop.f32.mrf.mxu2  ;;  %v12664_v25 = vld [vmem:[%s21287_s4 + $0x1280] sm:$0xf]  ;;  %v11461_v46 = vor.u32 %v14047_v26, %v11458_v54  ;;  %v14244_v32 = vld [vmem:[%s21287_s4 + $0x132c] sm:$0xf0]  ;;  %v5431_v54 = vmul.f32 0.2, %v18644_v30 }
 0x6ae   :  { %v12745_v15 = vor.u32 %v14244_v32, %v12744_v35  ;;  %v13896_v26 = vld [vmem:[%s21287_s4 + $0x84c] sm:$0xf0]  ;;  %v14230_v35 = vld [vmem:[%s21287_s4 + $0x12c4] sm:$0xf]  ;;  %v12698_v32 = vld [vmem:[%s21287_s4 + $0x12d0] sm:$0xf0] }
 0x6af   :  { %6537 = vmatpush.bf16.msra.mxu1 %v11541_v17  ;;  %7415 = vmatpush.bf16.msra.mxu3 %v12245_v42  ;;  %v12792_v17 = vld [vmem:[%s21287_s4 + $0x1380] sm:$0xf]  ;;  %v14256_v42 = vld [vmem:[%s21287_s4 + $0x138c] sm:$0xf0] }
 0x6b0   :  { %6526 = vmatpush.bf16.msrb.mxu0 %v11381_v40  ;;  %v12793_v40 = vor.u32 %v14256_v42, %v12792_v17  ;;  %v19149_v50 = vpop.f32.mrf.mxu3  ;;  %v12728_v17 = vld [vmem:[%s21287_s4 + $0x1300] sm:$0xf]  ;;  %v14240_v42 = vld [vmem:[%s21287_s4 + $0x130c] sm:$0xf0] }
 0x6b1   :  { %7400 = vmatpush.bf16.msra.mxu2 %v12149_v5  ;;  %v14232_v5 = vld [vmem:[%s21287_s4 + $0x12cc] sm:$0xf0] }
 0x6b2   :  { %v12697_v34 = vor.u32 %v14232_v5, %v12696_v18  ;;  %v12632_v5 = vld [vmem:[%s21287_s4 + $0x1240] sm:$0xf] }
 0x6b3   :  { %6538 = vmatpush.bf16.msra.mxu1 %v11525_v13  ;;  %7416 = vmatpush.bf16.msra.mxu3 %v12229_v24  ;;  %v14252_v13 = vld [vmem:[%s21287_s4 + $0x136c] sm:$0xf0]  ;;  %v11929_v24 = vor.u32 %v13912_v4, %v11928_v51  ;;  %v12842_v51 = vld [vmem:[%s21287_s4 + $0x13f0] sm:$0xf0] }
 0x6b4   :  { %6527 = vmatpush.bf16.msrb.mxu0 %v11365_v56  ;;  %v12777_v29 = vor.u32 %v14252_v13, %v12776_v11 }
 0x6b5   :  { %7401 = vmatpush.bf16.msra.mxu2 %v12133_v57  ;;  %v14228_v57 = vld [vmem:[%s21287_s4 + $0x12ac] sm:$0xf0] }
 0x6b6   :  { %7417 = vmatmul.bf16.vlgmr.msra.gmra.mxu3 %v18660_v43  ;;  %v11944_v43 = vld [vmem:[%s21287_s4 + $0x8e0] sm:$0xf]  ;;  %v12681_v39 = vor.u32 %v14228_v57, %v12680_v12  ;;  %v14212_v57 = vld [vmem:[%s21287_s4 + $0x122c] sm:$0xf0] }
 0x6b7   :  { %8237 = vmatpush.bf16.msrb.mxu3 %v12841_v3  ;;  %6539 = vmatpush.bf16.msra.mxu1 %v11509_v2  ;;  %v11945_v28 = vor.u32 %v13916_v14, %v11944_v43  ;;  %v6507_v3 = vpop.f32.mrf.mxu2  ;;  %v12648_v2 = vld [vmem:[%s21287_s4 + $0x1260] sm:$0xf]  ;;  %v13900_v14 = vld [vmem:[%s21287_s4 + $0x86c] sm:$0xf0] }
 0x6b8   :  { %6528 = vmatpush.bf16.msrb.mxu0 %v11349_v20  ;;  %v12040_v20 = vld [vmem:[%s21287_s4 + $0x9a0] sm:$0xf]  ;;  %v14208_v3 = vld [vmem:[%s21287_s4 + $0x120c] sm:$0xf0] }
 0x6b9   :  { %7402 = vmatpush.bf16.msra.mxu2 %v12117_v9  ;;  %v14224_v9 = vld [vmem:[%s21287_s4 + $0x128c] sm:$0xf0]  ;;  %v11880_v43 = vld [vmem:[%s21287_s4 + $0x860] sm:$0xf] }
 0x6ba   :  { %v12665_v27 = vor.u32 %v14224_v9, %v12664_v25  ;;  %v11881_v12 = vor.u32 %v13900_v14, %v11880_v43  ;;  %v13932_v25 = vld [vmem:[%s21287_s4 + $0x96c] sm:$0xf0]  ;;  %v12600_v9 = vld [vmem:[%s21287_s4 + $0x1200] sm:$0xf] }
 0x6bb   :  { %8238 = vmatpush.bf16.msrb.mxu3 %v12825_v23  ;;  %6540 = vmatpush.bf16.msra.mxu1 %v11493_v61  ;;  %v11896_v23 = vld [vmem:[%s21287_s4 + $0x880] sm:$0xf]  ;;  %v14216_v61 = vld [vmem:[%s21287_s4 + $0x124c] sm:$0xf0] }
 0x6bc   :  { %6529 = vmatpush.bf16.msrb.mxu0 %v11333_v22  ;;  %v11897_v18 = vor.u32 %v13904_v55, %v11896_v23  ;;  %v13936_v22 = vld [vmem:[%s21287_s4 + $0x98c] sm:$0xf0]  ;;  %v11976_v14 = vld [vmem:[%s21287_s4 + $0x920] sm:$0xf] }
 0x6bd   :  { %7403 = vmatpush.bf16.msra.mxu2 %v12101_v0  ;;  %v14220_v0 = vld [vmem:[%s21287_s4 + $0x126c] sm:$0xf0] }
 0x6be   :  { %v12649_v21 = vor.u32 %v14220_v0, %v12648_v2  ;;  %v11992_v2 = vld [vmem:[%s21287_s4 + $0x940] sm:$0xf]  ;;  %v13928_v0 = vld [vmem:[%s21287_s4 + $0x94c] sm:$0xf0] }
 0x6bf   :  { %8239 = vmatpush.bf16.msrb.mxu3 %v12809_v53  ;;  %6541 = vmatpush.bf16.msra.mxu1 %v11477_v49  ;;  %v12041_v53 = vor.u32 %v13940_v58, %v12040_v20  ;;  %v14266_v49 = vld [vmem:[%s21287_s4 + $0x13e4] sm:$0xf]  ;;  %v11832_v20 = vld [vmem:[%s21287_s4 + $0x800] sm:$0xf]  ;;  %v13888_v58 = vld [vmem:[%s21287_s4 + $0x80c] sm:$0xf0] }
 0x6c0   :  { %7404 = vmatmul.bf16.vlgmr.msra.gmra.mxu2 %v18623_v16  ;;  %v12072_v16 = vld [vmem:[%s21287_s4 + $0x9e0] sm:$0xf]  ;;  %7214 = vmatpush.bf16.msra.mxu0 %v11945_v28 }
 0x6c1   :  { %8224 = vmatpush.bf16.msrb.mxu2 %v12713_v1  ;;  %6530 = vmatmul.bf16.vlgmr.msrb.gmra.mxu0 %v18723_v63  ;;  %v12073_v56 = vor.u32 %v13948_v10, %v12072_v16  ;;  %v14248_v63 = vld [vmem:[%s21287_s4 + $0x134c] sm:$0xf0]  ;;  %v6520_v1 = vpop.f32.mrf.mxu3  ;;  %v12616_v28 = vld [vmem:[%s21287_s4 + $0x1220] sm:$0xf]  ;;  %v12025_v16 = vor.u32 %v13936_v22, %v12024_v7  ;;  %v12701_v7 = vor.u32 %v14230_v35, %v12698_v32  ;;  %v14254_v22 = vld [vmem:[%s21287_s4 + $0x1384] sm:$0xf] }
 0x6c2   :  { %v12761_v47 = vor.u32 %v14248_v63, %v12760_v31  ;;  %v12008_v10 = vld [vmem:[%s21287_s4 + $0x960] sm:$0xf]  ;;  %v12617_v13 = vor.u32 %v14212_v57, %v12616_v28  ;;  %v12601_v63 = vor.u32 %v14208_v3, %v12600_v9  ;;  %v12682_v28 = vld [vmem:[%s21287_s4 + $0x12b0] sm:$0xf0]  ;;  %v13910_v57 = vld [vmem:[%s21287_s4 + $0x8c4] sm:$0xf] }
 0x6c3   :  { %8240 = vmatpush.bf16.msrb.mxu3 %v12793_v40  ;;  %6542 = vmatpush.bf16.msra.mxu1 %v11461_v46  ;;  %v19247_v4 = vpop.f32.mrf.mxu2  ;;  %v11864_v40 = vld [vmem:[%s21287_s4 + $0x840] sm:$0xf]  ;;  %v12009_v37 = vor.u32 %v13932_v25, %v12008_v10  ;;  %v14250_v10 = vld [vmem:[%s21287_s4 + $0x1364] sm:$0xf]  ;;  %v12666_v9 = vld [vmem:[%s21287_s4 + $0x1290] sm:$0xf0] }
 0x6c4   :  { %7215 = vmatpush.bf16.msra.mxu0 %v11929_v24  ;;  %v12845_v24 = vor.u32 %v14266_v49, %v12842_v51  ;;  %v11865_v60 = vor.u32 %v13896_v26, %v11864_v40  ;;  %v11930_v49 = vld [vmem:[%s21287_s4 + $0x8d0] sm:$0xf0]  ;;  %v11960_v40 = vld [vmem:[%s21287_s4 + $0x900] sm:$0xf]  ;;  %v13920_v26 = vld [vmem:[%s21287_s4 + $0x90c] sm:$0xf0] }
 0x6c5   :  { %8225 = vmatpush.bf16.msrb.mxu2 %v12697_v34  ;;  %v12633_v34 = vor.u32 %v14216_v61, %v12632_v5  ;;  %v11946_v5 = vld [vmem:[%s21287_s4 + $0x8f0] sm:$0xf0]  ;;  %v14222_v25 = vld [vmem:[%s21287_s4 + $0x1284] sm:$0xf]  ;;  %v11961_v3 = vor.u32 %v13920_v26, %v11960_v40 }
 0x6c6   :  { %6543 = vmatmul.bf16.vlgmr.msra.gmra.mxu1 %v18764_v36  ;;  %v5432_v36 = vmul.f32 0.2, %v18680_v19  ;;  %v12746_v35 = vld [vmem:[%s21287_s4 + $0x1330] sm:$0xf0] }
 0x6c7   :  { %7227 = vmatpush.bf16.msrb.mxu1 %v12073_v56  ;;  %8241 = vmatpush.bf16.msrb.mxu3 %v12777_v29  ;;  %v12826_v56 = vld [vmem:[%s21287_s4 + $0x13d0] sm:$0xf0]  ;;  %v11848_v29 = vld [vmem:[%s21287_s4 + $0x820] sm:$0xf] }
 0x6c8   :  { %7216 = vmatpush.bf16.msra.mxu0 %v11913_v38  ;;  %v5440_v46 = vsel %vm5424_vm4, %v18680_v19, %v5432_v36  ;;  %v14234_v19 = vld [vmem:[%s21287_s4 + $0x12e4] sm:$0xf]  ;;  %v12829_v38 = vor.u32 %v14262_v52, %v12826_v56  ;;  %v11849_v23 = vor.u32 %v13892_v33, %v11848_v29  ;;  %v13924_v36 = vld [vmem:[%s21287_s4 + $0x92c] sm:$0xf0]  ;;  %v21481_v52 = vmov 0.0|0.0  }
 0x6c9   :  { %8226 = vmatpush.bf16.msrb.mxu2 %v12681_v39  ;;  %v12729_v39 = vor.u32 %v14240_v42, %v12728_v17  ;;  %v19260_v11 = vpop.f32.mrf.mxu3  ;;  %v19293_v31 = vpack.c.bf16 %v5440_v46, %v5440_v46  ;;  %v14226_v42 = vld [vmem:[%s21287_s4 + $0x12a4] sm:$0xf] }
 0x6ca   :  { %v13906_v46 = vld [vmem:[%s21287_s4 + $0x8a4] sm:$0xf] }
 0x6cb   :  { %7228 = vmatpush.bf16.msrb.mxu1 %v12057_v41  ;;  %8242 = vmatpush.bf16.msrb.mxu3 %v12761_v47  ;;  %v14258_v41 = vld [vmem:[%s21287_s4 + $0x13a4] sm:$0xf]  ;;  %v12810_v47 = vld [vmem:[%s21287_s4 + $0x13b0] sm:$0xf0]  ;;  %v6559_v1 = vpop.f32.mrf.mxu2 }
 0x6cc   :  { %7217 = vmatpush.bf16.msra.mxu0 %v11897_v18  ;;  %v11993_v18 = vor.u32 %v13928_v0, %v11992_v2  ;;  %v12813_v43 = vor.u32 %v14258_v41, %v12810_v47  ;;  %v13942_v33 = vld [vmem:[%s21287_s4 + $0x9c4] sm:$0xf]  ;;  %v12650_v0 = vld [vmem:[%s21287_s4 + $0x1270] sm:$0xf0] }
 0x6cd   :  { %8227 = vmatpush.bf16.msrb.mxu2 %v12665_v27  ;;  %v12714_v27 = vld [vmem:[%s21287_s4 + $0x12f0] sm:$0xf0]  ;;  %v14218_v2 = vld [vmem:[%s21287_s4 + $0x1264] sm:$0xf] }
 0x6ce   :  { %v12717_v55 = vor.u32 %v14234_v19, %v12714_v27  ;;  %v12669_v19 = vor.u32 %v14222_v25, %v12666_v9  ;;  %v12058_v27 = vld [vmem:[%s21287_s4 + $0x9d0] sm:$0xf0]  ;;  %v12653_v1 = vor.u32 %v14218_v2, %v12650_v0  ;;  %v12832_v9 = vld [vmem:[%s21287_s4 + $0x13c8] sm:$0xf] }
 0x6cf   :  { %7229 = vmatpush.bf16.msrb.mxu1 %v12041_v53  ;;  %8243 = vmatpush.bf16.msrb.mxu3 %v12745_v15  ;;  %v11833_v15 = vor.u32 %v13888_v58, %v11832_v20  ;;  %v12061_v41 = vor.u32 %v13942_v33, %v12058_v27  ;;  %v13938_v20 = vld [vmem:[%s21287_s4 + $0x9a4] sm:$0xf]  ;;  %v12816_v0 = vld [vmem:[%s21287_s4 + $0x13a8] sm:$0xf] }
 0x6d0   :  { %7218 = vmatpush.bf16.msra.mxu0 %v11881_v12  ;;  %v11977_v12 = vor.u32 %v13924_v36, %v11976_v14  ;;  %v14242_v58 = vld [vmem:[%s21287_s4 + $0x1324] sm:$0xf] }
 0x6d1   :  { %8228 = vmatpush.bf16.msrb.mxu2 %v12649_v21  ;;  %v5439_v21 = vsel %vm5423_vm5, %v18644_v30, %v5431_v54  ;;  %v13914_v30 = vld [vmem:[%s21287_s4 + $0x8e4] sm:$0xf]  ;;  %v6572_v61 = vpop.f32.mrf.mxu3  ;;  %v12749_v14 = vor.u32 %v14242_v58, %v12746_v35  ;;  %v13917_v58 = vld [vmem:[%s21287_s4 + $0x8f4] sm:$0xf0] }
 0x6d2   :  { %v19335_v53 = vpack.c.bf16 %v5439_v21, %v5439_v21  ;;  %v11949_v17 = vor.u32 %v13914_v30, %v11946_v5  ;;  %v13946_v54 = vld [vmem:[%s21287_s4 + $0x9e4] sm:$0xf]  ;;  %v12042_v21 = vld [vmem:[%s21287_s4 + $0x9b0] sm:$0xf0] }
 0x6d3   :  { %7230 = vmatpush.bf16.msrb.mxu1 %v12025_v16  ;;  %8244 = vmatpush.bf16.msrb.mxu3 %v12729_v39  ;;  %v12685_v16 = vor.u32 %v14226_v42, %v12682_v28  ;;  %v12074_v39 = vld [vmem:[%s21287_s4 + $0x9f0] sm:$0xf0]  ;;  %v13898_v5 = vld [vmem:[%s21287_s4 + $0x864] sm:$0xf] }
 0x6d4   :  { %7219 = vmatpush.bf16.msra.mxu0 %v11865_v60  ;;  %v11914_v60 = vld [vmem:[%s21287_s4 + $0x8b0] sm:$0xf0]  ;;  %v12077_v56 = vor.u32 %v13946_v54, %v12074_v39  ;;  %v13934_v36 = vld [vmem:[%s21287_s4 + $0x984] sm:$0xf] }
 0x6d5   :  { %8229 = vmatpush.bf16.msrb.mxu2 %v12633_v34  ;;  %v12794_v34 = vld [vmem:[%s21287_s4 + $0x1390] sm:$0xf0]  ;;  %v13930_v54 = vld [vmem:[%s21287_s4 + $0x964] sm:$0xf] }
 0x6d6   :  { %8245 = vmatmul.bf16.vlgmr.msrb.gmra.mxu3 %v19293_v31  ;;  %v12797_v51 = vor.u32 %v14254_v22, %v12794_v34  ;;  %v12634_v30 = vld [vmem:[%s21287_s4 + $0x1250] sm:$0xf0]  ;;  %v14238_v22 = vld [vmem:[%s21287_s4 + $0x1304] sm:$0xf] }
 0x6d7   :  { %8289 = vmatpush.bf16.msra.mxu3 %v12845_v24  ;;  %7231 = vmatpush.bf16.msrb.mxu1 %v12009_v37  ;;  %v11933_v24 = vor.u32 %v13910_v57, %v11930_v49  ;;  %v14246_v37 = vld [vmem:[%s21287_s4 + $0x1344] sm:$0xf]  ;;  %v11882_v61 = vld [vmem:[%s21287_s4 + $0x870] sm:$0xf0]  ;;  %v14269_v57 = vld [vmem:[%s21287_s4 + $0x13f4] sm:$0xf0] }
 0x6d8   :  { %7220 = vmatpush.bf16.msra.mxu0 %v11849_v23  ;;  %v13902_v23 = vld [vmem:[%s21287_s4 + $0x884] sm:$0xf]  ;;  %v12730_v34 = vld [vmem:[%s21287_s4 + $0x1310] sm:$0xf0]  ;;  %v11885_v42 = vor.u32 %v13898_v5, %v11882_v61  ;;  %v12800_v61 = vld [vmem:[%s21287_s4 + $0x1388] sm:$0xf] }
 0x6d9   :  { %8230 = vmatpush.bf16.msrb.mxu2 %v12617_v13  ;;  %v12778_v13 = vld [vmem:[%s21287_s4 + $0x1370] sm:$0xf0]  ;;  %v13894_v49 = vld [vmem:[%s21287_s4 + $0x844] sm:$0xf]  ;;  %v12733_v26 = vor.u32 %v14238_v22, %v12730_v34  ;;  %v11936_v22 = vld [vmem:[%s21287_s4 + $0x8c8] sm:$0xf] }
 0x6da   :  { %v12781_v29 = vor.u32 %v14250_v10, %v12778_v13  ;;  %v12618_v28 = vld [vmem:[%s21287_s4 + $0x1230] sm:$0xf0]  ;;  %v14206_v13 = vld [vmem:[%s21287_s4 + $0x1204] sm:$0xf]  ;;  %v13913_v34 = vld [vmem:[%s21287_s4 + $0x8d4] sm:$0xf0] }
 0x6db   :  { %8290 = vmatpush.bf16.msra.mxu3 %v12829_v38  ;;  %7232 = vmatpush.bf16.msrb.mxu1 %v11993_v18  ;;  %v11917_v38 = vor.u32 %v13906_v46, %v11914_v60  ;;  %v14214_v18 = vld [vmem:[%s21287_s4 + $0x1244] sm:$0xf]  ;;  %v12010_v10 = vld [vmem:[%s21287_s4 + $0x970] sm:$0xf0] }
 0x6dc   :  { %7221 = vmatpush.bf16.msra.mxu0 %v11833_v15  ;;  %v12026_v15 = vld [vmem:[%s21287_s4 + $0x990] sm:$0xf0]  ;;  %v13890_v46 = vld [vmem:[%s21287_s4 + $0x824] sm:$0xf]  ;;  %v12013_v33 = vor.u32 %v13930_v54, %v12010_v10  ;;  %v11937_v54 = vor.u32 %v13913_v34, %v11936_v22  ;;  %v12624_v22 = vld [vmem:[%s21287_s4 + $0x1228] sm:$0xf] }
 0x6dd   :  { %8231 = vmatpush.bf16.msrb.mxu2 %v12601_v63  ;;  %v12762_v63 = vld [vmem:[%s21287_s4 + $0x1350] sm:$0xf0]  ;;  %v12029_v40 = vor.u32 %v13934_v36, %v12026_v15  ;;  %v12688_v36 = vld [vmem:[%s21287_s4 + $0x12a8] sm:$0xf]  ;;  %v14229_v15 = vld [vmem:[%s21287_s4 + $0x12b4] sm:$0xf0] }
 0x6de   :  { %v12765_v47 = vor.u32 %v14246_v37, %v12762_v63  ;;  %v11850_v60 = vld [vmem:[%s21287_s4 + $0x830] sm:$0xf0]  ;;  %v13926_v37 = vld [vmem:[%s21287_s4 + $0x944] sm:$0xf] }
 0x6df   :  { %8291 = vmatpush.bf16.msra.mxu3 %v12813_v43  ;;  %7233 = vmatpush.bf16.msrb.mxu1 %v11977_v12  ;;  %v12045_v43 = vor.u32 %v13938_v20, %v12042_v21  ;;  %v12848_v12 = vld [vmem:[%s21287_s4 + $0x13e8] sm:$0xf]  ;;  %v11994_v63 = vld [vmem:[%s21287_s4 + $0x950] sm:$0xf0]  ;;  %v14233_v20 = vld [vmem:[%s21287_s4 + $0x12d4] sm:$0xf0] }
 0x6e0   :  { %8232 = vmatmul.bf16.vlgmr.msrb.gmra.mxu2 %v19335_v53  ;;  %7266 = vmatpush.bf16.msrb.mxu0 %v11949_v17  ;;  %v14210_v17 = vld [vmem:[%s21287_s4 + $0x1224] sm:$0xf]  ;;  %v12849_v39 = vor.u32 %v14269_v57, %v12848_v12  ;;  %v11952_v21 = vld [vmem:[%s21287_s4 + $0x8e8] sm:$0xf]  ;;  %v11962_v12 = vld [vmem:[%s21287_s4 + $0x910] sm:$0xf0] }
 0x6e1   :  { %8276 = vmatpush.bf16.msra.mxu2 %v12717_v55  ;;  %7222 = vmatmul.bf16.vlgmr.msra.gmra.mxu0 %v21481_v52  ;;  %v11898_v55 = vld [vmem:[%s21287_s4 + $0x890] sm:$0xf0]  ;;  %v12080_v57 = vld [vmem:[%s21287_s4 + $0x9e8] sm:$0xf] }
 0x6e2   :  { %v11901_v32 = vor.u32 %v13902_v23, %v11898_v55  ;;  %v14261_v23 = vld [vmem:[%s21287_s4 + $0x13b4] sm:$0xf0]  ;;  %v13886_v55 = vld [vmem:[%s21287_s4 + $0x804] sm:$0xf] }
 0x6e3   :  { %8292 = vmatpush.bf16.msra.mxu3 %v12797_v51  ;;  %7234 = vmatpush.bf16.msrb.mxu1 %v11961_v3  ;;  %v11866_v51 = vld [vmem:[%s21287_s4 + $0x850] sm:$0xf0]  ;;  %v14265_v3 = vld [vmem:[%s21287_s4 + $0x13d4] sm:$0xf0]  ;;  %v12817_v35 = vor.u32 %v14261_v23, %v12816_v0 }
 0x6e4   :  { %7267 = vmatpush.bf16.msrb.mxu0 %v11933_v24  ;;  %v12602_v24 = vld [vmem:[%s21287_s4 + $0x1210] sm:$0xf0]  ;;  %v11869_v25 = vor.u32 %v13894_v49, %v11866_v51  ;;  %v12833_v27 = vor.u32 %v14265_v3, %v12832_v9  ;;  %v12689_v49 = vor.u32 %v14229_v15, %v12688_v36  ;;  %v13949_v51 = vld [vmem:[%s21287_s4 + $0x9f4] sm:$0xf0]  ;;  %v12064_v3 = vld [vmem:[%s21287_s4 + $0x9c8] sm:$0xf] }
 0x6e5   :  { %8277 = vmatpush.bf16.msra.mxu2 %v12701_v7  ;;  %v12637_v7 = vor.u32 %v14214_v18, %v12634_v30  ;;  %v11978_v18 = vld [vmem:[%s21287_s4 + $0x930] sm:$0xf0]  ;;  %v12736_v15 = vld [vmem:[%s21287_s4 + $0x1308] sm:$0xf] }
 0x6e6   :  { %7235 = vmatmul.bf16.vlgmr.msrb.gmra.mxu1 %v21481_v52 }
 0x6e7   :  { %7279 = vmatpush.bf16.msra.mxu1 %v12077_v56  ;;  %8293 = vmatpush.bf16.msra.mxu3 %v12781_v29  ;;  %v12720_v56 = vld [vmem:[%s21287_s4 + $0x12e8] sm:$0xf]  ;;  %v14237_v29 = vld [vmem:[%s21287_s4 + $0x12f4] sm:$0xf0] }
 0x6e8   :  { %7268 = vmatpush.bf16.msrb.mxu0 %v11917_v38  ;;  %v11853_v38 = vor.u32 %v13890_v46, %v11850_v60  ;;  %v12721_v2 = vor.u32 %v14237_v29, %v12720_v56  ;;  %v13945_v60 = vld [vmem:[%s21287_s4 + $0x9d4] sm:$0xf0]  ;;  %v12768_v56 = vld [vmem:[%s21287_s4 + $0x1348] sm:$0xf] }
 0x6e9   :  { %8278 = vmatpush.bf16.msra.mxu2 %v12685_v16  ;;  %v12621_v16 = vor.u32 %v14210_v17, %v12618_v28  ;;  %v13918_v28 = vld [vmem:[%s21287_s4 + $0x904] sm:$0xf]  ;;  %v14249_v29 = vld [vmem:[%s21287_s4 + $0x1354] sm:$0xf0]  ;;  %v12065_v0 = vor.u32 %v13945_v60, %v12064_v3 }
 0x6ea   :  { %v11965_v10 = vor.u32 %v13918_v28, %v11962_v12  ;;  %v12769_v23 = vor.u32 %v14249_v29, %v12768_v56  ;;  %v14213_v28 = vld [vmem:[%s21287_s4 + $0x1234] sm:$0xf0]  ;;  %v14267_v12 = vld [vmem:[%s21287_s4 + $0x13ec] sm:$0xf]  ;;  %v12834_v29 = vld [vmem:[%s21287_s4 + $0x13d8] sm:$0xf0] }
 0x6eb   :  { %7280 = vmatpush.bf16.msra.mxu1 %v12061_v41  ;;  %8294 = vmatpush.bf16.msra.mxu3 %v12765_v47  ;;  %v11834_v41 = vld [vmem:[%s21287_s4 + $0x810] sm:$0xf0]  ;;  %v12704_v47 = vld [vmem:[%s21287_s4 + $0x12c8] sm:$0xf]  ;;  %v14209_v3 = vld [vmem:[%s21287_s4 + $0x1214] sm:$0xf0] }
 0x6ec   :  { %7269 = vmatpush.bf16.msrb.mxu0 %v11901_v32  ;;  %v13922_v32 = vld [vmem:[%s21287_s4 + $0x924] sm:$0xf]  ;;  %v11837_v30 = vor.u32 %v13886_v55, %v11834_v41  ;;  %v12705_v5 = vor.u32 %v14233_v20, %v12704_v47  ;;  %v12048_v55 = vld [vmem:[%s21287_s4 + $0x9a8] sm:$0xf]  ;;  %v13941_v47 = vld [vmem:[%s21287_s4 + $0x9b4] sm:$0xf0] }
 0x6ed   :  { %8279 = vmatpush.bf16.msra.mxu2 %v12669_v19  ;;  %v12605_v19 = vor.u32 %v14206_v13, %v12602_v24  ;;  %v11920_v13 = vld [vmem:[%s21287_s4 + $0x8a8] sm:$0xf]  ;;  %v13909_v24 = vld [vmem:[%s21287_s4 + $0x8b4] sm:$0xf0]  ;;  %v14263_v56 = vld [vmem:[%s21287_s4 + $0x13cc] sm:$0xf] }
 0x6ee   :  { %v12752_v20 = vld [vmem:[%s21287_s4 + $0x1328] sm:$0xf] }
 0x6ef   :  { %7281 = vmatpush.bf16.msra.mxu1 %v12045_v43  ;;  %8295 = vmatpush.bf16.msra.mxu3 %v12749_v14  ;;  %v14257_v43 = vld [vmem:[%s21287_s4 + $0x1394] sm:$0xf0]  ;;  %v11953_v14 = vor.u32 %v13917_v58, %v11952_v21 }
 0x6f0   :  { %7270 = vmatpush.bf16.msrb.mxu0 %v11885_v42  ;;  %v12801_v42 = vor.u32 %v14257_v43, %v12800_v61  ;;  %v12032_v43 = vld [vmem:[%s21287_s4 + $0x988] sm:$0xf] }
 0x6f1   :  { %8280 = vmatpush.bf16.msra.mxu2 %v12653_v1  ;;  %v11997_v1 = vor.u32 %v13926_v37, %v11994_v63  ;;  %v19552_v17 = vpop.f32.mrf.mxu2  ;;  %v14221_v37 = vld [vmem:[%s21287_s4 + $0x1274] sm:$0xf0]  ;;  %v11904_v63 = vld [vmem:[%s21287_s4 + $0x888] sm:$0xf] }
 0x6f3   :  { %7282 = vmatpush.bf16.msra.mxu1 %v12029_v40  ;;  %8296 = vmatpush.bf16.msra.mxu3 %v12733_v26  ;;  %v12784_v40 = vld [vmem:[%s21287_s4 + $0x1368] sm:$0xf]  ;;  %v14253_v26 = vld [vmem:[%s21287_s4 + $0x1374] sm:$0xf0] }
 0x6f4   :  { %7271 = vmatpush.bf16.msrb.mxu0 %v11869_v25  ;;  %v12081_v25 = vor.u32 %v13949_v51, %v12080_v57  ;;  %v12785_v9 = vor.u32 %v14253_v26, %v12784_v40  ;;  %v12850_v57 = vld [vmem:[%s21287_s4 + $0x13f8] sm:$0xf0]  ;;  %v13897_v51 = vld [vmem:[%s21287_s4 + $0x854] sm:$0xf0] }
 0x6f5   :  { %8281 = vmatpush.bf16.msra.mxu2 %v12637_v7  ;;  %v11981_v7 = vor.u32 %v13922_v32, %v11978_v18  ;;  %v14217_v32 = vld [vmem:[%s21287_s4 + $0x1254] sm:$0xf0]  ;;  %v11888_v18 = vld [vmem:[%s21287_s4 + $0x868] sm:$0xf] }
 0x6f6   :  { %8297 = vmatmul.bf16.vlgmr.msra.gmra.mxu3 %v19293_v31 }
 0x6f7   :  { %8341 = vmatpush.bf16.msrb.mxu3 %v12849_v39  ;;  %7283 = vmatpush.bf16.msra.mxu1 %v12013_v33  ;;  %v14225_v39 = vld [vmem:[%s21287_s4 + $0x1294] sm:$0xf0] }
 0x6f8   :  { %7272 = vmatpush.bf16.msrb.mxu0 %v11853_v38  ;;  %v13905_v38 = vld [vmem:[%s21287_s4 + $0x894] sm:$0xf0] }
 0x6f9   :  { %8282 = vmatpush.bf16.msra.mxu2 %v12621_v16  ;;  %v12672_v16 = vld [vmem:[%s21287_s4 + $0x1288] sm:$0xf]  ;;  %v19597_v33 = vpop.f32.mrf.mxu3  ;;  %v11905_v58 = vor.u32 %v13905_v38, %v11904_v63  ;;  %v12722_v63 = vld [vmem:[%s21287_s4 + $0x12f8] sm:$0xf0] }
 0x6fa   :  { %v12673_v46 = vor.u32 %v14225_v39, %v12672_v16  ;;  %v6375_v21 = vpop.f32.mrf.mxu0  ;;  %v12016_v16 = vld [vmem:[%s21287_s4 + $0x968] sm:$0xf] }
 0x6fb   :  { %8342 = vmatpush.bf16.msrb.mxu3 %v12833_v27  ;;  %7284 = vmatpush.bf16.msra.mxu1 %v11997_v1  ;;  %v12656_v27 = vld [vmem:[%s21287_s4 + $0x1268] sm:$0xf]  ;;  %v14245_v1 = vld [vmem:[%s21287_s4 + $0x1334] sm:$0xf0] }
 0x6fc   :  { %7273 = vmatpush.bf16.msrb.mxu0 %v11837_v30  ;;  %v12657_v41 = vor.u32 %v14221_v37, %v12656_v27  ;;  %v13901_v30 = vld [vmem:[%s21287_s4 + $0x874] sm:$0xf0]  ;;  %v12753_v61 = vor.u32 %v14245_v1, %v12752_v20  ;;  %v14235_v37 = vld [vmem:[%s21287_s4 + $0x12ec] sm:$0xf] }
 0x6fd   :  { %8283 = vmatpush.bf16.msra.mxu2 %v12605_v19  ;;  %v11921_v19 = vor.u32 %v13909_v24, %v11920_v13  ;;  %v12625_v13 = vor.u32 %v14213_v28, %v12624_v22  ;;  %v12853_v24 = vor.u32 %v14267_v12, %v12850_v57  ;;  %v13893_v27 = vld [vmem:[%s21287_s4 + $0x834] sm:$0xf0]  ;;  %v12725_v20 = vor.u32 %v14235_v37, %v12722_v63  ;;  %v14259_v1 = vld [vmem:[%s21287_s4 + $0x13ac] sm:$0xf]  ;;  %v12802_v12 = vld [vmem:[%s21287_s4 + $0x1398] sm:$0xf0] }
 0x6fe   :  { %v14255_v28 = vld [vmem:[%s21287_s4 + $0x138c] sm:$0xf] }
 0x6ff   :  { %8343 = vmatpush.bf16.msrb.mxu3 %v12817_v35  ;;  %7285 = vmatpush.bf16.msra.mxu1 %v11981_v7  ;;  %v12640_v35 = vld [vmem:[%s21287_s4 + $0x1248] sm:$0xf]  ;;  %v14241_v7 = vld [vmem:[%s21287_s4 + $0x1314] sm:$0xf0] }
 0x700   :  { %8284 = vmatmul.bf16.vlgmr.msra.gmra.mxu2 %v19335_v53  ;;  %7318 = vmatpush.bf16.msra.mxu0 %v11953_v14  ;;  %v13937_v14 = vld [vmem:[%s21287_s4 + $0x994] sm:$0xf0]  ;;  %v12641_v36 = vor.u32 %v14217_v32, %v12640_v35  ;;  %v14231_v32 = vld [vmem:[%s21287_s4 + $0x12cc] sm:$0xf] }
 0x701   :  { %8328 = vmatpush.bf16.msrb.mxu2 %v12721_v2  ;;  %7274 = vmatmul.bf16.vlgmr.msrb.gmra.mxu0 %v21481_v52  ;;  %v7251_v2 = vpop.f32.mrf.mxu2  ;;  %v7264_v34 = vpop.f32.mrf.mxu3  ;;  %v12033_v26 = vor.u32 %v13937_v14, %v12032_v43  ;;  %v13889_v35 = vld [vmem:[%s21287_s4 + $0x814] sm:$0xf0]  ;;  %v11954_v43 = vld [vmem:[%s21287_s4 + $0x8f8] sm:$0xf0] }
 0x703   :  { %8344 = vmatpush.bf16.msrb.mxu3 %v12801_v42  ;;  %7286 = vmatpush.bf16.msra.mxu1 %v11965_v10  ;;  %v11889_v42 = vor.u32 %v13901_v30, %v11888_v18  ;;  %v6388_v40 = vpop.f32.mrf.mxu1  ;;  %v12706_v18 = vld [vmem:[%s21287_s4 + $0x12d8] sm:$0xf0] }
 0x704   :  { %7319 = vmatpush.bf16.msra.mxu0 %v11937_v54  ;;  %v12737_v54 = vor.u32 %v14241_v7, %v12736_v15  ;;  %v19669_v39 = vadd.f32 %v6388_v40, %v6375_v21  ;;  %v12818_v21 = vld [vmem:[%s21287_s4 + $0x13b8] sm:$0xf0]  ;;  %v11984_v15 = vld [vmem:[%s21287_s4 + $0x928] sm:$0xf]  ;;  %v13925_v7 = vld [vmem:[%s21287_s4 + $0x934] sm:$0xf0] }
 0x705   :  { %8329 = vmatpush.bf16.msrb.mxu2 %v12705_v5  ;;  %v12049_v5 = vor.u32 %v13941_v47, %v12048_v55  ;;  %v13929_v55 = vld [vmem:[%s21287_s4 + $0x954] sm:$0xf0]  ;;  %v11985_v40 = vor.u32 %v13925_v7, %v11984_v15 }
 0x706   :  { %7287 = vmatmul.bf16.vlgmr.msra.gmra.mxu1 %v21481_v52 }
 0x707   :  { %7331 = vmatpush.bf16.msrb.mxu1 %v12081_v25  ;;  %8345 = vmatpush.bf16.msrb.mxu3 %v12785_v9  ;;  %v13933_v25 = vld [vmem:[%s21287_s4 + $0x974] sm:$0xf0]  ;;  %v12608_v9 = vld [vmem:[%s21287_s4 + $0x1208] sm:$0xf] }
 0x708   :  { %7320 = vmatpush.bf16.msra.mxu0 %v11921_v19  ;;  %v11856_v19 = vld [vmem:[%s21287_s4 + $0x828] sm:$0xf]  ;;  %v12017_v38 = vor.u32 %v13933_v25, %v12016_v16  ;;  %v12609_v2 = vor.u32 %v14209_v3, %v12608_v9  ;;  %v12805_v16 = vor.u32 %v14255_v28, %v12802_v12  ;;  %v13947_v25 = vld [vmem:[%s21287_s4 + $0x9ec] sm:$0xf] }
 0x709   :  { %8330 = vmatpush.bf16.msrb.mxu2 %v12689_v49  ;;  %v11872_v49 = vld [vmem:[%s21287_s4 + $0x848] sm:$0xf]  ;;  %v19671_v10 = vpop.f32.mrf.mxu2  ;;  %v11857_v47 = vor.u32 %v13893_v27, %v11856_v19  ;;  %v14223_v19 = vld [vmem:[%s21287_s4 + $0x128c] sm:$0xf]  ;;  %v12674_v27 = vld [vmem:[%s21287_s4 + $0x1298] sm:$0xf0] }
 0x70a   :  { %v11873_v60 = vor.u32 %v13897_v51, %v11872_v49  ;;  %v14227_v49 = vld [vmem:[%s21287_s4 + $0x12ac] sm:$0xf]  ;;  %v12690_v51 = vld [vmem:[%s21287_s4 + $0x12b8] sm:$0xf0] }
 0x70b   :  { %7332 = vmatpush.bf16.msrb.mxu1 %v12065_v0  ;;  %8346 = vmatpush.bf16.msrb.mxu3 %v12769_v23  ;;  %v12837_v0 = vor.u32 %v14263_v56, %v12834_v29  ;;  %v12000_v23 = vld [vmem:[%s21287_s4 + $0x948] sm:$0xf]  ;;  %v6390_v30 = vpop.f32.mrf.mxu1  ;;  %v12693_v3 = vor.u32 %v14227_v49, %v12690_v51  ;;  %v12786_v56 = vld [vmem:[%s21287_s4 + $0x1378] sm:$0xf0]  ;;  %v14215_v12 = vld [vmem:[%s21287_s4 + $0x124c] sm:$0xf] }
 0x70c   :  { %7321 = vmatpush.bf16.msra.mxu0 %v11905_v58  ;;  %v11840_v58 = vld [vmem:[%s21287_s4 + $0x808] sm:$0xf]  ;;  %v12658_v30 = vld [vmem:[%s21287_s4 + $0x1278] sm:$0xf0]  ;;  %v13899_v51 = vld [vmem:[%s21287_s4 + $0x86c] sm:$0xf] }
 0x70d   :  { %8331 = vmatpush.bf16.msrb.mxu2 %v12673_v46  ;;  %v6377_v46 = vpop.f32.mrf.mxu0  ;;  %v11841_v34 = vor.u32 %v13889_v35, %v11840_v58  ;;  %v14247_v58 = vld [vmem:[%s21287_s4 + $0x134c] sm:$0xf]  ;;  %v12770_v35 = vld [vmem:[%s21287_s4 + $0x1358] sm:$0xf0] }
 0x70e   :  { %v12082_v46 = vld [vmem:[%s21287_s4 + $0x9f8] sm:$0xf0] }
 0x70f   :  { %7333 = vmatpush.bf16.msrb.mxu1 %v12049_v5  ;;  %8347 = vmatpush.bf16.msrb.mxu3 %v12753_v61  ;;  %v12001_v5 = vor.u32 %v13929_v55, %v12000_v23  ;;  %v13915_v61 = vld [vmem:[%s21287_s4 + $0x8ec] sm:$0xf]  ;;  %v12085_v23 = vor.u32 %v13947_v25, %v12082_v46  ;;  %v12034_v25 = vld [vmem:[%s21287_s4 + $0x998] sm:$0xf0] }
 0x710   :  { %7322 = vmatpush.bf16.msra.mxu0 %v11889_v42  ;;  %v12709_v42 = vor.u32 %v14231_v32, %v12706_v18  ;;  %v11957_v57 = vor.u32 %v13915_v61, %v11954_v43  ;;  %v14219_v18 = vld [vmem:[%s21287_s4 + $0x126c] sm:$0xf]  ;;  %v11906_v61 = vld [vmem:[%s21287_s4 + $0x898] sm:$0xf0] }
 0x711   :  { %8332 = vmatpush.bf16.msrb.mxu2 %v12657_v41  ;;  %v19706_v41 = vpop.f32.mrf.mxu3  ;;  %v7303_v14 = vpop.f32.mrf.mxu2  ;;  %v12661_v7 = vor.u32 %v14219_v18, %v12658_v30 }
 0x712   :  { %v12773_v14 = vor.u32 %v14247_v58, %v12770_v35  ;;  %v13891_v58 = vld [vmem:[%s21287_s4 + $0x82c] sm:$0xf]  ;;  %v11858_v35 = vld [vmem:[%s21287_s4 + $0x838] sm:$0xf0] }
 0x713   :  { %7334 = vmatpush.bf16.msrb.mxu1 %v12033_v26  ;;  %8348 = vmatpush.bf16.msrb.mxu3 %v12737_v54  ;;  %v13911_v26 = vld [vmem:[%s21287_s4 + $0x8cc] sm:$0xf]  ;;  %v11938_v54 = vld [vmem:[%s21287_s4 + $0x8d8] sm:$0xf0]  ;;  %v6440_v37 = vpop.f32.mrf.mxu1 }
 0x714   :  { %7323 = vmatpush.bf16.msra.mxu0 %v11873_v60  ;;  %v14251_v60 = vld [vmem:[%s21287_s4 + $0x136c] sm:$0xf]  ;;  %v11941_v29 = vor.u32 %v13911_v26, %v11938_v54 }
 0x715   :  { %8333 = vmatpush.bf16.msrb.mxu2 %v12641_v36  ;;  %v12821_v36 = vor.u32 %v14259_v1, %v12818_v21  ;;  %v6427_v22 = vpop.f32.mrf.mxu0  ;;  %v12789_v55 = vor.u32 %v14251_v60, %v12786_v56  ;;  %v12677_v1 = vor.u32 %v14223_v19, %v12674_v27  ;;  %v12066_v21 = vld [vmem:[%s21287_s4 + $0x9d8] sm:$0xf0]  ;;  %v14211_v56 = vld [vmem:[%s21287_s4 + $0x122c] sm:$0xf] }
 0x716   :  { %8349 = vmatmul.bf16.vlgmr.msrb.gmra.mxu3 %v19293_v31  ;;  %v13895_v19 = vld [vmem:[%s21287_s4 + $0x84c] sm:$0xf]  ;;  %v11874_v27 = vld [vmem:[%s21287_s4 + $0x858] sm:$0xf0] }
 0x717   :  { %8393 = vmatpush.bf16.msra.mxu3 %v12853_v24  ;;  %7335 = vmatpush.bf16.msrb.mxu1 %v12017_v38  ;;  %v13921_v24 = vld [vmem:[%s21287_s4 + $0x914] sm:$0xf0]  ;;  %v13907_v38 = vld [vmem:[%s21287_s4 + $0x8ac] sm:$0xf] }
 0x718   :  { %7324 = vmatpush.bf16.msra.mxu0 %v11857_v47  ;;  %v13943_v47 = vld [vmem:[%s21287_s4 + $0x9cc] sm:$0xf] }
 0x719   :  { %8334 = vmatpush.bf16.msrb.mxu2 %v12625_v13  ;;  %v11968_v13 = vld [vmem:[%s21287_s4 + $0x908] sm:$0xf]  ;;  %v7316_v9 = vpop.f32.mrf.mxu3  ;;  %v12069_v43 = vor.u32 %v13943_v47, %v12066_v21  ;;  %v11877_v47 = vor.u32 %v13895_v19, %v11874_v27  ;;  %v14200_v19 = vld [vmem:[%s21287_s4 + $0x11cc] sm:$0xf0] }
 0x71a   :  { %v11969_v63 = vor.u32 %v13921_v24, %v11968_v13  ;;  %v14239_v9 = vld [vmem:[%s21287_s4 + $0x130c] sm:$0xf] }
 0x71b   :  { %8394 = vmatpush.bf16.msra.mxu3 %v12837_v0  ;;  %7336 = vmatpush.bf16.msrb.mxu1 %v12001_v5  ;;  %v19788_v0 = vadd.f32 %v6440_v37, %v6427_v22  ;;  %v13903_v5 = vld [vmem:[%s21287_s4 + $0x88c] sm:$0xf]  ;;  %v12050_v22 = vld [vmem:[%s21287_s4 + $0x9b8] sm:$0xf0]  ;;  %v6442_v49 = vpop.f32.mrf.mxu1 }
 0x71c   :  { %7325 = vmatpush.bf16.msra.mxu0 %v11841_v34  ;;  %v14243_v34 = vld [vmem:[%s21287_s4 + $0x132c] sm:$0xf]  ;;  %v11909_v28 = vor.u32 %v13903_v5, %v11906_v61 }
 0x71d   :  { %8335 = vmatpush.bf16.msrb.mxu2 %v12609_v2  ;;  %v11922_v2 = vld [vmem:[%s21287_s4 + $0x8b8] sm:$0xf0]  ;;  %v13927_v61 = vld [vmem:[%s21287_s4 + $0x94c] sm:$0xf] }
 0x71e   :  { %v11925_v32 = vor.u32 %v13907_v38, %v11922_v2 }
 0x71f   :  { %8395 = vmatpush.bf16.msra.mxu3 %v12821_v36  ;;  %7337 = vmatpush.bf16.msrb.mxu1 %v11985_v40  ;;  %v13939_v36 = vld [vmem:[%s21287_s4 + $0x9ac] sm:$0xf]  ;;  %v11890_v40 = vld [vmem:[%s21287_s4 + $0x878] sm:$0xf0] }
 0x720   :  { %8336 = vmatmul.bf16.vlgmr.msrb.gmra.mxu2 %v19335_v53  ;;  %7370 = vmatpush.bf16.msrb.mxu0 %v11957_v57  ;;  %v12642_v57 = vld [vmem:[%s21287_s4 + $0x1258] sm:$0xf0]  ;;  %v12053_v26 = vor.u32 %v13939_v36, %v12050_v22  ;;  %v11893_v60 = vor.u32 %v13899_v51, %v11890_v40  ;;  %v11861_v36 = vor.u32 %v13891_v58, %v11858_v35  ;;  %v12536_v35 = vld [vmem:[%s21287_s4 + $0x1180] sm:$0xf] }
 0x721   :  { %8380 = vmatpush.bf16.msra.mxu2 %v12725_v20  ;;  %7326 = vmatmul.bf16.vlgmr.msra.gmra.mxu0 %v21481_v52  ;;  %v6429_v20 = vpop.f32.mrf.mxu0  ;;  %v19818_v15 = vpop.f32.mrf.mxu3  ;;  %v12645_v24 = vor.u32 %v14215_v12, %v12642_v57  ;;  %v11842_v22 = vld [vmem:[%s21287_s4 + $0x818] sm:$0xf0] }
 0x722   :  { %v14207_v20 = vld [vmem:[%s21287_s4 + $0x120c] sm:$0xf]  ;;  %v11986_v12 = vld [vmem:[%s21287_s4 + $0x938] sm:$0xf0] }
 0x723   :  { %8396 = vmatpush.bf16.msra.mxu3 %v12805_v16  ;;  %7338 = vmatpush.bf16.msrb.mxu1 %v11969_v63  ;;  %v13935_v16 = vld [vmem:[%s21287_s4 + $0x98c] sm:$0xf]  ;;  %v19854_v46 = vpop.f32.mrf.mxu2  ;;  %v6492_v21 = vpop.f32.mrf.mxu1 }
 0x724   :  { %7371 = vmatpush.bf16.msrb.mxu0 %v11941_v29  ;;  %v12626_v29 = vld [vmem:[%s21287_s4 + $0x1238] sm:$0xf0]  ;;  %v12037_v37 = vor.u32 %v13935_v16, %v12034_v25  ;;  %v13919_v16 = vld [vmem:[%s21287_s4 + $0x90c] sm:$0xf] }
 0x725   :  { %8381 = vmatpush.bf16.msra.mxu2 %v12709_v42  ;;  %v12754_v42 = vld [vmem:[%s21287_s4 + $0x1338] sm:$0xf0]  ;;  %v12629_v2 = vor.u32 %v14211_v56, %v12626_v29  ;;  %v12568_v29 = vld [vmem:[%s21287_s4 + $0x11c0] sm:$0xf] }
 0x726   :  { %7339 = vmatmul.bf16.vlgmr.msrb.gmra.mxu1 %v21481_v52  ;;  %v12757_v54 = vor.u32 %v14243_v34, %v12754_v42  ;;  %v12456_v42 = vld [vmem:[%s21287_s4 + $0x10e0] sm:$0xf] }
 0x727   :  { %7383 = vmatpush.bf16.msra.mxu1 %v12085_v23  ;;  %8397 = vmatpush.bf16.msra.mxu3 %v12789_v55  ;;  %v13931_v23 = vld [vmem:[%s21287_s4 + $0x96c] sm:$0xf]  ;;  %v12018_v55 = vld [vmem:[%s21287_s4 + $0x978] sm:$0xf0] }
 0x728   :  { %7372 = vmatpush.bf16.msrb.mxu0 %v11925_v32  ;;  %v12021_v18 = vor.u32 %v13931_v23, %v12018_v55  ;;  %v12552_v23 = vld [vmem:[%s21287_s4 + $0x11a0] sm:$0xf]  ;;  %v14196_v55 = vld [vmem:[%s21287_s4 + $0x11ac] sm:$0xf0] }
 0x729   :  { %8382 = vmatpush.bf16.msra.mxu2 %v12693_v3  ;;  %v6479_v13 = vpop.f32.mrf.mxu0  ;;  %v12738_v3 = vld [vmem:[%s21287_s4 + $0x1318] sm:$0xf0]  ;;  %v7368_v38 = vpop.f32.mrf.mxu3 }
 0x72a   :  { %v12741_v63 = vor.u32 %v14239_v9, %v12738_v3  ;;  %v19886_v32 = vadd.f32 %v6492_v21, %v6479_v13  ;;  %v11970_v13 = vld [vmem:[%s21287_s4 + $0x918] sm:$0xf0]  ;;  %v12424_v3 = vld [vmem:[%s21287_s4 + $0x10a0] sm:$0xf]  ;;  %v12569_v38 = vor.u32 %v14200_v19, %v12568_v29  ;;  %v12553_v21 = vor.u32 %v14196_v55, %v12552_v23  ;;  %v14202_v23 = vld [vmem:[%s21287_s4 + $0x11e4] sm:$0xf] }
 0x72b   :  { %7384 = vmatpush.bf16.msra.mxu1 %v12069_v43  ;;  %8398 = vmatpush.bf16.msra.mxu3 %v12773_v14  ;;  %v12002_v43 = vld [vmem:[%s21287_s4 + $0x958] sm:$0xf0]  ;;  %v7355_v14 = vpop.f32.mrf.mxu2  ;;  %v6494_v49 = vpop.f32.mrf.mxu1  ;;  %v11973_v9 = vor.u32 %v13919_v16, %v11970_v13  ;;  %v12344_v16 = vld [vmem:[%s21287_s4 + $0x1000] sm:$0xf]  ;;  %v14144_v13 = vld [vmem:[%s21287_s4 + $0x100c] sm:$0xf0] }
 0x72c   :  { %7373 = vmatpush.bf16.msrb.mxu0 %v11909_v28  ;;  %v12005_v34 = vor.u32 %v13927_v61, %v12002_v43  ;;  %v14172_v28 = vld [vmem:[%s21287_s4 + $0x10ec] sm:$0xf0]  ;;  %v12376_v61 = vld [vmem:[%s21287_s4 + $0x1040] sm:$0xf]  ;;  %v12586_v55 = vld [vmem:[%s21287_s4 + $0x11f0] sm:$0xf0] }
 0x72d   :  { %8383 = vmatpush.bf16.msra.mxu2 %v12677_v1  ;;  %v12610_v1 = vld [vmem:[%s21287_s4 + $0x1218] sm:$0xf0]  ;;  %v12457_v51 = vor.u32 %v14172_v28, %v12456_v42  ;;  %v14152_v43 = vld [vmem:[%s21287_s4 + $0x104c] sm:$0xf0]  ;;  %v12360_v28 = vld [vmem:[%s21287_s4 + $0x1020] sm:$0xf] }
 0x72e   :  { %v12613_v5 = vor.u32 %v14207_v20, %v12610_v1  ;;  %v12392_v20 = vld [vmem:[%s21287_s4 + $0x1060] sm:$0xf]  ;;  %v14156_v1 = vld [vmem:[%s21287_s4 + $0x106c] sm:$0xf0] }
 0x72f   :  { %7385 = vmatpush.bf16.msra.mxu1 %v12053_v26  ;;  %8399 = vmatpush.bf16.msra.mxu3 %v12757_v54  ;;  %v12440_v26 = vld [vmem:[%s21287_s4 + $0x10c0] sm:$0xf]  ;;  %v14168_v54 = vld [vmem:[%s21287_s4 + $0x10cc] sm:$0xf0] }
 0x730   :  { %7374 = vmatpush.bf16.msrb.mxu0 %v11893_v60  ;;  %v12441_v25 = vor.u32 %v14168_v54, %v12440_v26  ;;  %v14164_v60 = vld [vmem:[%s21287_s4 + $0x10ac] sm:$0xf0] }
 0x731   :  { %8384 = vmatpush.bf16.msra.mxu2 %v12661_v7  ;;  %v6481_v30 = vpop.f32.mrf.mxu0  ;;  %v13887_v7 = vld [vmem:[%s21287_s4 + $0x80c] sm:$0xf]  ;;  %v12425_v27 = vor.u32 %v14164_v60, %v12424_v3  ;;  %v14180_v3 = vld [vmem:[%s21287_s4 + $0x112c] sm:$0xf0]  ;;  %v12345_v60 = vor.u32 %v14144_v13, %v12344_v16  ;;  %v14150_v16 = vld [vmem:[%s21287_s4 + $0x1044] sm:$0xf] }
 0x732   :  { %v11845_v57 = vor.u32 %v13887_v7, %v11842_v22  ;;  %v12520_v7 = vld [vmem:[%s21287_s4 + $0x1160] sm:$0xf]  ;;  %v14188_v22 = vld [vmem:[%s21287_s4 + $0x116c] sm:$0xf0] }
 0x733   :  { %7386 = vmatpush.bf16.msra.mxu1 %v12037_v37  ;;  %8400 = vmatpush.bf16.msra.mxu3 %v12741_v63  ;;  %v12408_v37 = vld [vmem:[%s21287_s4 + $0x1080] sm:$0xf]  ;;  %v14160_v63 = vld [vmem:[%s21287_s4 + $0x108c] sm:$0xf0] }
 0x734   :  { %7375 = vmatpush.bf16.msrb.mxu0 %v11877_v47  ;;  %v12409_v47 = vor.u32 %v14160_v63, %v12408_v37  ;;  %v12442_v37 = vld [vmem:[%s21287_s4 + $0x10d0] sm:$0xf0]  ;;  %v12472_v63 = vld [vmem:[%s21287_s4 + $0x1100] sm:$0xf] }
 0x735   :  { %8385 = vmatpush.bf16.msra.mxu2 %v12645_v24  ;;  %v14204_v24 = vld [vmem:[%s21287_s4 + $0x11ec] sm:$0xf0] }
 0x736   :  { %8401 = vmatmul.bf16.vlgmr.msra.gmra.mxu3 %v19293_v31  ;;  %v13923_v31 = vld [vmem:[%s21287_s4 + $0x92c] sm:$0xf] }
 0x737   :  { %7387 = vmatpush.bf16.msra.mxu1 %v12021_v18  ;;  %v11989_v40 = vor.u32 %v13923_v31, %v11986_v12  ;;  %v14192_v18 = vld [vmem:[%s21287_s4 + $0x118c] sm:$0xf0] }
 0x738   :  { %7376 = vmatpush.bf16.msrb.mxu0 %v11861_v36  ;;  %v12537_v14 = vor.u32 %v14192_v18, %v12536_v35  ;;  %v14148_v31 = vld [vmem:[%s21287_s4 + $0x102c] sm:$0xf0]  ;;  %v14198_v35 = vld [vmem:[%s21287_s4 + $0x11c4] sm:$0xf]  ;;  %v12570_v18 = vld [vmem:[%s21287_s4 + $0x11d0] sm:$0xf0] }
 0x739   :  { %8386 = vmatpush.bf16.msra.mxu2 %v12629_v2  ;;  %v19951_v2 = vpop.f32.mrf.mxu3  ;;  %v12361_v54 = vor.u32 %v14148_v31, %v12360_v28 }
 0x73b   :  { %7388 = vmatpush.bf16.msra.mxu1 %v12005_v34  ;;  %v12377_v34 = vor.u32 %v14152_v43, %v12376_v61  ;;  %v14158_v61 = vld [vmem:[%s21287_s4 + $0x1084] sm:$0xf]  ;;  %v12410_v43 = vld [vmem:[%s21287_s4 + $0x1090] sm:$0xf0] }
 0x73c   :  { %7377 = vmatpush.bf16.msrb.mxu0 %v11845_v57  ;;  %v12521_v57 = vor.u32 %v14188_v22, %v12520_v7  ;;  %v14194_v22 = vld [vmem:[%s21287_s4 + $0x11a4] sm:$0xf] }
 0x73d   :  { %8387 = vmatpush.bf16.msra.mxu2 %v12613_v5  ;;  %v12393_v5 = vor.u32 %v14156_v1, %v12392_v20  ;;  %v14162_v1 = vld [vmem:[%s21287_s4 + $0x10a4] sm:$0xf] }
 0x73e   :  { %v6531_v58 = vpop.f32.mrf.mxu0 }
 0x73f   :  { %7389 = vmatpush.bf16.msra.mxu1 %v11989_v40  ;;  %7378 = vmatmul.bf16.vlgmr.msrb.gmra.mxu0 %v21481_v52  ;;  %v14184_v40 = vld [vmem:[%s21287_s4 + $0x114c] sm:$0xf0] }
 0x740   :  { %8388 = vmatmul.bf16.vlgmr.msra.gmra.mxu2 %v19335_v53  ;;  %v12584_v53 = vld [vmem:[%s21287_s4 + $0x11e0] sm:$0xf]  ;;  %8198 = vmatpush.bf16.msra.mxu0 %v12457_v51 }
 0x741   :  { %v12585_v56 = vor.u32 %v14204_v24, %v12584_v53  ;;  %v7420_v36 = vpop.f32.mrf.mxu3  ;;  %v12504_v51 = vld [vmem:[%s21287_s4 + $0x1140] sm:$0xf]  ;;  %v14170_v24 = vld [vmem:[%s21287_s4 + $0x10e4] sm:$0xf] }
 0x742   :  { %v12505_v53 = vor.u32 %v14184_v40, %v12504_v51  ;;  %v12573_v36 = vor.u32 %v14198_v35, %v12570_v18  ;;  %v12538_v51 = vld [vmem:[%s21287_s4 + $0x1190] sm:$0xf0] }
 0x743   :  { %7390 = vmatpush.bf16.msra.mxu1 %v11973_v9  ;;  %v19972_v30 = vpop.f32.mrf.mxu2  ;;  %v6544_v42 = vpop.f32.mrf.mxu1  ;;  %v12488_v9 = vld [vmem:[%s21287_s4 + $0x1120] sm:$0xf]  ;;  %v12490_v35 = vld [vmem:[%s21287_s4 + $0x1130] sm:$0xf0] }
 0x744   :  { %8199 = vmatpush.bf16.msra.mxu0 %v12441_v25  ;;  %v19992_v12 = vadd.f32 %v6544_v42, %v6531_v58  ;;  %v12458_v25 = vld [vmem:[%s21287_s4 + $0x10f0] sm:$0xf0]  ;;  %v12489_v19 = vor.u32 %v14180_v3, %v12488_v9  ;;  %v12589_v58 = vor.u32 %v14202_v23, %v12586_v55  ;;  %v12413_v42 = vor.u32 %v14158_v61, %v12410_v43  ;;  %v14142_v55 = vld [vmem:[%s21287_s4 + $0x1004] sm:$0xf] }
 0x745   :  { %v12461_v29 = vor.u32 %v14170_v24, %v12458_v25  ;;  %v14186_v24 = vld [vmem:[%s21287_s4 + $0x1164] sm:$0xf]  ;;  %v12522_v25 = vld [vmem:[%s21287_s4 + $0x1170] sm:$0xf0] }
 0x746   :  { %7391 = vmatmul.bf16.vlgmr.msra.gmra.mxu1 %v21481_v52  ;;  %v6533_v49 = vpop.f32.mrf.mxu0 }
 0x747   :  { %8211 = vmatpush.bf16.msrb.mxu1 %v12585_v56  ;;  %v14190_v49 = vld [vmem:[%s21287_s4 + $0x1184] sm:$0xf] }
 0x748   :  { %8200 = vmatpush.bf16.msra.mxu0 %v12425_v27  ;;  %v14166_v27 = vld [vmem:[%s21287_s4 + $0x10c4] sm:$0xf]  ;;  %v12541_v13 = vor.u32 %v14190_v49, %v12538_v51  ;;  %v12576_v51 = vld [vmem:[%s21287_s4 + $0x11c8] sm:$0xf] }
 0x74b   :  { %8212 = vmatpush.bf16.msrb.mxu1 %v12569_v38  ;;  %v7407_v26 = vpop.f32.mrf.mxu2  ;;  %v6546_v56 = vpop.f32.mrf.mxu1  ;;  %v14176_v38 = vld [vmem:[%s21287_s4 + $0x110c] sm:$0xf0] }
 0x74c   :  { %8201 = vmatpush.bf16.msra.mxu0 %v12409_v47  ;;  %v12445_v47 = vor.u32 %v14166_v27, %v12442_v37  ;;  %v12473_v20 = vor.u32 %v14176_v38, %v12472_v63  ;;  %v12362_v56 = vld [vmem:[%s21287_s4 + $0x1030] sm:$0xf0]  ;;  %v14182_v27 = vld [vmem:[%s21287_s4 + $0x1144] sm:$0xf] }
 0x74d   :  { %v12506_v37 = vld [vmem:[%s21287_s4 + $0x1150] sm:$0xf0] }
 0x74f   :  { %8213 = vmatpush.bf16.msrb.mxu1 %v12553_v21  ;;  %v12426_v21 = vld [vmem:[%s21287_s4 + $0x10b0] sm:$0xf0] }
 0x750   :  { %8202 = vmatpush.bf16.msra.mxu0 %v12393_v5  ;;  %v12429_v5 = vor.u32 %v14162_v1, %v12426_v21  ;;  %v12464_v1 = vld [vmem:[%s21287_s4 + $0x10e8] sm:$0xf]  ;;  %v14173_v21 = vld [vmem:[%s21287_s4 + $0x10f4] sm:$0xf0] }
 0x753   :  { %8214 = vmatpush.bf16.msrb.mxu1 %v12537_v14  ;;  %v6402_v14 = vadd.f32 %v18877_v45, %v19669_v39  ;;  %v14154_v45 = vld [vmem:[%s21287_s4 + $0x1064] sm:$0xf]  ;;  %v12394_v39 = vld [vmem:[%s21287_s4 + $0x1070] sm:$0xf0] }
 0x754   :  { %8203 = vmatpush.bf16.msra.mxu0 %v12377_v34  ;;  %v12554_v34 = vld [vmem:[%s21287_s4 + $0x11b0] sm:$0xf0] }
 0x755   :  { %v6415_v28 = vadd.f32 %v18923_v62, %v6402_v14  ;;  %v12557_v31 = vor.u32 %v14194_v22, %v12554_v34  ;;  %v12378_v62 = vld [vmem:[%s21287_s4 + $0x1050] sm:$0xf0]  ;;  %v12448_v14 = vld [vmem:[%s21287_s4 + $0x10c8] sm:$0xf]  ;;  %v14174_v22 = vld [vmem:[%s21287_s4 + $0x1104] sm:$0xf] }
 0x756   :  { %v12381_v9 = vor.u32 %v14150_v16, %v12378_v62  ;;  %v12474_v34 = vld [vmem:[%s21287_s4 + $0x1110] sm:$0xf0]  ;;  %v12416_v16 = vld [vmem:[%s21287_s4 + $0x1088] sm:$0xf]  ;;  %v14161_v62 = vld [vmem:[%s21287_s4 + $0x1094] sm:$0xf0] }
 0x757   :  { %8215 = vmatpush.bf16.msrb.mxu1 %v12521_v57 }
 0x758   :  { %8204 = vmatpush.bf16.msra.mxu0 %v12361_v54  ;;  %v12397_v54 = vor.u32 %v14154_v45, %v12394_v39  ;;  %v14205_v45 = vld [vmem:[%s21287_s4 + $0x11f4] sm:$0xf0] }
 0x759   :  { %v20057_v7 = vpop.f32.mrf.mxu3 }
 0x75b   :  { %8216 = vmatpush.bf16.msrb.mxu1 %v12505_v53 }
 0x75c   :  { %8205 = vmatpush.bf16.msra.mxu0 %v12345_v60  ;;  %v14146_v60 = vld [vmem:[%s21287_s4 + $0x1024] sm:$0xf] }
 0x75d   :  { %v12365_v23 = vor.u32 %v14146_v60, %v12362_v56 }
 0x75e   :  { %v7223_v57 = vpop.f32.mrf.mxu0 }
 0x75f   :  { %8217 = vmatpush.bf16.msrb.mxu1 %v12489_v19  ;;  %8206 = vmatmul.bf16.vlgmr.msra.gmra.mxu0 %v21481_v52  ;;  %v7224_v40 = vadd.f32 %v7223_v57, %v6415_v28  ;;  %v12525_v19 = vor.u32 %v14186_v24, %v12522_v25  ;;  %v12477_v28 = vor.u32 %v14174_v22, %v12474_v34  ;;  %v14165_v57 = vld [vmem:[%s21287_s4 + $0x10b4] sm:$0xf0]  ;;  %v12560_v25 = vld [vmem:[%s21287_s4 + $0x11a8] sm:$0xf] }
 0x760   :  { %8250 = vmatpush.bf16.msrb.mxu0 %v12461_v29 }
 0x761   :  { %v8248_v53 = vpop.f32.mrf.mxu3 }
 0x763   :  { %8218 = vmatpush.bf16.msrb.mxu1 %v12473_v20  ;;  %v20079_v26 = vpop.f32.mrf.mxu2  ;;  %v7236_v3 = vpop.f32.mrf.mxu1  ;;  %v12509_v20 = vor.u32 %v14182_v27, %v12506_v37  ;;  %v12544_v27 = vld [vmem:[%s21287_s4 + $0x1188] sm:$0xf]  ;;  %v14193_v37 = vld [vmem:[%s21287_s4 + $0x1194] sm:$0xf0] }
 0x764   :  { %8251 = vmatpush.bf16.msrb.mxu0 %v12445_v47  ;;  %v20099_v29 = vadd.f32 %v7236_v3, %v7224_v40  ;;  %v12346_v47 = vld [vmem:[%s21287_s4 + $0x1010] sm:$0xf0]  ;;  %v14201_v40 = vld [vmem:[%s21287_s4 + $0x11d4] sm:$0xf0]  ;;  %v12417_v3 = vor.u32 %v14161_v62, %v12416_v16  ;;  %v12496_v16 = vld [vmem:[%s21287_s4 + $0x1128] sm:$0xf] }
 0x765   :  { %v12349_v18 = vor.u32 %v14142_v55, %v12346_v47  ;;  %v12577_v53 = vor.u32 %v14201_v40, %v12576_v51  ;;  %v12384_v55 = vld [vmem:[%s21287_s4 + $0x1048] sm:$0xf]  ;;  %v12545_v47 = vor.u32 %v14193_v37, %v12544_v27  ;;  %v13352_v51 = vld [vmem:[%s21287_s4 + $0x17e0] sm:$0xf]  ;;  %v14396_v62 = vld [vmem:[%s21287_s4 + $0x17ec] sm:$0xf0] }
 0x766   :  { %8219 = vmatmul.bf16.vlgmr.msrb.gmra.mxu1 %v21481_v52  ;;  %v7225_v63 = vpop.f32.mrf.mxu0  ;;  %v12480_v37 = vld [vmem:[%s21287_s4 + $0x1108] sm:$0xf] }
 0x767   :  { %8263 = vmatpush.bf16.msra.mxu1 %v12589_v58  ;;  %v14178_v58 = vld [vmem:[%s21287_s4 + $0x1124] sm:$0xf] }
 0x768   :  { %8252 = vmatpush.bf16.msrb.mxu0 %v12429_v5  ;;  %v12465_v5 = vor.u32 %v14173_v21, %v12464_v1  ;;  %v12493_v43 = vor.u32 %v14178_v58, %v12490_v35  ;;  %v12528_v1 = vld [vmem:[%s21287_s4 + $0x1168] sm:$0xf]  ;;  %v14189_v21 = vld [vmem:[%s21287_s4 + $0x1174] sm:$0xf0] }
 0x76b   :  { %8264 = vmatpush.bf16.msra.mxu1 %v12573_v36  ;;  %v8235_v38 = vpop.f32.mrf.mxu2  ;;  %v7238_v61 = vpop.f32.mrf.mxu1  ;;  %v14169_v36 = vld [vmem:[%s21287_s4 + $0x10d4] sm:$0xf0] }
 0x76c   :  { %8253 = vmatpush.bf16.msrb.mxu0 %v12413_v42  ;;  %v12592_v42 = vld [vmem:[%s21287_s4 + $0x11e8] sm:$0xf]  ;;  %v12449_v39 = vor.u32 %v14169_v36, %v12448_v14  ;;  %v14185_v36 = vld [vmem:[%s21287_s4 + $0x1154] sm:$0xf0] }
 0x76d   :  { %v12593_v49 = vor.u32 %v14205_v45, %v12592_v42  ;;  %v12512_v14 = vld [vmem:[%s21287_s4 + $0x1148] sm:$0xf] }
 0x76e   :  { %v12352_v45 = vld [vmem:[%s21287_s4 + $0x1008] sm:$0xf]  ;;  %v12513_v40 = vor.u32 %v14185_v36, %v12512_v14  ;;  %v13320_v14 = vld [vmem:[%s21287_s4 + $0x17a0] sm:$0xf]  ;;  %v14388_v36 = vld [vmem:[%s21287_s4 + $0x17ac] sm:$0xf0] }
 0x76f   :  { %8265 = vmatpush.bf16.msra.mxu1 %v12557_v31  ;;  %v12432_v31 = vld [vmem:[%s21287_s4 + $0x10a8] sm:$0xf] }
 0x770   :  { %8254 = vmatpush.bf16.msrb.mxu0 %v12397_v54  ;;  %v12433_v54 = vor.u32 %v14165_v57, %v12432_v31  ;;  %v14145_v31 = vld [vmem:[%s21287_s4 + $0x1014] sm:$0xf0]  ;;  %v14171_v57 = vld [vmem:[%s21287_s4 + $0x10ec] sm:$0xf] }
 0x773   :  { %8266 = vmatpush.bf16.msra.mxu1 %v12541_v13  ;;  %v6454_v13 = vadd.f32 %v18993_v44, %v19788_v0  ;;  %v12400_v44 = vld [vmem:[%s21287_s4 + $0x1068] sm:$0xf]  ;;  %v14157_v0 = vld [vmem:[%s21287_s4 + $0x1074] sm:$0xf0] }
 0x774   :  { %8255 = vmatpush.bf16.msrb.mxu0 %v12381_v9  ;;  %v14197_v9 = vld [vmem:[%s21287_s4 + $0x11b4] sm:$0xf0] }
 0x775   :  { %v6467_v60 = vadd.f32 %v19035_v6, %v6454_v13  ;;  %v12561_v56 = vor.u32 %v14197_v9, %v12560_v25  ;;  %v14153_v6 = vld [vmem:[%s21287_s4 + $0x1054] sm:$0xf0]  ;;  %v13208_v25 = vld [vmem:[%s21287_s4 + $0x16c0] sm:$0xf]  ;;  %v14360_v9 = vld [vmem:[%s21287_s4 + $0x16cc] sm:$0xf0] }
 0x776   :  { %v12385_v58 = vor.u32 %v14153_v6, %v12384_v55  ;;  %v14181_v13 = vld [vmem:[%s21287_s4 + $0x1134] sm:$0xf0] }
 0x777   :  { %8267 = vmatpush.bf16.msra.mxu1 %v12525_v19  ;;  %v12497_v27 = vor.u32 %v14181_v13, %v12496_v16  ;;  %v14177_v55 = vld [vmem:[%s21287_s4 + $0x1114] sm:$0xf0]  ;;  %v14384_v13 = vld [vmem:[%s21287_s4 + $0x178c] sm:$0xf0] }
 0x778   :  { %8256 = vmatpush.bf16.msrb.mxu0 %v12365_v23  ;;  %v12401_v23 = vor.u32 %v14157_v0, %v12400_v44  ;;  %v13209_v44 = vor.u32 %v14360_v9, %v13208_v25  ;;  %v12562_v25 = vld [vmem:[%s21287_s4 + $0x11b8] sm:$0xf0] }
 0x779   :  { %v20164_v24 = vpop.f32.mrf.mxu3 }
 0x77b   :  { %8268 = vmatpush.bf16.msra.mxu1 %v12509_v20 }
 0x77c   :  { %8257 = vmatpush.bf16.msrb.mxu0 %v12349_v18  ;;  %v12368_v18 = vld [vmem:[%s21287_s4 + $0x1028] sm:$0xf] }
 0x77e   :  { %v7275_v19 = vpop.f32.mrf.mxu0 }
 0x77f   :  { %8269 = vmatpush.bf16.msra.mxu1 %v12493_v43  ;;  %8258 = vmatmul.bf16.vlgmr.msrb.gmra.mxu0 %v21481_v52  ;;  %v7276_v63 = vadd.f32 %v7275_v19, %v6467_v60  ;;  %v12529_v43 = vor.u32 %v14189_v21, %v12528_v1  ;;  %v14167_v60 = vld [vmem:[%s21287_s4 + $0x10cc] sm:$0xf]  ;;  %v12594_v21 = vld [vmem:[%s21287_s4 + $0x11f8] sm:$0xf0] }
 0x780   :  { %8302 = vmatpush.bf16.msra.mxu0 %v12465_v5  ;;  %v14149_v5 = vld [vmem:[%s21287_s4 + $0x1034] sm:$0xf0]  ;;  %v14203_v1 = vld [vmem:[%s21287_s4 + $0x11ec] sm:$0xf] }
 0x781   :  { %v8300_v20 = vpop.f32.mrf.mxu3  ;;  %v12369_v42 = vor.u32 %v14149_v5, %v12368_v18  ;;  %v14163_v18 = vld [vmem:[%s21287_s4 + $0x10ac] sm:$0xf]  ;;  %v12481_v5 = vor.u32 %v14177_v55, %v12480_v37  ;;  %v12546_v55 = vld [vmem:[%s21287_s4 + $0x1198] sm:$0xf0] }
 0x782   :  { %v14356_v20 = vld [vmem:[%s21287_s4 + $0x16ac] sm:$0xf0]  ;;  %v14191_v37 = vld [vmem:[%s21287_s4 + $0x118c] sm:$0xf] }
 0x783   :  { %8270 = vmatpush.bf16.msra.mxu1 %v12477_v28  ;;  %v20186_v38 = vpop.f32.mrf.mxu2  ;;  %v7288_v35 = vpop.f32.mrf.mxu1  ;;  %v14364_v28 = vld [vmem:[%s21287_s4 + $0x16ec] sm:$0xf0] }
 0x784   :  { %8303 = vmatpush.bf16.msra.mxu0 %v12449_v39  ;;  %v20206_v61 = vadd.f32 %v7288_v35, %v7276_v63  ;;  %v13224_v39 = vld [vmem:[%s21287_s4 + $0x16e0] sm:$0xf] }
 0x785   :  { %v13336_v63 = vld [vmem:[%s21287_s4 + $0x17c0] sm:$0xf] }
 0x786   :  { %8271 = vmatmul.bf16.vlgmr.msra.gmra.mxu1 %v21481_v52  ;;  %v7277_v22 = vpop.f32.mrf.mxu0 }
 0x787   :  { %8315 = vmatpush.bf16.msrb.mxu1 %v12593_v49  ;;  %v13225_v49 = vor.u32 %v14364_v28, %v13224_v39  ;;  %v12597_v22 = vor.u32 %v14203_v1, %v12594_v21  ;;  %v13176_v39 = vld [vmem:[%s21287_s4 + $0x1680] sm:$0xf]  ;;  %v14352_v28 = vld [vmem:[%s21287_s4 + $0x168c] sm:$0xf0] }
 0x788   :  { %8304 = vmatpush.bf16.msra.mxu0 %v12433_v54  ;;  %v12466_v54 = vld [vmem:[%s21287_s4 + $0x10f8] sm:$0xf0] }
 0x789   :  { %9212 = vmatpush.bf16.msrb.mxu2 %v13225_v49  ;;  %v12469_v0 = vor.u32 %v14171_v57, %v12466_v54  ;;  %v13177_v57 = vor.u32 %v14352_v28, %v13176_v39  ;;  %v14159_v49 = vld [vmem:[%s21287_s4 + $0x108c] sm:$0xf]  ;;  %v6506_v54 = vadd.f32 %v19107_v8, %v19886_v32  ;;  %v13160_v8 = vld [vmem:[%s21287_s4 + $0x1660] sm:$0xf]  ;;  %v14348_v32 = vld [vmem:[%s21287_s4 + $0x166c] sm:$0xf0] }
 0x78a   :  { %v14147_v28 = vld [vmem:[%s21287_s4 + $0x102c] sm:$0xf] }
 0x78b   :  { %8316 = vmatpush.bf16.msrb.mxu1 %v12577_v53  ;;  %v8287_v34 = vpop.f32.mrf.mxu2  ;;  %v13353_v53 = vor.u32 %v14396_v62, %v13352_v51  ;;  %v7290_v19 = vpop.f32.mrf.mxu1  ;;  %v12418_v51 = vld [vmem:[%s21287_s4 + $0x1098] sm:$0xf0]  ;;  %v14195_v62 = vld [vmem:[%s21287_s4 + $0x11ac] sm:$0xf] }
 0x78c   :  { %8305 = vmatpush.bf16.msra.mxu0 %v12417_v3  ;;  %v12353_v3 = vor.u32 %v14145_v31, %v12352_v45  ;;  %v14199_v34 = vld [vmem:[%s21287_s4 + $0x11cc] sm:$0xf]  ;;  %v12578_v45 = vld [vmem:[%s21287_s4 + $0x11d8] sm:$0xf0]  ;;  %v6519_v19 = vadd.f32 %v19149_v50, %v6506_v54  ;;  %v13144_v50 = vld [vmem:[%s21287_s4 + $0x1640] sm:$0xf] }
 0x78d   :  { %9225 = vmatpush.bf16.msrb.mxu3 %v13353_v53  ;;  %9213 = vmatpush.bf16.msrb.mxu2 %v13209_v44  ;;  %v12581_v16 = vor.u32 %v14199_v34, %v12578_v45  ;;  %v13161_v44 = vor.u32 %v14348_v32, %v13160_v8  ;;  %v14187_v34 = vld [vmem:[%s21287_s4 + $0x116c] sm:$0xf]  ;;  %v13128_v54 = vld [vmem:[%s21287_s4 + $0x1620] sm:$0xf] }
 0x78e   :  { %v12968_v32 = vld [vmem:[%s21287_s4 + $0x14e0] sm:$0xf] }
 0x78f   :  { %8317 = vmatpush.bf16.msrb.mxu1 %v12561_v56  ;;  %v12450_v56 = vld [vmem:[%s21287_s4 + $0x10d8] sm:$0xf0] }
 0x790   :  { %8306 = vmatpush.bf16.msra.mxu0 %v12401_v23  ;;  %v14392_v23 = vld [vmem:[%s21287_s4 + $0x17cc] sm:$0xf0]  ;;  %v12453_v35 = vor.u32 %v14167_v60, %v12450_v56  ;;  %v12402_v60 = vld [vmem:[%s21287_s4 + $0x1078] sm:$0xf0]  ;;  %v13288_v56 = vld [vmem:[%s21287_s4 + $0x1760] sm:$0xf] }
 0x791   :  { %v13337_v6 = vor.u32 %v14392_v23, %v13336_v63  ;;  %v14380_v63 = vld [vmem:[%s21287_s4 + $0x176c] sm:$0xf0] }
 0x793   :  { %8318 = vmatpush.bf16.msrb.mxu1 %v12545_v47  ;;  %v13192_v47 = vld [vmem:[%s21287_s4 + $0x16a0] sm:$0xf]  ;;  %9226 = vmatpush.bf16.msrb.mxu3 %v13337_v6  ;;  %v13289_v6 = vor.u32 %v14380_v63, %v13288_v56  ;;  %v14179_v63 = vld [vmem:[%s21287_s4 + $0x112c] sm:$0xf] }
 0x794   :  { %8307 = vmatpush.bf16.msra.mxu0 %v12385_v58  ;;  %v13193_v58 = vor.u32 %v14356_v20, %v13192_v47  ;;  %v14344_v47 = vld [vmem:[%s21287_s4 + $0x164c] sm:$0xf0] }
 0x796   :  { %9214 = vmatpush.bf16.msrb.mxu2 %v13193_v58  ;;  %v14151_v58 = vld [vmem:[%s21287_s4 + $0x104c] sm:$0xf] }
 0x797   :  { %8319 = vmatpush.bf16.msrb.mxu1 %v12529_v43  ;;  %v12434_v43 = vld [vmem:[%s21287_s4 + $0x10b8] sm:$0xf0] }
 0x798   :  { %8308 = vmatpush.bf16.msra.mxu0 %v12369_v42  ;;  %v13321_v42 = vor.u32 %v14388_v36, %v13320_v14  ;;  %v12437_v31 = vor.u32 %v14163_v18, %v12434_v43  ;;  %v12386_v18 = vld [vmem:[%s21287_s4 + $0x1058] sm:$0xf0]  ;;  %v14376_v43 = vld [vmem:[%s21287_s4 + $0x174c] sm:$0xf0]  ;;  %v12549_v14 = vor.u32 %v14191_v37, %v12546_v55  ;;  %v14362_v55 = vld [vmem:[%s21287_s4 + $0x16e4] sm:$0xf] }
 0x799   :  { %v20322_v53 = vpop.f32.mrf.mxu3  ;;  %v12389_v45 = vor.u32 %v14151_v58, %v12386_v18  ;;  %v14394_v18 = vld [vmem:[%s21287_s4 + $0x17e4] sm:$0xf] }
 0x79a   :  { %9227 = vmatpush.bf16.msrb.mxu3 %v13321_v42  ;;  %9215 = vmatpush.bf16.msrb.mxu2 %v13177_v57  ;;  %v12530_v42 = vld [vmem:[%s21287_s4 + $0x1178] sm:$0xf0] }
 0x79b   :  { %8320 = vmatpush.bf16.msrb.mxu1 %v12513_v40  ;;  %v13304_v40 = vld [vmem:[%s21287_s4 + $0x1780] sm:$0xf] }
 0x79c   :  { %8309 = vmatpush.bf16.msra.mxu0 %v12353_v3  ;;  %v13305_v9 = vor.u32 %v14384_v13, %v13304_v40  ;;  %v12421_v3 = vor.u32 %v14159_v49, %v12418_v51  ;;  %v12533_v49 = vor.u32 %v14187_v34, %v12530_v42  ;;  %v14183_v51 = vld [vmem:[%s21287_s4 + $0x114c] sm:$0xf]  ;;  %v12514_v40 = vld [vmem:[%s21287_s4 + $0x1158] sm:$0xf0]  ;;  %v13210_v34 = vld [vmem:[%s21287_s4 + $0x16d0] sm:$0xf0] }
 0x79d   :  { %v12517_v37 = vor.u32 %v14183_v51, %v12514_v40  ;;  %v14390_v51 = vld [vmem:[%s21287_s4 + $0x17c4] sm:$0xf]  ;;  %v13338_v40 = vld [vmem:[%s21287_s4 + $0x17d0] sm:$0xf0] }
 0x79e   :  { %9228 = vmatpush.bf16.msrb.mxu3 %v13305_v9  ;;  %9216 = vmatpush.bf16.msrb.mxu2 %v13161_v44  ;;  %v7327_v23 = vpop.f32.mrf.mxu0  ;;  %v13256_v44 = vld [vmem:[%s21287_s4 + $0x1720] sm:$0xf] }
 0x79f   :  { %8321 = vmatpush.bf16.msrb.mxu1 %v12497_v27  ;;  %8310 = vmatmul.bf16.vlgmr.msra.gmra.mxu0 %v21481_v52  ;;  %v12565_v27 = vor.u32 %v14195_v62, %v12562_v25  ;;  %v7328_v20 = vadd.f32 %v7327_v23, %v6519_v19  ;;  %v12354_v62 = vld [vmem:[%s21287_s4 + $0x1018] sm:$0xf0]  ;;  %v14340_v25 = vld [vmem:[%s21287_s4 + $0x162c] sm:$0xf0]  ;;  %v13112_v19 = vld [vmem:[%s21287_s4 + $0x1600] sm:$0xf] }
 0x7a0   :  { %8354 = vmatpush.bf16.msrb.mxu0 %v12469_v0  ;;  %v14155_v0 = vld [vmem:[%s21287_s4 + $0x106c] sm:$0xf] }
 0x7a1   :  { %v12405_v21 = vor.u32 %v14155_v0, %v12402_v60  ;;  %v14372_v0 = vld [vmem:[%s21287_s4 + $0x172c] sm:$0xf0] }
 0x7a2   :  { %9229 = vmatpush.bf16.msrb.mxu3 %v13289_v6  ;;  %v14300_v60 = vld [vmem:[%s21287_s4 + $0x14ec] sm:$0xf0]  ;;  %v13257_v56 = vor.u32 %v14372_v0, %v13256_v44  ;;  %v13226_v6 = vld [vmem:[%s21287_s4 + $0x16f0] sm:$0xf0]  ;;  %v14386_v44 = vld [vmem:[%s21287_s4 + $0x17a4] sm:$0xf] }
 0x7a3   :  { %8322 = vmatpush.bf16.msrb.mxu1 %v12481_v5  ;;  %v20359_v1 = vpop.f32.mrf.mxu2  ;;  %v13272_v5 = vld [vmem:[%s21287_s4 + $0x1740] sm:$0xf]  ;;  %v7340_v39 = vpop.f32.mrf.mxu1  ;;  %v13322_v0 = vld [vmem:[%s21287_s4 + $0x17b0] sm:$0xf0] }
 0x7a4   :  { %8355 = vmatpush.bf16.msrb.mxu0 %v12453_v35  ;;  %v13145_v35 = vor.u32 %v14344_v47, %v13144_v50  ;;  %v13273_v36 = vor.u32 %v14376_v43, %v13272_v5  ;;  %v20385_v57 = vadd.f32 %v7340_v39, %v7328_v20  ;;  %v12498_v50 = vld [vmem:[%s21287_s4 + $0x1138] sm:$0xf0]  ;;  %v13229_v47 = vor.u32 %v14362_v55, %v13226_v6  ;;  %v13240_v20 = vld [vmem:[%s21287_s4 + $0x1700] sm:$0xf]  ;;  %v13354_v5 = vld [vmem:[%s21287_s4 + $0x17f0] sm:$0xf0] }
 0x7a5   :  { %v12969_v43 = vor.u32 %v14300_v60, %v12968_v32  ;;  %v12501_v42 = vor.u32 %v14179_v63, %v12498_v50  ;;  %v14296_v39 = vld [vmem:[%s21287_s4 + $0x14cc] sm:$0xf0]  ;;  %v14350_v63 = vld [vmem:[%s21287_s4 + $0x1684] sm:$0xf]  ;;  %v12920_v6 = vld [vmem:[%s21287_s4 + $0x1480] sm:$0xf] }
 0x7a6   :  { %8323 = vmatmul.bf16.vlgmr.msrb.gmra.mxu1 %v21481_v52  ;;  %9217 = vmatpush.bf16.msrb.mxu2 %v13145_v35  ;;  %v7329_v13 = vpop.f32.mrf.mxu0  ;;  %v14288_v50 = vld [vmem:[%s21287_s4 + $0x148c] sm:$0xf0] }
 0x7a7   :  { %8367 = vmatpush.bf16.msra.mxu1 %v12597_v22  ;;  %v8352_v22 = vpop.f32.mrf.mxu3  ;;  %9230 = vmatpush.bf16.msrb.mxu3 %v13273_v36  ;;  %v13357_v36 = vor.u32 %v14394_v18, %v13354_v5  ;;  %v14354_v13 = vld [vmem:[%s21287_s4 + $0x16a4] sm:$0xf]  ;;  %v13306_v18 = vld [vmem:[%s21287_s4 + $0x1790] sm:$0xf0] }
 0x7a8   :  { %8356 = vmatpush.bf16.msrb.mxu0 %v12437_v31  ;;  %v12370_v31 = vld [vmem:[%s21287_s4 + $0x1038] sm:$0xf0]  ;;  %v14358_v22 = vld [vmem:[%s21287_s4 + $0x16c4] sm:$0xf] }
 0x7a9   :  { %v12373_v8 = vor.u32 %v14147_v28, %v12370_v31  ;;  %v14175_v28 = vld [vmem:[%s21287_s4 + $0x110c] sm:$0xf]  ;;  %v12482_v31 = vld [vmem:[%s21287_s4 + $0x1118] sm:$0xf0] }
 0x7aa   :  { %v12485_v32 = vor.u32 %v14175_v28, %v12482_v31  ;;  %v13048_v31 = vld [vmem:[%s21287_s4 + $0x1580] sm:$0xf] }
 0x7ab   :  { %8368 = vmatpush.bf16.msra.mxu1 %v12581_v16  ;;  %v14143_v16 = vld [vmem:[%s21287_s4 + $0x100c] sm:$0xf]  ;;  %v8339_v9 = vpop.f32.mrf.mxu2  ;;  %9231 = vmatpush.bf16.msrb.mxu3 %v13257_v56  ;;  %v13080_v56 = vld [vmem:[%s21287_s4 + $0x15c0] sm:$0xf] }
 0x7ac   :  { %8357 = vmatpush.bf16.msrb.mxu0 %v12421_v3  ;;  %v13129_v3 = vor.u32 %v14340_v25, %v13128_v54  ;;  %v12357_v58 = vor.u32 %v14143_v16, %v12354_v62  ;;  %v13096_v54 = vld [vmem:[%s21287_s4 + $0x15e0] sm:$0xf]  ;;  %v14332_v16 = vld [vmem:[%s21287_s4 + $0x15ec] sm:$0xf0]  ;;  %v13341_v62 = vor.u32 %v14390_v51, %v13338_v40 }
 0x7ad   :  { %v12936_v9 = vld [vmem:[%s21287_s4 + $0x14a0] sm:$0xf]  ;;  %v13097_v60 = vor.u32 %v14332_v16, %v13096_v54  ;;  %v14320_v40 = vld [vmem:[%s21287_s4 + $0x158c] sm:$0xf0]  ;;  %v14342_v16 = vld [vmem:[%s21287_s4 + $0x1644] sm:$0xf] }
 0x7ae   :  { %9218 = vmatpush.bf16.msrb.mxu2 %v13129_v3  ;;  %v14292_v3 = vld [vmem:[%s21287_s4 + $0x14ac] sm:$0xf0] }
 0x7af   :  { %8369 = vmatpush.bf16.msra.mxu1 %v12565_v27  ;;  %v14336_v27 = vld [vmem:[%s21287_s4 + $0x160c] sm:$0xf0]  ;;  %v12937_v55 = vor.u32 %v14292_v3, %v12936_v9  ;;  %v12888_v9 = vld [vmem:[%s21287_s4 + $0x1440] sm:$0xf]  ;;  %v13274_v3 = vld [vmem:[%s21287_s4 + $0x1750] sm:$0xf0] }
 0x7b0   :  { %8358 = vmatpush.bf16.msrb.mxu0 %v12405_v21  ;;  %v13113_v23 = vor.u32 %v14336_v27, %v13112_v19  ;;  %v14368_v21 = vld [vmem:[%s21287_s4 + $0x170c] sm:$0xf0] }
 0x7b1   :  { %v13241_v35 = vor.u32 %v14368_v21, %v13240_v20  ;;  %v14328_v27 = vld [vmem:[%s21287_s4 + $0x15cc] sm:$0xf0]  ;;  %v6558_v20 = vadd.f32 %v19247_v4, %v19992_v12  ;;  %v14346_v12 = vld [vmem:[%s21287_s4 + $0x1664] sm:$0xf] }
 0x7b2   :  { %9219 = vmatpush.bf16.msrb.mxu2 %v13113_v23  ;;  %v13178_v23 = vld [vmem:[%s21287_s4 + $0x1690] sm:$0xf0]  ;;  %v13081_v21 = vor.u32 %v14328_v27, %v13080_v56  ;;  %v13032_v56 = vld [vmem:[%s21287_s4 + $0x1560] sm:$0xf] }
 0x7b3   :  { %8370 = vmatpush.bf16.msra.mxu1 %v12549_v14  ;;  %v7342_v14 = vpop.f32.mrf.mxu1  ;;  %9232 = vmatpush.bf16.msrb.mxu3 %v13241_v35  ;;  %v13181_v35 = vor.u32 %v14350_v63, %v13178_v23  ;;  %v5435_v63 = vmul.f32 0.2, %v18749_v48 }
 0x7b4   :  { %8359 = vmatpush.bf16.msrb.mxu0 %v12389_v45  ;;  %v12952_v45 = vld [vmem:[%s21287_s4 + $0x14c0] sm:$0xf]  ;;  %v13162_v14 = vld [vmem:[%s21287_s4 + $0x1670] sm:$0xf0] }
 0x7b5   :  { %v12953_v25 = vor.u32 %v14296_v39, %v12952_v45  ;;  %9220 = vmatmul.bf16.vlgmr.msrb.gmra.mxu2 %v21481_v52  ;;  %v13290_v45 = vld [vmem:[%s21287_s4 + $0x1770] sm:$0xf0]  ;;  %v6571_v39 = vadd.f32 %v19260_v11, %v6558_v20  ;;  %v13016_v20 = vld [vmem:[%s21287_s4 + $0x1540] sm:$0xf] }
 0x7b6   :  { %9264 = vmatpush.bf16.msra.mxu2 %v13229_v47  ;;  %9233 = vmatmul.bf16.vlgmr.msrb.gmra.mxu3 %v21481_v52  ;;  %v14382_v47 = vld [vmem:[%s21287_s4 + $0x1784] sm:$0xf]  ;;  %v13146_v11 = vld [vmem:[%s21287_s4 + $0x1650] sm:$0xf0] }
 0x7b7   :  { %8371 = vmatpush.bf16.msra.mxu1 %v12533_v49  ;;  %v13213_v49 = vor.u32 %v14358_v22, %v13210_v34  ;;  %9277 = vmatpush.bf16.msra.mxu3 %v13357_v36  ;;  %v13309_v4 = vor.u32 %v14382_v47, %v13306_v18  ;;  %v12921_v36 = vor.u32 %v14288_v50, %v12920_v6  ;;  %v12904_v22 = vld [vmem:[%s21287_s4 + $0x1460] sm:$0xf]  ;;  %v14284_v34 = vld [vmem:[%s21287_s4 + $0x146c] sm:$0xf0] }
 0x7b8   :  { %8360 = vmatpush.bf16.msrb.mxu0 %v12373_v8  ;;  %v13194_v8 = vld [vmem:[%s21287_s4 + $0x16b0] sm:$0xf0]  ;;  %v14276_v6 = vld [vmem:[%s21287_s4 + $0x142c] sm:$0xf0] }
 0x7b9   :  { %v13197_v19 = vor.u32 %v14354_v13, %v13194_v8  ;;  %v20527_v5 = vpop.f32.mrf.mxu3  ;;  %v14280_v8 = vld [vmem:[%s21287_s4 + $0x144c] sm:$0xf0] }
 0x7ba   :  { %9265 = vmatpush.bf16.msra.mxu2 %v13213_v49  ;;  %v13165_v49 = vor.u32 %v14346_v12, %v13162_v14  ;;  %v14272_v18 = vld [vmem:[%s21287_s4 + $0x140c] sm:$0xf0] }
 0x7bb   :  { %8372 = vmatpush.bf16.msra.mxu1 %v12517_v37  ;;  %9278 = vmatpush.bf16.msra.mxu3 %v13341_v62  ;;  %v13325_v37 = vor.u32 %v14386_v44, %v13322_v0  ;;  %v13049_v44 = vor.u32 %v14320_v40, %v13048_v31  ;;  %v13149_v0 = vor.u32 %v14342_v16, %v13146_v11  ;;  %v13114_v31 = vld [vmem:[%s21287_s4 + $0x1610] sm:$0xf0]  ;;  %v14365_v16 = vld [vmem:[%s21287_s4 + $0x16f4] sm:$0xf0]  ;;  %v14308_v11 = vld [vmem:[%s21287_s4 + $0x152c] sm:$0xf0] }
 0x7bc   :  { %8361 = vmatpush.bf16.msrb.mxu0 %v12357_v58  ;;  %v13064_v58 = vld [vmem:[%s21287_s4 + $0x15a0] sm:$0xf]  ;;  %v7379_v51 = vpop.f32.mrf.mxu0 }
 0x7bd   :  { %v7380_v62 = vadd.f32 %v7379_v51, %v6571_v39  ;;  %v13000_v51 = vld [vmem:[%s21287_s4 + $0x1520] sm:$0xf] }
 0x7be   :  { %9266 = vmatpush.bf16.msra.mxu2 %v13197_v19  ;;  %v14316_v19 = vld [vmem:[%s21287_s4 + $0x156c] sm:$0xf0] }
 0x7bf   :  { %8373 = vmatpush.bf16.msra.mxu1 %v12501_v42  ;;  %8362 = vmatmul.bf16.vlgmr.msrb.gmra.mxu0 %v21481_v52  ;;  %v14378_v42 = vld [vmem:[%s21287_s4 + $0x1764] sm:$0xf]  ;;  %v13033_v47 = vor.u32 %v14316_v19, %v13032_v56 }
 0x7c0   :  { %9186 = vmatpush.bf16.msra.mxu0 %v12969_v43  ;;  %v14324_v43 = vld [vmem:[%s21287_s4 + $0x15ac] sm:$0xf0]  ;;  %9279 = vmatpush.bf16.msra.mxu3 %v13325_v37  ;;  %v13293_v54 = vor.u32 %v14378_v42, %v13290_v45  ;;  %v12889_v37 = vor.u32 %v14280_v8, %v12888_v9  ;;  %v13258_v42 = vld [vmem:[%s21287_s4 + $0x1730] sm:$0xf0] }
 0x7c1   :  { %v13065_v28 = vor.u32 %v14324_v43, %v13064_v58  ;;  %v14338_v58 = vld [vmem:[%s21287_s4 + $0x1624] sm:$0xf]  ;;  %v12970_v45 = vld [vmem:[%s21287_s4 + $0x14f0] sm:$0xf0] }
 0x7c2   :  { %9267 = vmatpush.bf16.msra.mxu2 %v13181_v35  ;;  %v12856_v35 = vld [vmem:[%s21287_s4 + $0x1400] sm:$0xf]  ;;  %v13242_v9 = vld [vmem:[%s21287_s4 + $0x1710] sm:$0xf0] }
 0x7c3   :  { %8374 = vmatpush.bf16.msra.mxu1 %v12485_v32  ;;  %v20564_v13 = vpop.f32.mrf.mxu2  ;;  %v14374_v32 = vld [vmem:[%s21287_s4 + $0x1744] sm:$0xf]  ;;  %v7392_v23 = vpop.f32.mrf.mxu1  ;;  %v12857_v8 = vor.u32 %v14272_v18, %v12856_v35  ;;  %v13098_v18 = vld [vmem:[%s21287_s4 + $0x15f0] sm:$0xf0] }
 0x7c4   :  { %9187 = vmatpush.bf16.msra.mxu0 %v12953_v25  ;;  %9280 = vmatpush.bf16.msra.mxu3 %v13309_v4  ;;  %v12905_v25 = vor.u32 %v14284_v34, %v12904_v22  ;;  %v13277_v27 = vor.u32 %v14374_v32, %v13274_v3  ;;  %v20592_v50 = vadd.f32 %v7392_v23, %v7380_v62  ;;  %v7381_v43 = vpop.f32.mrf.mxu0  ;;  %v13130_v4 = vld [vmem:[%s21287_s4 + $0x1630] sm:$0xf0]  ;;  %v14370_v34 = vld [vmem:[%s21287_s4 + $0x1724] sm:$0xf]  ;;  %v13360_v3 = vld [vmem:[%s21287_s4 + $0x17e8] sm:$0xf] }
 0x7c5   :  { %v13133_v22 = vor.u32 %v14338_v58, %v13130_v4  ;;  %v13261_v39 = vor.u32 %v14370_v34, %v13258_v42  ;;  %v5443_v23 = vsel %vm5427_vm6, %v18749_v48, %v5435_v63  ;;  %v13344_v63 = vld [vmem:[%s21287_s4 + $0x17c8] sm:$0xf]  ;;  %v14393_v58 = vld [vmem:[%s21287_s4 + $0x17d4] sm:$0xf0]  ;;  %v14330_v35 = vld [vmem:[%s21287_s4 + $0x15e4] sm:$0xf] }
 0x7c6   :  { %8375 = vmatmul.bf16.vlgmr.msra.gmra.mxu1 %v21481_v52  ;;  %9268 = vmatpush.bf16.msra.mxu2 %v13165_v49  ;;  %v13345_v43 = vor.u32 %v14393_v58, %v13344_v63  ;;  %v13200_v4 = vld [vmem:[%s21287_s4 + $0x16a8] sm:$0xf]  ;;  %v12938_v42 = vld [vmem:[%s21287_s4 + $0x14b0] sm:$0xf0] }
 0x7c7   :  { %9199 = vmatpush.bf16.msrb.mxu1 %v13097_v60  ;;  %v8404_v60 = vpop.f32.mrf.mxu3  ;;  %v13050_v58 = vld [vmem:[%s21287_s4 + $0x1590] sm:$0xf0] }
 0x7c8   :  { %9188 = vmatpush.bf16.msra.mxu0 %v12937_v55  ;;  %9281 = vmatpush.bf16.msra.mxu3 %v13293_v54  ;;  %v12872_v55 = vld [vmem:[%s21287_s4 + $0x1420] sm:$0xf]  ;;  %v13232_v54 = vld [vmem:[%s21287_s4 + $0x16e8] sm:$0xf] }
 0x7c9   :  { %v12873_v14 = vor.u32 %v14276_v6, %v12872_v55  ;;  %v13233_v62 = vor.u32 %v14365_v16, %v13232_v54  ;;  %v13001_v55 = vor.u32 %v14308_v11, %v13000_v51  ;;  %v14294_v6 = vld [vmem:[%s21287_s4 + $0x14c4] sm:$0xf]  ;;  %v13184_v16 = vld [vmem:[%s21287_s4 + $0x1688] sm:$0xf]  ;;  %v14353_v11 = vld [vmem:[%s21287_s4 + $0x1694] sm:$0xf0] }
 0x7ca   :  { %9269 = vmatpush.bf16.msra.mxu2 %v13149_v0  ;;  %v5436_v0 = vmul.f32 0.2, %v18790_v59 }
 0x7cb   :  { %9200 = vmatpush.bf16.msrb.mxu1 %v13081_v21  ;;  %v14312_v21 = vld [vmem:[%s21287_s4 + $0x154c] sm:$0xf0]  ;;  %v8391_v12 = vpop.f32.mrf.mxu2  ;;  %v7394_v56 = vpop.f32.mrf.mxu1 }
 0x7cc   :  { %9189 = vmatpush.bf16.msra.mxu0 %v12921_v36  ;;  %9282 = vmatpush.bf16.msra.mxu3 %v13277_v27  ;;  %v14298_v36 = vld [vmem:[%s21287_s4 + $0x14e4] sm:$0xf]  ;;  %v13017_v49 = vor.u32 %v14312_v21, %v13016_v20  ;;  %v13216_v27 = vld [vmem:[%s21287_s4 + $0x16c8] sm:$0xf]  ;;  %v12984_v20 = vld [vmem:[%s21287_s4 + $0x1500] sm:$0xf]  ;;  %v20691_v12 = vpack.c.bf16 %v5443_v23, %v5443_v23  ;;  %v5444_v51 = vsel %vm5428_vm7, %v18790_v59, %v5436_v0 }
 0x7cd   :  { %v12973_v60 = vor.u32 %v14298_v36, %v12970_v45  ;;  %v14304_v21 = vld [vmem:[%s21287_s4 + $0x150c] sm:$0xf0]  ;;  %v14290_v36 = vld [vmem:[%s21287_s4 + $0x14a4] sm:$0xf]  ;;  %v13328_v45 = vld [vmem:[%s21287_s4 + $0x17a8] sm:$0xf] }
 0x7ce   :  { %9270 = vmatpush.bf16.msra.mxu2 %v13133_v22  ;;  %v14357_v22 = vld [vmem:[%s21287_s4 + $0x16b4] sm:$0xf0]  ;;  %v12985_v34 = vor.u32 %v14304_v21, %v12984_v20  ;;  %v14286_v59 = vld [vmem:[%s21287_s4 + $0x1484] sm:$0xf] }
 0x7cf   :  { %9201 = vmatpush.bf16.msrb.mxu1 %v13065_v28  ;;  %v14334_v28 = vld [vmem:[%s21287_s4 + $0x1604] sm:$0xf]  ;;  %v14385_v0 = vld [vmem:[%s21287_s4 + $0x1794] sm:$0xf0] }
 0x7d0   :  { %9190 = vmatpush.bf16.msra.mxu0 %v12905_v25  ;;  %v13117_v40 = vor.u32 %v14334_v28, %v13114_v31  ;;  %9283 = vmatpush.bf16.msra.mxu3 %v13261_v39  ;;  %v14366_v25 = vld [vmem:[%s21287_s4 + $0x1704] sm:$0xf]  ;;  %v14389_v39 = vld [vmem:[%s21287_s4 + $0x17b4] sm:$0xf0]  ;;  %v13101_v28 = vor.u32 %v14330_v35, %v13098_v18  ;;  %v13152_v18 = vld [vmem:[%s21287_s4 + $0x1648] sm:$0xf] }
 0x7d1   :  { %v13245_v32 = vor.u32 %v14366_v25, %v13242_v9  ;;  %v14326_v31 = vld [vmem:[%s21287_s4 + $0x15c4] sm:$0xf]  ;;  %v13329_v54 = vor.u32 %v14389_v39, %v13328_v45  ;;  %v12922_v25 = vld [vmem:[%s21287_s4 + $0x1490] sm:$0xf0]  ;;  %v13312_v9 = vld [vmem:[%s21287_s4 + $0x1788] sm:$0xf] }
 0x7d2   :  { %9271 = vmatpush.bf16.msra.mxu2 %v13117_v40  ;;  %v13082_v40 = vld [vmem:[%s21287_s4 + $0x15d0] sm:$0xf0]  ;;  %v13313_v56 = vor.u32 %v14385_v0, %v13312_v9  ;;  %v14282_v23 = vld [vmem:[%s21287_s4 + $0x1464] sm:$0xf] }
 0x7d3   :  { %9202 = vmatpush.bf16.msrb.mxu1 %v13049_v44  ;;  %v14397_v44 = vld [vmem:[%s21287_s4 + $0x17f4] sm:$0xf0]  ;;  %v14318_v21 = vld [vmem:[%s21287_s4 + $0x1584] sm:$0xf]  ;;  %v12858_v9 = vld [vmem:[%s21287_s4 + $0x1410] sm:$0xf0] }
 0x7d4   :  { %9191 = vmatpush.bf16.msra.mxu0 %v12889_v37  ;;  %v13361_v19 = vor.u32 %v14397_v44, %v13360_v3  ;;  %v14361_v37 = vld [vmem:[%s21287_s4 + $0x16d4] sm:$0xf0]  ;;  %9284 = vmatpush.bf16.msra.mxu3 %v13245_v32  ;;  %v13085_v32 = vor.u32 %v14326_v31, %v13082_v40  ;;  %v14322_v3 = vld [vmem:[%s21287_s4 + $0x15a4] sm:$0xf]  ;;  %v13185_v44 = vor.u32 %v14353_v11, %v13184_v16  ;;  %v12874_v16 = vld [vmem:[%s21287_s4 + $0x1430] sm:$0xf0] }
 0x7d5   :  { %v13217_v48 = vor.u32 %v14361_v37, %v13216_v27  ;;  %9272 = vmatmul.bf16.vlgmr.msra.gmra.mxu2 %v21481_v52  ;;  %v14349_v27 = vld [vmem:[%s21287_s4 + $0x1674] sm:$0xf0]  ;;  %v12925_v37 = vor.u32 %v14286_v59, %v12922_v25  ;;  %v14314_v39 = vld [vmem:[%s21287_s4 + $0x1564] sm:$0xf] }
 0x7d6   :  { %9316 = vmatpush.bf16.msrb.mxu2 %v13233_v62  ;;  %v12941_v62 = vor.u32 %v14290_v36, %v12938_v42  ;;  %v12890_v36 = vld [vmem:[%s21287_s4 + $0x1450] sm:$0xf0]  ;;  %v13053_v42 = vor.u32 %v14318_v21, %v13050_v58  ;;  %v14310_v59 = vld [vmem:[%s21287_s4 + $0x1544] sm:$0xf] }
 0x7d7   :  { %9203 = vmatpush.bf16.msrb.mxu1 %v13033_v47  ;;  %v12954_v47 = vld [vmem:[%s21287_s4 + $0x14d0] sm:$0xf0]  ;;  %9285 = vmatmul.bf16.vlgmr.msra.gmra.mxu3 %v21481_v52  ;;  %v14270_v25 = vld [vmem:[%s21287_s4 + $0x1404] sm:$0xf] }
 0x7d8   :  { %9192 = vmatpush.bf16.msra.mxu0 %v12873_v14  ;;  %9329 = vmatpush.bf16.msrb.mxu3 %v13361_v19  ;;  %v12957_v14 = vor.u32 %v14294_v6, %v12954_v47  ;;  %v13168_v19 = vld [vmem:[%s21287_s4 + $0x1668] sm:$0xf]  ;;  %v14381_v47 = vld [vmem:[%s21287_s4 + $0x1774] sm:$0xf0] }
 0x7d9   :  { %v13296_v6 = vld [vmem:[%s21287_s4 + $0x1768] sm:$0xf] }
 0x7da   :  { %9317 = vmatpush.bf16.msrb.mxu2 %v13217_v48  ;;  %v13169_v48 = vor.u32 %v14349_v27, %v13168_v19  ;;  %v13297_v35 = vor.u32 %v14381_v47, %v13296_v6  ;;  %v13264_v19 = vld [vmem:[%s21287_s4 + $0x1728] sm:$0xf]  ;;  %v14373_v27 = vld [vmem:[%s21287_s4 + $0x1734] sm:$0xf0] }
 0x7db   :  { %9204 = vmatpush.bf16.msrb.mxu1 %v13017_v49  ;;  %v13201_v49 = vor.u32 %v14357_v22, %v13200_v4  ;;  %v13280_v22 = vld [vmem:[%s21287_s4 + $0x1748] sm:$0xf]  ;;  %v14337_v6 = vld [vmem:[%s21287_s4 + $0x1614] sm:$0xf0] }
 0x7dc   :  { %9193 = vmatpush.bf16.msra.mxu0 %v12857_v8  ;;  %9330 = vmatpush.bf16.msrb.mxu3 %v13345_v43  ;;  %v20736_v8 = vpack.c.bf16 %v5444_v51, %v5444_v51  ;;  %v8207_v63 = vpop.f32.mrf.mxu0  ;;  %v14345_v43 = vld [vmem:[%s21287_s4 + $0x1654] sm:$0xf0]  ;;  %v7250_v51 = vadd.f32 %v19552_v17, %v20099_v29  ;;  %v13018_v17 = vld [vmem:[%s21287_s4 + $0x1550] sm:$0xf0]  ;;  %v13136_v29 = vld [vmem:[%s21287_s4 + $0x1628] sm:$0xf] }
 0x7dd   :  { %v13153_v45 = vor.u32 %v14345_v43, %v13152_v18  ;;  %v14369_v18 = vld [vmem:[%s21287_s4 + $0x1714] sm:$0xf0]  ;;  %v12861_v43 = vor.u32 %v14270_v25, %v12858_v9  ;;  %v14355_v25 = vld [vmem:[%s21287_s4 + $0x16ac] sm:$0xf] }
 0x7de   :  { %9318 = vmatpush.bf16.msrb.mxu2 %v13201_v49 }
 0x7df   :  { %9205 = vmatpush.bf16.msrb.mxu1 %v13001_v55  ;;  %9194 = vmatmul.bf16.vlgmr.msra.gmra.mxu0 %v20691_v12  ;;  %v12906_v55 = vld [vmem:[%s21287_s4 + $0x1470] sm:$0xf0] }
 0x7e0   :  { %9238 = vmatpush.bf16.msrb.mxu0 %v12973_v60  ;;  %v13066_v60 = vld [vmem:[%s21287_s4 + $0x15b0] sm:$0xf0]  ;;  %9331 = vmatpush.bf16.msrb.mxu3 %v13329_v54  ;;  %v12909_v4 = vor.u32 %v14282_v23, %v12906_v55  ;;  %v14274_v54 = vld [vmem:[%s21287_s4 + $0x1424] sm:$0xf]  ;;  %v13265_v23 = vor.u32 %v14373_v27, %v13264_v19  ;;  %v13120_v55 = vld [vmem:[%s21287_s4 + $0x1608] sm:$0xf] }
 0x7e1   :  { %v13069_v20 = vor.u32 %v14322_v3, %v13066_v60  ;;  %v14341_v3 = vld [vmem:[%s21287_s4 + $0x1634] sm:$0xf0]  ;;  %v12877_v0 = vor.u32 %v14274_v54, %v12874_v16  ;;  %v12976_v60 = vld [vmem:[%s21287_s4 + $0x14e8] sm:$0xf]  ;;  %v13121_v21 = vor.u32 %v14337_v6, %v13120_v55  ;;  %v12986_v54 = vld [vmem:[%s21287_s4 + $0x1510] sm:$0xf0] }
 0x7e2   :  { %9319 = vmatpush.bf16.msrb.mxu2 %v13185_v44  ;;  %v13088_v27 = vld [vmem:[%s21287_s4 + $0x15c8] sm:$0xf]  ;;  %v14351_v55 = vld [vmem:[%s21287_s4 + $0x168c] sm:$0xf]  ;;  %v13186_v6 = vld [vmem:[%s21287_s4 + $0x1698] sm:$0xf0] }
 0x7e3   :  { %9206 = vmatpush.bf16.msrb.mxu1 %v12985_v34  ;;  %v14377_v34 = vld [vmem:[%s21287_s4 + $0x1754] sm:$0xf0]  ;;  %v8220_v40 = vpop.f32.mrf.mxu1 }
 0x7e4   :  { %9239 = vmatpush.bf16.msrb.mxu0 %v12957_v14  ;;  %9332 = vmatpush.bf16.msrb.mxu3 %v13313_v56  ;;  %v14278_v14 = vld [vmem:[%s21287_s4 + $0x1444] sm:$0xf]  ;;  %v13281_v31 = vor.u32 %v14377_v34, %v13280_v22  ;;  %v8221_v11 = vadd.f32 %v8220_v40, %v8207_v63  ;;  %v13137_v56 = vor.u32 %v14341_v3, %v13136_v29  ;;  %v13234_v63 = vld [vmem:[%s21287_s4 + $0x16f8] sm:$0xf0] }
 0x7e5   :  { %v12893_v49 = vor.u32 %v14278_v14, %v12890_v36  ;;  %v14395_v14 = vld [vmem:[%s21287_s4 + $0x17ec] sm:$0xf]  ;;  %v13362_v36 = vld [vmem:[%s21287_s4 + $0x17f8] sm:$0xf0]  ;;  %v14302_v40 = vld [vmem:[%s21287_s4 + $0x1504] sm:$0xf] }
 0x7e6   :  { %9207 = vmatmul.bf16.vlgmr.msrb.gmra.mxu1 %v20736_v8  ;;  %9320 = vmatpush.bf16.msrb.mxu2 %v13169_v48  ;;  %v8234_v44 = vadd.f32 %v20079_v26, %v8221_v11  ;;  %v14301_v26 = vld [vmem:[%s21287_s4 + $0x14f4] sm:$0xf0]  ;;  %v14363_v48 = vld [vmem:[%s21287_s4 + $0x16ec] sm:$0xf]  ;;  %v13202_v3 = vld [vmem:[%s21287_s4 + $0x16b8] sm:$0xf0] }
 0x7e7   :  { %9251 = vmatpush.bf16.msra.mxu1 %v13101_v28  ;;  %v13034_v28 = vld [vmem:[%s21287_s4 + $0x1570] sm:$0xf0]  ;;  %v13237_v58 = vor.u32 %v14363_v48, %v13234_v63  ;;  %v12977_v34 = vor.u32 %v14301_v26, %v12976_v60  ;;  %v14391_v11 = vld [vmem:[%s21287_s4 + $0x17cc] sm:$0xf]  ;;  %v14329_v26 = vld [vmem:[%s21287_s4 + $0x15d4] sm:$0xf0] }
 0x7e8   :  { %9240 = vmatpush.bf16.msrb.mxu0 %v12941_v62  ;;  %9333 = vmatpush.bf16.msrb.mxu3 %v13297_v35  ;;  %v13037_v62 = vor.u32 %v14314_v39, %v13034_v28  ;;  %v8247_v47 = vadd.f32 %v20057_v7, %v8234_v44  ;;  %v13002_v7 = vld [vmem:[%s21287_s4 + $0x1530] sm:$0xf0]  ;;  %v13248_v35 = vld [vmem:[%s21287_s4 + $0x1708] sm:$0xf]  ;;  %v14359_v39 = vld [vmem:[%s21287_s4 + $0x16cc] sm:$0xf]  ;;  %v12989_v44 = vor.u32 %v14302_v40, %v12986_v54 }
 0x7e9   :  { %v13218_v28 = vld [vmem:[%s21287_s4 + $0x16d8] sm:$0xf0]  ;;  %v14387_v60 = vld [vmem:[%s21287_s4 + $0x17ac] sm:$0xf]  ;;  %v13089_v48 = vor.u32 %v14329_v26, %v13088_v27  ;;  %v13072_v63 = vld [vmem:[%s21287_s4 + $0x15a8] sm:$0xf] }
 0x7ea   :  { %9321 = vmatpush.bf16.msrb.mxu2 %v13153_v45  ;;  %v13365_v45 = vor.u32 %v14395_v14, %v13362_v36  ;;  %v13221_v16 = vor.u32 %v14359_v39, %v13218_v28  ;;  %v12912_v36 = vld [vmem:[%s21287_s4 + $0x1468] sm:$0xf]  ;;  %v14343_v54 = vld [vmem:[%s21287_s4 + $0x164c] sm:$0xf]  ;;  %v14277_v27 = vld [vmem:[%s21287_s4 + $0x1434] sm:$0xf0] }
 0x7eb   :  { %9252 = vmatpush.bf16.msra.mxu1 %v13085_v32  ;;  %v8209_v32 = vpop.f32.mrf.mxu0  ;;  %v13056_v28 = vld [vmem:[%s21287_s4 + $0x1588] sm:$0xf] }
 0x7ec   :  { %9241 = vmatpush.bf16.msrb.mxu0 %v12925_v37  ;;  %9334 = vmatpush.bf16.msrb.mxu3 %v13281_v31  ;;  %v7263_v37 = vadd.f32 %v19597_v33, %v7250_v51  ;;  %v14306_v33 = vld [vmem:[%s21287_s4 + $0x1524] sm:$0xf]  ;;  %v14297_v51 = vld [vmem:[%s21287_s4 + $0x14d4] sm:$0xf0]  ;;  %v12944_v32 = vld [vmem:[%s21287_s4 + $0x14a8] sm:$0xf] }
 0x7ed   :  { %v13005_v31 = vor.u32 %v14306_v33, %v13002_v7  ;;  %v14289_v33 = vld [vmem:[%s21287_s4 + $0x1494] sm:$0xf0]  ;;  %v13189_v7 = vor.u32 %v14351_v55, %v13186_v6  ;;  %v13138_v6 = vld [vmem:[%s21287_s4 + $0x1638] sm:$0xf0] }
 0x7ee   :  { %9322 = vmatpush.bf16.msrb.mxu2 %v13137_v56  ;;  %v20867_v22 = vadd.f32 %v8247_v47, %v7263_v37  ;;  %v13330_v56 = vld [vmem:[%s21287_s4 + $0x17b8] sm:$0xf0]  ;;  %v13205_v37 = vor.u32 %v14355_v25, %v13202_v3  ;;  %v14317_v3 = vld [vmem:[%s21287_s4 + $0x1574] sm:$0xf0] }
 0x7ef   :  { %9253 = vmatpush.bf16.msra.mxu1 %v13069_v20  ;;  %v13021_v20 = vor.u32 %v14310_v59, %v13018_v17  ;;  %v13104_v59 = vld [vmem:[%s21287_s4 + $0x15e8] sm:$0xf]  ;;  %v14333_v17 = vld [vmem:[%s21287_s4 + $0x15f4] sm:$0xf0] }
 0x7f0   :  { %9242 = vmatpush.bf16.msrb.mxu0 %v12909_v4  ;;  %9335 = vmatpush.bf16.msrb.mxu3 %v13265_v23  ;;  %v13249_v4 = vor.u32 %v14369_v18, %v13248_v35  ;;  %v13105_v19 = vor.u32 %v14333_v17, %v13104_v59  ;;  %v13333_v23 = vor.u32 %v14387_v60, %v13330_v56  ;;  %v14325_v35 = vld [vmem:[%s21287_s4 + $0x15b4] sm:$0xf0]  ;;  %v14375_v17 = vld [vmem:[%s21287_s4 + $0x174c] sm:$0xf] }
 0x7f1   :  { %v13073_v39 = vor.u32 %v14325_v35, %v13072_v63  ;;  %v14281_v59 = vld [vmem:[%s21287_s4 + $0x1454] sm:$0xf0]  ;;  %v7302_v60 = vadd.f32 %v19671_v10, %v20206_v61  ;;  %v13024_v10 = vld [vmem:[%s21287_s4 + $0x1548] sm:$0xf]  ;;  %v13266_v63 = vld [vmem:[%s21287_s4 + $0x1738] sm:$0xf0] }
 0x7f2   :  { %9323 = vmatpush.bf16.msrb.mxu2 %v13121_v21  ;;  %v14383_v21 = vld [vmem:[%s21287_s4 + $0x178c] sm:$0xf]  ;;  %v14313_v61 = vld [vmem:[%s21287_s4 + $0x1554] sm:$0xf0] }
 0x7f3   :  { %9254 = vmatpush.bf16.msra.mxu1 %v13053_v42  ;;  %v8222_v42 = vpop.f32.mrf.mxu1  ;;  %v14335_v35 = vld [vmem:[%s21287_s4 + $0x160c] sm:$0xf] }
 0x7f4   :  { %9243 = vmatpush.bf16.msrb.mxu0 %v12893_v49  ;;  %v12960_v49 = vld [vmem:[%s21287_s4 + $0x14c8] sm:$0xf]  ;;  %9336 = vmatpush.bf16.msrb.mxu3 %v13249_v4  ;;  %v13170_v4 = vld [vmem:[%s21287_s4 + $0x1678] sm:$0xf0]  ;;  %v14379_v42 = vld [vmem:[%s21287_s4 + $0x176c] sm:$0xf] }
 0x7f5   :  { %v12961_v9 = vor.u32 %v14297_v51, %v12960_v49  ;;  %9324 = vmatmul.bf16.vlgmr.msrb.gmra.mxu2 %v21481_v52  ;;  %v14321_v51 = vld [vmem:[%s21287_s4 + $0x1594] sm:$0xf0] }
 0x7f6   :  { %9368 = vmatpush.bf16.msra.mxu2 %v13237_v58  ;;  %v13314_v58 = vld [vmem:[%s21287_s4 + $0x1798] sm:$0xf0]  ;;  %v13057_v25 = vor.u32 %v14321_v51, %v13056_v28 }
 0x7f7   :  { %9255 = vmatpush.bf16.msra.mxu1 %v13037_v62  ;;  %v13346_v62 = vld [vmem:[%s21287_s4 + $0x17d8] sm:$0xf0]  ;;  %9337 = vmatmul.bf16.vlgmr.msrb.gmra.mxu3 %v21481_v52  ;;  %v13317_v18 = vor.u32 %v14383_v21, %v13314_v58 }
 0x7f8   :  { %9244 = vmatpush.bf16.msrb.mxu0 %v12877_v0  ;;  %9381 = vmatpush.bf16.msra.mxu3 %v13365_v45  ;;  %v13349_v29 = vor.u32 %v14391_v11, %v13346_v62  ;;  %v14293_v0 = vld [vmem:[%s21287_s4 + $0x14b4] sm:$0xf0]  ;;  %v13298_v45 = vld [vmem:[%s21287_s4 + $0x1778] sm:$0xf0]  ;;  %v12896_v62 = vld [vmem:[%s21287_s4 + $0x1448] sm:$0xf] }
 0x7f9   :  { %v12945_v47 = vor.u32 %v14293_v0, %v12944_v32  ;;  %v13301_v40 = vor.u32 %v14379_v42, %v13298_v45  ;;  %v13040_v32 = vld [vmem:[%s21287_s4 + $0x1568] sm:$0xf]  ;;  %v12897_v0 = vor.u32 %v14281_v59, %v12896_v62  ;;  %v14309_v42 = vld [vmem:[%s21287_s4 + $0x1534] sm:$0xf0]  ;;  %v13250_v45 = vld [vmem:[%s21287_s4 + $0x1718] sm:$0xf0] }
 0x7fa   :  { %9369 = vmatpush.bf16.msra.mxu2 %v13221_v16  ;;  %v13154_v16 = vld [vmem:[%s21287_s4 + $0x1658] sm:$0xf0]  ;;  %v13041_v26 = vor.u32 %v14317_v3, %v13040_v32  ;;  %v14305_v62 = vld [vmem:[%s21287_s4 + $0x1514] sm:$0xf0]  ;;  %v14331_v59 = vld [vmem:[%s21287_s4 + $0x15ec] sm:$0xf] }
 0x7fb   :  { %9256 = vmatpush.bf16.msra.mxu1 %v13021_v20  ;;  %v12928_v20 = vld [vmem:[%s21287_s4 + $0x1488] sm:$0xf]  ;;  %v12946_v32 = vld [vmem:[%s21287_s4 + $0x14b8] sm:$0xf0] }
 0x7fc   :  { %9245 = vmatpush.bf16.msrb.mxu0 %v12861_v43  ;;  %9382 = vmatpush.bf16.msra.mxu3 %v13349_v29  ;;  %v14347_v43 = vld [vmem:[%s21287_s4 + $0x166c] sm:$0xf]  ;;  %v12929_v14 = vor.u32 %v14289_v33, %v12928_v20  ;;  %v8259_v49 = vpop.f32.mrf.mxu0  ;;  %v13282_v29 = vld [vmem:[%s21287_s4 + $0x1758] sm:$0xf0]  ;;  %v12864_v33 = vld [vmem:[%s21287_s4 + $0x1408] sm:$0xf] }
 0x7fe   :  { %9370 = vmatpush.bf16.msra.mxu2 %v13205_v37 }
 0x7ff   :  { %9257 = vmatpush.bf16.msra.mxu1 %v13005_v31  ;;  %9246 = vmatmul.bf16.vlgmr.msrb.gmra.mxu0 %v20691_v12  ;;  %v13173_v31 = vor.u32 %v14347_v43, %v13170_v4  ;;  %v13025_v4 = vor.u32 %v14313_v61, %v13024_v10  ;;  %v12914_v10 = vld [vmem:[%s21287_s4 + $0x1478] sm:$0xf0] }
 0x800   :  { %9290 = vmatpush.bf16.msra.mxu0 %v12977_v34  ;;  %9383 = vmatpush.bf16.msra.mxu3 %v13333_v23  ;;  %v14285_v34 = vld [vmem:[%s21287_s4 + $0x1474] sm:$0xf0]  ;;  %v14339_v23 = vld [vmem:[%s21287_s4 + $0x162c] sm:$0xf] }
 0x801   :  { %v12913_v11 = vor.u32 %v14285_v34, %v12912_v36  ;;  %v13141_v21 = vor.u32 %v14339_v23, %v13138_v6  ;;  %v14367_v34 = vld [vmem:[%s21287_s4 + $0x170c] sm:$0xf] }
 0x802   :  { %9371 = vmatpush.bf16.msra.mxu2 %v13189_v7  ;;  %v7315_v7 = vadd.f32 %v19706_v41, %v7302_v60  ;;  %v14299_v41 = vld [vmem:[%s21287_s4 + $0x14ec] sm:$0xf]  ;;  %v13253_v28 = vor.u32 %v14367_v34, %v13250_v45 }
 0x803   :  { %9258 = vmatpush.bf16.msra.mxu1 %v12989_v44  ;;  %v13285_v44 = vor.u32 %v14375_v17, %v13282_v29  ;;  %v8272_v56 = vpop.f32.mrf.mxu1  ;;  %v13106_v17 = vld [vmem:[%s21287_s4 + $0x15f8] sm:$0xf0]  ;;  %v14283_v23 = vld [vmem:[%s21287_s4 + $0x146c] sm:$0xf] }
 0x804   :  { %9291 = vmatpush.bf16.msra.mxu0 %v12961_v9  ;;  %9384 = vmatpush.bf16.msra.mxu3 %v13317_v18  ;;  %v13157_v9 = vor.u32 %v14343_v54, %v13154_v16  ;;  %v8273_v37 = vadd.f32 %v8272_v56, %v8259_v49  ;;  %v8261_v55 = vpop.f32.mrf.mxu0  ;;  %v13122_v18 = vld [vmem:[%s21287_s4 + $0x1618] sm:$0xf0]  ;;  %v14295_v54 = vld [vmem:[%s21287_s4 + $0x14cc] sm:$0xf]  ;;  %v13109_v3 = vor.u32 %v14331_v59, %v13106_v17 }
 0x805   :  { %v13125_v36 = vor.u32 %v14335_v35, %v13122_v18  ;;  %v12962_v16 = vld [vmem:[%s21287_s4 + $0x14d8] sm:$0xf0]  ;;  %v14287_v56 = vld [vmem:[%s21287_s4 + $0x148c] sm:$0xf] }
 0x806   :  { %9259 = vmatmul.bf16.vlgmr.msra.gmra.mxu1 %v20736_v8  ;;  %9372 = vmatpush.bf16.msra.mxu2 %v13173_v31  ;;  %v12965_v29 = vor.u32 %v14295_v54, %v12962_v16  ;;  %v14319_v6 = vld [vmem:[%s21287_s4 + $0x158c] sm:$0xf]  ;;  %v12882_v18 = vld [vmem:[%s21287_s4 + $0x1438] sm:$0xf0] }
 0x807   :  { %9303 = vmatpush.bf16.msrb.mxu1 %v13105_v19  ;;  %v12880_v19 = vld [vmem:[%s21287_s4 + $0x1428] sm:$0xf]  ;;  %v14275_v35 = vld [vmem:[%s21287_s4 + $0x142c] sm:$0xf] }
 0x808   :  { %9292 = vmatpush.bf16.msra.mxu0 %v12945_v47  ;;  %9385 = vmatpush.bf16.msra.mxu3 %v13301_v40  ;;  %v8286_v47 = vadd.f32 %v20186_v38, %v8273_v37  ;;  %v12881_v20 = vor.u32 %v14277_v27, %v12880_v19  ;;  %v14273_v38 = vld [vmem:[%s21287_s4 + $0x1414] sm:$0xf0]  ;;  %v14323_v27 = vld [vmem:[%s21287_s4 + $0x15ac] sm:$0xf]  ;;  %v13074_v37 = vld [vmem:[%s21287_s4 + $0x15b8] sm:$0xf0] }
 0x809   :  { %v13077_v61 = vor.u32 %v14323_v27, %v13074_v37  ;;  %v14303_v16 = vld [vmem:[%s21287_s4 + $0x150c] sm:$0xf] }
 0x80a   :  { %9373 = vmatpush.bf16.msra.mxu2 %v13157_v9  ;;  %v8299_v43 = vadd.f32 %v20164_v24, %v8286_v47  ;;  %v13008_v24 = vld [vmem:[%s21287_s4 + $0x1528] sm:$0xf]  ;;  %v14291_v9 = vld [vmem:[%s21287_s4 + $0x14ac] sm:$0xf]  ;;  %v13058_v47 = vld [vmem:[%s21287_s4 + $0x1598] sm:$0xf0] }
 0x80b   :  { %9304 = vmatpush.bf16.msrb.mxu1 %v13089_v48  ;;  %v14371_v48 = vld [vmem:[%s21287_s4 + $0x172c] sm:$0xf]  ;;  %v8274_v51 = vpop.f32.mrf.mxu1  ;;  %v13009_v40 = vor.u32 %v14309_v42, %v13008_v24  ;;  %v12949_v60 = vor.u32 %v14291_v9, %v12946_v32  ;;  %v12885_v42 = vor.u32 %v14275_v35, %v12882_v18  ;;  %v14401_v9 = vld [vmem:[%s21289_s5 + $0x18] sm:$0xff] }
 0x80c   :  { %9293 = vmatpush.bf16.msra.mxu0 %v12929_v14  ;;  %9386 = vmatpush.bf16.msra.mxu3 %v13285_v44  ;;  %v13269_v58 = vor.u32 %v14371_v48, %v13266_v63  ;;  %v12978_v14 = vld [vmem:[%s21287_s4 + $0x14f8] sm:$0xf0]  ;;  %v21058_v31 = vadd.f32 %v8299_v43, %v7315_v7  ;;  %v14327_v44 = vld [vmem:[%s21287_s4 + $0x15cc] sm:$0xf]  ;;  %v13061_v48 = vor.u32 %v14319_v6, %v13058_v47 }
 0x80d   :  { %v12981_v49 = vor.u32 %v14299_v41, %v12978_v14  ;;  %v14315_v63 = vld [vmem:[%s21287_s4 + $0x156c] sm:$0xf]  ;;  %v13042_v7 = vld [vmem:[%s21287_s4 + $0x1578] sm:$0xf0]  ;;  %v7354_v43 = vadd.f32 %v19854_v46, %v20385_v57 }
 0x80e   :  { %9374 = vmatpush.bf16.msra.mxu2 %v13141_v21  ;;  %v12898_v21 = vld [vmem:[%s21287_s4 + $0x1458] sm:$0xf0]  ;;  %v13045_v41 = vor.u32 %v14315_v63, %v13042_v7  ;;  %v14311_v14 = vld [vmem:[%s21287_s4 + $0x154c] sm:$0xf] }
 0x80f   :  { %9305 = vmatpush.bf16.msrb.mxu1 %v13073_v39  ;;  %v12865_v39 = vor.u32 %v14273_v38, %v12864_v33  ;;  %v14279_v33 = vld [vmem:[%s21287_s4 + $0x144c] sm:$0xf]  ;;  %v12866_v57 = vld [vmem:[%s21287_s4 + $0x1418] sm:$0xf0]  ;;  %v7367_v45 = vadd.f32 %v19818_v15, %v7354_v43 }
 0x810   :  { %9294 = vmatpush.bf16.msra.mxu0 %v12913_v11  ;;  %9387 = vmatpush.bf16.msra.mxu3 %v13269_v58  ;;  %v12992_v11 = vld [vmem:[%s21287_s4 + $0x1508] sm:$0xf]  ;;  %v12901_v38 = vor.u32 %v14279_v33, %v12898_v21  ;;  %v14271_v46 = vld [vmem:[%s21287_s4 + $0x140c] sm:$0xf]  ;;  %v14405_v15 = vld [vmem:[%s21289_s5 + $0x38] sm:$0xff] }
 0x811   :  { %v12869_v51 = vor.u32 %v14271_v46, %v12866_v57  ;;  %v14403_v17 = vld [vmem:[%s21289_s5 + $0x28] sm:$0xff]  ;;  %v14417_v57 = vld [vmem:[%s21289_s5 + $0x98] sm:$0xff] }
 0x812   :  { %9375 = vmatpush.bf16.msra.mxu2 %v13125_v36  ;;  %v13026_v36 = vld [vmem:[%s21287_s4 + $0x1558] sm:$0xf0]  ;;  %v14407_v18 = vld [vmem:[%s21289_s5 + $0x48] sm:$0xff] }
 0x813   :  { %9306 = vmatpush.bf16.msrb.mxu1 %v13057_v25  ;;  %v12993_v25 = vor.u32 %v14305_v62, %v12992_v11  ;;  %v12994_v11 = vld [vmem:[%s21287_s4 + $0x1518] sm:$0xf0]  ;;  %v14404_v62 = vld [vmem:[%s21289_s5 + $0x30] sm:$0xff] }
 0x814   :  { %9295 = vmatpush.bf16.msra.mxu0 %v12897_v0  ;;  %9388 = vmatpush.bf16.msra.mxu3 %v13253_v28  ;;  %v13090_v0 = vld [vmem:[%s21287_s4 + $0x15d8] sm:$0xf0]  ;;  %v13029_v28 = vor.u32 %v14311_v14, %v13026_v36  ;;  %v12997_v59 = vor.u32 %v14303_v16, %v12994_v11  ;;  %v14406_v14 = vld [vmem:[%s21289_s5 + $0x40] sm:$0xff] }
 0x815   :  { %9376 = vmatmul.bf16.vlgmr.msra.gmra.mxu2 %v21481_v52  ;;  %v13093_v19 = vor.u32 %v14327_v44, %v13090_v0 }
 0x817   :  { %9307 = vmatpush.bf16.msrb.mxu1 %v13041_v26  ;;  %9389 = vmatmul.bf16.vlgmr.msra.gmra.mxu3 %v21481_v52  ;;  %v12930_v52 = vld [vmem:[%s21287_s4 + $0x1498] sm:$0xf0] }
 0x818   :  { %9296 = vmatpush.bf16.msra.mxu0 %v12881_v20  ;;  %v12933_v26 = vor.u32 %v14287_v56, %v12930_v52  ;;  %v12917_v20 = vor.u32 %v14283_v23, %v12914_v10  ;;  %v14399_v23 = vld [vmem:[%s21289_s5 + $0x8] sm:$0xff] }
 0x81b   :  { %9308 = vmatpush.bf16.msrb.mxu1 %v13025_v4 }
 0x81c   :  { %9297 = vmatpush.bf16.msra.mxu0 %v12865_v39  ;;  %v8311_v55 = vpop.f32.mrf.mxu0 }
 0x81f   :  { %9309 = vmatpush.bf16.msrb.mxu1 %v13009_v40  ;;  %9298 = vmatmul.bf16.vlgmr.msra.gmra.mxu0 %v20691_v12 }
 0x820   :  { %9342 = vmatpush.bf16.msrb.mxu0 %v12981_v49  ;;  %v13010_v49 = vld [vmem:[%s21287_s4 + $0x1538] sm:$0xf0] }
 0x823   :  { %9310 = vmatpush.bf16.msrb.mxu1 %v12993_v25  ;;  %v8324_v58 = vpop.f32.mrf.mxu1 }
 0x824   :  { %9343 = vmatpush.bf16.msrb.mxu0 %v12965_v29  ;;  %v8325_v4 = vadd.f32 %v8324_v58, %v8311_v55  ;;  %v8313_v34 = vpop.f32.mrf.mxu0  ;;  %v14402_v29 = vld [vmem:[%s21289_s5 + $0x20] sm:$0xff]  ;;  %v14409_v55 = vld [vmem:[%s21289_s5 + $0x58] sm:$0xff] }
 0x826   :  { %9311 = vmatmul.bf16.vlgmr.msrb.gmra.mxu1 %v20736_v8  ;;  %v8338_v24 = vadd.f32 %v20359_v1, %v8325_v4  ;;  %v14307_v1 = vld [vmem:[%s21287_s4 + $0x152c] sm:$0xf] }
 0x827   :  { %9355 = vmatpush.bf16.msra.mxu1 %v13109_v3  ;;  %v14400_v3 = vld [vmem:[%s21289_s5 + $0x10] sm:$0xff] }
 0x828   :  { %9344 = vmatpush.bf16.msrb.mxu0 %v12949_v60  ;;  %v8351_v39 = vadd.f32 %v20322_v53, %v8338_v24  ;;  %v13013_v53 = vor.u32 %v14307_v1, %v13010_v49  ;;  %v14419_v24 = vld [vmem:[%s21289_s5 + $0xa8] sm:$0xff] }
 0x82a   :  { %v21159_v40 = vadd.f32 %v8351_v39, %v7367_v45 }
 0x82b   :  { %9356 = vmatpush.bf16.msra.mxu1 %v13093_v19  ;;  %v8326_v54 = vpop.f32.mrf.mxu1 }
 0x82c   :  { %9345 = vmatpush.bf16.msrb.mxu0 %v12933_v26 }
 0x82f   :  { %9357 = vmatpush.bf16.msra.mxu1 %v13077_v61 }
 0x830   :  { %9346 = vmatpush.bf16.msrb.mxu0 %v12917_v20  ;;  %v14408_v20 = vld [vmem:[%s21289_s5 + $0x50] sm:$0xff] }
 0x833   :  { %9358 = vmatpush.bf16.msra.mxu1 %v13061_v48 }
 0x834   :  { %9347 = vmatpush.bf16.msrb.mxu0 %v12901_v38 }
 0x837   :  { %9359 = vmatpush.bf16.msra.mxu1 %v13045_v41  ;;  %v14421_v41 = vld [vmem:[%s21289_s5 + $0xb8] sm:$0xff] }
 0x838   :  { %9348 = vmatpush.bf16.msrb.mxu0 %v12885_v42  ;;  %9700 = vmatpush.bf16.msrb.mxu2 %v14421_v41  ;;  %v14418_v42 = vld [vmem:[%s21289_s5 + $0xa0] sm:$0xff] }
 0x839   :  { %v9234_v44 = vpop.f32.mrf.mxu3 }
 0x83b   :  { %9360 = vmatpush.bf16.msra.mxu1 %v13029_v28  ;;  %v14416_v28 = vld [vmem:[%s21289_s5 + $0x90] sm:$0xff] }
 0x83c   :  { %9349 = vmatpush.bf16.msrb.mxu0 %v12869_v51  ;;  %v8363_v25 = vpop.f32.mrf.mxu0 }
 0x83f   :  { %9361 = vmatpush.bf16.msra.mxu1 %v13013_v53  ;;  %9350 = vmatmul.bf16.vlgmr.msrb.gmra.mxu0 %v20691_v12  ;;  %v9221_v12 = vpop.f32.mrf.mxu2 }
 0x840   :  { %9674 = vmatpush.bf16.msra.mxu0 %v14405_v15 }
 0x841   :  { %v9236_v10 = vpop.f32.mrf.mxu3 }
 0x843   :  { %9362 = vmatpush.bf16.msra.mxu1 %v12997_v59  ;;  %v8376_v32 = vpop.f32.mrf.mxu1 }
 0x844   :  { %9675 = vmatpush.bf16.msra.mxu0 %v14404_v62  ;;  %v8377_v0 = vadd.f32 %v8376_v32, %v8363_v25  ;;  %v8365_v60 = vpop.f32.mrf.mxu0  ;;  %v14415_v62 = vld [vmem:[%s21289_s5 + $0x88] sm:$0xff]  ;;  %v14414_v25 = vld [vmem:[%s21289_s5 + $0x80] sm:$0xff] }
 0x845   :  { %v14427_v32 = vld [vmem:[%s21289_s5 + $0xe8] sm:$0xff] }
 0x846   :  { %9363 = vmatmul.bf16.vlgmr.msra.gmra.mxu1 %v20736_v8  ;;  %v7406_v8 = vadd.f32 %v19972_v30, %v20592_v50  ;;  %v8390_v56 = vadd.f32 %v20564_v13, %v8377_v0  ;;  %v14413_v30 = vld [vmem:[%s21289_s5 + $0x78] sm:$0xff]  ;;  %v14411_v13 = vld [vmem:[%s21289_s5 + $0x68] sm:$0xff]  ;;  %v14410_v50 = vld [vmem:[%s21289_s5 + $0x60] sm:$0xff] }
 0x847   :  { %v9223_v37 = vpop.f32.mrf.mxu2  ;;  %9687 = vmatpush.bf16.msrb.mxu1 %v14413_v30 }
 0x848   :  { %9676 = vmatpush.bf16.msra.mxu0 %v14403_v17  ;;  %v7419_v52 = vadd.f32 %v19951_v2, %v7406_v8  ;;  %v8403_v19 = vadd.f32 %v20527_v5, %v8390_v56  ;;  %v14398_v2 = vld [vmem:[%s21289_s5] sm:$0xff]  ;;  %v14412_v5 = vld [vmem:[%s21289_s5 + $0x70] sm:$0xff]  ;;  %v14425_v8 = vld [vmem:[%s21289_s5 + $0xd8] sm:$0xff] }
 0x84a   :  { %v21192_v27 = vadd.f32 %v8403_v19, %v7419_v52 }
 0x84b   :  { %v8378_v26 = vpop.f32.mrf.mxu1  ;;  %9688 = vmatpush.bf16.msrb.mxu1 %v14412_v5 }
 0x84c   :  { %9677 = vmatpush.bf16.msra.mxu0 %v14402_v29  ;;  %v14429_v29 = vld [vmem:[%s21289_s5 + $0xf8] sm:$0xff]  ;;  %v14424_v26 = vld [vmem:[%s21289_s5 + $0xd0] sm:$0xff] }
 0x84d   :  { %9713 = vmatpush.bf16.msrb.mxu3 %v14429_v29 }
 0x84f   :  { %9689 = vmatpush.bf16.msrb.mxu1 %v14411_v13  ;;  %v14423_v13 = vld [vmem:[%s21289_s5 + $0xc8] sm:$0xff] }
 0x850   :  { %9678 = vmatpush.bf16.msra.mxu0 %v14401_v9 }
 0x853   :  { %9690 = vmatpush.bf16.msrb.mxu1 %v14410_v50 }
 0x854   :  { %9679 = vmatpush.bf16.msra.mxu0 %v14400_v3  ;;  %v14426_v3 = vld [vmem:[%s21289_s5 + $0xe0] sm:$0xff] }
 0x857   :  { %9691 = vmatpush.bf16.msrb.mxu1 %v14409_v55 }
 0x858   :  { %9680 = vmatpush.bf16.msra.mxu0 %v14399_v23  ;;  %v9273_v6 = vpop.f32.mrf.mxu2 }
 0x85a   :  { %v9286_v33 = vpop.f32.mrf.mxu3 }
 0x85b   :  { %9692 = vmatpush.bf16.msrb.mxu1 %v14408_v20 }
 0x85c   :  { %9681 = vmatpush.bf16.msra.mxu0 %v14398_v2  ;;  %v9195_v61 = vpop.f32.mrf.mxu0 }
 0x85f   :  { %9693 = vmatpush.bf16.msrb.mxu1 %v14407_v18 }
 0x860   :  { %v9275_v58 = vpop.f32.mrf.mxu2 }
 0x862   :  { %v9288_v43 = vpop.f32.mrf.mxu3 }
 0x863   :  { %v9208_v47 = vpop.f32.mrf.mxu1  ;;  %9694 = vmatpush.bf16.msrb.mxu1 %v14406_v14 }
 0x864   :  { %v9209_v21 = vadd.f32 %v9208_v47, %v9195_v61  ;;  %v9197_v48 = vpop.f32.mrf.mxu0  ;;  %v14422_v61 = vld [vmem:[%s21289_s5 + $0xc0] sm:$0xff] }
 0x866   :  { %v9222_v63 = vadd.f32 %v9221_v12, %v9209_v21 }
 0x868   :  { %v9235_v7 = vadd.f32 %v9234_v44, %v9222_v63 }
 0x86a   :  { %v9394_v38 = vadd.f32 %v9235_v7, %v20867_v22  ;;  %v14420_v22 = vld [vmem:[%s21289_s5 + $0xb0] sm:$0xff] }
 0x86b   :  { %v9210_v35 = vpop.f32.mrf.mxu1  ;;  %9701 = vmatpush.bf16.msrb.mxu2 %v14420_v22  ;;  %v14433_v22 = vld [vmem:[%s21290_s8] ss:$0 sm:$0xff] }
 0x86c   :  { %vm9398_vm8 = vcmp.ge.f32.partialorder %v9394_v38, 0.0  ;;  %v9402_v4 = vmul.f32 0.2, %v9394_v38 }
 0x86e   :  { %v9406_v36 = vsel %vm9398_vm8, %v9394_v38, %v9402_v4 }
 0x86f   :  { %v9410_v34 = vpack.c.bf16 %v9406_v36, %v9406_v36  ;;  %9702 = vmatpush.bf16.msrb.mxu2 %v14419_v24 }
 0x871   :  { %9682 = vmatmul.bf16.vlgmr.msra.gmra.mxu0 %v9410_v34 }
 0x873   :  { %9703 = vmatpush.bf16.msrb.mxu2 %v14418_v42 }
 0x877   :  { %9704 = vmatpush.bf16.msrb.mxu2 %v14417_v57 }
 0x878   :  { %v9325_v45 = vpop.f32.mrf.mxu2 }
 0x87a   :  { %v9338_v1 = vpop.f32.mrf.mxu3 }
 0x87b   :  { %9705 = vmatpush.bf16.msrb.mxu2 %v14416_v28 }
 0x87c   :  { %v9247_v46 = vpop.f32.mrf.mxu0 }
 0x87f   :  { %9706 = vmatpush.bf16.msrb.mxu2 %v14415_v62 }
 0x880   :  { %v9327_v16 = vpop.f32.mrf.mxu2 }
 0x882   :  { %v9340_v59 = vpop.f32.mrf.mxu3 }
 0x883   :  { %v9260_v39 = vpop.f32.mrf.mxu1  ;;  %9707 = vmatpush.bf16.msrb.mxu2 %v14414_v25 }
 0x884   :  { %v9261_v49 = vadd.f32 %v9260_v39, %v9247_v46  ;;  %v9249_v51 = vpop.f32.mrf.mxu0 }
 0x886   :  { %v9274_v54 = vadd.f32 %v9273_v6, %v9261_v49 }
 0x888   :  { %v9287_v15 = vadd.f32 %v9286_v33, %v9274_v54 }
 0x88a   :  { %v9395_v53 = vadd.f32 %v9287_v15, %v21058_v31  ;;  %v14428_v31 = vld [vmem:[%s21289_s5 + $0xf0] sm:$0xff] }
 0x88b   :  { %v9262_v11 = vpop.f32.mrf.mxu1  ;;  %9714 = vmatpush.bf16.msrb.mxu3 %v14428_v31 }
 0x88c   :  { %vm9399_vm9 = vcmp.ge.f32.partialorder %v9395_v53, 0.0  ;;  %v9403_v17 = vmul.f32 0.2, %v9395_v53 }
 0x88e   :  { %v9407_v9 = vsel %vm9399_vm9, %v9395_v53, %v9403_v17 }
 0x88f   :  { %v9411_v12 = vpack.c.bf16 %v9407_v9, %v9407_v9  ;;  %9715 = vmatpush.bf16.msrb.mxu3 %v14427_v32 }
 0x891   :  { %9695 = vmatmul.bf16.vlgmr.msrb.gmra.mxu1 %v9411_v12 }
 0x893   :  { %9716 = vmatpush.bf16.msrb.mxu3 %v14426_v3 }
 0x897   :  { %9717 = vmatpush.bf16.msrb.mxu3 %v14425_v8 }
 0x898   :  { %v9377_v0 = vpop.f32.mrf.mxu2 }
 0x89a   :  { %v9390_v60 = vpop.f32.mrf.mxu3 }
 0x89b   :  { %9718 = vmatpush.bf16.msrb.mxu3 %v14424_v26 }
 0x89c   :  { %v9299_v44 = vpop.f32.mrf.mxu0 }
 0x89f   :  { %9719 = vmatpush.bf16.msrb.mxu3 %v14423_v13 }
 0x8a0   :  { %v9379_v10 = vpop.f32.mrf.mxu2 }
 0x8a2   :  { %v9392_v2 = vpop.f32.mrf.mxu3 }
 0x8a3   :  { %v9312_v56 = vpop.f32.mrf.mxu1  ;;  %9720 = vmatpush.bf16.msrb.mxu3 %v14422_v61 }
 0x8a4   :  { %v9313_v52 = vadd.f32 %v9312_v56, %v9299_v44  ;;  %v9301_v19 = vpop.f32.mrf.mxu0 }
 0x8a6   :  { %v9326_v37 = vadd.f32 %v9325_v45, %v9313_v52 }
 0x8a8   :  { %v9339_v23 = vadd.f32 %v9338_v1, %v9326_v37 }
 0x8aa   :  { %v9396_v30 = vadd.f32 %v9339_v23, %v21159_v40 }
 0x8ab   :  { %v9314_v5 = vpop.f32.mrf.mxu1 }
 0x8ac   :  { %vm9400_vm10 = vcmp.ge.f32.partialorder %v9396_v30, 0.0  ;;  %v9404_v50 = vmul.f32 0.2, %v9396_v30 }
 0x8ae   :  { %v9408_v55 = vsel %vm9400_vm10, %v9396_v30, %v9404_v50 }
 0x8af   :  { %v9412_v6 = vpack.c.bf16 %v9408_v55, %v9408_v55 }
 0x8b1   :  { %9708 = vmatmul.bf16.vlgmr.msrb.gmra.mxu2 %v9412_v6 }
 0x8bc   :  { %v9351_v47 = vpop.f32.mrf.mxu0 }
 0x8c3   :  { %v9364_v20 = vpop.f32.mrf.mxu1 }
 0x8c4   :  { %v9365_v40 = vadd.f32 %v9364_v20, %v9351_v47  ;;  %v9353_v33 = vpop.f32.mrf.mxu0 }
 0x8c6   :  { %v9378_v21 = vadd.f32 %v9377_v0, %v9365_v40 }
 0x8c8   :  { %v9391_v48 = vadd.f32 %v9390_v60, %v9378_v21 }
 0x8ca   :  { %v9397_v63 = vadd.f32 %v9391_v48, %v21192_v27 }
 0x8cb   :  { %v9366_v7 = vpop.f32.mrf.mxu1 }
 0x8cc   :  { %vm9401_vm11 = vcmp.ge.f32.partialorder %v9397_v63, 0.0  ;;  %v9405_v38 = vmul.f32 0.2, %v9397_v63 }
 0x8ce   :  { %v9409_v58 = vsel %vm9401_vm11, %v9397_v63, %v9405_v38 }
 0x8cf   :  { %v9413_v35 = vpack.c.bf16 %v9409_v58, %v9409_v58 }
 0x8d1   :  { %9721 = vmatmul.bf16.vlgmr.msrb.gmra.mxu3 %v9413_v35 }
 0x8ee   :  { %v9683_v18 = vpop.f32.mrf.mxu0 }
 0x8ef   :  { %v9684_v34 = vadd.f32 %v14433_v22, %v9683_v18 }
 0x8f6   :  { %v9685_v43 = vpop.f32.mrf.mxu0 }
 0x90e   :  { %v9696_v4 = vpop.f32.mrf.mxu1 }
 0x90f   :  { %v9697_v24 = vadd.f32 %v9696_v4, %v9684_v34 }
 0x916   :  { %v9698_v41 = vpop.f32.mrf.mxu1 }
 0x934   :  { %v9709_v14 = vpop.f32.mrf.mxu2 }
 0x935   :  { %v9710_v42 = vadd.f32 %v9709_v14, %v9697_v24 }
 0x93c   :  { %v9711_v36 = vpop.f32.mrf.mxu2 }
 0x954   :  { %v9722_v27 = vpop.f32.mrf.mxu3 }
 0x955   :  { %v9723_v46 = vadd.f32 %v9722_v27, %v9710_v42 }
 0x957   :  { %v9726_v57 = vsub.f32 0.0, %v9723_v46 }
 0x959   :  { %v9727_v45 = vmul.f32 1.442695, %v9726_v57 }
 0x95b   :  { %14434 = vpow2.f32 %v9727_v45 }
 0x95c   :  { %v9724_v39 = vpop.f32.mrf.mxu3 }
 0x961   :  { %v14435_v28 = vpop.eup %14434 }
 0x962   :  { %v9729_v1 = vadd.f32 1.0, %v14435_v28 }
 0x964   :  { %14436 = vrcp.f32 %v9729_v1  ;;  %v9741_v15 = vand.u32 2147483648, %v9729_v1  ;;  %v9739_v16 = vand.u32 2147483647, %v9729_v1  ;;  %vm9735_vm13 = vweird.f32 %v9729_v1 }
 0x966   :  { %v9742_v62 = vor.u32 1.1754944e-38, %v9741_v15  ;;  %vm9740_vm15 = vcmp.eq.f32.partialorder %v9739_v16, 8.507059e+37 }
 0x96a   :  { %v14437_v49 = vpop.eup %14436 }
 0x96b   :  { %v9731_v51 = vmul.f32 %v14437_v49, %v9729_v1  ;;  %vm9736_vm12 = vweird.f32 %v14437_v49 }
 0x96c   :  { %vm9737_vm14 = vmor %vm9735_vm13, %vm9736_vm12 }
 0x96d   :  { %v9732_v54 = vsub.f32 1.0, %v9731_v51 }
 0x96f   :  { %v9733_v53 = vmul.f32 %v14437_v49, %v9732_v54 }
 0x971   :  { %v9734_v11 = vadd.f32 %v14437_v49, %v9733_v53 }
 0x973   :  { %v9738_v59 = vsel %vm9737_vm14, %v14437_v49, %v9734_v11 }
 0x974   :  { %v9743_v17 = vsel %vm9740_vm15, %v9742_v62, %v9738_v59 }
 0x975   :  { %9745 = vst [vmem:[%s21291_s9] sm:$0xff] %v9743_v17 }

</bundles_post_ra>
